<compile_context>
chip_gen: v7x
topology: tpu7x:2x2x1
jax: 0.10.0
libtpu: 0.0.40
codegen_flags: <defaults>
</compile_context>

<pallas_src>
import functools

import jax
import jax.numpy as jnp
from jax.experimental import pallas as pl
from jax.experimental.pallas import tpu as pltpu


# ---------------- fused conv chain + max-over-points + FC head kernel --------

def _chain_head_kernel(x_ref, w1_ref, b1_ref, w2_ref, b2_ref, w3_ref, b3_ref,
                       hw1_ref, hb1_ref, hw2_ref, hb2_ref, hw3_ref, hb3_ref,
                       o_ref, acc_ref,
                       *, relu_last, head_kind, n_valid, tn, need_mask):
    n = pl.program_id(1)

    @pl.when(n == 0)
    def _():
        acc_ref[...] = jnp.full(acc_ref.shape, -jnp.inf, acc_ref.dtype)

    x = x_ref[0]            # (tn, 3)  f32
    w1 = w1_ref[0]          # (3, C1)  f32, BN scale (and TNet transform) folded

    # layer1: Cin=3 contraction on the VPU (3 broadcast MACs), bias + ReLU.
    h = (x[:, 0:1] * w1[0:1, :]
         + x[:, 1:2] * w1[1:2, :]
         + x[:, 2:3] * w1[2:3, :])                               # (tn, C1)
    h = jnp.maximum(h + b1_ref[...], 0.0)

    # layer2: C1 -> C2 on the MXU (bf16 operands, f32 accumulate), bias + ReLU.
    h = jnp.dot(h.astype(jnp.bfloat16), w2_ref[...],
                preferred_element_type=jnp.float32)
    h = jnp.maximum(h + b2_ref[...], 0.0)                        # (tn, C2)

    # layer3: C2 -> C3 on the MXU (bf16), bias (+ optional ReLU).
    h = jnp.dot(h.astype(jnp.bfloat16), w3_ref[...],
                preferred_element_type=jnp.float32)
    h = h + b3_ref[...]                                          # (tn, C3)
    if relu_last:
        h = jnp.maximum(h, 0.0)

    if need_mask:  # mask OOB / padded point rows before the max (index-based)
        row = n * tn + jax.lax.broadcasted_iota(jnp.int32, (tn, 1), 0)
        h = jnp.where(row < n_valid, h, -jnp.inf)

    # VPU-only slab max into an (8, C3) accumulator; the 8->1 cross-sublane
    # (XLU) reduce happens exactly once, in the finalize below.
    c3 = h.shape[-1]
    h = jnp.max(h.reshape(tn // 8, 8, c3), axis=0)               # (8, C3)
    acc_ref[...] = jnp.maximum(acc_ref[...], h)

    @pl.when(n == pl.num_programs(1) - 1)
    def _():
        g = jnp.max(acc_ref[...], axis=0, keepdims=True)         # (1, C3)
        # Sublane-broadcast to M=8 (same MXU cost as M=1, shape-safe).
        gb = jnp.broadcast_to(g, (8, g.shape[1])).astype(jnp.bfloat16)

        h1 = jnp.dot(gb, hw1_ref[...],
                     preferred_element_type=jnp.float32) + hb1_ref[...]
        if head_kind == 'cls':
            h1 = jnp.maximum(h1, 0.0)       # fc1 + (folded) bn1 + relu
        h2 = jnp.dot(h1.astype(jnp.bfloat16), hw2_ref[...],
                     preferred_element_type=jnp.float32) + hb2_ref[...]
        if head_kind == 'cls':
            # TODO(synk): Dropout(p=0.3) is identity under inference semantics.
            h2 = jnp.maximum(h2, 0.0)       # fc2 + (folded) bn2 + relu
        y = jnp.dot(h2.astype(jnp.bfloat16), hw3_ref[...],
                    preferred_element_type=jnp.float32) + hb3_ref[...]
        if head_kind == 'cls':
            m = jnp.max(y, axis=1, keepdims=True)
            s = y - m
            y = s - jnp.log(jnp.sum(jnp.exp(s), axis=1, keepdims=True))
        o_ref[0] = y[0:1]                                        # (1, OC)


def fused_chain_with_head(x_bn3, w1_b, b1, w2, b2, w3, b3,
                          hw1, hb1, hw2, hb2, hw3, hb3,
                          *, relu_last, head_kind, tn_cap=2048):
    """conv1+BN+ReLU -> conv2+BN+ReLU -> conv3+BN[+ReLU] -> max over points ->
    3-layer FC head, all in ONE pallas_call.

    x:(B,N,3), w1_b:(1 or B, 3, C1) with BN scale folded; w2/w3 BN-scale folded.
    head_kind: 'linear' (TNet head) or 'cls' (fc+relu, fc+relu, fc+log_softmax).
    Returns (B, OC) float32.
    """
    B, N, cin = x_bn3.shape
    assert cin == 3
    C1 = w1_b.shape[-1]
    C2 = w2.shape[-1]
    C3 = w3.shape[-1]
    H1 = hw1.shape[-1]
    H2 = hw2.shape[-1]
    OC = hw3.shape[-1]

    # No host-side pad of x: the ragged last tile is handled by the in-kernel
    # index-based -inf row mask (OOB block reads are unspecified but masked).
    tn = tn_cap if N >= tn_cap else ((N + 7) // 8) * 8
    n_tiles = pl.cdiv(N, tn)
    need_mask = (n_tiles * tn != N)

    f32, bf16 = jnp.float32, jnp.bfloat16
    x_bn3 = x_bn3.astype(f32)
    w1_b = w1_b.astype(f32)
    w2 = w2.astype(bf16)
    w3 = w3.astype(bf16)
    hw1 = hw1.astype(bf16)
    hw2 = hw2.astype(bf16)
    hw3 = hw3.astype(bf16)
    b1 = b1.reshape(1, C1).astype(f32)
    b2 = b2.reshape(1, C2).astype(f32)
    b3 = b3.reshape(1, C3).astype(f32)
    hb1 = hb1.reshape(1, H1).astype(f32)
    hb2 = hb2.reshape(1, H2).astype(f32)
    hb3 = hb3.reshape(1, OC).astype(f32)

    if w1_b.shape[0] == 1:
        w1_map = lambda b, n: (0, 0, 0)     # shared weight: revisit one block
    else:
        w1_map = lambda b, n: (b, 0, 0)     # per-batch (TNet transform folded)

    kernel = functools.partial(
        _chain_head_kernel, relu_last=relu_last, head_kind=head_kind,
        n_valid=N, tn=tn, need_mask=need_mask)

    flops = (2 * B * n_tiles * tn * (3 * C1 + C1 * C2 + C2 * C3)
             + 2 * B * (C3 * H1 + H1 * H2 + H2 * OC))
    bytes_acc = (4 * B * N * 3 + 4 * w1_b.size
                 + 2 * (w2.size + w3.size + hw1.size + hw2.size + hw3.size)
                 + 4 * (C1 + C2 + C3 + H1 + H2 + OC) + 4 * B * OC)

    # TODO(synk): v7x-only megacore fallback for B==1 / odd B (split the point
    # axis across cores) is not implemented; B is the only "parallel" axis.
    out = pl.pallas_call(
        kernel,
        out_shape=jax.ShapeDtypeStruct((B, 1, OC), f32),
        grid_spec=pltpu.PrefetchScalarGridSpec(
            num_scalar_prefetch=0,
            grid=(B, n_tiles),
            in_specs=[
                pl.BlockSpec((1, tn, 3), lambda b, n: (b, n, 0)),
                pl.BlockSpec((1, 3, C1), w1_map),
                pl.BlockSpec((1, C1), lambda b, n: (0, 0)),
                pl.BlockSpec((C1, C2), lambda b, n: (0, 0)),
                pl.BlockSpec((1, C2), lambda b, n: (0, 0)),
                pl.BlockSpec((C2, C3), lambda b, n: (0, 0)),
                pl.BlockSpec((1, C3), lambda b, n: (0, 0)),
                pl.BlockSpec((C3, H1), lambda b, n: (0, 0)),
                pl.BlockSpec((1, H1), lambda b, n: (0, 0)),
                pl.BlockSpec((H1, H2), lambda b, n: (0, 0)),
                pl.BlockSpec((1, H2), lambda b, n: (0, 0)),
                pl.BlockSpec((H2, OC), lambda b, n: (0, 0)),
                pl.BlockSpec((1, OC), lambda b, n: (0, 0)),
            ],
            out_specs=pl.BlockSpec((1, 1, OC), lambda b, n: (b, 0, 0)),
            scratch_shapes=[pltpu.VMEM((8, C3), jnp.float32)],
        ),
        compiler_params=pltpu.CompilerParams(
            dimension_semantics=("parallel", "arbitrary"),
            vmem_limit_bytes=48 * 1024 * 1024),
        cost_estimate=pl.CostEstimate(
            flops=flops, transcendentals=B * OC, bytes_accessed=bytes_acc),
    )(x_bn3, w1_b, b1, w2, b2, w3, b3, hw1, hb1, hw2, hb2, hw3, hb3)
    return out.reshape(B, OC)


# ----------------------------- parameter setup -------------------------------

class ParamGen:
    def __init__(self, key):
        self.key = key

    def _next(self):
        self.key, sub = jax.random.split(self.key)
        return sub

    def linear(self, cin, cout):
        w = 0.1 * jax.random.normal(self._next(), (cin, cout), jnp.float32)
        b = 0.1 * jax.random.normal(self._next(), (cout,), jnp.float32)
        return w, b

    def bn(self, c):
        gamma = 1.0 + 0.1 * jax.random.normal(self._next(), (c,), jnp.float32)
        beta = 0.1 * jax.random.normal(self._next(), (c,), jnp.float32)
        mean = 0.1 * jax.random.normal(self._next(), (c,), jnp.float32)
        var = 0.5 + jax.random.uniform(self._next(), (c,), dtype=jnp.float32)
        return gamma, beta, mean, var


def init_params(key):
    g = ParamGen(key)
    p = {}
    # TNet(k=3)
    p['t3_c1'] = g.linear(3, 64);     p['t3_bn1'] = g.bn(64)
    p['t3_c2'] = g.linear(64, 128);   p['t3_bn2'] = g.bn(128)
    p['t3_c3'] = g.linear(128, 1024); p['t3_bn3'] = g.bn(1024)
    p['t3_fc1'] = g.linear(1024, 512)
    p['t3_fc2'] = g.linear(512, 256)
    p['t3_fc3'] = g.linear(256, 9)
    # PointNetfeat (feature_transform=False)
    p['l1'] = g.linear(3, 64);     p['l1_bn'] = g.bn(64)
    p['l2'] = g.linear(64, 128);   p['l2_bn'] = g.bn(128)
    p['l3'] = g.linear(128, 1024); p['l3_bn'] = g.bn(1024)
    # Classifier head
    p['fc1'] = g.linear(1024, 512); p['bn1'] = g.bn(512)
    p['fc2'] = g.linear(512, 256);  p['bn2'] = g.bn(256)
    p['fc3'] = g.linear(256, 2)
    return p


def fold_bn(bias, gamma, beta, mean, var, eps=1e-5):
    # BN(x@W + b) == x@(W*scale) + shifted_bias  (inference running stats)
    scale = gamma / jnp.sqrt(var + eps)
    shifted = (bias - mean) * scale + beta
    return scale, shifted


# ------------------------------- model forward -------------------------------

def pointnet_cls_forward(x, p):
    # x: (B, 3, N) matches the PyTorch NCW Conv1d input convention.
    B, _, N = x.shape
    x_pts = jnp.transpose(x, (0, 2, 1))                       # (B, N, 3)

    # ---- TNet(k=3): conv chain + max pool + FC head, fused in ONE call.
    s1, bb1 = fold_bn(p['t3_c1'][1], *p['t3_bn1'])
    s2, bb2 = fold_bn(p['t3_c2'][1], *p['t3_bn2'])
    s3, bb3 = fold_bn(p['t3_c3'][1], *p['t3_bn3'])
    t_w1 = (p['t3_c1'][0] * s1[None, :])[None]                # (1, 3, 64) shared
    t_w2 = p['t3_c2'][0] * s2[None, :]
    t_w3 = p['t3_c3'][0] * s3[None, :]
    t9 = fused_chain_with_head(
        x_pts, t_w1, bb1, t_w2, bb2, t_w3, bb3,
        p['t3_fc1'][0], p['t3_fc1'][1],
        p['t3_fc2'][0], p['t3_fc2'][1],
        p['t3_fc3'][0], p['t3_fc3'][1],
        relu_last=True, head_kind='linear')                   # (B, 9)
    trans = t9.reshape(B, 3, 3) + jnp.eye(3, dtype=jnp.float32)[None]

    # ---- Main chain + classifier head, fused in ONE call.  The input TNet
    # transform is folded into layer1's weight:
    #   (x @ trans) @ (W1*s1) == x @ (trans @ (W1*s1))   -> no bmm round trip.
    ls1, lbb1 = fold_bn(p['l1'][1], *p['l1_bn'])
    ls2, lbb2 = fold_bn(p['l2'][1], *p['l2_bn'])
    ls3, lbb3 = fold_bn(p['l3'][1], *p['l3_bn'])
    w1_eff = jnp.einsum('bij,jk->bik', trans, p['l1'][0] * ls1[None, :])
    w2_eff = p['l2'][0] * ls2[None, :]
    w3_eff = p['l3'][0] * ls3[None, :]

    cs1, cb1 = fold_bn(p['fc1'][1], *p['bn1'])
    cs2, cb2 = fold_bn(p['fc2'][1], *p['bn2'])
    cw1 = p['fc1'][0] * cs1[None, :]
    cw2 = p['fc2'][0] * cs2[None, :]

    # feature_transform=False -> trans_feat is None and no 64x64 TNet.
    logp = fused_chain_with_head(
        x_pts, w1_eff, lbb1, w2_eff, lbb2, w3_eff, lbb3,
        cw1, cb1, cw2, cb2, p['fc3'][0], p['fc3'][1],
        relu_last=False, head_kind='cls')                     # (B, num_classes)
    return logp, trans, None


if __name__ == "__main__":
    key = jax.random.PRNGKey(0)
    pkey, xkey = jax.random.split(key)
    params = init_params(pkey)

    B, N = 2, 128
    x = jax.random.normal(xkey, (B, 3, N), jnp.float32)

    fwd = jax.jit(pointnet_cls_forward)
    logp, trans, trans_feat = fwd(x, params)
    jax.block_until_ready((logp, trans))

    assert logp.shape == (B, 2)
    assert trans.shape == (B, 3, 3)
    assert trans_feat is None
    assert bool(jnp.all(jnp.isfinite(logp)))
    # log-softmax self-consistency: each row exponent-sums to 1.
    row_sums = jnp.sum(jnp.exp(logp), axis=1)
    assert bool(jnp.all(jnp.abs(row_sums - 1.0) < 1e-3))
    print("KERNEL_OK")
</pallas_src>

<mosaic_0001>
module attributes {stable_mosaic.version = 11 : i64} {
  func.func @_chain_head_kernel(%arg0: i32, %arg1: i32, %arg2: memref<1x128x3xf32, #tpu.memory_space<vmem>>, %arg3: memref<1x3x64xf32, #tpu.memory_space<vmem>>, %arg4: memref<1x64xf32, #tpu.memory_space<vmem>>, %arg5: memref<64x128xbf16, #tpu.memory_space<vmem>>, %arg6: memref<1x128xf32, #tpu.memory_space<vmem>>, %arg7: memref<128x1024xbf16, #tpu.memory_space<vmem>>, %arg8: memref<1x1024xf32, #tpu.memory_space<vmem>>, %arg9: memref<1024x512xbf16, #tpu.memory_space<vmem>>, %arg10: memref<1x512xf32, #tpu.memory_space<vmem>>, %arg11: memref<512x256xbf16, #tpu.memory_space<vmem>>, %arg12: memref<1x256xf32, #tpu.memory_space<vmem>>, %arg13: memref<256x9xbf16, #tpu.memory_space<vmem>>, %arg14: memref<1x9xf32, #tpu.memory_space<vmem>>, %arg15: memref<1x1x9xf32, #tpu.memory_space<vmem>>, %arg16: memref<8x1024xf32, #tpu.memory_space<vmem>>) attributes {dimension_semantics = [#tpu.dimension_semantics<parallel>, #tpu.dimension_semantics<arbitrary>], iteration_bounds = array<i64: 2, 1>, scalar_prefetch = 0 : i64, scratch_operands = 1 : i64, tpu.core_type = #tpu.core_type<tc>, window_params = [{transform_indices = @transform_0, window_bounds = array<i64: 1, 128, 3>}, {pipeline_mode = #tpu.pipeline_mode<synchronous>, transform_indices = @transform_1, window_bounds = array<i64: 1, 3, 64>}, {pipeline_mode = #tpu.pipeline_mode<synchronous>, transform_indices = @transform_2, window_bounds = array<i64: 1, 64>}, {pipeline_mode = #tpu.pipeline_mode<synchronous>, transform_indices = @transform_3, window_bounds = array<i64: 64, 128>}, {pipeline_mode = #tpu.pipeline_mode<synchronous>, transform_indices = @transform_4, window_bounds = array<i64: 1, 128>}, {pipeline_mode = #tpu.pipeline_mode<synchronous>, transform_indices = @transform_5, window_bounds = array<i64: 128, 1024>}, {pipeline_mode = #tpu.pipeline_mode<synchronous>, transform_indices = @transform_6, window_bounds = array<i64: 1, 1024>}, {pipeline_mode = #tpu.pipeline_mode<synchronous>, transform_indices = @transform_7, window_bounds = array<i64: 1024, 512>}, {pipeline_mode = #tpu.pipeline_mode<synchronous>, transform_indices = @transform_8, window_bounds = array<i64: 1, 512>}, {pipeline_mode = #tpu.pipeline_mode<synchronous>, transform_indices = @transform_9, window_bounds = array<i64: 512, 256>}, {pipeline_mode = #tpu.pipeline_mode<synchronous>, transform_indices = @transform_10, window_bounds = array<i64: 1, 256>}, {pipeline_mode = #tpu.pipeline_mode<synchronous>, transform_indices = @transform_11, window_bounds = array<i64: 256, 9>}, {pipeline_mode = #tpu.pipeline_mode<synchronous>, transform_indices = @transform_12, window_bounds = array<i64: 1, 9>}, {transform_indices = @transform_13, window_bounds = array<i64: 1, 1, 9>}]} {
    %c0_i32 = arith.constant 0 : i32
    %0 = arith.cmpi eq, %arg1, %c0_i32 : i32
    %1 = arith.extui %0 : i1 to i32
    %c0_i32_0 = arith.constant 0 : i32
    %2 = arith.cmpi ne, %1, %c0_i32_0 : i32
    scf.if %2 {
      %cst_27 = arith.constant 0xFF800000 : f32
      %53 = vector.broadcast %cst_27 : f32 to vector<8x1024xf32>
      %c0_28 = arith.constant 0 : index
      %c0_29 = arith.constant 0 : index
      %54 = vector.load %arg16[%c0_28, %c0_29] : memref<8x1024xf32, #tpu.memory_space<vmem>>, vector<8x1024xf32>
      tpu.vector_store %arg16[%c0_28, %c0_29], %53 {strides = array<i32>} : memref<8x1024xf32, #tpu.memory_space<vmem>>, vector<8x1024xf32>,
    } else {
    }
    %c0 = arith.constant 0 : index
    %c0_1 = arith.constant 0 : index
    %c0_2 = arith.constant 0 : index
    %3 = vector.load %arg2[%c0, %c0_1, %c0_2] : memref<1x128x3xf32, #tpu.memory_space<vmem>>, vector<1x128x3xf32>
    %4 = vector.shape_cast %3 : vector<1x128x3xf32> to vector<128x3xf32>
    %c0_3 = arith.constant 0 : index
    %c0_4 = arith.constant 0 : index
    %c0_5 = arith.constant 0 : index
    %5 = vector.load %arg3[%c0_3, %c0_4, %c0_5] : memref<1x3x64xf32, #tpu.memory_space<vmem>>, vector<1x3x64xf32>
    %6 = vector.shape_cast %5 : vector<1x3x64xf32> to vector<3x64xf32>
    %7 = vector.extract_strided_slice %4 {offsets = [0, 0], sizes = [128, 1], strides = [1, 1]} : vector<128x3xf32> to vector<128x1xf32>
    %8 = vector.extract_strided_slice %6 {offsets = [0, 0], sizes = [1, 64], strides = [1, 1]} : vector<3x64xf32> to vector<1x64xf32>
    %9 = vector.broadcast %7 : vector<128x1xf32> to vector<128x64xf32>
    %10 = vector.broadcast %8 : vector<1x64xf32> to vector<128x64xf32>
    %11 = arith.mulf %9, %10 : vector<128x64xf32>
    %12 = vector.extract_strided_slice %4 {offsets = [0, 1], sizes = [128, 1], strides = [1, 1]} : vector<128x3xf32> to vector<128x1xf32>
    %13 = vector.extract_strided_slice %6 {offsets = [1, 0], sizes = [1, 64], strides = [1, 1]} : vector<3x64xf32> to vector<1x64xf32>
    %14 = vector.broadcast %12 : vector<128x1xf32> to vector<128x64xf32>
    %15 = vector.broadcast %13 : vector<1x64xf32> to vector<128x64xf32>
    %16 = arith.mulf %14, %15 : vector<128x64xf32>
    %17 = arith.addf %11, %16 : vector<128x64xf32>
    %18 = vector.extract_strided_slice %4 {offsets = [0, 2], sizes = [128, 1], strides = [1, 1]} : vector<128x3xf32> to vector<128x1xf32>
    %19 = vector.extract_strided_slice %6 {offsets = [2, 0], sizes = [1, 64], strides = [1, 1]} : vector<3x64xf32> to vector<1x64xf32>
    %20 = vector.broadcast %18 : vector<128x1xf32> to vector<128x64xf32>
    %21 = vector.broadcast %19 : vector<1x64xf32> to vector<128x64xf32>
    %22 = arith.mulf %20, %21 : vector<128x64xf32>
    %23 = arith.addf %17, %22 : vector<128x64xf32>
    %c0_6 = arith.constant 0 : index
    %c0_7 = arith.constant 0 : index
    %24 = vector.load %arg4[%c0_6, %c0_7] : memref<1x64xf32, #tpu.memory_space<vmem>>, vector<1x64xf32>
    %25 = vector.broadcast %24 : vector<1x64xf32> to vector<128x64xf32>
    %26 = arith.addf %23, %25 : vector<128x64xf32>
    %cst = arith.constant 0.000000e+00 : f32
    %27 = vector.broadcast %cst : f32 to vector<128x64xf32>
    %28 = arith.maximumf %26, %27 : vector<128x64xf32>
    %29 = arith.truncf %28 : vector<128x64xf32> to vector<128x64xbf16>
    %c0_8 = arith.constant 0 : index
    %c0_9 = arith.constant 0 : index
    %30 = vector.load %arg5[%c0_8, %c0_9] : memref<64x128xbf16, #tpu.memory_space<vmem>>, vector<64x128xbf16>
    %cst_10 = arith.constant dense<0.000000e+00> : vector<128x128xf32>
    %31 = tpu.matmul %29, %30, %cst_10 {dimension_numbers = #tpu.dot_dimension_numbers<[1], [0], [0], [1], [0, 0, 1, 1], [], []>} : vector<128x64xbf16>, vector<64x128xbf16>, vector<128x128xf32> -> vector<128x128xf32>
    %c0_11 = arith.constant 0 : index
    %c0_12 = arith.constant 0 : index
    %32 = vector.load %arg6[%c0_11, %c0_12] : memref<1x128xf32, #tpu.memory_space<vmem>>, vector<1x128xf32>
    %33 = vector.broadcast %32 : vector<1x128xf32> to vector<128x128xf32>
    %34 = arith.addf %31, %33 : vector<128x128xf32>
    %cst_13 = arith.constant 0.000000e+00 : f32
    %35 = vector.broadcast %cst_13 : f32 to vector<128x128xf32>
    %36 = arith.maximumf %34, %35 : vector<128x128xf32>
    %37 = arith.truncf %36 : vector<128x128xf32> to vector<128x128xbf16>
    %c0_14 = arith.constant 0 : index
    %c0_15 = arith.constant 0 : index
    %38 = vector.load %arg7[%c0_14, %c0_15] : memref<128x1024xbf16, #tpu.memory_space<vmem>>, vector<128x1024xbf16>
    %cst_16 = arith.constant dense<0.000000e+00> : vector<128x1024xf32>
    %39 = tpu.matmul %37, %38, %cst_16 {dimension_numbers = #tpu.dot_dimension_numbers<[1], [0], [0], [1], [0, 0, 1, 1], [], []>} : vector<128x128xbf16>, vector<128x1024xbf16>, vector<128x1024xf32> -> vector<128x1024xf32>
    %c0_17 = arith.constant 0 : index
    %c0_18 = arith.constant 0 : index
    %40 = vector.load %arg8[%c0_17, %c0_18] : memref<1x1024xf32, #tpu.memory_space<vmem>>, vector<1x1024xf32>
    %41 = vector.broadcast %40 : vector<1x1024xf32> to vector<128x1024xf32>
    %42 = arith.addf %39, %41 : vector<128x1024xf32>
    %cst_19 = arith.constant 0.000000e+00 : f32
    %43 = vector.broadcast %cst_19 : f32 to vector<128x1024xf32>
    %44 = arith.maximumf %42, %43 : vector<128x1024xf32>
    %45 = vector.shape_cast %44 : vector<128x1024xf32> to vector<16x8x1024xf32>
    %cst_20 = arith.constant dense<0xFF800000> : vector<8x1024xf32>
    %46 = vector.multi_reduction <maximumf>, %45, %cst_20 [0] : vector<16x8x1024xf32> to vector<8x1024xf32>
    %c0_21 = arith.constant 0 : index
    %c0_22 = arith.constant 0 : index
    %47 = vector.load %arg16[%c0_21, %c0_22] : memref<8x1024xf32, #tpu.memory_space<vmem>>, vector<8x1024xf32>
    %48 = arith.maximumf %47, %46 : vector<8x1024xf32>
    %c0_23 = arith.constant 0 : index
    %c0_24 = arith.constant 0 : index
    %49 = vector.load %arg16[%c0_23, %c0_24] : memref<8x1024xf32, #tpu.memory_space<vmem>>, vector<8x1024xf32>
    tpu.vector_store %arg16[%c0_23, %c0_24], %48 {strides = array<i32>} : memref<8x1024xf32, #tpu.memory_space<vmem>>, vector<8x1024xf32>,
    %c0_i32_25 = arith.constant 0 : i32
    %50 = arith.cmpi eq, %arg1, %c0_i32_25 : i32
    %51 = arith.extui %50 : i1 to i32
    %c0_i32_26 = arith.constant 0 : i32
    %52 = arith.cmpi ne, %51, %c0_i32_26 : i32
    scf.if %52 {
      %c0_27 = arith.constant 0 : index
      %c0_28 = arith.constant 0 : index
      %53 = vector.load %arg16[%c0_27, %c0_28] : memref<8x1024xf32, #tpu.memory_space<vmem>>, vector<8x1024xf32>
      %cst_29 = arith.constant dense<0xFF800000> : vector<1024xf32>
      %54 = vector.multi_reduction <maximumf>, %53, %cst_29 [0] : vector<8x1024xf32> to vector<1024xf32>
      %55 = vector.shape_cast %54 : vector<1024xf32> to vector<1x1024xf32>
      %56 = vector.shape_cast %55 : vector<1x1024xf32> to vector<1x1024xf32>
      %57 = vector.broadcast %56 : vector<1x1024xf32> to vector<8x1024xf32>
      %58 = arith.truncf %57 : vector<8x1024xf32> to vector<8x1024xbf16>
      %c0_30 = arith.constant 0 : index
      %c0_31 = arith.constant 0 : index
      %59 = vector.load %arg9[%c0_30, %c0_31] : memref<1024x512xbf16, #tpu.memory_space<vmem>>, vector<1024x512xbf16>
      %cst_32 = arith.constant dense<0.000000e+00> : vector<8x512xf32>
      %60 = tpu.matmul %58, %59, %cst_32 {dimension_numbers = #tpu.dot_dimension_numbers<[1], [0], [0], [1], [0, 0, 1, 1], [], []>} : vector<8x1024xbf16>, vector<1024x512xbf16>, vector<8x512xf32> -> vector<8x512xf32>
      %c0_33 = arith.constant 0 : index
      %c0_34 = arith.constant 0 : index
      %61 = vector.load %arg10[%c0_33, %c0_34] : memref<1x512xf32, #tpu.memory_space<vmem>>, vector<1x512xf32>
      %62 = vector.broadcast %61 : vector<1x512xf32> to vector<8x512xf32>
      %63 = arith.addf %60, %62 : vector<8x512xf32>
      %64 = arith.truncf %63 : vector<8x512xf32> to vector<8x512xbf16>
      %c0_35 = arith.constant 0 : index
      %c0_36 = arith.constant 0 : index
      %65 = vector.load %arg11[%c0_35, %c0_36] : memref<512x256xbf16, #tpu.memory_space<vmem>>, vector<512x256xbf16>
      %cst_37 = arith.constant dense<0.000000e+00> : vector<8x256xf32>
      %66 = tpu.matmul %64, %65, %cst_37 {dimension_numbers = #tpu.dot_dimension_numbers<[1], [0], [0], [1], [0, 0, 1, 1], [], []>} : vector<8x512xbf16>, vector<512x256xbf16>, vector<8x256xf32> -> vector<8x256xf32>
      %c0_38 = arith.constant 0 : index
      %c0_39 = arith.constant 0 : index
      %67 = vector.load %arg12[%c0_38, %c0_39] : memref<1x256xf32, #tpu.memory_space<vmem>>, vector<1x256xf32>
      %68 = vector.broadcast %67 : vector<1x256xf32> to vector<8x256xf32>
      %69 = arith.addf %66, %68 : vector<8x256xf32>
      %70 = arith.truncf %69 : vector<8x256xf32> to vector<8x256xbf16>
      %c0_40 = arith.constant 0 : index
      %c0_41 = arith.constant 0 : index
      %71 = vector.load %arg13[%c0_40, %c0_41] : memref<256x9xbf16, #tpu.memory_space<vmem>>, vector<256x9xbf16>
      %cst_42 = arith.constant dense<0.000000e+00> : vector<8x9xf32>
      %72 = tpu.matmul %70, %71, %cst_42 {dimension_numbers = #tpu.dot_dimension_numbers<[1], [0], [0], [1], [0, 0, 1, 1], [], []>} : vector<8x256xbf16>, vector<256x9xbf16>, vector<8x9xf32> -> vector<8x9xf32>
      %c0_43 = arith.constant 0 : index
      %c0_44 = arith.constant 0 : index
      %73 = vector.load %arg14[%c0_43, %c0_44] : memref<1x9xf32, #tpu.memory_space<vmem>>, vector<1x9xf32>
      %74 = vector.broadcast %73 : vector<1x9xf32> to vector<8x9xf32>
      %75 = arith.addf %72, %74 : vector<8x9xf32>
      %76 = vector.extract_strided_slice %75 {offsets = [0, 0], sizes = [1, 9], strides = [1, 1]} : vector<8x9xf32> to vector<1x9xf32>
      %c0_45 = arith.constant 0 : index
      %c0_46 = arith.constant 0 : index
      %c0_47 = arith.constant 0 : index
      %77 = vector.load %arg15[%c0_45, %c0_46, %c0_47] : memref<1x1x9xf32, #tpu.memory_space<vmem>>, vector<1x1x9xf32>
      %78 = vector.shape_cast %77 : vector<1x1x9xf32> to vector<1x9xf32>
      %79 = vector.shape_cast %76 : vector<1x9xf32> to vector<1x1x9xf32>
      tpu.vector_store %arg15[%c0_45, %c0_46, %c0_47], %79 {strides = array<i32>} : memref<1x1x9xf32, #tpu.memory_space<vmem>>, vector<1x1x9xf32>,
    } else {
    }
    return
  }
  func.func @transform_0(%arg0: i32, %arg1: i32) -> (i32, i32, i32) {
    %c0_i32 = arith.constant 0 : i32
    %c0_i32_0 = arith.constant 0 : i32
    return %arg0, %arg1, %c0_i32 : i32, i32, i32
  }
  func.func @transform_1(%arg0: i32, %arg1: i32) -> (i32, i32, i32) {
    %c0_i32 = arith.constant 0 : i32
    %c0_i32_0 = arith.constant 0 : i32
    %c0_i32_1 = arith.constant 0 : i32
    %c0_i32_2 = arith.constant 0 : i32
    return %c0_i32, %c0_i32_0, %c0_i32_1 : i32, i32, i32
  }
  func.func @transform_2(%arg0: i32, %arg1: i32) -> (i32, i32) {
    %c0_i32 = arith.constant 0 : i32
    %c0_i32_0 = arith.constant 0 : i32
    %c0_i32_1 = arith.constant 0 : i32
    return %c0_i32, %c0_i32_0 : i32, i32
  }
  func.func @transform_3(%arg0: i32, %arg1: i32) -> (i32, i32) {
    %c0_i32 = arith.constant 0 : i32
    %c0_i32_0 = arith.constant 0 : i32
    %c0_i32_1 = arith.constant 0 : i32
    return %c0_i32, %c0_i32_0 : i32, i32
  }
  func.func @transform_4(%arg0: i32, %arg1: i32) -> (i32, i32) {
    %c0_i32 = arith.constant 0 : i32
    %c0_i32_0 = arith.constant 0 : i32
    %c0_i32_1 = arith.constant 0 : i32
    return %c0_i32, %c0_i32_0 : i32, i32
  }
  func.func @transform_5(%arg0: i32, %arg1: i32) -> (i32, i32) {
    %c0_i32 = arith.constant 0 : i32
    %c0_i32_0 = arith.constant 0 : i32
    %c0_i32_1 = arith.constant 0 : i32
    return %c0_i32, %c0_i32_0 : i32, i32
  }
  func.func @transform_6(%arg0: i32, %arg1: i32) -> (i32, i32) {
    %c0_i32 = arith.constant 0 : i32
    %c0_i32_0 = arith.constant 0 : i32
    %c0_i32_1 = arith.constant 0 : i32
    return %c0_i32, %c0_i32_0 : i32, i32
  }
  func.func @transform_7(%arg0: i32, %arg1: i32) -> (i32, i32) {
    %c0_i32 = arith.constant 0 : i32
    %c0_i32_0 = arith.constant 0 : i32
    %c0_i32_1 = arith.constant 0 : i32
    return %c0_i32, %c0_i32_0 : i32, i32
  }
  func.func @transform_8(%arg0: i32, %arg1: i32) -> (i32, i32) {
    %c0_i32 = arith.constant 0 : i32
    %c0_i32_0 = arith.constant 0 : i32
    %c0_i32_1 = arith.constant 0 : i32
    return %c0_i32, %c0_i32_0 : i32, i32
  }
  func.func @transform_9(%arg0: i32, %arg1: i32) -> (i32, i32) {
    %c0_i32 = arith.constant 0 : i32
    %c0_i32_0 = arith.constant 0 : i32
    %c0_i32_1 = arith.constant 0 : i32
    return %c0_i32, %c0_i32_0 : i32, i32
  }
  func.func @transform_10(%arg0: i32, %arg1: i32) -> (i32, i32) {
    %c0_i32 = arith.constant 0 : i32
    %c0_i32_0 = arith.constant 0 : i32
    %c0_i32_1 = arith.constant 0 : i32
    return %c0_i32, %c0_i32_0 : i32, i32
  }
  func.func @transform_11(%arg0: i32, %arg1: i32) -> (i32, i32) {
    %c0_i32 = arith.constant 0 : i32
    %c0_i32_0 = arith.constant 0 : i32
    %c0_i32_1 = arith.constant 0 : i32
    return %c0_i32, %c0_i32_0 : i32, i32
  }
  func.func @transform_12(%arg0: i32, %arg1: i32) -> (i32, i32) {
    %c0_i32 = arith.constant 0 : i32
    %c0_i32_0 = arith.constant 0 : i32
    %c0_i32_1 = arith.constant 0 : i32
    return %c0_i32, %c0_i32_0 : i32, i32
  }
  func.func @transform_13(%arg0: i32, %arg1: i32) -> (i32, i32, i32) {
    %c0_i32 = arith.constant 0 : i32
    %c0_i32_0 = arith.constant 0 : i32
    %c0_i32_1 = arith.constant 0 : i32
    return %arg0, %c0_i32, %c0_i32_0 : i32, i32, i32
  }
}

module attributes {stable_mosaic.version = 11 : i64} {
  func.func @_chain_head_kernel(%arg0: i32, %arg1: i32, %arg2: memref<1x128x3xf32, #tpu.memory_space<vmem>>, %arg3: memref<1x3x64xf32, #tpu.memory_space<vmem>>, %arg4: memref<1x64xf32, #tpu.memory_space<vmem>>, %arg5: memref<64x128xbf16, #tpu.memory_space<vmem>>, %arg6: memref<1x128xf32, #tpu.memory_space<vmem>>, %arg7: memref<128x1024xbf16, #tpu.memory_space<vmem>>, %arg8: memref<1x1024xf32, #tpu.memory_space<vmem>>, %arg9: memref<1024x512xbf16, #tpu.memory_space<vmem>>, %arg10: memref<1x512xf32, #tpu.memory_space<vmem>>, %arg11: memref<512x256xbf16, #tpu.memory_space<vmem>>, %arg12: memref<1x256xf32, #tpu.memory_space<vmem>>, %arg13: memref<256x2xbf16, #tpu.memory_space<vmem>>, %arg14: memref<1x2xf32, #tpu.memory_space<vmem>>, %arg15: memref<1x1x2xf32, #tpu.memory_space<vmem>>, %arg16: memref<8x1024xf32, #tpu.memory_space<vmem>>) attributes {dimension_semantics = [#tpu.dimension_semantics<parallel>, #tpu.dimension_semantics<arbitrary>], iteration_bounds = array<i64: 2, 1>, scalar_prefetch = 0 : i64, scratch_operands = 1 : i64, tpu.core_type = #tpu.core_type<tc>, window_params = [{transform_indices = @transform_0, window_bounds = array<i64: 1, 128, 3>}, {transform_indices = @transform_1, window_bounds = array<i64: 1, 3, 64>}, {pipeline_mode = #tpu.pipeline_mode<synchronous>, transform_indices = @transform_2, window_bounds = array<i64: 1, 64>}, {pipeline_mode = #tpu.pipeline_mode<synchronous>, transform_indices = @transform_3, window_bounds = array<i64: 64, 128>}, {pipeline_mode = #tpu.pipeline_mode<synchronous>, transform_indices = @transform_4, window_bounds = array<i64: 1, 128>}, {pipeline_mode = #tpu.pipeline_mode<synchronous>, transform_indices = @transform_5, window_bounds = array<i64: 128, 1024>}, {pipeline_mode = #tpu.pipeline_mode<synchronous>, transform_indices = @transform_6, window_bounds = array<i64: 1, 1024>}, {pipeline_mode = #tpu.pipeline_mode<synchronous>, transform_indices = @transform_7, window_bounds = array<i64: 1024, 512>}, {pipeline_mode = #tpu.pipeline_mode<synchronous>, transform_indices = @transform_8, window_bounds = array<i64: 1, 512>}, {pipeline_mode = #tpu.pipeline_mode<synchronous>, transform_indices = @transform_9, window_bounds = array<i64: 512, 256>}, {pipeline_mode = #tpu.pipeline_mode<synchronous>, transform_indices = @transform_10, window_bounds = array<i64: 1, 256>}, {pipeline_mode = #tpu.pipeline_mode<synchronous>, transform_indices = @transform_11, window_bounds = array<i64: 256, 2>}, {pipeline_mode = #tpu.pipeline_mode<synchronous>, transform_indices = @transform_12, window_bounds = array<i64: 1, 2>}, {transform_indices = @transform_13, window_bounds = array<i64: 1, 1, 2>}]} {
    %c0_i32 = arith.constant 0 : i32
    %0 = arith.cmpi eq, %arg1, %c0_i32 : i32
    %1 = arith.extui %0 : i1 to i32
    %c0_i32_0 = arith.constant 0 : i32
    %2 = arith.cmpi ne, %1, %c0_i32_0 : i32
    scf.if %2 {
      %cst_26 = arith.constant 0xFF800000 : f32
      %51 = vector.broadcast %cst_26 : f32 to vector<8x1024xf32>
      %c0_27 = arith.constant 0 : index
      %c0_28 = arith.constant 0 : index
      %52 = vector.load %arg16[%c0_27, %c0_28] : memref<8x1024xf32, #tpu.memory_space<vmem>>, vector<8x1024xf32>
      tpu.vector_store %arg16[%c0_27, %c0_28], %51 {strides = array<i32>} : memref<8x1024xf32, #tpu.memory_space<vmem>>, vector<8x1024xf32>,
    } else {
    }
    %c0 = arith.constant 0 : index
    %c0_1 = arith.constant 0 : index
    %c0_2 = arith.constant 0 : index
    %3 = vector.load %arg2[%c0, %c0_1, %c0_2] : memref<1x128x3xf32, #tpu.memory_space<vmem>>, vector<1x128x3xf32>
    %4 = vector.shape_cast %3 : vector<1x128x3xf32> to vector<128x3xf32>
    %c0_3 = arith.constant 0 : index
    %c0_4 = arith.constant 0 : index
    %c0_5 = arith.constant 0 : index
    %5 = vector.load %arg3[%c0_3, %c0_4, %c0_5] : memref<1x3x64xf32, #tpu.memory_space<vmem>>, vector<1x3x64xf32>
    %6 = vector.shape_cast %5 : vector<1x3x64xf32> to vector<3x64xf32>
    %7 = vector.extract_strided_slice %4 {offsets = [0, 0], sizes = [128, 1], strides = [1, 1]} : vector<128x3xf32> to vector<128x1xf32>
    %8 = vector.extract_strided_slice %6 {offsets = [0, 0], sizes = [1, 64], strides = [1, 1]} : vector<3x64xf32> to vector<1x64xf32>
    %9 = vector.broadcast %7 : vector<128x1xf32> to vector<128x64xf32>
    %10 = vector.broadcast %8 : vector<1x64xf32> to vector<128x64xf32>
    %11 = arith.mulf %9, %10 : vector<128x64xf32>
    %12 = vector.extract_strided_slice %4 {offsets = [0, 1], sizes = [128, 1], strides = [1, 1]} : vector<128x3xf32> to vector<128x1xf32>
    %13 = vector.extract_strided_slice %6 {offsets = [1, 0], sizes = [1, 64], strides = [1, 1]} : vector<3x64xf32> to vector<1x64xf32>
    %14 = vector.broadcast %12 : vector<128x1xf32> to vector<128x64xf32>
    %15 = vector.broadcast %13 : vector<1x64xf32> to vector<128x64xf32>
    %16 = arith.mulf %14, %15 : vector<128x64xf32>
    %17 = arith.addf %11, %16 : vector<128x64xf32>
    %18 = vector.extract_strided_slice %4 {offsets = [0, 2], sizes = [128, 1], strides = [1, 1]} : vector<128x3xf32> to vector<128x1xf32>
    %19 = vector.extract_strided_slice %6 {offsets = [2, 0], sizes = [1, 64], strides = [1, 1]} : vector<3x64xf32> to vector<1x64xf32>
    %20 = vector.broadcast %18 : vector<128x1xf32> to vector<128x64xf32>
    %21 = vector.broadcast %19 : vector<1x64xf32> to vector<128x64xf32>
    %22 = arith.mulf %20, %21 : vector<128x64xf32>
    %23 = arith.addf %17, %22 : vector<128x64xf32>
    %c0_6 = arith.constant 0 : index
    %c0_7 = arith.constant 0 : index
    %24 = vector.load %arg4[%c0_6, %c0_7] : memref<1x64xf32, #tpu.memory_space<vmem>>, vector<1x64xf32>
    %25 = vector.broadcast %24 : vector<1x64xf32> to vector<128x64xf32>
    %26 = arith.addf %23, %25 : vector<128x64xf32>
    %cst = arith.constant 0.000000e+00 : f32
    %27 = vector.broadcast %cst : f32 to vector<128x64xf32>
    %28 = arith.maximumf %26, %27 : vector<128x64xf32>
    %29 = arith.truncf %28 : vector<128x64xf32> to vector<128x64xbf16>
    %c0_8 = arith.constant 0 : index
    %c0_9 = arith.constant 0 : index
    %30 = vector.load %arg5[%c0_8, %c0_9] : memref<64x128xbf16, #tpu.memory_space<vmem>>, vector<64x128xbf16>
    %cst_10 = arith.constant dense<0.000000e+00> : vector<128x128xf32>
    %31 = tpu.matmul %29, %30, %cst_10 {dimension_numbers = #tpu.dot_dimension_numbers<[1], [0], [0], [1], [0, 0, 1, 1], [], []>} : vector<128x64xbf16>, vector<64x128xbf16>, vector<128x128xf32> -> vector<128x128xf32>
    %c0_11 = arith.constant 0 : index
    %c0_12 = arith.constant 0 : index
    %32 = vector.load %arg6[%c0_11, %c0_12] : memref<1x128xf32, #tpu.memory_space<vmem>>, vector<1x128xf32>
    %33 = vector.broadcast %32 : vector<1x128xf32> to vector<128x128xf32>
    %34 = arith.addf %31, %33 : vector<128x128xf32>
    %cst_13 = arith.constant 0.000000e+00 : f32
    %35 = vector.broadcast %cst_13 : f32 to vector<128x128xf32>
    %36 = arith.maximumf %34, %35 : vector<128x128xf32>
    %37 = arith.truncf %36 : vector<128x128xf32> to vector<128x128xbf16>
    %c0_14 = arith.constant 0 : index
    %c0_15 = arith.constant 0 : index
    %38 = vector.load %arg7[%c0_14, %c0_15] : memref<128x1024xbf16, #tpu.memory_space<vmem>>, vector<128x1024xbf16>
    %cst_16 = arith.constant dense<0.000000e+00> : vector<128x1024xf32>
    %39 = tpu.matmul %37, %38, %cst_16 {dimension_numbers = #tpu.dot_dimension_numbers<[1], [0], [0], [1], [0, 0, 1, 1], [], []>} : vector<128x128xbf16>, vector<128x1024xbf16>, vector<128x1024xf32> -> vector<128x1024xf32>
    %c0_17 = arith.constant 0 : index
    %c0_18 = arith.constant 0 : index
    %40 = vector.load %arg8[%c0_17, %c0_18] : memref<1x1024xf32, #tpu.memory_space<vmem>>, vector<1x1024xf32>
    %41 = vector.broadcast %40 : vector<1x1024xf32> to vector<128x1024xf32>
    %42 = arith.addf %39, %41 : vector<128x1024xf32>
    %43 = vector.shape_cast %42 : vector<128x1024xf32> to vector<16x8x1024xf32>
    %cst_19 = arith.constant dense<0xFF800000> : vector<8x1024xf32>
    %44 = vector.multi_reduction <maximumf>, %43, %cst_19 [0] : vector<16x8x1024xf32> to vector<8x1024xf32>
    %c0_20 = arith.constant 0 : index
    %c0_21 = arith.constant 0 : index
    %45 = vector.load %arg16[%c0_20, %c0_21] : memref<8x1024xf32, #tpu.memory_space<vmem>>, vector<8x1024xf32>
    %46 = arith.maximumf %45, %44 : vector<8x1024xf32>
    %c0_22 = arith.constant 0 : index
    %c0_23 = arith.constant 0 : index
    %47 = vector.load %arg16[%c0_22, %c0_23] : memref<8x1024xf32, #tpu.memory_space<vmem>>, vector<8x1024xf32>
    tpu.vector_store %arg16[%c0_22, %c0_23], %46 {strides = array<i32>} : memref<8x1024xf32, #tpu.memory_space<vmem>>, vector<8x1024xf32>,
    %c0_i32_24 = arith.constant 0 : i32
    %48 = arith.cmpi eq, %arg1, %c0_i32_24 : i32
    %49 = arith.extui %48 : i1 to i32
    %c0_i32_25 = arith.constant 0 : i32
    %50 = arith.cmpi ne, %49, %c0_i32_25 : i32
    scf.if %50 {
      %c0_26 = arith.constant 0 : index
      %c0_27 = arith.constant 0 : index
      %51 = vector.load %arg16[%c0_26, %c0_27] : memref<8x1024xf32, #tpu.memory_space<vmem>>, vector<8x1024xf32>
      %cst_28 = arith.constant dense<0xFF800000> : vector<1024xf32>
      %52 = vector.multi_reduction <maximumf>, %51, %cst_28 [0] : vector<8x1024xf32> to vector<1024xf32>
      %53 = vector.shape_cast %52 : vector<1024xf32> to vector<1x1024xf32>
      %54 = vector.shape_cast %53 : vector<1x1024xf32> to vector<1x1024xf32>
      %55 = vector.broadcast %54 : vector<1x1024xf32> to vector<8x1024xf32>
      %56 = arith.truncf %55 : vector<8x1024xf32> to vector<8x1024xbf16>
      %c0_29 = arith.constant 0 : index
      %c0_30 = arith.constant 0 : index
      %57 = vector.load %arg9[%c0_29, %c0_30] : memref<1024x512xbf16, #tpu.memory_space<vmem>>, vector<1024x512xbf16>
      %cst_31 = arith.constant dense<0.000000e+00> : vector<8x512xf32>
      %58 = tpu.matmul %56, %57, %cst_31 {dimension_numbers = #tpu.dot_dimension_numbers<[1], [0], [0], [1], [0, 0, 1, 1], [], []>} : vector<8x1024xbf16>, vector<1024x512xbf16>, vector<8x512xf32> -> vector<8x512xf32>
      %c0_32 = arith.constant 0 : index
      %c0_33 = arith.constant 0 : index
      %59 = vector.load %arg10[%c0_32, %c0_33] : memref<1x512xf32, #tpu.memory_space<vmem>>, vector<1x512xf32>
      %60 = vector.broadcast %59 : vector<1x512xf32> to vector<8x512xf32>
      %61 = arith.addf %58, %60 : vector<8x512xf32>
      %cst_34 = arith.constant 0.000000e+00 : f32
      %62 = vector.broadcast %cst_34 : f32 to vector<8x512xf32>
      %63 = arith.maximumf %61, %62 : vector<8x512xf32>
      %64 = arith.truncf %63 : vector<8x512xf32> to vector<8x512xbf16>
      %c0_35 = arith.constant 0 : index
      %c0_36 = arith.constant 0 : index
      %65 = vector.load %arg11[%c0_35, %c0_36] : memref<512x256xbf16, #tpu.memory_space<vmem>>, vector<512x256xbf16>
      %cst_37 = arith.constant dense<0.000000e+00> : vector<8x256xf32>
      %66 = tpu.matmul %64, %65, %cst_37 {dimension_numbers = #tpu.dot_dimension_numbers<[1], [0], [0], [1], [0, 0, 1, 1], [], []>} : vector<8x512xbf16>, vector<512x256xbf16>, vector<8x256xf32> -> vector<8x256xf32>
      %c0_38 = arith.constant 0 : index
      %c0_39 = arith.constant 0 : index
      %67 = vector.load %arg12[%c0_38, %c0_39] : memref<1x256xf32, #tpu.memory_space<vmem>>, vector<1x256xf32>
      %68 = vector.broadcast %67 : vector<1x256xf32> to vector<8x256xf32>
      %69 = arith.addf %66, %68 : vector<8x256xf32>
      %cst_40 = arith.constant 0.000000e+00 : f32
      %70 = vector.broadcast %cst_40 : f32 to vector<8x256xf32>
      %71 = arith.maximumf %69, %70 : vector<8x256xf32>
      %72 = arith.truncf %71 : vector<8x256xf32> to vector<8x256xbf16>
      %c0_41 = arith.constant 0 : index
      %c0_42 = arith.constant 0 : index
      %73 = vector.load %arg13[%c0_41, %c0_42] : memref<256x2xbf16, #tpu.memory_space<vmem>>, vector<256x2xbf16>
      %cst_43 = arith.constant dense<0.000000e+00> : vector<8x2xf32>
      %74 = tpu.matmul %72, %73, %cst_43 {dimension_numbers = #tpu.dot_dimension_numbers<[1], [0], [0], [1], [0, 0, 1, 1], [], []>} : vector<8x256xbf16>, vector<256x2xbf16>, vector<8x2xf32> -> vector<8x2xf32>
      %c0_44 = arith.constant 0 : index
      %c0_45 = arith.constant 0 : index
      %75 = vector.load %arg14[%c0_44, %c0_45] : memref<1x2xf32, #tpu.memory_space<vmem>>, vector<1x2xf32>
      %76 = vector.broadcast %75 : vector<1x2xf32> to vector<8x2xf32>
      %77 = arith.addf %74, %76 : vector<8x2xf32>
      %cst_46 = arith.constant dense<0xFF800000> : vector<8xf32>
      %78 = vector.multi_reduction <maximumf>, %77, %cst_46 [1] : vector<8x2xf32> to vector<8xf32>
      %79 = vector.shape_cast %78 : vector<8xf32> to vector<8x1xf32>
      %80 = vector.broadcast %79 : vector<8x1xf32> to vector<8x2xf32>
      %81 = arith.subf %77, %80 : vector<8x2xf32>
      %82 = math.exp %81 : vector<8x2xf32>
      %cst_47 = arith.constant dense<0.000000e+00> : vector<8xf32>
      %83 = vector.multi_reduction <add>, %82, %cst_47 [1] : vector<8x2xf32> to vector<8xf32>
      %84 = vector.shape_cast %83 : vector<8xf32> to vector<8x1xf32>
      %85 = math.log %84 : vector<8x1xf32>
      %86 = vector.broadcast %85 : vector<8x1xf32> to vector<8x2xf32>
      %87 = arith.subf %81, %86 : vector<8x2xf32>
      %88 = vector.extract_strided_slice %87 {offsets = [0, 0], sizes = [1, 2], strides = [1, 1]} : vector<8x2xf32> to vector<1x2xf32>
      %c0_48 = arith.constant 0 : index
      %c0_49 = arith.constant 0 : index
      %c0_50 = arith.constant 0 : index
      %89 = vector.load %arg15[%c0_48, %c0_49, %c0_50] : memref<1x1x2xf32, #tpu.memory_space<vmem>>, vector<1x1x2xf32>
      %90 = vector.shape_cast %89 : vector<1x1x2xf32> to vector<1x2xf32>
      %91 = vector.shape_cast %88 : vector<1x2xf32> to vector<1x1x2xf32>
      tpu.vector_store %arg15[%c0_48, %c0_49, %c0_50], %91 {strides = array<i32>} : memref<1x1x2xf32, #tpu.memory_space<vmem>>, vector<1x1x2xf32>,
    } else {
    }
    return
  }
  func.func @transform_0(%arg0: i32, %arg1: i32) -> (i32, i32, i32) {
    %c0_i32 = arith.constant 0 : i32
    %c0_i32_0 = arith.constant 0 : i32
    return %arg0, %arg1, %c0_i32 : i32, i32, i32
  }
  func.func @transform_1(%arg0: i32, %arg1: i32) -> (i32, i32, i32) {
    %c0_i32 = arith.constant 0 : i32
    %c0_i32_0 = arith.constant 0 : i32
    %c0_i32_1 = arith.constant 0 : i32
    return %arg0, %c0_i32, %c0_i32_0 : i32, i32, i32
  }
  func.func @transform_2(%arg0: i32, %arg1: i32) -> (i32, i32) {
    %c0_i32 = arith.constant 0 : i32
    %c0_i32_0 = arith.constant 0 : i32
    %c0_i32_1 = arith.constant 0 : i32
    return %c0_i32, %c0_i32_0 : i32, i32
  }
  func.func @transform_3(%arg0: i32, %arg1: i32) -> (i32, i32) {
    %c0_i32 = arith.constant 0 : i32
    %c0_i32_0 = arith.constant 0 : i32
    %c0_i32_1 = arith.constant 0 : i32
    return %c0_i32, %c0_i32_0 : i32, i32
  }
  func.func @transform_4(%arg0: i32, %arg1: i32) -> (i32, i32) {
    %c0_i32 = arith.constant 0 : i32
    %c0_i32_0 = arith.constant 0 : i32
    %c0_i32_1 = arith.constant 0 : i32
    return %c0_i32, %c0_i32_0 : i32, i32
  }
  func.func @transform_5(%arg0: i32, %arg1: i32) -> (i32, i32) {
    %c0_i32 = arith.constant 0 : i32
    %c0_i32_0 = arith.constant 0 : i32
    %c0_i32_1 = arith.constant 0 : i32
    return %c0_i32, %c0_i32_0 : i32, i32
  }
  func.func @transform_6(%arg0: i32, %arg1: i32) -> (i32, i32) {
    %c0_i32 = arith.constant 0 : i32
    %c0_i32_0 = arith.constant 0 : i32
    %c0_i32_1 = arith.constant 0 : i32
    return %c0_i32, %c0_i32_0 : i32, i32
  }
  func.func @transform_7(%arg0: i32, %arg1: i32) -> (i32, i32) {
    %c0_i32 = arith.constant 0 : i32
    %c0_i32_0 = arith.constant 0 : i32
    %c0_i32_1 = arith.constant 0 : i32
    return %c0_i32, %c0_i32_0 : i32, i32
  }
  func.func @transform_8(%arg0: i32, %arg1: i32) -> (i32, i32) {
    %c0_i32 = arith.constant 0 : i32
    %c0_i32_0 = arith.constant 0 : i32
    %c0_i32_1 = arith.constant 0 : i32
    return %c0_i32, %c0_i32_0 : i32, i32
  }
  func.func @transform_9(%arg0: i32, %arg1: i32) -> (i32, i32) {
    %c0_i32 = arith.constant 0 : i32
    %c0_i32_0 = arith.constant 0 : i32
    %c0_i32_1 = arith.constant 0 : i32
    return %c0_i32, %c0_i32_0 : i32, i32
  }
  func.func @transform_10(%arg0: i32, %arg1: i32) -> (i32, i32) {
    %c0_i32 = arith.constant 0 : i32
    %c0_i32_0 = arith.constant 0 : i32
    %c0_i32_1 = arith.constant 0 : i32
    return %c0_i32, %c0_i32_0 : i32, i32
  }
  func.func @transform_11(%arg0: i32, %arg1: i32) -> (i32, i32) {
    %c0_i32 = arith.constant 0 : i32
    %c0_i32_0 = arith.constant 0 : i32
    %c0_i32_1 = arith.constant 0 : i32
    return %c0_i32, %c0_i32_0 : i32, i32
  }
  func.func @transform_12(%arg0: i32, %arg1: i32) -> (i32, i32) {
    %c0_i32 = arith.constant 0 : i32
    %c0_i32_0 = arith.constant 0 : i32
    %c0_i32_1 = arith.constant 0 : i32
    return %c0_i32, %c0_i32_0 : i32, i32
  }
  func.func @transform_13(%arg0: i32, %arg1: i32) -> (i32, i32, i32) {
    %c0_i32 = arith.constant 0 : i32
    %c0_i32_0 = arith.constant 0 : i32
    %c0_i32_1 = arith.constant 0 : i32
    return %arg0, %c0_i32, %c0_i32_0 : i32, i32, i32
  }
}

</mosaic_0001>

<bundles_post_ra>
// kernel: pointnet_cls_forward.2
= control target key start
LH: loop header
LB: loop body
LE: loop exit
PB: predicated region body
PF: predicated region fallthrough
CT: control target
= control target key end

     0   :  { %s6033_s25 = smov 0   ;;  %s6035_s26 = smov 0   ;;  %s7809_s0 = inlined_call_operand.vmem [shape: f32[2,128,3], index: 0, kind: input, shape index: {}]   ;;  %s7810_s1 = inlined_call_operand.vmem [shape: f32[1,3,64], index: 1, kind: input, shape index: {}]   ;;  %s7811_s2 = inlined_call_operand.vmem [shape: f32[1,64], index: 2, kind: input, shape index: {}]   ;;  %s7812_s3 = inlined_call_operand.vmem [shape: bf16[64,128], index: 3, kind: input, shape index: {}]   ;;  %s7813_s4 = inlined_call_operand.vmem [shape: f32[1,128], index: 4, kind: input, shape index: {}]   ;;  %s7814_s5 = inlined_call_operand.vmem [shape: bf16[128,1024], index: 5, kind: input, shape index: {}]   ;;  %s7815_s6 = inlined_call_operand.vmem [shape: f32[1,1024], index: 6, kind: input, shape index: {}]   ;;  %s7816_s7 = inlined_call_operand.vmem [shape: bf16[1024,512], index: 7, kind: input, shape index: {}]   ;;  %s7817_s8 = inlined_call_operand.vmem [shape: f32[1,512], index: 8, kind: input, shape index: {}]   ;;  %s7818_s9 = inlined_call_operand.vmem [shape: bf16[512,256], index: 9, kind: input, shape index: {}]   ;;  %s7819_s10 = inlined_call_operand.vmem [shape: f32[1,256], index: 10, kind: input, shape index: {}]   ;;  %s7820_s11 = inlined_call_operand.vmem [shape: bf16[256,9], index: 11, kind: input, shape index: {}]   ;;  %s7821_s12 = inlined_call_operand.vmem [shape: f32[1,9], index: 12, kind: input, shape index: {}]   ;;  %s7822_s13 = inlined_call_operand.vmem [shape: f32[2,1,9], index: 13, kind: output, shape index: {}]  }
   0x1   :  { %s6037_s27 = smov 0  }
   0x2 LB: > { %s35_s28 = sadd.s32 1, %s5954_s26  ;;  %p4856_p0 = scmp.ge.s32.totalorder %s5958_s27, 1  ;;  %s5958_s27 = sphi %s6037_s27, %s23_s27   ;;  %s5954_s26 = sphi %s6035_s26, %s7824_s26   ;;  %s5950_s25 = sphi %s6033_s25, %s7823_s25  }
   0x3   : > { %p37_p1 = scmp.ge.s32.totalorder %s35_s28, 2  ;;  %p406_p2 = scmp.lt.s32.totalorder %s5958_s27, 3 }
   0x5   : > { %s7826_s28 = smov (%p37_p1, %s35_s28), 0  ;;  %p407_p3 = pnand %p4856_p0, %p406_p2 }
   0x6   : > { %p453_p4 = scmp.lt.s32.totalorder (!%p407_p3), %s5950_s25, 1  ;;  %v5960_v0 = vmov (!%p407_p3), 1   ;;  %v5961_v1 = vmov (!%p407_p3), 0   ;;  %v5962_v8 = vmov (!%p407_p3), 2   ;;  %v5436_v12 = vld [vmem:[%s7812_s3] sm:$0xff] (!%p407_p3)   ;;  %v5437_v13 = vld [vmem:[%s7812_s3 + $0x8] sm:$0xff] (!%p407_p3)   ;;  %v575_v36 = vlaneseq (!%p407_p3) }
   0x7   : > { %410 = sbr.rel (%p407_p3) target bundleno = 1665 (0x681), region = 72  ;;  %5414 = vset.pattern.permute.xlu0 (!%p407_p3), %v5960_v0  ;;  %5412 = vset.pattern.permute.xlu1 (!%p407_p3), %v5960_v0  ;;  %v5438_v14 = vld [vmem:[%s7812_s3 + $0x10] sm:$0xff] (!%p407_p3)   ;;  %v5439_v15 = vld [vmem:[%s7812_s3 + $0x18] sm:$0xff] (!%p407_p3)   ;;  %v1027_v30 = vld [vmem:[%s7814_s5] sm:$0xff] (!%p407_p3)  ;;  %vm881_vm0 = vcmask (!%p407_p3), 523264   ;;  %vm4789_vm1 = vcmask (!%p407_p3), 65536  }
   0x8   : > { %1525 = vmatprep.mubr.bf16.mxu1 (!%p407_p3), %v5961_v1  ;;  %5311 = vmatprep.subr.bf16.mxu0 (!%p407_p3), %v5436_v12  ;;  %v1031_v31 = vld [vmem:[%s7814_s5 + $0x20] sm:$0xff] (!%p407_p3)  ;;  %v6144_v42 = vshrl.u32 (!%p407_p3), %v575_v36, 7 }
   0x9   : > { %5312 = vmatpush3.bf16.msra.mxu0 (!%p407_p3), %v5436_v12  ;;  %v1035_v32 = vld [vmem:[%s7814_s5 + $0x40] sm:$0xff] (!%p407_p3)  ;;  %v4874_v34 = vcombine.high (!%p407_p3), %v1027_v30, %v1031_v31  ;;  %v6130_v37 = vcombine.low (!%p407_p3), %v1027_v30, %v1031_v31 }
   0xa   : > { %5313 = vmatprep.subr.bf16.mxu0 (!%p407_p3), %v5437_v13  ;;  %v1039_v35 = vld [vmem:[%s7814_s5 + $0x60] sm:$0xff] (!%p407_p3)  ;;  %v6161_v49 = vsub.s32 (!%p407_p3), 1, %v6144_v42  ;;  %v6171_v54 = vsub.s32 (!%p407_p3), 0, %v6144_v42  ;;  %v6174_v55 = vsub.s32 (!%p407_p3), 2, %v6144_v42 }
   0xb   : > { %v6132_v38 = vcombine.high (!%p407_p3), %v1035_v32, %v1039_v35  ;;  %5335 = vmatprep.subr.bf16.mxu1 (!%p407_p3), %v4874_v34  ;;  %v1043_v40 = vld [vmem:[%s7814_s5 + $0x80] sm:$0xff] (!%p407_p3)  ;;  %v6146_v44 = vcombine.low (!%p407_p3), %v1035_v32, %v1039_v35 }
   0xc   : > { %v1047_v41 = vld [vmem:[%s7814_s5 + $0xa0] sm:$0xff] (!%p407_p3)  ;;  %5343 = vmatpush1.bf16.msra.mxu1 (!%p407_p3), %v6130_v37 }
   0xd   : > { %5314 = vmatpush3.bf16.msra.mxu0 (!%p407_p3), %v5437_v13  ;;  %5336 = vmatprep.subr.bf16.mxu1 (!%p407_p3), %v6132_v38  ;;  %v6148_v45 = vcombine.high (!%p407_p3), %v1043_v40, %v1047_v41  ;;  %v1051_v47 = vld [vmem:[%s7814_s5 + $0xc0] sm:$0xff] (!%p407_p3)  ;;  %v6163_v51 = vcombine.low (!%p407_p3), %v1043_v40, %v1047_v41 }
   0xe   : > { %s7828_s25 = smov (!%p453_p4, %s5950_s25), 1  ;;  %5315 = vmatprep.subr.bf16.mxu0 %v5438_v14  ;;  %v1055_v48 = vld [vmem:[%s7814_s5 + $0xe0] sm:$0xff] }
   0xf   : > { %s5276_s29 = sshll.u32 %s7828_s25, 7  ;;  %v494_v52 = vld [vmem:[%s7810_s1] sm:$0x7]  ;;  %v6168_v53 = vcombine.high %v1051_v47, %v1055_v48  ;;  %v6189_v61 = vcombine.low %v1051_v47, %v1055_v48  ;;  %s464_s21 = scalar_lea.vmem %s7822_s13, %s7828_s25 }
  0x10   : > { %s6060_s15 = scalar_lea.vmem %s7809_s0, %s5276_s29  ;;  %5344 = vmatpush1.bf16.msra.mxu1 %v6146_v44  ;;  %v1059_v57 = vld [vmem:[%s7814_s5 + $0x100] sm:$0xff]  ;;  %v6187_v59 = vrot.slane %v494_v52, %v6161_v49  ;;  %v6194_v63 = vrot.slane %v494_v52, %v6171_v54 }
  0x11   : > { %v480_v2 = vld [vmem:[%s6060_s15 + $0x10] sm:$0xff]  ;;  %v478_v3 = vld [vmem:[%s6060_s15] sm:$0xff]  ;;  %v483_v4 = vld [vmem:[%s6060_s15 + $0x28] sm:$0xff]  ;;  %5316 = vmatpush3.bf16.msra.mxu0 %v5438_v14  ;;  %5337 = vmatprep.subr.bf16.mxu1 %v6148_v45 }
  0x12   : > { %604 = vperm.xlu0 %5414, %v480_v2   ;;  %596 = vperm.xlu1 %5412, %v478_v3   ;;  %v479_v5 = vld [vmem:[%s6060_s15 + $0x8] sm:$0xff]  ;;  %v484_v6 = vld [vmem:[%s6060_s15 + $0x30] sm:$0xff]  ;;  %v481_v7 = vld [vmem:[%s6060_s15 + $0x18] sm:$0xff] }
  0x13   : > { %v482_v9 = vld [vmem:[%s6060_s15 + $0x20] sm:$0xff]  ;;  %v485_v10 = vld [vmem:[%s6060_s15 + $0x38] sm:$0xff]  ;;  %v487_v11 = vld [vmem:[%s6060_s15 + $0x48] sm:$0xff]  ;;  %5317 = vmatprep.subr.bf16.mxu0 %v5439_v15 }
  0x14   : > { %v488_v16 = vld [vmem:[%s6060_s15 + $0x50] sm:$0xff]  ;;  %v490_v17 = vld [vmem:[%s6060_s15 + $0x60] sm:$0xff]  ;;  %v491_v18 = vld [vmem:[%s6060_s15 + $0x68] sm:$0xff]  ;;  %5345 = vmatpush1.bf16.msra.mxu1 %v6163_v51 }
  0x15   : > { %5318 = vmatpush3.bf16.msra.mxu0 %v5439_v15  ;;  %v486_v19 = vld [vmem:[%s6060_s15 + $0x40] sm:$0xff]  ;;  %v492_v20 = vld [vmem:[%s6060_s15 + $0x70] sm:$0xff]  ;;  %v493_v21 = vld [vmem:[%s6060_s15 + $0x78] sm:$0xff]  ;;  %5338 = vmatprep.subr.bf16.mxu1 %v6168_v53 }
  0x16   : > { %616 = vperm.xlu0 %5414, %v483_v4   ;;  %600 = vperm.xlu1 %5412, %v479_v5   ;;  %v489_v22 = vld [vmem:[%s6060_s15 + $0x58] sm:$0xff]  ;;  %v1063_v58 = vld [vmem:[%s7814_s5 + $0x120] sm:$0xff] }
  0x17   : > { %1453 = vmatprep.subr.bf16.mxu0 %v4874_v34  ;;  %v6191_v62 = vcombine.high %v1059_v57, %v1063_v58 }
  0x18   : > { %5346 = vmatpush1.bf16.msra.mxu1 %v6189_v61 }
  0x19   : > { %5339 = vmatprep.subr.bf16.mxu1 %v6191_v62 }
  0x1a   : > { %620 = vperm.xlu0 %5414, %v484_v6   ;;  %5413 = vset.pattern.permute.xlu1 %v5961_v1 }
  0x1b   : > { %512 = vperm.xlu1 %5413, %v481_v7  }
  0x1e   : > { %5420 = vset.pattern.permute.xlu0 %v5962_v8 }
  0x1f   : > { %700 = vperm.xlu0 %5420, %v479_v5   ;;  %5415 = vset.pattern.permute.xlu1 %v5960_v0 }
  0x20   : > { %608 = vperm.xlu1 %5415, %v481_v7  }
  0x23   : > { %712 = vperm.xlu0 %5420, %v482_v9  }
  0x24   : > { %5416 = vset.pattern.permute.xlu1 %v5962_v8 }
  0x25   : > { %696 = vperm.xlu1 %5416, %v478_v3  }
  0x27   : > { %724 = vperm.xlu0 %5420, %v485_v10  }
  0x29   : > { %704 = vperm.xlu1 %5416, %v480_v2  }
  0x2b   : > { %732 = vperm.xlu0 %5420, %v487_v11  }
  0x2d   : > { %708 = vperm.xlu1 %5416, %v481_v7   ;;  %v6209_v7 = vcombine.low %v1059_v57, %v1063_v58 }
  0x2f   : > { %5428 = vset.pattern.permute.xlu0 %v5961_v1  ;;  %5347 = vmatpush1.bf16.msra.mxu1 %v6209_v7 }
  0x30   : > { %497 = vperm.xlu0 %5428, %v478_v3   ;;  %v1071_v3 = vld [vmem:[%s7814_s5 + $0x160] sm:$0xff] }
  0x31   : > { %5417 = vset.pattern.permute.xlu1 %v5961_v1 }
  0x32   : > { %522 = vperm.xlu1 %5417, %v483_v4  }
  0x34   : > { %502 = vperm.xlu0 %5428, %v479_v5  }
  0x36   : > { %5418 = vset.pattern.permute.xlu1 %v5960_v0 }
  0x37   : > { %612 = vperm.xlu1 %5418, %v482_v9  }
  0x38   : > { %507 = vperm.xlu0 %5428, %v480_v2   ;;  %v1067_v2 = vld [vmem:[%s7814_s5 + $0x140] sm:$0xff] }
  0x3b   : > { %5419 = vset.pattern.permute.xlu1 %v5961_v1 }
  0x3c   : > { %517 = vperm.xlu0 %5428, %v482_v9   ;;  %527 = vperm.xlu1 %5419, %v484_v6   ;;  %v6211_v9 = vcombine.high %v1067_v2, %v1071_v3 }
  0x3e   : > { %5340 = vmatprep.subr.bf16.mxu1 %v6211_v9 }
  0x40   : > { %532 = vperm.xlu1 %5419, %v485_v10   ;;  %542 = vperm.xlu0 %5428, %v487_v11  }
  0x44   : > { %5421 = vset.pattern.permute.xlu1 %v5960_v0  ;;  %547 = vperm.xlu0 %5428, %v488_v16  }
  0x45   : > { %624 = vperm.xlu1 %5421, %v485_v10  }
  0x48   : > { %557 = vperm.xlu0 %5428, %v490_v17  }
  0x49   : > { %5422 = vset.pattern.permute.xlu1 %v5962_v8 }
  0x4a   : > { %716 = vperm.xlu1 %5422, %v483_v4  }
  0x4c   : > { %5429 = vset.pattern.permute.xlu0 %v5960_v0 }
  0x4d   : > { %636 = vperm.xlu0 %5429, %v488_v16  }
  0x4e   : > { %720 = vperm.xlu1 %5422, %v484_v6  }
  0x51   : > { %648 = vperm.xlu0 %5429, %v491_v18  }
  0x52   : > { %5423 = vset.pattern.permute.xlu1 %v5961_v1 }
  0x53   : > { %537 = vperm.xlu1 %5423, %v486_v19  }
  0x55   : > { %652 = vperm.xlu0 %5429, %v492_v20  }
  0x57   : > { %5424 = vset.pattern.permute.xlu1 %v5960_v0 }
  0x58   : > { %628 = vperm.xlu1 %5424, %v486_v19  }
  0x59   : > { %5434 = vset.pattern.permute.xlu0 %v5962_v8 }
  0x5a   : > { %744 = vperm.xlu0 %5434, %v490_v17  }
  0x5c   : > { %632 = vperm.xlu1 %5424, %v487_v11  }
  0x5e   : > { %756 = vperm.xlu0 %5434, %v493_v21  }
  0x60   : > { %5425 = vset.pattern.permute.xlu1 %v5961_v1 }
  0x61   : > { %552 = vperm.xlu1 %5425, %v489_v22  }
  0x65   : > { %5426 = vset.pattern.permute.xlu1 %v5960_v0 }
  0x66   : > { %640 = vperm.xlu1 %5426, %v489_v22  }
  0x6a   : > { %5427 = vset.pattern.permute.xlu1 %v5962_v8 }
  0x6b   : > { %728 = vperm.xlu1 %5427, %v486_v19  }
  0x6f   : > { %736 = vperm.xlu1 %5427, %v488_v16  }
  0x73   : > { %740 = vperm.xlu1 %5427, %v489_v22  }
  0x77   : > { %5430 = vset.pattern.permute.xlu1 %v5961_v1 }
  0x78   : > { %562 = vperm.xlu1 %5430, %v491_v18  }
  0x7c   : > { %5431 = vset.pattern.permute.xlu1 %v5960_v0 }
  0x7d   : > { %644 = vperm.xlu1 %5431, %v490_v17  }
  0x81   : > { %5432 = vset.pattern.permute.xlu1 %v5961_v1 }
  0x82   : > { %567 = vperm.xlu1 %5432, %v492_v20  }
  0x86   : > { %572 = vperm.xlu1 %5432, %v493_v21  }
  0x8a   : > { %5433 = vset.pattern.permute.xlu1 %v5960_v0  ;;  %v6197_v0 = vrot.slane %v494_v52, %v6174_v55 }
  0x8b   : > { %656 = vperm.xlu1 %5433, %v493_v21  }
  0x8f   : > { %5435 = vset.pattern.permute.xlu1 %v5962_v8 }
  0x90   : > { %748 = vperm.xlu1 %5435, %v491_v18  }
  0x91   : > { %v597_v23 = vpop.permute.xlu1 %596  ;;  %v6112_v24 = vpop.permute.xlu0 %604 }
  0x92   : > { %v663_v5 = vmul.f32 %v6187_v59, %v597_v23  ;;  %v665_v21 = vmul.f32 %v6187_v59, %v6112_v24 }
  0x94   : > { %752 = vperm.xlu1 %5435, %v492_v20   ;;  %v6222_v20 = vcombine.low %v1067_v2, %v1071_v3 }
  0x95   : > { %v601_v25 = vpop.permute.xlu1 %600  ;;  %v6114_v26 = vpop.permute.xlu0 %616 }
  0x96   : > { %v664_v13 = vmul.f32 %v6187_v59, %v601_v25  ;;  %5348 = vmatpush1.bf16.msra.mxu1 %v6222_v20 }
  0x99   : > { %v6116_v27 = vpop.permute.xlu0 %620 }
  0x9a   : > { %v513_v28 = vpop.permute.xlu1 %512 }
  0x9b   : > { %v582_v14 = vmul.f32 %v6194_v63, %v513_v28  ;;  %v6230_v28 = vld [vmem:[%s7811_s2] ss:$0 sm:$0xff] }
  0x9e   : > { %v701_v29 = vpop.permute.xlu0 %700 }
  0x9f   : > { %v609_v33 = vpop.permute.xlu1 %608  ;;  %v764_v15 = vmul.f32 %v6197_v0, %v701_v29 }
  0xa0   : > { %v666_v10 = vmul.f32 %v6187_v59, %v609_v33 }
  0xa2   : > { %v6134_v39 = vpop.permute.xlu0 %712  ;;  %v682_v22 = vadd.f32 %v666_v10, %v582_v14 }
  0xa4   : > { %v697_v43 = vpop.permute.xlu1 %696 }
  0xa5   : > { %v763_v11 = vmul.f32 %v6197_v0, %v697_v43 }
  0xa6   : > { %v6150_v46 = vpop.permute.xlu0 %724 }
  0xa8   : > { %v705_v50 = vpop.permute.xlu1 %704 }
  0xa9   : > { %v765_v34 = vmul.f32 %v6197_v0, %v705_v50 }
  0xaa   : > { %v6176_v56 = vpop.permute.xlu0 %732 }
  0xac   : > { %v709_v60 = vpop.permute.xlu1 %708 }
  0xad   : > { %v766_v17 = vmul.f32 %v6197_v0, %v709_v60 }
  0xaf   : > { %v498_v4 = vpop.permute.xlu0 %497  ;;  %v782_v30 = vadd.f32 %v766_v17, %v682_v22 }
  0xb0   : > { %v579_v6 = vmul.f32 %v6194_v63, %v498_v4 }
  0xb1   : > { %v523_v8 = vpop.permute.xlu1 %522  ;;  %v805_v40 = vadd.f32 %v6230_v28, %v782_v30 }
  0xb2   : > { %v679_v12 = vadd.f32 %v663_v5, %v579_v6  ;;  %v767_v5 = vmul.f32 %v6197_v0, %v6134_v39  ;;  %v770_v39 = vmul.f32 %v6197_v0, %v6150_v46 }
  0xb3   : > { %v503_v16 = vpop.permute.xlu0 %502  ;;  %v821_v60 = vmax.f32 %v805_v40, 0.0 }
  0xb4   : > { %v779_v18 = vadd.f32 %v763_v11, %v679_v12  ;;  %v580_v19 = vmul.f32 %v6194_v63, %v503_v16  ;;  %v668_v12 = vmul.f32 %v6187_v59, %v6114_v26 }
  0xb6   : > { %v680_v23 = vadd.f32 %v664_v13, %v580_v19  ;;  %v613_v25 = vpop.permute.xlu1 %612  ;;  %v802_v33 = vadd.f32 %v6230_v28, %v779_v18  ;;  %v584_v13 = vmul.f32 %v6194_v63, %v523_v8 }
  0xb7   : > { %v508_v29 = vpop.permute.xlu0 %507  ;;  %v667_v50 = vmul.f32 %v6187_v59, %v613_v25 }
  0xb8   : > { %v780_v31 = vadd.f32 %v764_v15, %v680_v23  ;;  %v581_v32 = vmul.f32 %v6194_v63, %v508_v29  ;;  %v818_v43 = vmax.f32 %v802_v33, 0.0  ;;  %v684_v18 = vadd.f32 %v668_v12, %v584_v13 }
  0xba   : > { %v681_v24 = vadd.f32 %v665_v21, %v581_v32  ;;  %v803_v35 = vadd.f32 %v6230_v28, %v780_v31 }
  0xbb   : > { %v528_v36 = vpop.permute.xlu1 %527  ;;  %v518_v48 = vpop.permute.xlu0 %517 }
  0xbc   : > { %v781_v41 = vadd.f32 %v765_v34, %v681_v24  ;;  %v819_v47 = vmax.f32 %v803_v35, 0.0  ;;  %v583_v3 = vmul.f32 %v6194_v63, %v518_v48  ;;  %v585_v26 = vmul.f32 %v6194_v63, %v528_v36 }
  0xbe   : > { %v804_v52 = vadd.f32 %v6230_v28, %v781_v41  ;;  %v834_v57 = vpack.c.bf16 %v819_v47, %v818_v43  ;;  %v683_v6 = vadd.f32 %v667_v50, %v583_v3 }
  0xbf   : > { %v533_v58 = vpop.permute.xlu1 %532  ;;  %v543_v34 = vpop.permute.xlu0 %542 }
  0xc0   : > { %v820_v2 = vmax.f32 %v804_v52, 0.0  ;;  %5319 = vmatprep.mubr.msk.bf16.mxu0 %vm881_vm0, %v834_v57  ;;  %v586_v14 = vmul.f32 %v6194_v63, %v533_v58  ;;  %v783_v15 = vadd.f32 %v767_v5, %v683_v6 }
  0xc2   : > { %v835_v4 = vpack.c.bf16 %v821_v60, %v820_v2 }
  0xc3   : > { %v548_v35 = vpop.permute.xlu0 %547 }
  0xc4   : > { %5320 = vmatmul.mubr.msk.bf16.vlgmr.msra.gmra.mrb[0].mxu0 %vm881_vm0, %v835_v4  ;;  %v625_v10 = vpop.permute.xlu1 %624  ;;  %v589_v60 = vmul.f32 %v6194_v63, %v548_v35 }
  0xc5   : > { %v670_v11 = vmul.f32 %v6187_v59, %v625_v10  ;;  %1454 = vmatpush1.bf16.msra.mxu0 %v6130_v37  ;;  %v669_v37 = vmul.f32 %v6187_v59, %v6116_v27 }
  0xc6   : > { %1455 = vmatprep.subr.bf16.mxu0 %v6132_v38  ;;  %v806_v38 = vadd.f32 %v6230_v28, %v783_v15 }
  0xc7   : > { %v686_v16 = vadd.f32 %v670_v11, %v586_v14  ;;  %v685_v22 = vadd.f32 %v669_v37, %v585_v26  ;;  %v558_v41 = vpop.permute.xlu0 %557 }
  0xc8   : > { %v822_v27 = vmax.f32 %v806_v38, 0.0 }
  0xc9   : > { %v717_v17 = vpop.permute.xlu1 %716  ;;  %1456 = vmatpush1.bf16.msra.mxu0 %v6146_v44  ;;  %v786_v19 = vadd.f32 %v770_v39, %v686_v16 }
  0xca   : > { %v768_v8 = vmul.f32 %v6197_v0, %v717_v17  ;;  %1457 = vmatprep.subr.bf16.mxu0 %v6148_v45 }
  0xcb   : > { %v809_v25 = vadd.f32 %v6230_v28, %v786_v19 }
  0xcc   : > { %v784_v21 = vadd.f32 %v768_v8, %v684_v18  ;;  %v637_v48 = vpop.permute.xlu0 %636 }
  0xcd   : > { %v721_v46 = vpop.permute.xlu1 %720  ;;  %1458 = vmatpush1.bf16.msra.mxu0 %v6163_v51  ;;  %v825_v51 = vmax.f32 %v809_v25, 0.0  ;;  %v673_v2 = vmul.f32 %v6187_v59, %v637_v48 }
  0xce   : > { %v807_v44 = vadd.f32 %v6230_v28, %v784_v21  ;;  %v769_v23 = vmul.f32 %v6197_v0, %v721_v46  ;;  %1459 = vmatprep.subr.bf16.mxu0 %v6168_v53 }
  0xcf   : > { %v689_v6 = vadd.f32 %v673_v2, %v589_v60 }
  0xd0   : > { %v823_v29 = vmax.f32 %v807_v44, 0.0  ;;  %v785_v30 = vadd.f32 %v769_v23, %v685_v22  ;;  %v649_v22 = vpop.permute.xlu0 %648 }
  0xd1   : > { %1460 = vmatpush1.bf16.msra.mxu0 %v6189_v61 }
  0xd2   : > { %v836_v45 = vpack.c.bf16 %v823_v29, %v822_v27  ;;  %v808_v31 = vadd.f32 %v6230_v28, %v785_v30  ;;  %v538_v32 = vpop.permute.xlu1 %537  ;;  %1461 = vmatprep.subr.bf16.mxu0 %v6191_v62  ;;  %v588_v62 = vmul.f32 %v6194_v63, %v543_v34  ;;  %v676_v34 = vmul.f32 %v6187_v59, %v649_v22 }
  0xd3   : > { %v587_v52 = vmul.f32 %v6194_v63, %v538_v32 }
  0xd4   : > { %v824_v33 = vmax.f32 %v808_v31, 0.0  ;;  %5323 = vmatprep.mubr.msk.bf16.mxu0 %vm881_vm0, %v836_v45  ;;  %v653_v23 = vpop.permute.xlu0 %652  ;;  %v591_v45 = vmul.f32 %v6194_v63, %v558_v41 }
  0xd5   : > { %1462 = vmatpush1.bf16.msra.mxu0 %v6209_v7  ;;  %v772_v7 = vmul.f32 %v6197_v0, %v6176_v56  ;;  %v677_v41 = vmul.f32 %v6187_v59, %v653_v23 }
  0xd6   : > { %v837_v53 = vpack.c.bf16 %v825_v51, %v824_v33  ;;  %1463 = vmatprep.subr.bf16.mxu0 %v6211_v9 }
  0xd7   : > { %v629_v24 = vpop.permute.xlu1 %628 }
  0xd8   : > { %5324 = vmatmul.mubr.msk.bf16.gmra.mrb[4].mxu0 %vm881_vm0, %v837_v53  ;;  %v671_v9 = vmul.f32 %v6187_v59, %v629_v24 }
  0xd9   : > { %1464 = vmatpush1.bf16.msra.mxu0 %v6222_v20  ;;  %v745_v30 = vpop.permute.xlu0 %744 }
  0xda   : > { %v687_v58 = vadd.f32 %v671_v9, %v587_v52  ;;  %v775_v32 = vmul.f32 %v6197_v0, %v745_v30 }
  0xdb   : > { %v633_v61 = vpop.permute.xlu1 %632 }
  0xdc   : > { %v672_v40 = vmul.f32 %v6187_v59, %v633_v61 }
  0xdd   : > { %v757_v53 = vpop.permute.xlu0 %756 }
  0xde   : > { %v688_v43 = vadd.f32 %v672_v40, %v588_v62  ;;  %v778_v62 = vmul.f32 %v6197_v0, %v757_v53 }
  0xe0   : > { %v553_v36 = vpop.permute.xlu1 %552  ;;  %v788_v57 = vadd.f32 %v772_v7, %v688_v43 }
  0xe1   : > { %v590_v13 = vmul.f32 %v6194_v63, %v553_v36 }
  0xe2   : > { %v811_v50 = vadd.f32 %v6230_v28, %v788_v57 }
  0xe4   : > { %v827_v12 = vmax.f32 %v811_v50, 0.0 }
  0xe5   : > { %v641_v47 = vpop.permute.xlu1 %640 }
  0xe6   : > { %v674_v56 = vmul.f32 %v6187_v59, %v641_v47 }
  0xe8   : > { %v690_v16 = vadd.f32 %v674_v56, %v590_v13  ;;  %v1087_v13 = vld [vmem:[%s7814_s5 + $0x1e0] sm:$0xff] }
  0xea   : > { %v729_v20 = vpop.permute.xlu1 %728 }
  0xeb   : > { %v771_v3 = vmul.f32 %v6197_v0, %v729_v20 }
  0xed   : > { %v787_v4 = vadd.f32 %v771_v3, %v687_v58 }
  0xee   : > { %v737_v5 = vpop.permute.xlu1 %736 }
  0xef   : > { %v810_v10 = vadd.f32 %v6230_v28, %v787_v4  ;;  %v773_v11 = vmul.f32 %v6197_v0, %v737_v5 }
  0xf1   : > { %v826_v14 = vmax.f32 %v810_v10, 0.0  ;;  %v789_v39 = vadd.f32 %v773_v11, %v689_v6 }
  0xf2   : > { %v741_v15 = vpop.permute.xlu1 %740 }
  0xf3   : > { %v838_v17 = vpack.c.bf16 %v827_v12, %v826_v14  ;;  %v774_v37 = vmul.f32 %v6197_v0, %v741_v15  ;;  %v812_v18 = vadd.f32 %v6230_v28, %v789_v39  ;;  %v1083_v12 = vld [vmem:[%s7814_s5 + $0x1c0] sm:$0xff]  ;;  %v1028_v15 = vld [vmem:[%s7814_s5 + $0x8] sm:$0xff] }
  0xf4   : > { %v4930_v14 = vcombine.high %v1083_v12, %v1087_v13 }
  0xf5   : > { %v790_v26 = vadd.f32 %v774_v37, %v690_v16  ;;  %5327 = vmatprep.mubr.msk.bf16.mxu0 %vm881_vm0, %v838_v17  ;;  %v828_v19 = vmax.f32 %v812_v18, 0.0  ;;  %v1032_v16 = vld [vmem:[%s7814_s5 + $0x28] sm:$0xff]  ;;  %v6332_v18 = vld [vmem:[%s7814_s5 + $0x10] sm:$0xff] }
  0xf6   : > { %v4875_v17 = vcombine.low %v1028_v15, %v1032_v16  ;;  %v4876_v37 = vcombine.high %v1028_v15, %v1032_v16  ;;  %v1084_v16 = vld [vmem:[%s7814_s5 + $0x1c8] sm:$0xff] }
  0xf7   : > { %v813_v8 = vadd.f32 %v6230_v28, %v790_v26  ;;  %v563_v38 = vpop.permute.xlu1 %562  ;;  %v6337_v26 = vld [vmem:[%s7814_s5 + $0x30] sm:$0xff] }
  0xf8   : > { %v592_v24 = vmul.f32 %v6194_v63, %v563_v38  ;;  %v4878_v38 = vcombine.high %v6332_v18, %v6337_v26 }
  0xf9   : > { %v829_v21 = vmax.f32 %v813_v8, 0.0  ;;  %v4877_v8 = vcombine.low %v6332_v18, %v6337_v26 }
  0xfa   : > { %v692_v43 = vadd.f32 %v676_v34, %v592_v24 }
  0xfb   : > { %v839_v46 = vpack.c.bf16 %v829_v21, %v828_v19  ;;  %v6346_v19 = vld [vmem:[%s7813_s4] ss:$0 sm:$0xff] }
  0xfc   : > { %v645_v44 = vpop.permute.xlu1 %644 }
  0xfd   : > { %5328 = vmatmul.mubr.msk.bf16.gmra.mrb[8].mxu0 %vm881_vm0, %v839_v46  ;;  %v675_v29 = vmul.f32 %v6187_v59, %v645_v44 }
  0xff   : > { %v691_v31 = vadd.f32 %v675_v29, %v591_v45 }
 0x101   : > { %v568_v27 = vpop.permute.xlu1 %567  ;;  %v791_v35 = vadd.f32 %v775_v32, %v691_v31  ;;  %v1036_v31 = vld [vmem:[%s7814_s5 + $0x48] sm:$0xff] }
 0x102   : > { %v593_v47 = vmul.f32 %v6194_v63, %v568_v27  ;;  %v1040_v32 = vld [vmem:[%s7814_s5 + $0x68] sm:$0xff] }
 0x103   : > { %v814_v9 = vadd.f32 %v6230_v28, %v791_v35  ;;  %v4884_v24 = vcombine.high %v1036_v31, %v1040_v32  ;;  %v1048_v35 = vld [vmem:[%s7814_s5 + $0xa8] sm:$0xff] }
 0x104   : > { %v693_v20 = vadd.f32 %v677_v41, %v593_v47 }
 0x105   : > { %v573_v25 = vpop.permute.xlu1 %572  ;;  %v830_v2 = vmax.f32 %v814_v9, 0.0  ;;  %v1064_v9 = vld [vmem:[%s7814_s5 + $0x128] sm:$0xff] }
 0x106   : > { %v594_v61 = vmul.f32 %v6194_v63, %v573_v25  ;;  %v1079_v63 = vld [vmem:[%s7814_s5 + $0x1a0] sm:$0xff] }
 0x10a   : > { %v657_v51 = vpop.permute.xlu1 %656 }
 0x10b   : > { %v678_v33 = vmul.f32 %v6187_v59, %v657_v51  ;;  %v1075_v59 = vld [vmem:[%s7814_s5 + $0x180] sm:$0xff] }
 0x10c   : > { %v4922_v5 = vcombine.high %v1075_v59, %v1079_v63  ;;  %v4921_v10 = vcombine.low %v1075_v59, %v1079_v63 }
 0x10d   : > { %v694_v36 = vadd.f32 %v678_v33, %v594_v61  ;;  %v1044_v61 = vld [vmem:[%s7814_s5 + $0x88] sm:$0xff] }
 0x10e   : > { %1465 = vmatprep.subr.bf16.mxu0 %v4922_v5  ;;  %5341 = vmatprep.subr.bf16.mxu1 %v4922_v5  ;;  %v4891_v41 = vcombine.low %v1044_v61, %v1048_v35 }
 0x10f   : > { %v749_v40 = vpop.permute.xlu1 %748  ;;  %v794_v48 = vadd.f32 %v778_v62, %v694_v36  ;;  %1466 = vmatpush1.bf16.msra.mxu0 %v4921_v10  ;;  %5349 = vmatpush1.bf16.msra.mxu1 %v4921_v10  ;;  %v4883_v36 = vcombine.low %v1036_v31, %v1040_v32  ;;  %v4892_v62 = vcombine.high %v1044_v61, %v1048_v35  ;;  %v1062_v35 = vld [vmem:[%s7814_s5 + $0x118] sm:$0xff] }
 0x110   : > { %v776_v7 = vmul.f32 %v6197_v0, %v749_v40  ;;  %1467 = vmatprep.subr.bf16.mxu0 %v4930_v14  ;;  %5342 = vmatprep.subr.bf16.mxu1 %v4930_v14  ;;  %v1052_v40 = vld [vmem:[%s7814_s5 + $0xc8] sm:$0xff] }
 0x111   : > { %v817_v3 = vadd.f32 %v6230_v28, %v794_v48 }
 0x112   : > { %v792_v52 = vadd.f32 %v776_v7, %v692_v43  ;;  %v1056_v43 = vld [vmem:[%s7814_s5 + $0xe8] sm:$0xff] }
 0x113   : > { %v753_v57 = vpop.permute.xlu1 %752  ;;  %v4900_v47 = vcombine.high %v1052_v40, %v1056_v43  ;;  %v1060_v7 = vld [vmem:[%s7814_s5 + $0x108] sm:$0xff]  ;;  %v4899_v48 = vcombine.low %v1052_v40, %v1056_v43 }
 0x114   : > { %v815_v58 = vadd.f32 %v6230_v28, %v792_v52  ;;  %v777_v60 = vmul.f32 %v6197_v0, %v753_v57  ;;  %v833_v0 = vmax.f32 %v817_v3, 0.0  ;;  %v4908_v57 = vcombine.high %v1060_v7, %v1064_v9 }
 0x115   : > { %v4907_v63 = vcombine.low %v1060_v7, %v1064_v9 }
 0x116   : > { %v831_v50 = vmax.f32 %v815_v58, 0.0  ;;  %v793_v4 = vadd.f32 %v777_v60, %v693_v20  ;;  %v1068_v60 = vld [vmem:[%s7814_s5 + $0x148] sm:$0xff] }
 0x118   : > { %v840_v6 = vpack.c.bf16 %v831_v50, %v830_v2  ;;  %v816_v56 = vadd.f32 %v6230_v28, %v793_v4  ;;  %v4929_v28 = vcombine.low %v1083_v12, %v1087_v13  ;;  %v1072_v2 = vld [vmem:[%s7814_s5 + $0x168] sm:$0xff] }
 0x11a   : > { %v832_v11 = vmax.f32 %v816_v56, 0.0  ;;  %5331 = vmatprep.mubr.msk.bf16.mxu0 %vm881_vm0, %v840_v6  ;;  %1468 = vmatpush1.bf16.msra.mxu0 %v4929_v28  ;;  %v4916_v6 = vcombine.high %v1068_v60, %v1072_v2 }
 0x11b   : > { %5350 = vmatpush1.bf16.msra.mxu1 %v4929_v28  ;;  %1566 = vmatprep.subr.bf16.mxu0 %v4876_v37 }
 0x11c   : > { %v841_v39 = vpack.c.bf16 %v833_v0, %v832_v11  ;;  %1679 = vmatprep.subr.bf16.mxu1 %v4878_v38  ;;  %v1076_v0 = vld [vmem:[%s7814_s5 + $0x188] sm:$0xff] }
 0x11d   : > { %v1080_v11 = vld [vmem:[%s7814_s5 + $0x1a8] sm:$0xff] }
 0x11e   : > { %5332 = vmatmul.mubr.msk.bf16.gmra.mrb[12].mxu0 %vm881_vm0, %v841_v39  ;;  %v4915_v39 = vcombine.low %v1068_v60, %v1072_v2  ;;  %v4924_v15 = vcombine.high %v1076_v0, %v1080_v11  ;;  %v4923_v37 = vcombine.low %v1076_v0, %v1080_v11 }
 0x11f   : > { %1485 = vmatprep.mubr.bf16.mxu0 %v5961_v1 }
 0x197   : > { %v5321_v21 = vpop.f32.mrb[0].mxu0 }
 0x198   : > { %v949_v46 = vadd.f32 %v5321_v21, %v6346_v19  ;;  %v940_v22 = vpop.f32.mrb[1].mxu0  ;;  %v1030_v21 = vld [vmem:[%s7814_s5 + $0x18] sm:$0xff] }
 0x199   : > { %v941_v44 = vadd.f32 %v6346_v19, %v940_v22  ;;  %v5322_v23 = vpop.f32.mrb[2].mxu0 }
 0x19a   : > { %v952_v27 = vadd.f32 %v5322_v23, %v6346_v19  ;;  %v943_v25 = vpop.f32.mrb[3].mxu0  ;;  %v1005_v30 = vmax.f32 %v949_v46, 0.0  ;;  %v1034_v46 = vld [vmem:[%s7814_s5 + $0x38] sm:$0xff] }
 0x19b   : > { %v944_v29 = vadd.f32 %v6346_v19, %v943_v25  ;;  %v1003_v51 = vmax.f32 %v941_v44, 0.0  ;;  %v4880_v44 = vcombine.high %v1030_v21, %v1034_v46  ;;  %v1038_v23 = vld [vmem:[%s7814_s5 + $0x58] sm:$0xff]  ;;  %v4879_v25 = vcombine.low %v1030_v21, %v1034_v46 }
 0x19c   : > { %v1006_v45 = vmax.f32 %v952_v27, 0.0  ;;  %v1042_v27 = vld [vmem:[%s7814_s5 + $0x78] sm:$0xff] }
 0x19d   : > { %v1004_v33 = vmax.f32 %v944_v29, 0.0  ;;  %v4888_v29 = vcombine.high %v1038_v23, %v1042_v27  ;;  %v4887_v31 = vcombine.low %v1038_v23, %v1042_v27  ;;  %v1061_v23 = vld [vmem:[%s7814_s5 + $0x110] sm:$0xff] }
 0x19e   : > { %v6358_v53 = vpack.c.bf16 %v1006_v45, %v1005_v30  ;;  %v1046_v30 = vld [vmem:[%s7814_s5 + $0x98] sm:$0xff]  ;;  %v1065_v27 = vld [vmem:[%s7814_s5 + $0x130] sm:$0xff] }
 0x19f   : > { %v6360_v34 = vpack.c.bf16 %v1004_v33, %v1003_v51  ;;  %v1050_v45 = vld [vmem:[%s7814_s5 + $0xb8] sm:$0xff] }
 0x1a0   : > { %v4896_v32 = vcombine.high %v1046_v30, %v1050_v45  ;;  %v1054_v51 = vld [vmem:[%s7814_s5 + $0xd8] sm:$0xff] }
 0x1a1   : > { %1486 = vmatmul.mubr.bf16.vlgmr.msra.gmra.mrb[16].mxu0 %v6360_v34  ;;  %v1058_v33 = vld [vmem:[%s7814_s5 + $0xf8] sm:$0xff] }
 0x1a2   : > { %1567 = vmatpush1.bf16.msra.mxu0 %v4875_v17  ;;  %1495 = vmatprep.mubr.bf16.mxu0 %v5961_v1  ;;  %v1088_v17 = vld [vmem:[%s7814_s5 + $0x1e8] sm:$0xff]  ;;  %v4904_v61 = vcombine.high %v1054_v51, %v1058_v33 }
 0x1a3   : > { %1568 = vmatprep.subr.bf16.mxu0 %v4884_v24  ;;  %v4932_v38 = vcombine.high %v1084_v16, %v1088_v17  ;;  %v4931_v22 = vcombine.low %v1084_v16, %v1088_v17  ;;  %v4895_v24 = vcombine.low %v1046_v30, %v1050_v45  ;;  %v1045_v16 = vld [vmem:[%s7814_s5 + $0x90] sm:$0xff] }
 0x1a4   : > { %v1049_v17 = vld [vmem:[%s7814_s5 + $0xb0] sm:$0xff] }
 0x1a5   : > { %v4894_v46 = vcombine.high %v1045_v16, %v1049_v17  ;;  %v4893_v26 = vcombine.low %v1045_v16, %v1049_v17  ;;  %v1069_v30 = vld [vmem:[%s7814_s5 + $0x150] sm:$0xff]  ;;  %v5469_v16 = vld [vmem:[%s7816_s7 + $0x8c] ss:$16 sps:$4 sm:$0xff]  }
 0x1a6   : > { %1569 = vmatpush1.bf16.msra.mxu0 %v4883_v36  ;;  %v1066_v36 = vld [vmem:[%s7814_s5 + $0x138] sm:$0xff]  ;;  %v1073_v45 = vld [vmem:[%s7814_s5 + $0x170] sm:$0xff] }
 0x1a7   : > { %1570 = vmatprep.subr.bf16.mxu0 %v4892_v62  ;;  %v4903_v62 = vcombine.low %v1054_v51, %v1058_v33  ;;  %v4912_v40 = vcombine.high %v1062_v35, %v1066_v36  ;;  %v1077_v51 = vld [vmem:[%s7814_s5 + $0x190] sm:$0xff] }
 0x1a8   : > { %v1081_v33 = vld [vmem:[%s7814_s5 + $0x1b0] sm:$0xff] }
 0x1a9   : > { %1496 = vmatmul.mubr.bf16.gmra.mrb[20].mxu0 %v6358_v53  ;;  %v5464_v17 = vld [vmem:[%s7816_s7 + $0x80] ss:$16 sps:$4 sm:$0xff]  }
 0x1aa   : > { %1571 = vmatpush1.bf16.msra.mxu0 %v4891_v41  ;;  %1505 = vmatprep.mubr.bf16.mxu0 %v5961_v1  ;;  %v1070_v41 = vld [vmem:[%s7814_s5 + $0x158] sm:$0xff] }
 0x1ab   : > { %v5325_v52 = vpop.f32.mrb[4].mxu0  ;;  %1572 = vmatprep.subr.bf16.mxu0 %v4900_v47  ;;  %v1074_v47 = vld [vmem:[%s7814_s5 + $0x178] sm:$0xff] }
 0x1ac   : > { %v965_v20 = vadd.f32 %v5325_v52, %v6346_v19  ;;  %v956_v58 = vpop.f32.mrb[5].mxu0  ;;  %v4920_v60 = vcombine.high %v1070_v41, %v1074_v47 }
 0x1ad   : > { %v957_v3 = vadd.f32 %v6346_v19, %v956_v58  ;;  %v5326_v50 = vpop.f32.mrb[6].mxu0 }
 0x1ae   : > { %v968_v4 = vadd.f32 %v5326_v50, %v6346_v19  ;;  %v959_v59 = vpop.f32.mrb[7].mxu0  ;;  %1573 = vmatpush1.bf16.msra.mxu0 %v4899_v48  ;;  %v1009_v56 = vmax.f32 %v965_v20, 0.0 }
 0x1af   : > { %v960_v5 = vadd.f32 %v6346_v19, %v959_v59  ;;  %1574 = vmatprep.subr.bf16.mxu0 %v4908_v57  ;;  %v1007_v12 = vmax.f32 %v957_v3, 0.0  ;;  %v4911_v57 = vcombine.low %v1062_v35, %v1066_v36  ;;  %v1037_v3 = vld [vmem:[%s7814_s5 + $0x50] sm:$0xff] }
 0x1b0   : > { %v1010_v10 = vmax.f32 %v968_v4, 0.0  ;;  %v1041_v59 = vld [vmem:[%s7814_s5 + $0x70] sm:$0xff] }
 0x1b1   : > { %v1008_v13 = vmax.f32 %v960_v5, 0.0  ;;  %v1082_v5 = vld [vmem:[%s7814_s5 + $0x1b8] sm:$0xff]  ;;  %v1085_v35 = vld [vmem:[%s7814_s5 + $0x1d0] sm:$0xff] }
 0x1b2   : > { %v6400_v14 = vpack.c.bf16 %v1010_v10, %v1009_v56  ;;  %1575 = vmatpush1.bf16.msra.mxu0 %v4907_v63  ;;  %v1078_v63 = vld [vmem:[%s7814_s5 + $0x198] sm:$0xff]  ;;  %v4919_v10 = vcombine.low %v1070_v41, %v1074_v47  ;;  %v1089_v36 = vld [vmem:[%s7814_s5 + $0x1f0] sm:$0xff] }
 0x1b3   : > { %v6402_v28 = vpack.c.bf16 %v1008_v13, %v1007_v12  ;;  %1576 = vmatprep.subr.bf16.mxu0 %v4916_v6  ;;  %v4886_v12 = vcombine.high %v1037_v3, %v1041_v59  ;;  %v4928_v13 = vcombine.high %v1078_v63, %v1082_v5 }
 0x1b5   : > { %1506 = vmatmul.mubr.bf16.gmra.mrb[24].mxu0 %v6402_v28 }
 0x1b6   : > { %1577 = vmatpush1.bf16.msra.mxu0 %v4915_v39  ;;  %1515 = vmatprep.mubr.bf16.mxu0 %v5961_v1  ;;  %v1086_v39 = vld [vmem:[%s7814_s5 + $0x1d8] sm:$0xff] }
 0x1b7   : > { %1578 = vmatprep.subr.bf16.mxu0 %v4924_v15  ;;  %v1090_v15 = vld [vmem:[%s7814_s5 + $0x1f8] sm:$0xff] }
 0x1b8   : > { %v4936_v21 = vcombine.high %v1086_v39, %v1090_v15  ;;  %v4935_v18 = vcombine.low %v1086_v39, %v1090_v15  ;;  %v5461_v39 = vld [vmem:[%s7816_s7 + $0x68] ss:$16 sps:$4 sm:$0xff]   ;;  %v5466_v15 = vld [vmem:[%s7816_s7 + $0x84] ss:$16 sps:$4 sm:$0xff]  }
 0x1ba   : > { %1579 = vmatpush1.bf16.msra.mxu0 %v4923_v37  ;;  %v4927_v37 = vcombine.low %v1078_v63, %v1082_v5  ;;  %v5446_v63 = vld [vmem:[%s7816_s7 + $0x20] ss:$16 sps:$4 sm:$0xff]   ;;  %v5449_v5 = vld [vmem:[%s7816_s7 + $0x28] ss:$16 sps:$4 sm:$0xff]  }
 0x1bb   : > { %1580 = vmatprep.subr.bf16.mxu0 %v4932_v38  ;;  %v4885_v38 = vcombine.low %v1037_v3, %v1041_v59  ;;  %v5451_v59 = vld [vmem:[%s7816_s7 + $0x2c] ss:$16 sps:$4 sm:$0xff]  }
 0x1bd   : > { %1516 = vmatmul.mubr.bf16.gmra.mrb[28].mxu0 %v6400_v14 }
 0x1be   : > { %1581 = vmatpush1.bf16.msra.mxu0 %v4931_v22  ;;  %1598 = vmatprep.mubr.bf16.mxu0 %v5961_v1  ;;  %v1053_v22 = vld [vmem:[%s7814_s5 + $0xd0] sm:$0xff] }
 0x1bf   : > { %1792 = vmatprep.subr.bf16.mxu0 %v4880_v44  ;;  %v1057_v44 = vld [vmem:[%s7814_s5 + $0xf0] sm:$0xff] }
 0x1c5   : > { %1599 = vmatmul.mubr.bf16.vlgmr.msra.gmra.mrb[32].mxu0 %v6360_v34 }
 0x1c6   : > { %1608 = vmatprep.mubr.bf16.mxu0 %v5961_v1  ;;  %1793 = vmatpush1.bf16.msra.mxu0 %v4879_v25  ;;  %v4901_v25 = vcombine.low %v1053_v22, %v1057_v44 }
 0x1c7   : > { %1794 = vmatprep.subr.bf16.mxu0 %v4888_v29  ;;  %v4910_v29 = vcombine.high %v1061_v23, %v1065_v27 }
 0x1ca   : > { %1795 = vmatpush1.bf16.msra.mxu0 %v4887_v31  ;;  %v4909_v31 = vcombine.low %v1061_v23, %v1065_v27  ;;  %v5482_v23 = vld [vmem:[%s7816_s7 + $0xe0] ss:$16 sps:$4 sm:$0xff]   ;;  %v5485_v27 = vld [vmem:[%s7816_s7 + $0xe8] ss:$16 sps:$4 sm:$0xff]  }
 0x1cb   : > { %1796 = vmatprep.subr.bf16.mxu0 %v4896_v32  ;;  %v4918_v32 = vcombine.high %v1069_v30, %v1073_v45 }
 0x1cd   : > { %1609 = vmatmul.mubr.bf16.gmra.mrb[36].mxu0 %v6358_v53 }
 0x1ce   : > { %1618 = vmatprep.mubr.bf16.mxu0 %v5961_v1  ;;  %1797 = vmatpush1.bf16.msra.mxu0 %v4895_v24  ;;  %v4917_v24 = vcombine.low %v1069_v30, %v1073_v45  ;;  %v5493_v30 = vld [vmem:[%s7816_s7 + $0x10c] ss:$16 sps:$4 sm:$0xff]   ;;  %v5488_v45 = vld [vmem:[%s7816_s7 + $0x100] ss:$16 sps:$4 sm:$0xff]  }
 0x1cf   : > { %1798 = vmatprep.subr.bf16.mxu0 %v4904_v61  ;;  %v4926_v61 = vcombine.high %v1077_v51, %v1081_v33 }
 0x1d0   : > { %v5329_v43 = vpop.f32.mrb[8].mxu0 }
 0x1d1   : > { %v981_v7 = vadd.f32 %v5329_v43, %v6346_v19  ;;  %v972_v9 = vpop.f32.mrb[9].mxu0 }
 0x1d2   : > { %v973_v48 = vadd.f32 %v6346_v19, %v972_v9  ;;  %v5330_v52 = vpop.f32.mrb[10].mxu0  ;;  %1799 = vmatpush1.bf16.msra.mxu0 %v4903_v62  ;;  %v4925_v62 = vcombine.low %v1077_v51, %v1081_v33  ;;  %v5499_v51 = vld [vmem:[%s7816_s7 + $0x12c] ss:$16 sps:$4 sm:$0xff]   ;;  %v5494_v33 = vld [vmem:[%s7816_s7 + $0x120] ss:$16 sps:$4 sm:$0xff]  }
 0x1d3   : > { %v984_v20 = vadd.f32 %v5330_v52, %v6346_v19  ;;  %v975_v58 = vpop.f32.mrb[11].mxu0  ;;  %1800 = vmatprep.subr.bf16.mxu0 %v4912_v40  ;;  %v1013_v50 = vmax.f32 %v981_v7, 0.0  ;;  %v4934_v40 = vcombine.high %v1085_v35, %v1089_v36 }
 0x1d4   : > { %v976_v2 = vadd.f32 %v6346_v19, %v975_v58  ;;  %v1011_v6 = vmax.f32 %v973_v48, 0.0  ;;  %v4933_v48 = vcombine.low %v1085_v35, %v1089_v36  ;;  %v5505_v35 = vld [vmem:[%s7816_s7 + $0x14c] ss:$16 sps:$4 sm:$0xff]   ;;  %v5500_v36 = vld [vmem:[%s7816_s7 + $0x140] ss:$16 sps:$4 sm:$0xff]  }
 0x1d5   : > { %v1014_v4 = vmax.f32 %v984_v20, 0.0  ;;  %1619 = vmatmul.mubr.bf16.gmra.mrb[40].mxu0 %v6402_v28 }
 0x1d6   : > { %v1012_v56 = vmax.f32 %v976_v2, 0.0  ;;  %1628 = vmatprep.mubr.bf16.mxu0 %v5961_v1  ;;  %1801 = vmatpush1.bf16.msra.mxu0 %v4911_v57 }
 0x1d7   : > { %v6472_v0 = vpack.c.bf16 %v1014_v4, %v1013_v50  ;;  %1802 = vmatprep.subr.bf16.mxu0 %v4920_v60 }
 0x1d8   : > { %v6474_v11 = vpack.c.bf16 %v1012_v56, %v1011_v6  ;;  %v5454_v6 = vld [vmem:[%s7816_s7 + $0x44] ss:$16 sps:$4 sm:$0xff]   ;;  %v5457_v56 = vld [vmem:[%s7816_s7 + $0x4c] ss:$16 sps:$4 sm:$0xff]  }
 0x1da   : > { %1526 = vmatmul.mubr.bf16.vlgmr.msra.gmra.mrb[0].mxu1 %v6474_v11  ;;  %1803 = vmatpush1.bf16.msra.mxu0 %v4919_v10  ;;  %v5452_v10 = vld [vmem:[%s7816_s7 + $0x40] ss:$16 sps:$4 sm:$0xff]  }
 0x1db   : > { %1535 = vmatprep.mubr.bf16.mxu1 %v5961_v1  ;;  %1680 = vmatpush1.bf16.msra.mxu1 %v4877_v8  ;;  %v4902_v8 = vcombine.high %v1053_v22, %v1057_v44  ;;  %v5478_v22 = vld [vmem:[%s7816_s7 + $0xc4] ss:$16 sps:$4 sm:$0xff]   ;;  %v5481_v44 = vld [vmem:[%s7816_s7 + $0xcc] ss:$16 sps:$4 sm:$0xff]  }
 0x1dc   : > { %1681 = vmatprep.subr.bf16.mxu1 %v4886_v12  ;;  %1804 = vmatprep.subr.bf16.mxu0 %v4928_v13  ;;  %v5463_v12 = vld [vmem:[%s7816_s7 + $0x6c] ss:$16 sps:$4 sm:$0xff]   ;;  %v5458_v13 = vld [vmem:[%s7816_s7 + $0x60] ss:$16 sps:$4 sm:$0xff]  }
 0x1dd   : > { %1629 = vmatmul.mubr.bf16.gmra.mrb[44].mxu0 %v6400_v14 }
 0x1de   : > { %1638 = vmatprep.mubr.bf16.mxu0 %v5961_v1  ;;  %1805 = vmatpush1.bf16.msra.mxu0 %v4927_v37  ;;  %v5467_v37 = vld [vmem:[%s7816_s7 + $0x88] ss:$16 sps:$4 sm:$0xff]  }
 0x1df   : > { %1682 = vmatpush1.bf16.msra.mxu1 %v4885_v38  ;;  %1806 = vmatprep.subr.bf16.mxu0 %v4936_v21  ;;  %v5475_v38 = vld [vmem:[%s7816_s7 + $0xac] ss:$16 sps:$4 sm:$0xff]   ;;  %v5470_v21 = vld [vmem:[%s7816_s7 + $0xa0] ss:$16 sps:$4 sm:$0xff]  }
 0x1e0   : > { %1683 = vmatprep.subr.bf16.mxu1 %v4894_v46  ;;  %v5473_v46 = vld [vmem:[%s7816_s7 + $0xa8] ss:$16 sps:$4 sm:$0xff]  }
 0x1e2   : > { %1536 = vmatmul.mubr.bf16.gmra.mrb[4].mxu1 %v6472_v0  ;;  %1807 = vmatpush1.bf16.msra.mxu0 %v4935_v18  ;;  %v5476_v18 = vld [vmem:[%s7816_s7 + $0xc0] ss:$16 sps:$4 sm:$0xff]  }
 0x1e3   : > { %1684 = vmatpush1.bf16.msra.mxu1 %v4893_v26  ;;  %1545 = vmatprep.mubr.bf16.mxu1 %v5961_v1  ;;  %v5479_v26 = vld [vmem:[%s7816_s7 + $0xc8] ss:$16 sps:$4 sm:$0xff]  }
 0x1e4   : > { %1685 = vmatprep.subr.bf16.mxu1 %v4902_v8  ;;  %v5484_v8 = vld [vmem:[%s7816_s7 + $0xe4] ss:$16 sps:$4 sm:$0xff]  }
 0x1e5   : > { %1639 = vmatmul.mubr.bf16.gmra.mrb[48].mxu0 %v6474_v11 }
 0x1e6   : > { %1648 = vmatprep.mubr.bf16.mxu0 %v5961_v1 }
 0x1e7   : > { %1686 = vmatpush1.bf16.msra.mxu1 %v4901_v25  ;;  %v5487_v25 = vld [vmem:[%s7816_s7 + $0xec] ss:$16 sps:$4 sm:$0xff]  }
 0x1e8   : > { %1687 = vmatprep.subr.bf16.mxu1 %v4910_v29  ;;  %v5490_v29 = vld [vmem:[%s7816_s7 + $0x104] ss:$16 sps:$4 sm:$0xff]  }
 0x1eb   : > { %1688 = vmatpush1.bf16.msra.mxu1 %v4909_v31  ;;  %v5491_v31 = vld [vmem:[%s7816_s7 + $0x108] ss:$16 sps:$4 sm:$0xff]  }
 0x1ec   : > { %1689 = vmatprep.subr.bf16.mxu1 %v4918_v32  ;;  %v5496_v32 = vld [vmem:[%s7816_s7 + $0x124] ss:$16 sps:$4 sm:$0xff]  }
 0x1ed   : > { %1649 = vmatmul.mubr.bf16.gmra.mrb[52].mxu0 %v6472_v0 }
 0x1ee   : > { %1658 = vmatprep.mubr.bf16.mxu0 %v5961_v1 }
 0x1ef   : > { %1690 = vmatpush1.bf16.msra.mxu1 %v4917_v24  ;;  %v5497_v24 = vld [vmem:[%s7816_s7 + $0x128] ss:$16 sps:$4 sm:$0xff]  }
 0x1f0   : > { %1691 = vmatprep.subr.bf16.mxu1 %v4926_v61  ;;  %v5502_v61 = vld [vmem:[%s7816_s7 + $0x144] ss:$16 sps:$4 sm:$0xff]  }
 0x1f1   : > { %v5333_v43 = vpop.f32.mrb[12].mxu0 }
 0x1f2   : > { %v997_v41 = vadd.f32 %v5333_v43, %v6346_v19  ;;  %v988_v47 = vpop.f32.mrb[13].mxu0  ;;  %v5511_v43 = vld [vmem:[%s7816_s7 + $0x16c] ss:$16 sps:$4 sm:$0xff]  }
 0x1f3   : > { %v989_v7 = vadd.f32 %v6346_v19, %v988_v47  ;;  %v5334_v9 = vpop.f32.mrb[14].mxu0  ;;  %1692 = vmatpush1.bf16.msra.mxu1 %v4925_v62  ;;  %v5503_v62 = vld [vmem:[%s7816_s7 + $0x148] ss:$16 sps:$4 sm:$0xff]  }
 0x1f4   : > { %v1000_v52 = vadd.f32 %v5334_v9, %v6346_v19  ;;  %v991_v57 = vpop.f32.mrb[15].mxu0  ;;  %1693 = vmatprep.subr.bf16.mxu1 %v4934_v40  ;;  %v1017_v58 = vmax.f32 %v997_v41, 0.0  ;;  %v5508_v40 = vld [vmem:[%s7816_s7 + $0x164] ss:$16 sps:$4 sm:$0xff]   ;;  %v5506_v41 = vld [vmem:[%s7816_s7 + $0x160] ss:$16 sps:$4 sm:$0xff]  }
 0x1f5   : > { %v992_v20 = vadd.f32 %v6346_v19, %v991_v57  ;;  %v1015_v2 = vmax.f32 %v989_v7, 0.0  ;;  %v5442_v19 = vld [vmem:[%s7816_s7 + $0x4] ss:$16 sps:$4 sm:$0xff]   ;;  %v5509_v47 = vld [vmem:[%s7816_s7 + $0x168] ss:$16 sps:$4 sm:$0xff]  }
 0x1f6   : > { %v1018_v60 = vmax.f32 %v1000_v52, 0.0  ;;  %v5514_v7 = vld [vmem:[%s7816_s7 + $0x184] ss:$16 sps:$4 sm:$0xff]   ;;  %v5517_v9 = vld [vmem:[%s7816_s7 + $0x18c] ss:$16 sps:$4 sm:$0xff]  }
 0x1f7   : > { %v1016_v3 = vmax.f32 %v992_v20, 0.0  ;;  %1694 = vmatpush1.bf16.msra.mxu1 %v4933_v48  ;;  %v5512_v48 = vld [vmem:[%s7816_s7 + $0x180] ss:$16 sps:$4 sm:$0xff]   ;;  %v5515_v52 = vld [vmem:[%s7816_s7 + $0x188] ss:$16 sps:$4 sm:$0xff]  }
 0x1f8   : > { %v6535_v50 = vpack.c.bf16 %v1018_v60, %v1017_v58  ;;  %3802 = vmatprep.subr.bf16.mxu1 %v5442_v19  ;;  %v5520_v57 = vld [vmem:[%s7816_s7 + $0x1a4] ss:$16 sps:$4 sm:$0xff]   ;;  %v5523_v20 = vld [vmem:[%s7816_s7 + $0x1ac] ss:$16 sps:$4 sm:$0xff]   ;;  %v5518_v58 = vld [vmem:[%s7816_s7 + $0x1a0] ss:$16 sps:$4 sm:$0xff]  }
 0x1f9   : > { %v6537_v4 = vpack.c.bf16 %v1016_v3, %v1015_v2  ;;  %v5521_v60 = vld [vmem:[%s7816_s7 + $0x1a8] ss:$16 sps:$4 sm:$0xff]   ;;  %v5526_v2 = vld [vmem:[%s7816_s7 + $0x1c4] ss:$16 sps:$4 sm:$0xff]   ;;  %v5529_v3 = vld [vmem:[%s7816_s7 + $0x1cc] ss:$16 sps:$4 sm:$0xff]  }
 0x1fa   : > { %v5532_v19 = vld [vmem:[%s7816_s7 + $0x1e4] ss:$16 sps:$4 sm:$0xff]  }
 0x1fb   : > { %1546 = vmatmul.mubr.bf16.gmra.mrb[8].mxu1 %v6537_v4  ;;  %1659 = vmatmul.mubr.bf16.gmra.mrb[56].mxu0 %v6537_v4 }
 0x1fc   : > { %1555 = vmatprep.mubr.bf16.mxu1 %v5961_v1  ;;  %1668 = vmatprep.mubr.bf16.mxu0 %v5961_v1 }
 0x203   : > { %1556 = vmatmul.mubr.bf16.gmra.mrb[12].mxu1 %v6535_v50  ;;  %1669 = vmatmul.mubr.bf16.gmra.mrb[60].mxu0 %v6535_v50 }
 0x204   : > { %1711 = vmatprep.mubr.bf16.mxu1 %v5961_v1  ;;  %1824 = vmatprep.mubr.bf16.mxu0 %v5961_v1 }
 0x20b   : > { %1712 = vmatmul.mubr.bf16.vlgmr.msra.gmra.mrb[16].mxu1 %v6360_v34  ;;  %1825 = vmatmul.mubr.bf16.vlgmr.msra.gmra.mrb[64].mxu0 %v6360_v34  ;;  %v5440_v34 = vld [vmem:[%s7816_s7] ss:$16 sps:$4 sm:$0xff]  }
 0x20c   : > { %1721 = vmatprep.mubr.bf16.mxu1 %v5961_v1  ;;  %1834 = vmatprep.mubr.bf16.mxu0 %v5961_v1 }
 0x20d   : > { %3803 = vmatpush1.bf16.msra.mxu1 %v5440_v34  ;;  %v5530_v34 = vld [vmem:[%s7816_s7 + $0x1e0] ss:$16 sps:$4 sm:$0xff]  }
 0x213   : > { %1722 = vmatmul.mubr.bf16.gmra.mrb[20].mxu1 %v6358_v53  ;;  %1835 = vmatmul.mubr.bf16.gmra.mrb[68].mxu0 %v6358_v53  ;;  %v5445_v53 = vld [vmem:[%s7816_s7 + $0xc] ss:$16 sps:$4 sm:$0xff]  }
 0x214   : > { %1731 = vmatprep.mubr.bf16.mxu1 %v5961_v1  ;;  %1844 = vmatprep.mubr.bf16.mxu0 %v5961_v1 }
 0x215   : > { %3966 = vmatprep.subr.bf16.mxu0 %v5445_v53  ;;  %v5535_v53 = vld [vmem:[%s7816_s7 + $0x1ec] ss:$16 sps:$4 sm:$0xff]  }
 0x21b   : > { %1732 = vmatmul.mubr.bf16.gmra.mrb[24].mxu1 %v6402_v28  ;;  %1845 = vmatmul.mubr.bf16.gmra.mrb[72].mxu0 %v6402_v28  ;;  %v5448_v28 = vld [vmem:[%s7816_s7 + $0x24] ss:$16 sps:$4 sm:$0xff]  }
 0x21c   : > { %1741 = vmatprep.mubr.bf16.mxu1 %v5961_v1  ;;  %1854 = vmatprep.mubr.bf16.mxu0 %v5961_v1 }
 0x21d   : > { %3804 = vmatprep.subr.bf16.mxu1 %v5448_v28  ;;  %v6772_v28 = vld [vmem:[%s7815_s6] sm:$0xff] }
 0x21e   : > { %3805 = vmatpush1.bf16.msra.mxu1 %v5446_v63  ;;  %v6780_v63 = vrot.slane %v6772_v28, %v6161_v49 }
 0x21f   : > { %3806 = vmatprep.subr.bf16.mxu1 %v5454_v6  ;;  %v5541_v6 = vld [vmem:[%s7816_s7 + $0x20c] ss:$16 sps:$4 sm:$0xff]  }
 0x222   : > { %3807 = vmatpush1.bf16.msra.mxu1 %v5452_v10 }
 0x223   : > { %1742 = vmatmul.mubr.bf16.gmra.mrb[28].mxu1 %v6400_v14  ;;  %1855 = vmatmul.mubr.bf16.gmra.mrb[76].mxu0 %v6400_v14  ;;  %v5443_v14 = vld [vmem:[%s7816_s7 + $0x8] ss:$16 sps:$4 sm:$0xff]  }
 0x224   : > { %1751 = vmatprep.mubr.bf16.mxu1 %v5961_v1  ;;  %1864 = vmatprep.mubr.bf16.mxu0 %v5961_v1 }
 0x225   : > { %3967 = vmatpush1.bf16.msra.mxu0 %v5443_v14  ;;  %v5533_v14 = vld [vmem:[%s7816_s7 + $0x1e8] ss:$16 sps:$4 sm:$0xff]  }
 0x226   : > { %3968 = vmatprep.subr.bf16.mxu0 %v5451_v59  ;;  %v6776_v59 = vrot.slane %v6772_v28, %v6171_v54 }
 0x229   : > { %3969 = vmatpush1.bf16.msra.mxu0 %v5449_v5  ;;  %v5538_v5 = vld [vmem:[%s7816_s7 + $0x204] ss:$16 sps:$4 sm:$0xff]  }
 0x22a   : > { %3970 = vmatprep.subr.bf16.mxu0 %v5457_v56 }
 0x22b   : > { %1752 = vmatmul.mubr.bf16.gmra.mrb[32].mxu1 %v6474_v11  ;;  %1865 = vmatmul.mubr.bf16.gmra.mrb[80].mxu0 %v6474_v11  ;;  %v5460_v11 = vld [vmem:[%s7816_s7 + $0x64] ss:$16 sps:$4 sm:$0xff]  }
 0x22c   : > { %1761 = vmatprep.mubr.bf16.mxu1 %v5961_v1  ;;  %1874 = vmatprep.mubr.bf16.mxu0 %v5961_v1 }
 0x22d   : > { %3808 = vmatprep.subr.bf16.mxu1 %v5460_v11 }
 0x22e   : > { %3809 = vmatpush1.bf16.msra.mxu1 %v5458_v13 }
 0x22f   : > { %3810 = vmatprep.subr.bf16.mxu1 %v5466_v15 }
 0x232   : > { %3811 = vmatpush1.bf16.msra.mxu1 %v5464_v17 }
 0x233   : > { %1762 = vmatmul.mubr.bf16.gmra.mrb[36].mxu1 %v6472_v0  ;;  %1875 = vmatmul.mubr.bf16.gmra.mrb[84].mxu0 %v6472_v0  ;;  %v5455_v0 = vld [vmem:[%s7816_s7 + $0x48] ss:$16 sps:$4 sm:$0xff]  }
 0x234   : > { %1771 = vmatprep.mubr.bf16.mxu1 %v5961_v1  ;;  %1884 = vmatprep.mubr.bf16.mxu0 %v5961_v1 }
 0x235   : > { %3971 = vmatpush1.bf16.msra.mxu0 %v5455_v0 }
 0x236   : > { %3972 = vmatprep.subr.bf16.mxu0 %v5463_v12 }
 0x239   : > { %3973 = vmatpush1.bf16.msra.mxu0 %v5461_v39 }
 0x23a   : > { %3974 = vmatprep.subr.bf16.mxu0 %v5469_v16 }
 0x23b   : > { %1772 = vmatmul.mubr.bf16.gmra.mrb[40].mxu1 %v6537_v4  ;;  %1885 = vmatmul.mubr.bf16.gmra.mrb[88].mxu0 %v6537_v4  ;;  %v5527_v4 = vld [vmem:[%s7816_s7 + $0x1c8] ss:$16 sps:$4 sm:$0xff]  }
 0x23c   : > { %1781 = vmatprep.mubr.bf16.mxu1 %v5961_v1  ;;  %1894 = vmatprep.mubr.bf16.mxu0 %v5961_v1  ;;  %v5472_v1 = vld [vmem:[%s7816_s7 + $0xa4] ss:$16 sps:$4 sm:$0xff]  }
 0x23d   : > { %3975 = vmatpush1.bf16.msra.mxu0 %v5467_v37  ;;  %3812 = vmatprep.subr.bf16.mxu1 %v5472_v1 }
 0x23e   : > { %3976 = vmatprep.subr.bf16.mxu0 %v5475_v38  ;;  %3813 = vmatpush1.bf16.msra.mxu1 %v5470_v21 }
 0x23f   : > { %3814 = vmatprep.subr.bf16.mxu1 %v5478_v22 }
 0x241   : > { %3977 = vmatpush1.bf16.msra.mxu0 %v5473_v46 }
 0x242   : > { %3978 = vmatprep.subr.bf16.mxu0 %v5481_v44  ;;  %3815 = vmatpush1.bf16.msra.mxu1 %v5476_v18 }
 0x243   : > { %1782 = vmatmul.mubr.bf16.gmra.mrb[44].mxu1 %v6535_v50  ;;  %1895 = vmatmul.mubr.bf16.gmra.mrb[92].mxu0 %v6535_v50  ;;  %v5524_v50 = vld [vmem:[%s7816_s7 + $0x1c0] ss:$16 sps:$4 sm:$0xff]  }
 0x244   : > { %3816 = vmatprep.subr.bf16.mxu1 %v5484_v8 }
 0x245   : > { %3979 = vmatpush1.bf16.msra.mxu0 %v5479_v26 }
 0x246   : > { %3980 = vmatprep.subr.bf16.mxu0 %v5487_v25  ;;  %3817 = vmatpush1.bf16.msra.mxu1 %v5482_v23 }
 0x247   : > { %3818 = vmatprep.subr.bf16.mxu1 %v5490_v29 }
 0x249   : > { %3981 = vmatpush1.bf16.msra.mxu0 %v5485_v27 }
 0x24a   : > { %3982 = vmatprep.subr.bf16.mxu0 %v5493_v30  ;;  %3819 = vmatpush1.bf16.msra.mxu1 %v5488_v45 }
 0x24b   : > { %3820 = vmatprep.subr.bf16.mxu1 %v5496_v32 }
 0x24d   : > { %3983 = vmatpush1.bf16.msra.mxu0 %v5491_v31 }
 0x24e   : > { %3984 = vmatprep.subr.bf16.mxu0 %v5499_v51  ;;  %3821 = vmatpush1.bf16.msra.mxu1 %v5494_v33 }
 0x24f   : > { %3822 = vmatprep.subr.bf16.mxu1 %v5502_v61 }
 0x251   : > { %3985 = vmatpush1.bf16.msra.mxu0 %v5497_v24 }
 0x252   : > { %3986 = vmatprep.subr.bf16.mxu0 %v5505_v35  ;;  %3823 = vmatpush1.bf16.msra.mxu1 %v5500_v36 }
 0x253   : > { %3824 = vmatprep.subr.bf16.mxu1 %v5508_v40 }
 0x255   : > { %3987 = vmatpush1.bf16.msra.mxu0 %v5503_v62 }
 0x256   : > { %3988 = vmatprep.subr.bf16.mxu0 %v5511_v43  ;;  %3825 = vmatpush1.bf16.msra.mxu1 %v5506_v41 }
 0x257   : > { %3826 = vmatprep.subr.bf16.mxu1 %v5514_v7 }
 0x259   : > { %3989 = vmatpush1.bf16.msra.mxu0 %v5509_v47 }
 0x25a   : > { %3990 = vmatprep.subr.bf16.mxu0 %v5517_v9  ;;  %3827 = vmatpush1.bf16.msra.mxu1 %v5512_v48 }
 0x25b   : > { %3828 = vmatprep.subr.bf16.mxu1 %v5520_v57 }
 0x25d   : > { %3991 = vmatpush1.bf16.msra.mxu0 %v5515_v52 }
 0x25e   : > { %3992 = vmatprep.subr.bf16.mxu0 %v5523_v20  ;;  %3829 = vmatpush1.bf16.msra.mxu1 %v5518_v58 }
 0x25f   : > { %3830 = vmatprep.subr.bf16.mxu1 %v5526_v2 }
 0x261   : > { %3993 = vmatpush1.bf16.msra.mxu0 %v5521_v60 }
 0x262   : > { %3994 = vmatprep.subr.bf16.mxu0 %v5529_v3  ;;  %3831 = vmatpush1.bf16.msra.mxu1 %v5524_v50 }
 0x263   : > { %3832 = vmatprep.subr.bf16.mxu1 %v5532_v19  ;;  %v1107_v19 = vsub.s32 3, %v6144_v42 }
 0x265   : > { %3995 = vmatpush1.bf16.msra.mxu0 %v5527_v4 }
 0x266   : > { %3996 = vmatprep.subr.bf16.mxu0 %v5535_v53  ;;  %3833 = vmatpush1.bf16.msra.mxu1 %v5530_v34 }
 0x267   : > { %3843 = vmatprep.subr.bf16.mxu1 %v5538_v5 }
 0x269   : > { %3997 = vmatpush1.bf16.msra.mxu0 %v5533_v14 }
 0x26a   : > { %4007 = vmatprep.subr.bf16.mxu0 %v5541_v6 }
 0x274   : > { %v1487_v56 = vpop.f32.mrb[16].mxu0 }
 0x275   : > { %v1488_v10 = vadd.f32 %v1487_v56, %v6776_v59  ;;  %v1489_v0 = vpop.f32.mrb[17].mxu0 }
 0x276   : > { %v1490_v11 = vadd.f32 %v1489_v0, %v6780_v63  ;;  %v1491_v12 = vpop.f32.mrb[18].mxu0  ;;  %v6807_v0 = vrot.slane %v6772_v28, %v6174_v55 }
 0x277   : > { %v1492_v13 = vadd.f32 %v1491_v12, %v6776_v59  ;;  %v1493_v39 = vpop.f32.mrb[19].mxu0  ;;  %v1905_v16 = vmax.f32 %v1488_v10, 0.0 }
 0x278   : > { %v1494_v15 = vadd.f32 %v1493_v39, %v6780_v63  ;;  %v1906_v37 = vmax.f32 %v1490_v11, 0.0 }
 0x279   : > { %v1913_v17 = vmax.f32 %v1492_v13, 0.0  ;;  %v6812_v13 = vrot.slane %v6772_v28, %v1107_v19 }
 0x27a   : > { %v1914_v1 = vmax.f32 %v1494_v15, 0.0 }
 0x27b   : > { %v2033_v38 = vmax.f32 %v1905_v16, %v1913_v17 }
 0x27c   : > { %v2048_v21 = vmax.f32 %v1906_v37, %v1914_v1  ;;  %v1497_v46 = vpop.f32.mrb[20].mxu0 }
 0x27d   : > { %v1498_v22 = vadd.f32 %v1497_v46, %v6776_v59  ;;  %v1499_v44 = vpop.f32.mrb[21].mxu0 }
 0x27e   : > { %v1500_v18 = vadd.f32 %v1499_v44, %v6780_v63  ;;  %v1501_v26 = vpop.f32.mrb[22].mxu0 }
 0x27f   : > { %v1921_v8 = vmax.f32 %v1498_v22, 0.0  ;;  %v1502_v23 = vadd.f32 %v1501_v26, %v6776_v59  ;;  %v1503_v27 = vpop.f32.mrb[23].mxu0 }
 0x280   : > { %v1922_v25 = vmax.f32 %v1500_v18, 0.0  ;;  %v1504_v29 = vadd.f32 %v1503_v27, %v6780_v63 }
 0x281   : > { %v2034_v30 = vmax.f32 %v2033_v38, %v1921_v8  ;;  %v1929_v45 = vmax.f32 %v1502_v23, 0.0 }
 0x282   : > { %v2049_v31 = vmax.f32 %v2048_v21, %v1922_v25  ;;  %v1930_v32 = vmax.f32 %v1504_v29, 0.0 }
 0x283   : > { %v2035_v51 = vmax.f32 %v2034_v30, %v1929_v45 }
 0x284   : > { %v2050_v33 = vmax.f32 %v2049_v31, %v1930_v32 }
 0x288   : > { %v1507_v24 = vpop.f32.mrb[24].mxu0 }
 0x289   : > { %v1508_v61 = vadd.f32 %v1507_v24, %v6776_v59  ;;  %v1509_v35 = vpop.f32.mrb[25].mxu0 }
 0x28a   : > { %v1510_v36 = vadd.f32 %v1509_v35, %v6780_v63  ;;  %v1511_v62 = vpop.f32.mrb[26].mxu0 }
 0x28b   : > { %v1937_v40 = vmax.f32 %v1508_v61, 0.0  ;;  %v1512_v43 = vadd.f32 %v1511_v62, %v6776_v59  ;;  %v1513_v41 = vpop.f32.mrb[27].mxu0 }
 0x28c   : > { %v1938_v47 = vmax.f32 %v1510_v36, 0.0  ;;  %v1514_v7 = vadd.f32 %v1513_v41, %v6780_v63 }
 0x28d   : > { %v2036_v9 = vmax.f32 %v2035_v51, %v1937_v40  ;;  %v1945_v48 = vmax.f32 %v1512_v43, 0.0 }
 0x28e   : > { %v2051_v52 = vmax.f32 %v2050_v33, %v1938_v47  ;;  %v1946_v57 = vmax.f32 %v1514_v7, 0.0 }
 0x28f   : > { %v2037_v20 = vmax.f32 %v2036_v9, %v1945_v48 }
 0x290   : > { %v2052_v58 = vmax.f32 %v2051_v52, %v1946_v57  ;;  %v1517_v60 = vpop.f32.mrb[28].mxu0 }
 0x291   : > { %v1518_v2 = vadd.f32 %v1517_v60, %v6776_v59  ;;  %v1519_v3 = vpop.f32.mrb[29].mxu0 }
 0x292   : > { %v1520_v50 = vadd.f32 %v1519_v3, %v6780_v63  ;;  %v1521_v4 = vpop.f32.mrb[30].mxu0 }
 0x293   : > { %v1953_v53 = vmax.f32 %v1518_v2, 0.0  ;;  %v1522_v34 = vadd.f32 %v1521_v4, %v6776_v59  ;;  %v1523_v14 = vpop.f32.mrb[31].mxu0 }
 0x294   : > { %v1954_v5 = vmax.f32 %v1520_v50, 0.0  ;;  %v1524_v6 = vadd.f32 %v1523_v14, %v6780_v63 }
 0x295   : > { %v2038_v56 = vmax.f32 %v2037_v20, %v1953_v53  ;;  %v1961_v10 = vmax.f32 %v1522_v34, 0.0 }
 0x296   : > { %v2053_v11 = vmax.f32 %v2052_v58, %v1954_v5  ;;  %v1962_v12 = vmax.f32 %v1524_v6, 0.0 }
 0x297   : > { %v2039_v39 = vmax.f32 %v2038_v56, %v1961_v10 }
 0x298   : > { %v6814_v15 = vmax.f32 %v2053_v11, %v1962_v12  ;;  %v1600_v16 = vpop.f32.mrb[32].mxu0 }
 0x299   : > { %v1601_v17 = vadd.f32 %v1600_v16, %v6807_v0  ;;  %v1602_v37 = vpop.f32.mrb[33].mxu0 }
 0x29a   : > { %v1603_v1 = vadd.f32 %v1602_v37, %v6812_v13  ;;  %v1604_v38 = vpop.f32.mrb[34].mxu0 }
 0x29b   : > { %v1605_v21 = vadd.f32 %v1604_v38, %v6807_v0  ;;  %v1606_v46 = vpop.f32.mrb[35].mxu0  ;;  %v1907_v44 = vmax.f32 %v1601_v17, 0.0 }
 0x29c   : > { %v1607_v22 = vadd.f32 %v1606_v46, %v6812_v13  ;;  %v1908_v26 = vmax.f32 %v1603_v1, 0.0 }
 0x29d   : > { %v1915_v18 = vmax.f32 %v1605_v21, 0.0 }
 0x29e   : > { %v1916_v8 = vmax.f32 %v1607_v22, 0.0 }
 0x29f   : > { %v2063_v23 = vmax.f32 %v1907_v44, %v1915_v18 }
 0x2a0   : > { %v2078_v27 = vmax.f32 %v1908_v26, %v1916_v8  ;;  %v1610_v25 = vpop.f32.mrb[36].mxu0 }
 0x2a1   : > { %v1611_v29 = vadd.f32 %v1610_v25, %v6807_v0  ;;  %v1612_v30 = vpop.f32.mrb[37].mxu0 }
 0x2a2   : > { %v1613_v45 = vadd.f32 %v1612_v30, %v6812_v13  ;;  %v1614_v31 = vpop.f32.mrb[38].mxu0 }
 0x2a3   : > { %v1923_v32 = vmax.f32 %v1611_v29, 0.0  ;;  %v1615_v51 = vadd.f32 %v1614_v31, %v6807_v0  ;;  %v1616_v33 = vpop.f32.mrb[39].mxu0 }
 0x2a4   : > { %v1924_v24 = vmax.f32 %v1613_v45, 0.0  ;;  %v1617_v61 = vadd.f32 %v1616_v33, %v6812_v13 }
 0x2a5   : > { %v2064_v35 = vmax.f32 %v2063_v23, %v1923_v32  ;;  %v1931_v36 = vmax.f32 %v1615_v51, 0.0 }
 0x2a6   : > { %v2079_v62 = vmax.f32 %v2078_v27, %v1924_v24  ;;  %v1932_v40 = vmax.f32 %v1617_v61, 0.0 }
 0x2a7   : > { %v2065_v43 = vmax.f32 %v2064_v35, %v1931_v36 }
 0x2a8   : > { %v2080_v41 = vmax.f32 %v2079_v62, %v1932_v40  ;;  %v1620_v47 = vpop.f32.mrb[40].mxu0 }
 0x2a9   : > { %v1621_v7 = vadd.f32 %v1620_v47, %v6807_v0  ;;  %v1622_v9 = vpop.f32.mrb[41].mxu0 }
 0x2aa   : > { %v1623_v48 = vadd.f32 %v1622_v9, %v6812_v13  ;;  %v1624_v52 = vpop.f32.mrb[42].mxu0 }
 0x2ab   : > { %v1939_v57 = vmax.f32 %v1621_v7, 0.0  ;;  %v1625_v20 = vadd.f32 %v1624_v52, %v6807_v0  ;;  %v1626_v58 = vpop.f32.mrb[43].mxu0 }
 0x2ac   : > { %v1940_v60 = vmax.f32 %v1623_v48, 0.0  ;;  %v1627_v2 = vadd.f32 %v1626_v58, %v6812_v13 }
 0x2ad   : > { %v2066_v3 = vmax.f32 %v2065_v43, %v1939_v57  ;;  %v1947_v50 = vmax.f32 %v1625_v20, 0.0  ;;  %v1527_v4 = vpop.f32.mrb[0].mxu1 }
 0x2ae   : > { %v2081_v53 = vmax.f32 %v2080_v41, %v1940_v60  ;;  %v1948_v34 = vmax.f32 %v1627_v2, 0.0  ;;  %v1528_v14 = vadd.f32 %v1527_v4, %v6776_v59  ;;  %v1529_v5 = vpop.f32.mrb[1].mxu1 }
 0x2af   : > { %v2067_v6 = vmax.f32 %v2066_v3, %v1947_v50  ;;  %v1530_v56 = vadd.f32 %v1529_v5, %v6780_v63  ;;  %v1531_v10 = vpop.f32.mrb[2].mxu1 }
 0x2b0   : > { %v2082_v11 = vmax.f32 %v2081_v53, %v1948_v34  ;;  %v1969_v12 = vmax.f32 %v1528_v14, 0.0  ;;  %v1532_v16 = vadd.f32 %v1531_v10, %v6776_v59  ;;  %v1533_v17 = vpop.f32.mrb[3].mxu1  ;;  %v1630_v37 = vpop.f32.mrb[44].mxu0 }
 0x2b1   : > { %v1970_v1 = vmax.f32 %v1530_v56, 0.0  ;;  %v1534_v38 = vadd.f32 %v1533_v17, %v6780_v63  ;;  %v1631_v21 = vadd.f32 %v1630_v37, %v6807_v0  ;;  %v1632_v46 = vpop.f32.mrb[45].mxu0 }
 0x2b2   : > { %v2040_v22 = vmax.f32 %v2039_v39, %v1969_v12  ;;  %v1977_v44 = vmax.f32 %v1532_v16, 0.0  ;;  %v1633_v18 = vadd.f32 %v1632_v46, %v6812_v13  ;;  %v1634_v26 = vpop.f32.mrb[46].mxu0 }
 0x2b3   : > { %v2055_v8 = vmax.f32 %v6814_v15, %v1970_v1  ;;  %v1978_v23 = vmax.f32 %v1534_v38, 0.0  ;;  %v1955_v27 = vmax.f32 %v1631_v21, 0.0  ;;  %v1635_v25 = vadd.f32 %v1634_v26, %v6807_v0  ;;  %v1636_v29 = vpop.f32.mrb[47].mxu0 }
 0x2b4   : > { %v2041_v30 = vmax.f32 %v2040_v22, %v1977_v44  ;;  %v1956_v45 = vmax.f32 %v1633_v18, 0.0  ;;  %v1637_v31 = vadd.f32 %v1636_v29, %v6812_v13 }
 0x2b5   : > { %v2056_v32 = vmax.f32 %v2055_v8, %v1978_v23  ;;  %v2068_v51 = vmax.f32 %v2067_v6, %v1955_v27  ;;  %v1963_v33 = vmax.f32 %v1635_v25, 0.0  ;;  %v1537_v24 = vpop.f32.mrb[4].mxu1 }
 0x2b6   : > { %v2083_v39 = vmax.f32 %v2082_v11, %v1956_v45  ;;  %v1964_v61 = vmax.f32 %v1637_v31, 0.0  ;;  %v1538_v35 = vadd.f32 %v1537_v24, %v6776_v59  ;;  %v1539_v36 = vpop.f32.mrb[5].mxu1 }
 0x2b7   : > { %v2069_v62 = vmax.f32 %v2068_v51, %v1963_v33  ;;  %v1540_v15 = vadd.f32 %v1539_v36, %v6780_v63  ;;  %v1541_v40 = vpop.f32.mrb[6].mxu1 }
 0x2b8   : > { %v2084_v43 = vmax.f32 %v2083_v39, %v1964_v61  ;;  %v1985_v41 = vmax.f32 %v1538_v35, 0.0  ;;  %v1542_v47 = vadd.f32 %v1541_v40, %v6776_v59  ;;  %v1543_v7 = vpop.f32.mrb[7].mxu1  ;;  %v1640_v9 = vpop.f32.mrb[48].mxu0 }
 0x2b9   : > { %v1986_v48 = vmax.f32 %v1540_v15, 0.0  ;;  %v1544_v52 = vadd.f32 %v1543_v7, %v6780_v63  ;;  %v1641_v57 = vadd.f32 %v1640_v9, %v6807_v0  ;;  %v1642_v20 = vpop.f32.mrb[49].mxu0 }
 0x2ba   : > { %v2042_v58 = vmax.f32 %v2041_v30, %v1985_v41  ;;  %v1993_v60 = vmax.f32 %v1542_v47, 0.0  ;;  %v1643_v2 = vadd.f32 %v1642_v20, %v6812_v13  ;;  %v1644_v3 = vpop.f32.mrb[50].mxu0 }
 0x2bb   : > { %v2057_v50 = vmax.f32 %v2056_v32, %v1986_v48  ;;  %v1994_v4 = vmax.f32 %v1544_v52, 0.0  ;;  %v1971_v53 = vmax.f32 %v1641_v57, 0.0  ;;  %v1645_v34 = vadd.f32 %v1644_v3, %v6807_v0  ;;  %v1646_v14 = vpop.f32.mrb[51].mxu0 }
 0x2bc   : > { %v2043_v5 = vmax.f32 %v2042_v58, %v1993_v60  ;;  %v1972_v6 = vmax.f32 %v1643_v2, 0.0  ;;  %v1647_v56 = vadd.f32 %v1646_v14, %v6812_v13 }
 0x2bd   : > { %v2058_v10 = vmax.f32 %v2057_v50, %v1994_v4  ;;  %v2070_v11 = vmax.f32 %v2069_v62, %v1971_v53  ;;  %v1979_v12 = vmax.f32 %v1645_v34, 0.0 }
 0x2be   : > { %v2085_v16 = vmax.f32 %v2084_v43, %v1972_v6  ;;  %v1980_v17 = vmax.f32 %v1647_v56, 0.0  ;;  %v1111_v43 = vsub.s32 4, %v6144_v42 }
 0x2bf   : > { %v2071_v37 = vmax.f32 %v2070_v11, %v1979_v12 }
 0x2c0   : > { %v2086_v1 = vmax.f32 %v2085_v16, %v1980_v17  ;;  %v1650_v38 = vpop.f32.mrb[52].mxu0 }
 0x2c1   : > { %v1651_v21 = vadd.f32 %v1650_v38, %v6807_v0  ;;  %v1652_v46 = vpop.f32.mrb[53].mxu0 }
 0x2c2   : > { %v1653_v22 = vadd.f32 %v1652_v46, %v6812_v13  ;;  %v1654_v44 = vpop.f32.mrb[54].mxu0 }
 0x2c3   : > { %v1987_v18 = vmax.f32 %v1651_v21, 0.0  ;;  %v1655_v26 = vadd.f32 %v1654_v44, %v6807_v0  ;;  %v1656_v8 = vpop.f32.mrb[55].mxu0 }
 0x2c4   : > { %v1988_v23 = vmax.f32 %v1653_v22, 0.0  ;;  %v1657_v27 = vadd.f32 %v1656_v8, %v6812_v13  ;;  %v1115_v22 = vsub.s32 5, %v6144_v42  ;;  %v6865_v8 = vrot.slane %v6772_v28, %v1111_v43 }
 0x2c5   : > { %v2072_v25 = vmax.f32 %v2071_v37, %v1987_v18  ;;  %v1995_v29 = vmax.f32 %v1655_v26, 0.0 }
 0x2c6   : > { %v2087_v30 = vmax.f32 %v2086_v1, %v1988_v23  ;;  %v1996_v45 = vmax.f32 %v1657_v27, 0.0  ;;  %v1123_v23 = vsub.s32 7, %v6144_v42 }
 0x2c7   : > { %v2073_v31 = vmax.f32 %v2072_v25, %v1995_v29 }
 0x2c8   : > { %v2088_v32 = vmax.f32 %v2087_v30, %v1996_v45 }
 0x2ce   : > { %v1547_v51 = vpop.f32.mrb[8].mxu1  ;;  %v1660_v33 = vpop.f32.mrb[56].mxu0 }
 0x2cf   : > { %v1548_v24 = vadd.f32 %v1547_v51, %v6776_v59  ;;  %v1661_v39 = vadd.f32 %v1660_v33, %v6807_v0  ;;  %v1549_v61 = vpop.f32.mrb[9].mxu1  ;;  %v1662_v35 = vpop.f32.mrb[57].mxu0 }
 0x2d0   : > { %v1550_v36 = vadd.f32 %v1549_v61, %v6780_v63  ;;  %v1663_v62 = vadd.f32 %v1662_v35, %v6812_v13  ;;  %v1551_v15 = vpop.f32.mrb[10].mxu1  ;;  %v1664_v40 = vpop.f32.mrb[58].mxu0 }
 0x2d1   : > { %v2001_v41 = vmax.f32 %v1548_v24, 0.0  ;;  %v2003_v47 = vmax.f32 %v1661_v39, 0.0  ;;  %v1552_v7 = vadd.f32 %v1551_v15, %v6776_v59  ;;  %v1665_v9 = vadd.f32 %v1664_v40, %v6807_v0  ;;  %v1553_v48 = vpop.f32.mrb[11].mxu1  ;;  %v1666_v52 = vpop.f32.mrb[59].mxu0 }
 0x2d2   : > { %v2002_v57 = vmax.f32 %v1550_v36, 0.0  ;;  %v2004_v20 = vmax.f32 %v1663_v62, 0.0  ;;  %v1554_v58 = vadd.f32 %v1553_v48, %v6780_v63  ;;  %v1667_v60 = vadd.f32 %v1666_v52, %v6812_v13 }
 0x2d3   : > { %v2044_v2 = vmax.f32 %v2043_v5, %v2001_v41  ;;  %v2074_v3 = vmax.f32 %v2073_v31, %v2003_v47  ;;  %v2009_v50 = vmax.f32 %v1552_v7, 0.0  ;;  %v2011_v4 = vmax.f32 %v1665_v9, 0.0 }
 0x2d4   : > { %v2059_v53 = vmax.f32 %v2058_v10, %v2002_v57  ;;  %v2089_v34 = vmax.f32 %v2088_v32, %v2004_v20  ;;  %v2010_v14 = vmax.f32 %v1554_v58, 0.0  ;;  %v2012_v6 = vmax.f32 %v1667_v60, 0.0 }
 0x2d5   : > { %v2045_v56 = vmax.f32 %v2044_v2, %v2009_v50  ;;  %v2075_v11 = vmax.f32 %v2074_v3, %v2011_v4  ;;  %v1119_v5 = vsub.s32 6, %v6144_v42  ;;  %v6881_v48 = vrot.slane %v6772_v28, %v1123_v23 }
 0x2d6   : > { %v2060_v12 = vmax.f32 %v2059_v53, %v2010_v14  ;;  %v2090_v16 = vmax.f32 %v2089_v34, %v2012_v6  ;;  %v1557_v17 = vpop.f32.mrb[12].mxu1  ;;  %v1670_v37 = vpop.f32.mrb[60].mxu0 }
 0x2d7   : > { %v1558_v1 = vadd.f32 %v1557_v17, %v6776_v59  ;;  %v1671_v38 = vadd.f32 %v1670_v37, %v6807_v0  ;;  %v1559_v21 = vpop.f32.mrb[13].mxu1  ;;  %v1672_v46 = vpop.f32.mrb[61].mxu0 }
 0x2d8   : > { %v1560_v10 = vadd.f32 %v1559_v21, %v6780_v63  ;;  %v1673_v44 = vadd.f32 %v1672_v46, %v6812_v13  ;;  %v1561_v18 = vpop.f32.mrb[14].mxu1  ;;  %v1674_v26 = vpop.f32.mrb[62].mxu0 }
 0x2d9   : > { %v2017_v27 = vmax.f32 %v1558_v1, 0.0  ;;  %v2019_v25 = vmax.f32 %v1671_v38, 0.0  ;;  %v1562_v29 = vadd.f32 %v1561_v18, %v6776_v59  ;;  %v1675_v30 = vadd.f32 %v1674_v26, %v6807_v0  ;;  %v1563_v45 = vpop.f32.mrb[15].mxu1  ;;  %v1676_v31 = vpop.f32.mrb[63].mxu0 }
 0x2da   : > { %v2018_v32 = vmax.f32 %v1560_v10, 0.0  ;;  %v2020_v51 = vmax.f32 %v1673_v44, 0.0  ;;  %v1564_v33 = vadd.f32 %v1563_v45, %v6780_v63  ;;  %v1677_v24 = vadd.f32 %v1676_v31, %v6812_v13 }
 0x2db   : > { %v2046_v39 = vmax.f32 %v2045_v56, %v2017_v27  ;;  %v2076_v61 = vmax.f32 %v2075_v11, %v2019_v25  ;;  %v2025_v35 = vmax.f32 %v1562_v29, 0.0  ;;  %v2027_v36 = vmax.f32 %v1675_v30, 0.0 }
 0x2dc   : > { %v2061_v62 = vmax.f32 %v2060_v12, %v2018_v32  ;;  %v2091_v15 = vmax.f32 %v2090_v16, %v2020_v51  ;;  %v2026_v40 = vmax.f32 %v1564_v33, 0.0  ;;  %v2028_v43 = vmax.f32 %v1677_v24, 0.0 }
 0x2dd   : > { %v2047_v41 = vmax.f32 %v2046_v39, %v2025_v35  ;;  %v6872_v59 = vmax.f32 %v2076_v61, %v2027_v36  ;;  %v6875_v0 = vrot.slane %v6772_v28, %v1119_v5  ;;  %v6878_v13 = vrot.slane %v6772_v28, %v1115_v22 }
 0x2de   : > { %v2062_v47 = vmax.f32 %v2061_v62, %v2026_v40  ;;  %v2092_v7 = vmax.f32 %v2091_v15, %v2028_v43  ;;  %v1713_v9 = vpop.f32.mrb[16].mxu1  ;;  %v1826_v63 = vpop.f32.mrb[64].mxu0 }
 0x2df   : > { %v2188_v52 = vrot.slane %v2047_v41, 4  ;;  %v1714_v57 = vadd.f32 %v1713_v9, %v6865_v8  ;;  %v1715_v20 = vpop.f32.mrb[17].mxu1  ;;  %v1828_v58 = vpop.f32.mrb[65].mxu0  ;;  %v1827_v53 = vadd.f32 %v1826_v63, %v6875_v0 }
 0x2e0   : > { %v2194_v60 = vrot.slane %v2062_v47, 4  ;;  %v2206_v2 = vrot.slane %v2092_v7, 4  ;;  %v1717_v3 = vpop.f32.mrb[18].mxu1  ;;  %v1830_v50 = vpop.f32.mrb[66].mxu0  ;;  %v1716_v11 = vadd.f32 %v1715_v20, %v6878_v13  ;;  %v1829_v28 = vadd.f32 %v1828_v58, %v6881_v48 }
 0x2e1   : > { %v2189_v4 = vmax.f32 %v2047_v41, %v2188_v52  ;;  %v1719_v34 = vpop.f32.mrb[19].mxu1  ;;  %v1832_v14 = vpop.f32.mrb[67].mxu0  ;;  %v1909_v16 = vmax.f32 %v1714_v57, 0.0  ;;  %v1718_v17 = vadd.f32 %v1717_v3, %v6865_v8  ;;  %v1831_v37 = vadd.f32 %v1830_v50, %v6875_v0 }
 0x2e2   : > { %v2195_v6 = vmax.f32 %v2062_v47, %v2194_v60  ;;  %v2207_v56 = vmax.f32 %v2092_v7, %v2206_v2  ;;  %v1720_v21 = vadd.f32 %v1719_v34, %v6878_v13  ;;  %v1833_v46 = vadd.f32 %v1832_v14, %v6881_v48 }
 0x2e3   : > { %v2190_v12 = vrot.slane %v2189_v4, 2  ;;  %v1911_v22 = vmax.f32 %v1827_v53, 0.0  ;;  %v1917_v10 = vmax.f32 %v1718_v17, 0.0  ;;  %v1919_v44 = vmax.f32 %v1831_v37, 0.0 }
 0x2e4   : > { %v2196_v1 = vrot.slane %v2195_v6, 2  ;;  %v2208_v38 = vrot.slane %v2207_v56, 2  ;;  %v1910_v18 = vmax.f32 %v1716_v11, 0.0  ;;  %v1912_v26 = vmax.f32 %v1829_v28, 0.0 }
 0x2e5   : > { %v2191_v5 = vmax.f32 %v2189_v4, %v2190_v12  ;;  %v1918_v23 = vmax.f32 %v1720_v21, 0.0  ;;  %v1920_v27 = vmax.f32 %v1833_v46, 0.0  ;;  %v2093_v30 = vmax.f32 %v1909_v16, %v1917_v10 }
 0x2e6   : > { %v1723_v25 = vpop.f32.mrb[20].mxu1  ;;  %v1836_v29 = vpop.f32.mrb[68].mxu0  ;;  %v2123_v45 = vmax.f32 %v1911_v22, %v1919_v44  ;;  %v2197_v51 = vmax.f32 %v2195_v6, %v2196_v1  ;;  %v2209_v33 = vmax.f32 %v2207_v56, %v2208_v38 }
 0x2e7   : > { %v1725_v31 = vpop.f32.mrb[21].mxu1  ;;  %v1838_v32 = vpop.f32.mrb[69].mxu0  ;;  %v2108_v24 = vmax.f32 %v1910_v18, %v1918_v23  ;;  %v2138_v39 = vmax.f32 %v1912_v26, %v1920_v27  ;;  %v1724_v61 = vadd.f32 %v1723_v25, %v6865_v8  ;;  %v1837_v35 = vadd.f32 %v1836_v29, %v6875_v0 }
 0x2e8   : > { %v1727_v36 = vpop.f32.mrb[22].mxu1  ;;  %v1840_v62 = vpop.f32.mrb[70].mxu0  ;;  %v2192_v15 = vrot.slane %v2191_v5, 1  ;;  %v1726_v40 = vadd.f32 %v1725_v31, %v6878_v13  ;;  %v1839_v43 = vadd.f32 %v1838_v32, %v6881_v48  ;;  %v2198_v6 = vrot.slane %v2197_v51, 1 }
 0x2e9   : > { %v1728_v41 = vadd.f32 %v1727_v36, %v6865_v8  ;;  %v1729_v47 = vpop.f32.mrb[23].mxu1  ;;  %v1842_v7 = vpop.f32.mrb[71].mxu0  ;;  %v1925_v9 = vmax.f32 %v1724_v61, 0.0  ;;  %v1927_v63 = vmax.f32 %v1837_v35, 0.0  ;;  %v1841_v52 = vadd.f32 %v1840_v62, %v6875_v0 }
 0x2ea   : > { %v1730_v57 = vadd.f32 %v1729_v47, %v6878_v13  ;;  %v1926_v20 = vmax.f32 %v1726_v40, 0.0  ;;  %v1928_v58 = vmax.f32 %v1839_v43, 0.0  ;;  %v1843_v14 = vadd.f32 %v1842_v7, %v6881_v48  ;;  %v5544_v7 = vld [vmem:[%s7816_s7 + $0x224] ss:$16 sps:$4 sm:$0xff]  }
 0x2eb   : > { %v1933_v60 = vmax.f32 %v1728_v41, 0.0  ;;  %v2094_v2 = vmax.f32 %v2093_v30, %v1925_v9  ;;  %v2124_v3 = vmax.f32 %v2123_v45, %v1927_v63  ;;  %v1935_v50 = vmax.f32 %v1841_v52, 0.0  ;;  %v5547_v9 = vld [vmem:[%s7816_s7 + $0x22c] ss:$16 sps:$4 sm:$0xff]  }
 0x2ec   : > { %v1934_v4 = vmax.f32 %v1730_v57, 0.0  ;;  %v2109_v53 = vmax.f32 %v2108_v24, %v1926_v20  ;;  %v2139_v34 = vmax.f32 %v2138_v39, %v1928_v58  ;;  %v2193_v56 = vmax.f32 %v2191_v5, %v2192_v15  ;;  %v5536_v24 = vld [vmem:[%s7816_s7 + $0x200] ss:$16 sps:$4 sm:$0xff]   ;;  %v5545_v58 = vld [vmem:[%s7816_s7 + $0x228] ss:$16 sps:$4 sm:$0xff]  }
 0x2ed   : > { %v2095_v11 = vmax.f32 %v2094_v2, %v1933_v60  ;;  %v2125_v28 = vmax.f32 %v2124_v3, %v1935_v50  ;;  %v2210_v17 = vrot.slane %v2209_v33, 1  ;;  %v1936_v1 = vmax.f32 %v1843_v14, 0.0  ;;  %v5542_v20 = vld [vmem:[%s7816_s7 + $0x220] ss:$16 sps:$4 sm:$0xff]  }
 0x2ee   : > { %v1733_v12 = vpop.f32.mrb[24].mxu1  ;;  %v1846_v16 = vpop.f32.mrb[72].mxu0  ;;  %v2110_v37 = vmax.f32 %v2109_v53, %v1934_v4  ;;  %v2199_v10 = vmax.f32 %v2197_v51, %v2198_v6  ;;  %v5539_v51 = vld [vmem:[%s7816_s7 + $0x208] ss:$16 sps:$4 sm:$0xff]   ;;  %v2236_v35 = vpack.c.bf16 %v2193_v56, %v2193_v56  ;;  %v5550_v4 = vld [vmem:[%s7816_s7 + $0x244] ss:$16 sps:$4 sm:$0xff]  }
 0x2ef   : > { %v1734_v38 = vadd.f32 %v1733_v12, %v6865_v8  ;;  %v1847_v21 = vadd.f32 %v1846_v16, %v6875_v0  ;;  %v1735_v46 = vpop.f32.mrb[25].mxu1  ;;  %v1848_v22 = vpop.f32.mrb[73].mxu0  ;;  %v2211_v23 = vmax.f32 %v2209_v33, %v2210_v17  ;;  %v2140_v27 = vmax.f32 %v2139_v34, %v1936_v1  ;;  %v5553_v6 = vld [vmem:[%s7816_s7 + $0x24c] ss:$16 sps:$4 sm:$0xff]  }
 0x2f0   : > { %v1736_v44 = vadd.f32 %v1735_v46, %v6878_v13  ;;  %v1849_v18 = vadd.f32 %v1848_v22, %v6881_v48  ;;  %v1737_v26 = vpop.f32.mrb[26].mxu1  ;;  %v1850_v5 = vpop.f32.mrb[74].mxu0  ;;  %v2237_v32 = vpack.c.bf16 %v2199_v10, %v2199_v10 }
 0x2f1   : > { %v1941_v25 = vmax.f32 %v1734_v38, 0.0  ;;  %v1943_v29 = vmax.f32 %v1847_v21, 0.0  ;;  %v1738_v30 = vadd.f32 %v1737_v26, %v6865_v8  ;;  %v1739_v45 = vpop.f32.mrb[27].mxu1  ;;  %v1852_v31 = vpop.f32.mrb[75].mxu0  ;;  %v1851_v33 = vadd.f32 %v1850_v5, %v6875_v0 }
 0x2f2   : > { %v1942_v39 = vmax.f32 %v1736_v44, 0.0  ;;  %v1944_v61 = vmax.f32 %v1849_v18, 0.0  ;;  %3834 = vmatprep.mubr.bf16.mxu1 %v2237_v32  ;;  %3998 = vmatprep.mubr.bf16.mxu0 %v2237_v32  ;;  %v1740_v47 = vadd.f32 %v1739_v45, %v6878_v13  ;;  %v2239_v52 = vpack.c.bf16 %v2211_v23, %v2211_v23  ;;  %v5548_v44 = vld [vmem:[%s7816_s7 + $0x240] ss:$16 sps:$4 sm:$0xff]   ;;  %v5551_v18 = vld [vmem:[%s7816_s7 + $0x248] ss:$16 sps:$4 sm:$0xff]  }
 0x2f3   : > { %v2096_v36 = vmax.f32 %v2095_v11, %v1941_v25  ;;  %v2126_v62 = vmax.f32 %v2125_v28, %v1943_v29  ;;  %v1949_v15 = vmax.f32 %v1738_v30, 0.0  ;;  %v1951_v41 = vmax.f32 %v1851_v33, 0.0  ;;  %3835 = vmatmul.mubr.bf16.vlgmr.msra.gmra.mrb[48].mxu1 %v2236_v35  ;;  %3999 = vmatmul.mubr.bf16.vlgmr.msra.gmra.mrb[96].mxu0 %v2236_v35  ;;  %v5559_v32 = vld [vmem:[%s7816_s7 + $0x26c] ss:$16 sps:$4 sm:$0xff]  }
 0x2f4   : > { %v2111_v40 = vmax.f32 %v2110_v37, %v1942_v39  ;;  %v2141_v43 = vmax.f32 %v2140_v27, %v1944_v61  ;;  %v1853_v57 = vadd.f32 %v1852_v31, %v6881_v48  ;;  %3844 = vmatpush1.bf16.msra.mxu1 %v5536_v24  ;;  %4008 = vmatpush1.bf16.msra.mxu0 %v5539_v51  ;;  %v1950_v2 = vmax.f32 %v1740_v47, 0.0  ;;  %v5556_v31 = vld [vmem:[%s7816_s7 + $0x264] ss:$16 sps:$4 sm:$0xff]  }
 0x2f5   : > { %v2097_v63 = vmax.f32 %v2096_v36, %v1949_v15  ;;  %v2127_v60 = vmax.f32 %v2126_v62, %v1951_v41  ;;  %3875 = vmatprep.mubr.bf16.mxu1 %v2239_v52  ;;  %4039 = vmatprep.mubr.bf16.mxu0 %v2239_v52  ;;  %v5554_v15 = vld [vmem:[%s7816_s7 + $0x260] ss:$16 sps:$4 sm:$0xff]   ;;  %v5565_v52 = vld [vmem:[%s7816_s7 + $0x28c] ss:$16 sps:$4 sm:$0xff]  }
 0x2f6   : > { %v1743_v3 = vpop.f32.mrb[28].mxu1  ;;  %v1856_v50 = vpop.f32.mrb[76].mxu0  ;;  %v1952_v53 = vmax.f32 %v1853_v57, 0.0  ;;  %v2112_v28 = vmax.f32 %v2111_v40, %v1950_v2  ;;  %3845 = vmatprep.subr.bf16.mxu1 %v5544_v7  ;;  %4009 = vmatprep.subr.bf16.mxu0 %v5547_v9  ;;  %v5557_v40 = vld [vmem:[%s7816_s7 + $0x268] ss:$16 sps:$4 sm:$0xff]  }
 0x2f7   : > { %v1744_v34 = vadd.f32 %v1743_v3, %v6865_v8  ;;  %v1857_v14 = vadd.f32 %v1856_v50, %v6875_v0  ;;  %v1745_v56 = vpop.f32.mrb[29].mxu1  ;;  %v1858_v11 = vpop.f32.mrb[77].mxu0 }
 0x2f8   : > { %v1746_v12 = vadd.f32 %v1745_v56, %v6878_v13  ;;  %v1859_v16 = vadd.f32 %v1858_v11, %v6881_v48  ;;  %v1747_v17 = vpop.f32.mrb[30].mxu1  ;;  %v1860_v37 = vpop.f32.mrb[78].mxu0  ;;  %v2142_v1 = vmax.f32 %v2141_v43, %v1952_v53  ;;  %3846 = vmatpush1.bf16.msra.mxu1 %v5542_v20  ;;  %4010 = vmatpush1.bf16.msra.mxu0 %v5545_v58  ;;  %v5560_v56 = vld [vmem:[%s7816_s7 + $0x280] ss:$16 sps:$4 sm:$0xff]   ;;  %v5563_v11 = vld [vmem:[%s7816_s7 + $0x288] ss:$16 sps:$4 sm:$0xff]  }
 0x2f9   : > { %v1957_v38 = vmax.f32 %v1744_v34, 0.0  ;;  %v1959_v21 = vmax.f32 %v1857_v14, 0.0  ;;  %v1748_v46 = vadd.f32 %v1747_v17, %v6865_v8  ;;  %v1749_v22 = vpop.f32.mrb[31].mxu1  ;;  %v1862_v10 = vpop.f32.mrb[79].mxu0  ;;  %v1861_v23 = vadd.f32 %v1860_v37, %v6875_v0  ;;  %3847 = vmatprep.subr.bf16.mxu1 %v5550_v4  ;;  %4011 = vmatprep.subr.bf16.mxu0 %v5553_v6 }
 0x2fa   : > { %v1958_v26 = vmax.f32 %v1746_v12, 0.0  ;;  %v1960_v5 = vmax.f32 %v1859_v16, 0.0  ;;  %v1750_v27 = vadd.f32 %v1749_v22, %v6878_v13  ;;  %v1863_v45 = vadd.f32 %v1862_v10, %v6881_v48  ;;  %v5571_v22 = vld [vmem:[%s7816_s7 + $0x2ac] ss:$16 sps:$4 sm:$0xff]  }
 0x2fb   : > { %v2098_v25 = vmax.f32 %v2097_v63, %v1957_v38  ;;  %v2128_v29 = vmax.f32 %v2127_v60, %v1959_v21  ;;  %v1965_v30 = vmax.f32 %v1748_v46, 0.0  ;;  %v1967_v39 = vmax.f32 %v1861_v23, 0.0  ;;  %v5562_v63 = vld [vmem:[%s7816_s7 + $0x284] ss:$16 sps:$4 sm:$0xff]  }
 0x2fc   : > { %v2113_v24 = vmax.f32 %v2112_v28, %v1958_v26  ;;  %v2143_v51 = vmax.f32 %v2142_v1, %v1960_v5  ;;  %v1966_v61 = vmax.f32 %v1750_v27, 0.0  ;;  %v1968_v35 = vmax.f32 %v1863_v45, 0.0  ;;  %3848 = vmatpush1.bf16.msra.mxu1 %v5548_v44  ;;  %4012 = vmatpush1.bf16.msra.mxu0 %v5551_v18  ;;  %v5568_v46 = vld [vmem:[%s7816_s7 + $0x2a4] ss:$16 sps:$4 sm:$0xff]  }
 0x2fd   : > { %v2099_v33 = vmax.f32 %v2098_v25, %v1965_v30  ;;  %v2129_v36 = vmax.f32 %v2128_v29, %v1967_v39  ;;  %3849 = vmatprep.subr.bf16.mxu1 %v5556_v31  ;;  %4013 = vmatprep.subr.bf16.mxu0 %v5559_v32  ;;  %v5566_v29 = vld [vmem:[%s7816_s7 + $0x2a0] ss:$16 sps:$4 sm:$0xff]   ;;  %v5569_v30 = vld [vmem:[%s7816_s7 + $0x2a8] ss:$16 sps:$4 sm:$0xff]   ;;  %v5577_v39 = vld [vmem:[%s7816_s7 + $0x2cc] ss:$16 sps:$4 sm:$0xff]  }
 0x2fe   : > { %v2114_v62 = vmax.f32 %v2113_v24, %v1966_v61  ;;  %v1753_v43 = vpop.f32.mrb[32].mxu1  ;;  %v1866_v41 = vpop.f32.mrb[80].mxu0  ;;  %v2144_v47 = vmax.f32 %v2143_v51, %v1968_v35  ;;  %v5574_v51 = vld [vmem:[%s7816_s7 + $0x2c4] ss:$16 sps:$4 sm:$0xff]  }
 0x2ff   : > { %v1754_v7 = vadd.f32 %v1753_v43, %v6865_v8  ;;  %v1867_v9 = vadd.f32 %v1866_v41, %v6875_v0  ;;  %v1755_v57 = vpop.f32.mrb[33].mxu1  ;;  %v1868_v20 = vpop.f32.mrb[81].mxu0 }
 0x300   : > { %v1756_v58 = vadd.f32 %v1755_v57, %v6878_v13  ;;  %v1869_v60 = vadd.f32 %v1868_v20, %v6881_v48  ;;  %v1757_v2 = vpop.f32.mrb[34].mxu1  ;;  %v1870_v3 = vpop.f32.mrb[82].mxu0  ;;  %3850 = vmatpush1.bf16.msra.mxu1 %v5554_v15  ;;  %4014 = vmatpush1.bf16.msra.mxu0 %v5557_v40 }
 0x301   : > { %v1973_v50 = vmax.f32 %v1754_v7, 0.0  ;;  %v1975_v4 = vmax.f32 %v1867_v9, 0.0  ;;  %v1758_v53 = vadd.f32 %v1757_v2, %v6865_v8  ;;  %v1871_v34 = vadd.f32 %v1870_v3, %v6875_v0  ;;  %v1759_v14 = vpop.f32.mrb[35].mxu1  ;;  %v1872_v6 = vpop.f32.mrb[83].mxu0  ;;  %3851 = vmatprep.subr.bf16.mxu1 %v5562_v63  ;;  %4015 = vmatprep.subr.bf16.mxu0 %v5565_v52  ;;  %v5572_v63 = vld [vmem:[%s7816_s7 + $0x2c0] ss:$16 sps:$4 sm:$0xff]  }
 0x302   : > { %v1974_v28 = vmax.f32 %v1756_v58, 0.0  ;;  %v1976_v12 = vmax.f32 %v1869_v60, 0.0  ;;  %v1760_v16 = vadd.f32 %v1759_v14, %v6878_v13  ;;  %v1873_v17 = vadd.f32 %v1872_v6, %v6881_v48  ;;  %v5575_v52 = vld [vmem:[%s7816_s7 + $0x2c8] ss:$16 sps:$4 sm:$0xff]  }
 0x303   : > { %v2100_v37 = vmax.f32 %v2099_v33, %v1973_v50  ;;  %v2130_v1 = vmax.f32 %v2129_v36, %v1975_v4  ;;  %v1981_v38 = vmax.f32 %v1758_v53, 0.0  ;;  %v1983_v21 = vmax.f32 %v1871_v34, 0.0  ;;  %v5580_v53 = vld [vmem:[%s7816_s7 + $0x2e4] ss:$16 sps:$4 sm:$0xff]   ;;  %v5583_v34 = vld [vmem:[%s7816_s7 + $0x2ec] ss:$16 sps:$4 sm:$0xff]  }
 0x304   : > { %v2115_v10 = vmax.f32 %v2114_v62, %v1974_v28  ;;  %v2145_v44 = vmax.f32 %v2144_v47, %v1976_v12  ;;  %v1982_v18 = vmax.f32 %v1760_v16, 0.0  ;;  %v1984_v26 = vmax.f32 %v1873_v17, 0.0  ;;  %3852 = vmatpush1.bf16.msra.mxu1 %v5560_v56  ;;  %4016 = vmatpush1.bf16.msra.mxu0 %v5563_v11 }
 0x305   : > { %v2101_v5 = vmax.f32 %v2100_v37, %v1981_v38  ;;  %v2131_v23 = vmax.f32 %v2130_v1, %v1983_v21  ;;  %3853 = vmatprep.subr.bf16.mxu1 %v5568_v46  ;;  %4017 = vmatprep.subr.bf16.mxu0 %v5571_v22  ;;  %v5578_v37 = vld [vmem:[%s7816_s7 + $0x2e0] ss:$16 sps:$4 sm:$0xff]   ;;  %v5581_v1 = vld [vmem:[%s7816_s7 + $0x2e8] ss:$16 sps:$4 sm:$0xff]  }
 0x306   : > { %v2116_v27 = vmax.f32 %v2115_v10, %v1982_v18  ;;  %v2146_v25 = vmax.f32 %v2145_v44, %v1984_v26  ;;  %v1763_v45 = vpop.f32.mrb[36].mxu1  ;;  %v1876_v31 = vpop.f32.mrb[84].mxu0  ;;  %v5586_v10 = vld [vmem:[%s7816_s7 + $0x304] ss:$16 sps:$4 sm:$0xff]   ;;  %v5589_v44 = vld [vmem:[%s7816_s7 + $0x30c] ss:$16 sps:$4 sm:$0xff]  }
 0x307   : > { %v1764_v32 = vadd.f32 %v1763_v45, %v6865_v8  ;;  %v1877_v24 = vadd.f32 %v1876_v31, %v6875_v0  ;;  %v1765_v61 = vpop.f32.mrb[37].mxu1  ;;  %v1878_v33 = vpop.f32.mrb[85].mxu0 }
 0x308   : > { %v1766_v35 = vadd.f32 %v1765_v61, %v6878_v13  ;;  %v1879_v36 = vadd.f32 %v1878_v33, %v6881_v48  ;;  %v1767_v62 = vpop.f32.mrb[38].mxu1  ;;  %v1880_v15 = vpop.f32.mrb[86].mxu0  ;;  %3854 = vmatpush1.bf16.msra.mxu1 %v5566_v29  ;;  %4018 = vmatpush1.bf16.msra.mxu0 %v5569_v30 }
 0x309   : > { %v1989_v40 = vmax.f32 %v1764_v32, 0.0  ;;  %v1991_v43 = vmax.f32 %v1877_v24, 0.0  ;;  %v1768_v41 = vadd.f32 %v1767_v62, %v6865_v8  ;;  %v1881_v47 = vadd.f32 %v1880_v15, %v6875_v0  ;;  %v1769_v7 = vpop.f32.mrb[39].mxu1  ;;  %v1882_v9 = vpop.f32.mrb[87].mxu0  ;;  %3855 = vmatprep.subr.bf16.mxu1 %v5574_v51  ;;  %4019 = vmatprep.subr.bf16.mxu0 %v5577_v39  ;;  %v5584_v51 = vld [vmem:[%s7816_s7 + $0x300] ss:$16 sps:$4 sm:$0xff]  }
 0x30a   : > { %v1990_v57 = vmax.f32 %v1766_v35, 0.0  ;;  %v1992_v20 = vmax.f32 %v1879_v36, 0.0  ;;  %v1770_v58 = vadd.f32 %v1769_v7, %v6878_v13  ;;  %v1883_v60 = vadd.f32 %v1882_v9, %v6881_v48  ;;  %v5587_v39 = vld [vmem:[%s7816_s7 + $0x308] ss:$16 sps:$4 sm:$0xff]  }
 0x30b   : > { %v2102_v2 = vmax.f32 %v2101_v5, %v1989_v40  ;;  %v2132_v3 = vmax.f32 %v2131_v23, %v1991_v43  ;;  %v1997_v50 = vmax.f32 %v1768_v41, 0.0  ;;  %v1999_v4 = vmax.f32 %v1881_v47, 0.0  ;;  %v5592_v41 = vld [vmem:[%s7816_s7 + $0x324] ss:$16 sps:$4 sm:$0xff]   ;;  %v5595_v47 = vld [vmem:[%s7816_s7 + $0x32c] ss:$16 sps:$4 sm:$0xff]  }
 0x30c   : > { %v2117_v14 = vmax.f32 %v2116_v27, %v1990_v57  ;;  %v2147_v6 = vmax.f32 %v2146_v25, %v1992_v20  ;;  %v1998_v56 = vmax.f32 %v1770_v58, 0.0  ;;  %v2000_v11 = vmax.f32 %v1883_v60, 0.0  ;;  %3856 = vmatpush1.bf16.msra.mxu1 %v5572_v63  ;;  %4020 = vmatpush1.bf16.msra.mxu0 %v5575_v52 }
 0x30d   : > { %v2103_v28 = vmax.f32 %v2102_v2, %v1997_v50  ;;  %v2133_v12 = vmax.f32 %v2132_v3, %v1999_v4  ;;  %3857 = vmatprep.subr.bf16.mxu1 %v5580_v53  ;;  %4021 = vmatprep.subr.bf16.mxu0 %v5583_v34  ;;  %v5590_v2 = vld [vmem:[%s7816_s7 + $0x320] ss:$16 sps:$4 sm:$0xff]   ;;  %v5593_v3 = vld [vmem:[%s7816_s7 + $0x328] ss:$16 sps:$4 sm:$0xff]  }
 0x30e   : > { %v2118_v16 = vmax.f32 %v2117_v14, %v1998_v56  ;;  %v2148_v17 = vmax.f32 %v2147_v6, %v2000_v11  ;;  %v1773_v38 = vpop.f32.mrb[40].mxu1  ;;  %v1886_v21 = vpop.f32.mrb[88].mxu0  ;;  %v5598_v14 = vld [vmem:[%s7816_s7 + $0x344] ss:$16 sps:$4 sm:$0xff]   ;;  %v5601_v6 = vld [vmem:[%s7816_s7 + $0x34c] ss:$16 sps:$4 sm:$0xff]  }
 0x30f   : > { %v1774_v46 = vadd.f32 %v1773_v38, %v6865_v8  ;;  %v1887_v22 = vadd.f32 %v1886_v21, %v6875_v0  ;;  %v1775_v18 = vpop.f32.mrb[41].mxu1  ;;  %v1888_v26 = vpop.f32.mrb[89].mxu0 }
 0x310   : > { %v1776_v5 = vadd.f32 %v1775_v18, %v6878_v13  ;;  %v1889_v23 = vadd.f32 %v1888_v26, %v6881_v48  ;;  %v1777_v27 = vpop.f32.mrb[42].mxu1  ;;  %v1890_v25 = vpop.f32.mrb[90].mxu0  ;;  %3858 = vmatpush1.bf16.msra.mxu1 %v5578_v37  ;;  %4022 = vmatpush1.bf16.msra.mxu0 %v5581_v1  ;;  %v5599_v18 = vld [vmem:[%s7816_s7 + $0x348] ss:$16 sps:$4 sm:$0xff]  }
 0x311   : > { %v2005_v29 = vmax.f32 %v1774_v46, 0.0  ;;  %v2007_v30 = vmax.f32 %v1887_v22, 0.0  ;;  %v1778_v45 = vadd.f32 %v1777_v27, %v6865_v8  ;;  %v1891_v31 = vadd.f32 %v1890_v25, %v6875_v0  ;;  %v1779_v32 = vpop.f32.mrb[43].mxu1  ;;  %v1892_v24 = vpop.f32.mrb[91].mxu0  ;;  %3859 = vmatprep.subr.bf16.mxu1 %v5586_v10  ;;  %4023 = vmatprep.subr.bf16.mxu0 %v5589_v44  ;;  %v5596_v44 = vld [vmem:[%s7816_s7 + $0x340] ss:$16 sps:$4 sm:$0xff]  }
 0x312   : > { %v2006_v61 = vmax.f32 %v1776_v5, 0.0  ;;  %v2008_v33 = vmax.f32 %v1889_v23, 0.0  ;;  %v1780_v35 = vadd.f32 %v1779_v32, %v6878_v13  ;;  %v1893_v36 = vadd.f32 %v1892_v24, %v6881_v48 }
 0x313   : > { %v2104_v62 = vmax.f32 %v2103_v28, %v2005_v29  ;;  %v2134_v15 = vmax.f32 %v2133_v12, %v2007_v30  ;;  %v2013_v40 = vmax.f32 %v1778_v45, 0.0  ;;  %v2015_v43 = vmax.f32 %v1891_v31, 0.0  ;;  %v5604_v30 = vld [vmem:[%s7816_s7 + $0x364] ss:$16 sps:$4 sm:$0xff]   ;;  %v5607_v45 = vld [vmem:[%s7816_s7 + $0x36c] ss:$16 sps:$4 sm:$0xff]  }
 0x314   : > { %v2119_v7 = vmax.f32 %v2118_v16, %v2006_v61  ;;  %v2149_v9 = vmax.f32 %v2148_v17, %v2008_v33  ;;  %v2014_v63 = vmax.f32 %v1780_v35, 0.0  ;;  %v2016_v52 = vmax.f32 %v1893_v36, 0.0  ;;  %3860 = vmatpush1.bf16.msra.mxu1 %v5584_v51  ;;  %4024 = vmatpush1.bf16.msra.mxu0 %v5587_v39  ;;  %v5602_v33 = vld [vmem:[%s7816_s7 + $0x360] ss:$16 sps:$4 sm:$0xff]   ;;  %v5605_v35 = vld [vmem:[%s7816_s7 + $0x368] ss:$16 sps:$4 sm:$0xff]  }
 0x315   : > { %v2105_v57 = vmax.f32 %v2104_v62, %v2013_v40  ;;  %v2135_v20 = vmax.f32 %v2134_v15, %v2015_v43  ;;  %3861 = vmatprep.subr.bf16.mxu1 %v5592_v41  ;;  %4025 = vmatprep.subr.bf16.mxu0 %v5595_v47  ;;  %v2200_v28 = vrot.slane %v6872_v59, 4  ;;  %v5610_v62 = vld [vmem:[%s7816_s7 + $0x384] ss:$16 sps:$4 sm:$0xff]   ;;  %v5613_v15 = vld [vmem:[%s7816_s7 + $0x38c] ss:$16 sps:$4 sm:$0xff]  }
 0x316   : > { %v2120_v58 = vmax.f32 %v2119_v7, %v2014_v63  ;;  %v2150_v60 = vmax.f32 %v2149_v9, %v2016_v52  ;;  %v1783_v50 = vpop.f32.mrb[44].mxu1  ;;  %v1896_v4 = vpop.f32.mrb[92].mxu0  ;;  %v5608_v41 = vld [vmem:[%s7816_s7 + $0x380] ss:$16 sps:$4 sm:$0xff]   ;;  %v5616_v7 = vld [vmem:[%s7816_s7 + $0x3a4] ss:$16 sps:$4 sm:$0xff]  }
 0x317   : > { %v1784_v53 = vadd.f32 %v1783_v50, %v6865_v8  ;;  %v1897_v34 = vadd.f32 %v1896_v4, %v6875_v0  ;;  %v1785_v56 = vpop.f32.mrb[45].mxu1  ;;  %v1898_v11 = vpop.f32.mrb[93].mxu0  ;;  %v2201_v36 = vmax.f32 %v6872_v59, %v2200_v28  ;;  %v5611_v59 = vld [vmem:[%s7816_s7 + $0x388] ss:$16 sps:$4 sm:$0xff]   ;;  %v5619_v9 = vld [vmem:[%s7816_s7 + $0x3ac] ss:$16 sps:$4 sm:$0xff]  }
 0x318   : > { %v1786_v12 = vadd.f32 %v1785_v56, %v6878_v13  ;;  %v1899_v16 = vadd.f32 %v1898_v11, %v6881_v48  ;;  %v1787_v17 = vpop.f32.mrb[46].mxu1  ;;  %v1900_v37 = vpop.f32.mrb[94].mxu0  ;;  %3862 = vmatpush1.bf16.msra.mxu1 %v5590_v2  ;;  %4026 = vmatpush1.bf16.msra.mxu0 %v5593_v3  ;;  %v5614_v52 = vld [vmem:[%s7816_s7 + $0x3a0] ss:$16 sps:$4 sm:$0xff]   ;;  %v5625_v2 = vld [vmem:[%s7816_s7 + $0x3cc] ss:$16 sps:$4 sm:$0xff]  }
 0x319   : > { %v2021_v1 = vmax.f32 %v1784_v53, 0.0  ;;  %v2023_v38 = vmax.f32 %v1897_v34, 0.0  ;;  %v1788_v21 = vadd.f32 %v1787_v17, %v6865_v8  ;;  %v1901_v46 = vadd.f32 %v1900_v37, %v6875_v0  ;;  %v1789_v22 = vpop.f32.mrb[47].mxu1  ;;  %v1902_v10 = vpop.f32.mrb[95].mxu0  ;;  %3863 = vmatprep.subr.bf16.mxu1 %v5598_v14  ;;  %4027 = vmatprep.subr.bf16.mxu0 %v5601_v6  ;;  %v5620_v3 = vld [vmem:[%s7816_s7 + $0x3c0] ss:$16 sps:$4 sm:$0xff]  }
 0x31a   : > { %v2022_v26 = vmax.f32 %v1786_v12, 0.0  ;;  %v2024_v5 = vmax.f32 %v1899_v16, 0.0  ;;  %v1790_v23 = vadd.f32 %v1789_v22, %v6878_v13  ;;  %v1903_v8 = vadd.f32 %v1902_v10, %v6881_v48  ;;  %v5623_v50 = vld [vmem:[%s7816_s7 + $0x3c8] ss:$16 sps:$4 sm:$0xff]   ;;  %v5628_v34 = vld [vmem:[%s7816_s7 + $0x3e4] ss:$16 sps:$4 sm:$0xff]  }
 0x31b   : > { %v2106_v27 = vmax.f32 %v2105_v57, %v2021_v1  ;;  %v2136_v0 = vmax.f32 %v2135_v20, %v2023_v38  ;;  %v2029_v25 = vmax.f32 %v1788_v21, 0.0  ;;  %v2031_v29 = vmax.f32 %v1901_v46, 0.0  ;;  %v5617_v57 = vld [vmem:[%s7816_s7 + $0x3a8] ss:$16 sps:$4 sm:$0xff]   ;;  %v5631_v14 = vld [vmem:[%s7816_s7 + $0x3ec] ss:$16 sps:$4 sm:$0xff]  }
 0x31c   : > { %v2121_v31 = vmax.f32 %v2120_v58, %v2022_v26  ;;  %v2151_v32 = vmax.f32 %v2150_v60, %v2024_v5  ;;  %v2030_v24 = vmax.f32 %v1790_v23, 0.0  ;;  %v2032_v13 = vmax.f32 %v1903_v8, 0.0  ;;  %3864 = vmatpush1.bf16.msra.mxu1 %v5596_v44  ;;  %4028 = vmatpush1.bf16.msra.mxu0 %v5599_v18  ;;  %v5622_v60 = vld [vmem:[%s7816_s7 + $0x3c4] ss:$16 sps:$4 sm:$0xff]   ;;  %v5626_v6 = vld [vmem:[%s7816_s7 + $0x3e0] ss:$16 sps:$4 sm:$0xff]  }
 0x31d   : > { %v7080_v51 = vmax.f32 %v2106_v27, %v2029_v25  ;;  %v7082_v48 = vmax.f32 %v2136_v0, %v2031_v29  ;;  %3865 = vmatprep.subr.bf16.mxu1 %v5604_v30  ;;  %4029 = vmatprep.subr.bf16.mxu0 %v5607_v45  ;;  %v2202_v47 = vrot.slane %v2201_v36, 2  ;;  %v5629_v56 = vld [vmem:[%s7816_s7 + $0x3e8] ss:$16 sps:$4 sm:$0xff]   ;;  %v5634_v12 = vld [vmem:[%s7816_s7 + $0x404] ss:$16 sps:$4 sm:$0xff]  }
 0x31e   : > { %v2122_v39 = vmax.f32 %v2121_v31, %v2030_v24  ;;  %v7084_v61 = vmax.f32 %v2151_v32, %v2032_v13  ;;  %v5637_v16 = vld [vmem:[%s7816_s7 + $0x40c] ss:$16 sps:$4 sm:$0xff]   ;;  %v5632_v17 = vld [vmem:[%s7816_s7 + $0x400] ss:$16 sps:$4 sm:$0xff]   ;;  %v5635_v38 = vld [vmem:[%s7816_s7 + $0x408] ss:$16 sps:$4 sm:$0xff]  }
 0x31f   : > { %v2203_v58 = vmax.f32 %v2201_v36, %v2202_v47  ;;  %v5640_v21 = vld [vmem:[%s7816_s7 + $0x424] ss:$16 sps:$4 sm:$0xff]   ;;  %v5643_v46 = vld [vmem:[%s7816_s7 + $0x42c] ss:$16 sps:$4 sm:$0xff]   ;;  %v5638_v22 = vld [vmem:[%s7816_s7 + $0x420] ss:$16 sps:$4 sm:$0xff]  }
 0x320   : > { %v2218_v40 = vrot.slane %v2122_v39, 4  ;;  %3866 = vmatpush1.bf16.msra.mxu1 %v5602_v33  ;;  %4030 = vmatpush1.bf16.msra.mxu0 %v5605_v35  ;;  %v5641_v10 = vld [vmem:[%s7816_s7 + $0x428] ss:$16 sps:$4 sm:$0xff]   ;;  %v5646_v44 = vld [vmem:[%s7816_s7 + $0x444] ss:$16 sps:$4 sm:$0xff]  }
 0x321   : > { %3867 = vmatprep.subr.bf16.mxu1 %v5610_v62  ;;  %4031 = vmatprep.subr.bf16.mxu0 %v5613_v15  ;;  %v2204_v53 = vrot.slane %v2203_v58, 1  ;;  %v5649_v18 = vld [vmem:[%s7816_s7 + $0x44c] ss:$16 sps:$4 sm:$0xff]   ;;  %v5644_v26 = vld [vmem:[%s7816_s7 + $0x440] ss:$16 sps:$4 sm:$0xff]  }
 0x322   : > { %v2219_v43 = vmax.f32 %v2122_v39, %v2218_v40  ;;  %v5647_v5 = vld [vmem:[%s7816_s7 + $0x448] ss:$16 sps:$4 sm:$0xff]   ;;  %v5652_v23 = vld [vmem:[%s7816_s7 + $0x464] ss:$16 sps:$4 sm:$0xff]   ;;  %v5655_v8 = vld [vmem:[%s7816_s7 + $0x46c] ss:$16 sps:$4 sm:$0xff]  }
 0x323   : > { %v2205_v28 = vmax.f32 %v2203_v58, %v2204_v53  ;;  %v5650_v27 = vld [vmem:[%s7816_s7 + $0x460] ss:$16 sps:$4 sm:$0xff]   ;;  %v5653_v0 = vld [vmem:[%s7816_s7 + $0x468] ss:$16 sps:$4 sm:$0xff]   ;;  %v5658_v25 = vld [vmem:[%s7816_s7 + $0x484] ss:$16 sps:$4 sm:$0xff]  }
 0x324   : > { %v2220_v63 = vrot.slane %v2219_v43, 2  ;;  %3868 = vmatpush1.bf16.msra.mxu1 %v5608_v41  ;;  %4032 = vmatpush1.bf16.msra.mxu0 %v5611_v59  ;;  %v5661_v29 = vld [vmem:[%s7816_s7 + $0x48c] ss:$16 sps:$4 sm:$0xff]   ;;  %v5656_v30 = vld [vmem:[%s7816_s7 + $0x480] ss:$16 sps:$4 sm:$0xff]   ;;  %v2230_v53 = vrot.slane %v7084_v61, 4 }
 0x325   : > { %3869 = vmatprep.subr.bf16.mxu1 %v5616_v7  ;;  %4033 = vmatprep.subr.bf16.mxu0 %v5619_v9  ;;  %v2238_v1 = vpack.c.bf16 %v2205_v28, %v2205_v28  ;;  %v5659_v45 = vld [vmem:[%s7816_s7 + $0x488] ss:$16 sps:$4 sm:$0xff]   ;;  %v5664_v31 = vld [vmem:[%s7816_s7 + $0x4a4] ss:$16 sps:$4 sm:$0xff]   ;;  %v5667_v32 = vld [vmem:[%s7816_s7 + $0x4ac] ss:$16 sps:$4 sm:$0xff]  }
 0x326   : > { %v2221_v20 = vmax.f32 %v2219_v43, %v2220_v63  ;;  %v5662_v24 = vld [vmem:[%s7816_s7 + $0x4a0] ss:$16 sps:$4 sm:$0xff]   ;;  %v5665_v13 = vld [vmem:[%s7816_s7 + $0x4a8] ss:$16 sps:$4 sm:$0xff]   ;;  %v5670_v39 = vld [vmem:[%s7816_s7 + $0x4c4] ss:$16 sps:$4 sm:$0xff]   ;;  %v2231_v28 = vmax.f32 %v7084_v61, %v2230_v53 }
 0x327   : > { %v5673_v33 = vld [vmem:[%s7816_s7 + $0x4cc] ss:$16 sps:$4 sm:$0xff]   ;;  %v5668_v35 = vld [vmem:[%s7816_s7 + $0x4c0] ss:$16 sps:$4 sm:$0xff]   ;;  %v5671_v36 = vld [vmem:[%s7816_s7 + $0x4c8] ss:$16 sps:$4 sm:$0xff]  }
 0x328   : > { %3870 = vmatpush1.bf16.msra.mxu1 %v5614_v52  ;;  %4034 = vmatpush1.bf16.msra.mxu0 %v5617_v57  ;;  %v2222_v4 = vrot.slane %v2221_v20, 1  ;;  %v5676_v62 = vld [vmem:[%s7816_s7 + $0x4e4] ss:$16 sps:$4 sm:$0xff]   ;;  %v5679_v15 = vld [vmem:[%s7816_s7 + $0x4ec] ss:$16 sps:$4 sm:$0xff]  }
 0x329   : > { %3871 = vmatprep.subr.bf16.mxu1 %v5622_v60  ;;  %4035 = vmatprep.subr.bf16.mxu0 %v5625_v2  ;;  %v5674_v40 = vld [vmem:[%s7816_s7 + $0x4e0] ss:$16 sps:$4 sm:$0xff]   ;;  %v5677_v43 = vld [vmem:[%s7816_s7 + $0x4e8] ss:$16 sps:$4 sm:$0xff]   ;;  %v5682_v41 = vld [vmem:[%s7816_s7 + $0x504] ss:$16 sps:$4 sm:$0xff]  }
 0x32a   : > { %v2223_v11 = vmax.f32 %v2221_v20, %v2222_v4  ;;  %v5685_v59 = vld [vmem:[%s7816_s7 + $0x50c] ss:$16 sps:$4 sm:$0xff]   ;;  %v5680_v47 = vld [vmem:[%s7816_s7 + $0x500] ss:$16 sps:$4 sm:$0xff]   ;;  %v5683_v7 = vld [vmem:[%s7816_s7 + $0x508] ss:$16 sps:$4 sm:$0xff]  }
 0x32b   : > { %v5688_v9 = vld [vmem:[%s7816_s7 + $0x524] ss:$16 sps:$4 sm:$0xff]   ;;  %v5691_v63 = vld [vmem:[%s7816_s7 + $0x52c] ss:$16 sps:$4 sm:$0xff]   ;;  %v5686_v52 = vld [vmem:[%s7816_s7 + $0x520] ss:$16 sps:$4 sm:$0xff]  }
 0x32c   : > { %3872 = vmatpush1.bf16.msra.mxu1 %v5620_v3  ;;  %4036 = vmatpush1.bf16.msra.mxu0 %v5623_v50  ;;  %v2241_v37 = vpack.c.bf16 %v2223_v11, %v2223_v11  ;;  %v5689_v57 = vld [vmem:[%s7816_s7 + $0x528] ss:$16 sps:$4 sm:$0xff]   ;;  %v5694_v20 = vld [vmem:[%s7816_s7 + $0x544] ss:$16 sps:$4 sm:$0xff]   ;;  %v5697_v58 = vld [vmem:[%s7816_s7 + $0x54c] ss:$16 sps:$4 sm:$0xff]  }
 0x32d   : > { %3873 = vmatprep.subr.bf16.mxu1 %v5628_v34  ;;  %4037 = vmatprep.subr.bf16.mxu0 %v5631_v14  ;;  %v5692_v60 = vld [vmem:[%s7816_s7 + $0x540] ss:$16 sps:$4 sm:$0xff]   ;;  %v2212_v2 = vrot.slane %v7080_v51, 4  ;;  %v5695_v3 = vld [vmem:[%s7816_s7 + $0x548] ss:$16 sps:$4 sm:$0xff]  }
 0x32e   : > { %v5700_v50 = vld [vmem:[%s7816_s7 + $0x564] ss:$16 sps:$4 sm:$0xff]   ;;  %v5703_v4 = vld [vmem:[%s7816_s7 + $0x56c] ss:$16 sps:$4 sm:$0xff]   ;;  %v5698_v34 = vld [vmem:[%s7816_s7 + $0x560] ss:$16 sps:$4 sm:$0xff]  }
 0x32f   : > { %v2213_v14 = vmax.f32 %v7080_v51, %v2212_v2  ;;  %v5709_v11 = vld [vmem:[%s7816_s7 + $0x58c] ss:$16 sps:$4 sm:$0xff]   ;;  %v5704_v51 = vld [vmem:[%s7816_s7 + $0x580] ss:$16 sps:$4 sm:$0xff]   ;;  %v5761_v2 = vld [vmem:[%s7816_s7 + $0x6a8] ss:$16 sps:$4 sm:$0xff]  }
 0x330   : > { %3874 = vmatpush1.bf16.msra.mxu1 %v5626_v6  ;;  %4038 = vmatpush1.bf16.msra.mxu0 %v5629_v56  ;;  %v5701_v6 = vld [vmem:[%s7816_s7 + $0x568] ss:$16 sps:$4 sm:$0xff]   ;;  %v5706_v56 = vld [vmem:[%s7816_s7 + $0x584] ss:$16 sps:$4 sm:$0xff]   ;;  %v5715_v61 = vld [vmem:[%s7816_s7 + $0x5ac] ss:$16 sps:$4 sm:$0xff]  }
 0x331   : > { %3884 = vmatprep.subr.bf16.mxu1 %v5634_v12  ;;  %4048 = vmatprep.subr.bf16.mxu0 %v5637_v16  ;;  %v2214_v12 = vrot.slane %v2213_v14, 2  ;;  %v5707_v16 = vld [vmem:[%s7816_s7 + $0x588] ss:$16 sps:$4 sm:$0xff]  }
 0x332   : > { %v5767_v53 = vld [vmem:[%s7816_s7 + $0x6c8] ss:$16 sps:$4 sm:$0xff]  }
 0x333   : > { %3876 = vmatmul.mubr.bf16.vlgmr.msra.gmra.mrb[48].mxu1 %v2238_v1  ;;  %4040 = vmatmul.mubr.bf16.vlgmr.msra.gmra.mrb[96].mxu0 %v2238_v1  ;;  %v5710_v1 = vld [vmem:[%s7816_s7 + $0x5a0] ss:$16 sps:$4 sm:$0xff]  }
 0x334   : > { %3885 = vmatpush1.bf16.msra.mxu1 %v5632_v17  ;;  %3916 = vmatprep.mubr.bf16.mxu1 %v2241_v37  ;;  %v5712_v17 = vld [vmem:[%s7816_s7 + $0x5a4] ss:$16 sps:$4 sm:$0xff]  }
 0x335   : > { %4049 = vmatpush1.bf16.msra.mxu0 %v5635_v38  ;;  %4080 = vmatprep.mubr.bf16.mxu0 %v2241_v37  ;;  %v2232_v37 = vrot.slane %v2231_v28, 2  ;;  %v2215_v38 = vmax.f32 %v2213_v14, %v2214_v12  ;;  %v5775_v14 = vld [vmem:[%s7816_s7 + $0x6ec] ss:$16 sps:$4 sm:$0xff]   ;;  %v5779_v12 = vld [vmem:[%s7816_s7 + $0x708] ss:$16 sps:$4 sm:$0xff]  }
 0x336   : > { %3886 = vmatprep.subr.bf16.mxu1 %v5640_v21  ;;  %4050 = vmatprep.subr.bf16.mxu0 %v5643_v46  ;;  %v5713_v21 = vld [vmem:[%s7816_s7 + $0x5a8] ss:$16 sps:$4 sm:$0xff]   ;;  %v5718_v46 = vld [vmem:[%s7816_s7 + $0x5c4] ss:$16 sps:$4 sm:$0xff]  }
 0x338   : > { %3887 = vmatpush1.bf16.msra.mxu1 %v5638_v22  ;;  %v5721_v22 = vld [vmem:[%s7816_s7 + $0x5cc] ss:$16 sps:$4 sm:$0xff]  }
 0x339   : > { %4051 = vmatpush1.bf16.msra.mxu0 %v5641_v10  ;;  %3888 = vmatprep.subr.bf16.mxu1 %v5646_v44  ;;  %v2233_v10 = vmax.f32 %v2231_v28, %v2232_v37  ;;  %v5716_v44 = vld [vmem:[%s7816_s7 + $0x5c0] ss:$16 sps:$4 sm:$0xff]   ;;  %v5781_v28 = vld [vmem:[%s7816_s7 + $0x70c] ss:$16 sps:$4 sm:$0xff]   ;;  %v5785_v37 = vld [vmem:[%s7816_s7 + $0x728] ss:$16 sps:$4 sm:$0xff]  }
 0x33a   : > { %4052 = vmatprep.subr.bf16.mxu0 %v5649_v18  ;;  %v2216_v18 = vrot.slane %v2215_v38, 1 }
 0x33c   : > { %3889 = vmatpush1.bf16.msra.mxu1 %v5644_v26  ;;  %v5719_v26 = vld [vmem:[%s7816_s7 + $0x5c8] ss:$16 sps:$4 sm:$0xff]  }
 0x33d   : > { %4053 = vmatpush1.bf16.msra.mxu0 %v5647_v5  ;;  %3890 = vmatprep.subr.bf16.mxu1 %v5652_v23  ;;  %v5724_v5 = vld [vmem:[%s7816_s7 + $0x5e4] ss:$16 sps:$4 sm:$0xff]   ;;  %v5727_v23 = vld [vmem:[%s7816_s7 + $0x5ec] ss:$16 sps:$4 sm:$0xff]  }
 0x33e   : > { %4054 = vmatprep.subr.bf16.mxu0 %v5655_v8  ;;  %v2234_v8 = vrot.slane %v2233_v10, 1 }
 0x340   : > { %3891 = vmatpush1.bf16.msra.mxu1 %v5650_v27  ;;  %v5722_v27 = vld [vmem:[%s7816_s7 + $0x5e0] ss:$16 sps:$4 sm:$0xff]  }
 0x341   : > { %4055 = vmatpush1.bf16.msra.mxu0 %v5653_v0  ;;  %3892 = vmatprep.subr.bf16.mxu1 %v5658_v25  ;;  %v5725_v0 = vld [vmem:[%s7816_s7 + $0x5e8] ss:$16 sps:$4 sm:$0xff]   ;;  %v2217_v25 = vmax.f32 %v2215_v38, %v2216_v18  ;;  %v5793_v38 = vld [vmem:[%s7816_s7 + $0x74c] ss:$16 sps:$4 sm:$0xff]   ;;  %v5794_v18 = vld [vmem:[%s7816_s7 + $0x760] ss:$16 sps:$4 sm:$0xff]  }
 0x342   : > { %4056 = vmatprep.subr.bf16.mxu0 %v5661_v29  ;;  %v5730_v29 = vld [vmem:[%s7816_s7 + $0x604] ss:$16 sps:$4 sm:$0xff]  }
 0x344   : > { %3893 = vmatpush1.bf16.msra.mxu1 %v5656_v30  ;;  %v5733_v30 = vld [vmem:[%s7816_s7 + $0x60c] ss:$16 sps:$4 sm:$0xff]  }
 0x345   : > { %4057 = vmatpush1.bf16.msra.mxu0 %v5659_v45  ;;  %3894 = vmatprep.subr.bf16.mxu1 %v5664_v31  ;;  %v2235_v45 = vmax.f32 %v2233_v10, %v2234_v8  ;;  %v5728_v31 = vld [vmem:[%s7816_s7 + $0x600] ss:$16 sps:$4 sm:$0xff]   ;;  %v5796_v10 = vld [vmem:[%s7816_s7 + $0x764] ss:$16 sps:$4 sm:$0xff]   ;;  %v5805_v8 = vld [vmem:[%s7816_s7 + $0x78c] ss:$16 sps:$4 sm:$0xff]  }
 0x346   : > { %4058 = vmatprep.subr.bf16.mxu0 %v5667_v32  ;;  %v2240_v32 = vpack.c.bf16 %v2217_v25, %v2217_v25  ;;  %v5808_v25 = vld [vmem:[%s7816_s7 + $0x7a4] ss:$16 sps:$4 sm:$0xff]  }
 0x348   : > { %3895 = vmatpush1.bf16.msra.mxu1 %v5662_v24  ;;  %v5731_v24 = vld [vmem:[%s7816_s7 + $0x608] ss:$16 sps:$4 sm:$0xff]  }
 0x349   : > { %4059 = vmatpush1.bf16.msra.mxu0 %v5665_v13  ;;  %3896 = vmatprep.subr.bf16.mxu1 %v5670_v39  ;;  %v5736_v13 = vld [vmem:[%s7816_s7 + $0x624] ss:$16 sps:$4 sm:$0xff]   ;;  %v2243_v39 = vpack.c.bf16 %v2235_v45, %v2235_v45 }
 0x34a   : > { %4060 = vmatprep.subr.bf16.mxu0 %v5673_v33  ;;  %v5739_v33 = vld [vmem:[%s7816_s7 + $0x62c] ss:$16 sps:$4 sm:$0xff]  }
 0x34c   : > { %3897 = vmatpush1.bf16.msra.mxu1 %v5668_v35  ;;  %v5734_v35 = vld [vmem:[%s7816_s7 + $0x620] ss:$16 sps:$4 sm:$0xff]  }
 0x34d   : > { %4061 = vmatpush1.bf16.msra.mxu0 %v5671_v36  ;;  %3898 = vmatprep.subr.bf16.mxu1 %v5676_v62  ;;  %v5737_v36 = vld [vmem:[%s7816_s7 + $0x628] ss:$16 sps:$4 sm:$0xff]   ;;  %v5742_v62 = vld [vmem:[%s7816_s7 + $0x644] ss:$16 sps:$4 sm:$0xff]  }
 0x34e   : > { %4062 = vmatprep.subr.bf16.mxu0 %v5679_v15  ;;  %v5745_v15 = vld [vmem:[%s7816_s7 + $0x64c] ss:$16 sps:$4 sm:$0xff]  }
 0x350   : > { %3899 = vmatpush1.bf16.msra.mxu1 %v5674_v40  ;;  %v5740_v40 = vld [vmem:[%s7816_s7 + $0x640] ss:$16 sps:$4 sm:$0xff]  }
 0x351   : > { %4063 = vmatpush1.bf16.msra.mxu0 %v5677_v43  ;;  %3900 = vmatprep.subr.bf16.mxu1 %v5682_v41  ;;  %v5743_v43 = vld [vmem:[%s7816_s7 + $0x648] ss:$16 sps:$4 sm:$0xff]   ;;  %v5748_v41 = vld [vmem:[%s7816_s7 + $0x664] ss:$16 sps:$4 sm:$0xff]  }
 0x352   : > { %4064 = vmatprep.subr.bf16.mxu0 %v5685_v59  ;;  %v5751_v59 = vld [vmem:[%s7816_s7 + $0x66c] ss:$16 sps:$4 sm:$0xff]  }
 0x354   : > { %3901 = vmatpush1.bf16.msra.mxu1 %v5680_v47  ;;  %v5746_v47 = vld [vmem:[%s7816_s7 + $0x660] ss:$16 sps:$4 sm:$0xff]  }
 0x355   : > { %4065 = vmatpush1.bf16.msra.mxu0 %v5683_v7  ;;  %3902 = vmatprep.subr.bf16.mxu1 %v5688_v9  ;;  %v5749_v7 = vld [vmem:[%s7816_s7 + $0x668] ss:$16 sps:$4 sm:$0xff]   ;;  %v5754_v9 = vld [vmem:[%s7816_s7 + $0x684] ss:$16 sps:$4 sm:$0xff]  }
 0x356   : > { %4066 = vmatprep.subr.bf16.mxu0 %v5691_v63  ;;  %v5757_v63 = vld [vmem:[%s7816_s7 + $0x68c] ss:$16 sps:$4 sm:$0xff]  }
 0x358   : > { %3903 = vmatpush1.bf16.msra.mxu1 %v5686_v52  ;;  %v5752_v52 = vld [vmem:[%s7816_s7 + $0x680] ss:$16 sps:$4 sm:$0xff]  }
 0x359   : > { %4067 = vmatpush1.bf16.msra.mxu0 %v5689_v57  ;;  %3904 = vmatprep.subr.bf16.mxu1 %v5694_v20  ;;  %v5755_v57 = vld [vmem:[%s7816_s7 + $0x688] ss:$16 sps:$4 sm:$0xff]   ;;  %v5760_v20 = vld [vmem:[%s7816_s7 + $0x6a4] ss:$16 sps:$4 sm:$0xff]  }
 0x35a   : > { %4068 = vmatprep.subr.bf16.mxu0 %v5697_v58  ;;  %v5763_v58 = vld [vmem:[%s7816_s7 + $0x6ac] ss:$16 sps:$4 sm:$0xff]  }
 0x35c   : > { %3905 = vmatpush1.bf16.msra.mxu1 %v5692_v60  ;;  %v5758_v60 = vld [vmem:[%s7816_s7 + $0x6a0] ss:$16 sps:$4 sm:$0xff]  }
 0x35d   : > { %4069 = vmatpush1.bf16.msra.mxu0 %v5695_v3  ;;  %3906 = vmatprep.subr.bf16.mxu1 %v5700_v50  ;;  %v5766_v3 = vld [vmem:[%s7816_s7 + $0x6c4] ss:$16 sps:$4 sm:$0xff]   ;;  %v5769_v50 = vld [vmem:[%s7816_s7 + $0x6cc] ss:$16 sps:$4 sm:$0xff]  }
 0x35e   : > { %4070 = vmatprep.subr.bf16.mxu0 %v5703_v4  ;;  %v5764_v4 = vld [vmem:[%s7816_s7 + $0x6c0] ss:$16 sps:$4 sm:$0xff]  }
 0x360   : > { %3907 = vmatpush1.bf16.msra.mxu1 %v5698_v34  ;;  %v5772_v34 = vld [vmem:[%s7816_s7 + $0x6e4] ss:$16 sps:$4 sm:$0xff]  }
 0x361   : > { %4071 = vmatpush1.bf16.msra.mxu0 %v5701_v6  ;;  %3908 = vmatprep.subr.bf16.mxu1 %v5706_v56  ;;  %v5770_v6 = vld [vmem:[%s7816_s7 + $0x6e0] ss:$16 sps:$4 sm:$0xff]   ;;  %v5773_v56 = vld [vmem:[%s7816_s7 + $0x6e8] ss:$16 sps:$4 sm:$0xff]  }
 0x362   : > { %4072 = vmatprep.subr.bf16.mxu0 %v5709_v11  ;;  %v5778_v11 = vld [vmem:[%s7816_s7 + $0x704] ss:$16 sps:$4 sm:$0xff]  }
 0x364   : > { %3909 = vmatpush1.bf16.msra.mxu1 %v5704_v51  ;;  %v5776_v51 = vld [vmem:[%s7816_s7 + $0x700] ss:$16 sps:$4 sm:$0xff]  }
 0x365   : > { %4073 = vmatpush1.bf16.msra.mxu0 %v5707_v16  ;;  %3910 = vmatprep.subr.bf16.mxu1 %v5712_v17  ;;  %v5784_v16 = vld [vmem:[%s7816_s7 + $0x724] ss:$16 sps:$4 sm:$0xff]   ;;  %v5787_v17 = vld [vmem:[%s7816_s7 + $0x72c] ss:$16 sps:$4 sm:$0xff]  }
 0x366   : > { %4074 = vmatprep.subr.bf16.mxu0 %v5715_v61  ;;  %v5782_v61 = vld [vmem:[%s7816_s7 + $0x720] ss:$16 sps:$4 sm:$0xff]  }
 0x368   : > { %3911 = vmatpush1.bf16.msra.mxu1 %v5710_v1  ;;  %v5790_v1 = vld [vmem:[%s7816_s7 + $0x744] ss:$16 sps:$4 sm:$0xff]  }
 0x369   : > { %4075 = vmatpush1.bf16.msra.mxu0 %v5713_v21  ;;  %3912 = vmatprep.subr.bf16.mxu1 %v5718_v46  ;;  %v5788_v21 = vld [vmem:[%s7816_s7 + $0x740] ss:$16 sps:$4 sm:$0xff]   ;;  %v2224_v46 = vrot.slane %v7082_v48, 4 }
 0x36a   : > { %4076 = vmatprep.subr.bf16.mxu0 %v5721_v22  ;;  %v5791_v22 = vld [vmem:[%s7816_s7 + $0x748] ss:$16 sps:$4 sm:$0xff]  }
 0x36c   : > { %3913 = vmatpush1.bf16.msra.mxu1 %v5716_v44  ;;  %v5799_v44 = vld [vmem:[%s7816_s7 + $0x76c] ss:$16 sps:$4 sm:$0xff]  }
 0x36d   : > { %4077 = vmatpush1.bf16.msra.mxu0 %v5719_v26  ;;  %3914 = vmatprep.subr.bf16.mxu1 %v5724_v5  ;;  %v2225_v26 = vmax.f32 %v7082_v48, %v2224_v46  ;;  %v5797_v5 = vld [vmem:[%s7816_s7 + $0x768] ss:$16 sps:$4 sm:$0xff]   ;;  %v5800_v48 = vld [vmem:[%s7816_s7 + $0x780] ss:$16 sps:$4 sm:$0xff]  }
 0x36e   : > { %4078 = vmatprep.subr.bf16.mxu0 %v5727_v23  ;;  %v5802_v23 = vld [vmem:[%s7816_s7 + $0x784] ss:$16 sps:$4 sm:$0xff]   ;;  %v5869_v46 = vld [vmem:[%s7818_s9 + $0xf0] ss:$8 sps:$4 sm:$0xff]  }
 0x370   : > { %3915 = vmatpush1.bf16.msra.mxu1 %v5722_v27  ;;  %v2226_v27 = vrot.slane %v2225_v26, 2 }
 0x371   : > { %4079 = vmatpush1.bf16.msra.mxu0 %v5725_v0  ;;  %3925 = vmatprep.subr.bf16.mxu1 %v5730_v29  ;;  %v5803_v0 = vld [vmem:[%s7816_s7 + $0x788] ss:$16 sps:$4 sm:$0xff]   ;;  %v5811_v29 = vld [vmem:[%s7816_s7 + $0x7ac] ss:$16 sps:$4 sm:$0xff]  }
 0x372   : > { %4089 = vmatprep.subr.bf16.mxu0 %v5733_v30  ;;  %v5806_v30 = vld [vmem:[%s7816_s7 + $0x7a0] ss:$16 sps:$4 sm:$0xff]   ;;  %v2227_v45 = vmax.f32 %v2225_v26, %v2226_v27  ;;  %v5923_v26 = vld [vmem:[%s7820_s11 + $0x8] sm:$0xff]  }
 0x373   : > { %3917 = vmatmul.mubr.bf16.vlgmr.msra.gmra.mrb[48].mxu1 %v2240_v32  ;;  %v5928_v27 = vld [vmem:[%s7820_s11 + $0x60] sm:$0xff]  }
 0x374   : > { %4081 = vmatmul.mubr.bf16.vlgmr.msra.gmra.mrb[96].mxu0 %v2240_v32  ;;  %3926 = vmatpush1.bf16.msra.mxu1 %v5728_v31  ;;  %v5809_v31 = vld [vmem:[%s7816_s7 + $0x7a8] ss:$16 sps:$4 sm:$0xff]   ;;  %v5814_v32 = vld [vmem:[%s7816_s7 + $0x7c4] ss:$16 sps:$4 sm:$0xff]  }
 0x375   : > { %3957 = vmatprep.mubr.bf16.mxu1 %v2243_v39  ;;  %4090 = vmatpush1.bf16.msra.mxu0 %v5731_v24  ;;  %v5817_v24 = vld [vmem:[%s7816_s7 + $0x7cc] ss:$16 sps:$4 sm:$0xff]  }
 0x376   : > { %4121 = vmatprep.mubr.bf16.mxu0 %v2243_v39  ;;  %3927 = vmatprep.subr.bf16.mxu1 %v5736_v13  ;;  %v5812_v13 = vld [vmem:[%s7816_s7 + $0x7c0] ss:$16 sps:$4 sm:$0xff]   ;;  %v2228_v39 = vrot.slane %v2227_v45, 1 }
 0x377   : > { %4091 = vmatprep.subr.bf16.mxu0 %v5739_v33  ;;  %v5815_v33 = vld [vmem:[%s7816_s7 + $0x7c8] ss:$16 sps:$4 sm:$0xff]  }
 0x378   : > { %3928 = vmatpush1.bf16.msra.mxu1 %v5734_v35  ;;  %v5820_v35 = vld [vmem:[%s7816_s7 + $0x7e4] ss:$16 sps:$4 sm:$0xff]  }
 0x379   : > { %4092 = vmatpush1.bf16.msra.mxu0 %v5737_v36  ;;  %3929 = vmatprep.subr.bf16.mxu1 %v5742_v62  ;;  %v5823_v36 = vld [vmem:[%s7816_s7 + $0x7ec] ss:$16 sps:$4 sm:$0xff]   ;;  %v5818_v62 = vld [vmem:[%s7816_s7 + $0x7e0] ss:$16 sps:$4 sm:$0xff]  }
 0x37a   : > { %4093 = vmatprep.subr.bf16.mxu0 %v5745_v15  ;;  %v5821_v15 = vld [vmem:[%s7816_s7 + $0x7e8] ss:$16 sps:$4 sm:$0xff]  }
 0x37c   : > { %3930 = vmatpush1.bf16.msra.mxu1 %v5740_v40  ;;  %v2229_v40 = vmax.f32 %v2227_v45, %v2228_v39  ;;  %v7672_v45 = vld [vmem:[%s7817_s8] sm:$0xf] }
 0x37d   : > { %4094 = vmatpush1.bf16.msra.mxu0 %v5743_v43  ;;  %3931 = vmatprep.subr.bf16.mxu1 %v5748_v41  ;;  %v5826_v43 = vld [vmem:[%s7818_s9 + $0x4] ss:$8 sps:$4 sm:$0xff]   ;;  %v5824_v41 = vld [vmem:[%s7818_s9] ss:$8 sps:$4 sm:$0xff]  }
 0x37e   : > { %4095 = vmatprep.subr.bf16.mxu0 %v5751_v59  ;;  %v2242_v59 = vpack.c.bf16 %v2229_v40, %v2229_v40 }
 0x380   : > { %3932 = vmatpush1.bf16.msra.mxu1 %v5746_v47  ;;  %v5829_v47 = vld [vmem:[%s7818_s9 + $0x14] ss:$8 sps:$4 sm:$0xff]  }
 0x381   : > { %4096 = vmatpush1.bf16.msra.mxu0 %v5749_v7  ;;  %3933 = vmatprep.subr.bf16.mxu1 %v5754_v9  ;;  %v5827_v7 = vld [vmem:[%s7818_s9 + $0x10] ss:$8 sps:$4 sm:$0xff]   ;;  %v5832_v9 = vld [vmem:[%s7818_s9 + $0x24] ss:$8 sps:$4 sm:$0xff]  }
 0x382   : > { %4097 = vmatprep.subr.bf16.mxu0 %v5757_v63  ;;  %v5830_v63 = vld [vmem:[%s7818_s9 + $0x20] ss:$8 sps:$4 sm:$0xff]  }
 0x384   : > { %3934 = vmatpush1.bf16.msra.mxu1 %v5752_v52  ;;  %v5835_v52 = vld [vmem:[%s7818_s9 + $0x34] ss:$8 sps:$4 sm:$0xff]  }
 0x385   : > { %4098 = vmatpush1.bf16.msra.mxu0 %v5755_v57  ;;  %3935 = vmatprep.subr.bf16.mxu1 %v5760_v20  ;;  %v5833_v57 = vld [vmem:[%s7818_s9 + $0x30] ss:$8 sps:$4 sm:$0xff]   ;;  %v5838_v20 = vld [vmem:[%s7818_s9 + $0x44] ss:$8 sps:$4 sm:$0xff]  }
 0x386   : > { %4099 = vmatprep.subr.bf16.mxu0 %v5763_v58  ;;  %v5836_v58 = vld [vmem:[%s7818_s9 + $0x40] ss:$8 sps:$4 sm:$0xff]  }
 0x388   : > { %3936 = vmatpush1.bf16.msra.mxu1 %v5758_v60  ;;  %v5841_v60 = vld [vmem:[%s7818_s9 + $0x54] ss:$8 sps:$4 sm:$0xff]  }
 0x389   : > { %4100 = vmatpush1.bf16.msra.mxu0 %v5761_v2  ;;  %3937 = vmatprep.subr.bf16.mxu1 %v5766_v3  ;;  %v5839_v2 = vld [vmem:[%s7818_s9 + $0x50] ss:$8 sps:$4 sm:$0xff]   ;;  %v5844_v3 = vld [vmem:[%s7818_s9 + $0x64] ss:$8 sps:$4 sm:$0xff]  }
 0x38a   : > { %4101 = vmatprep.subr.bf16.mxu0 %v5769_v50  ;;  %v5842_v50 = vld [vmem:[%s7818_s9 + $0x60] ss:$8 sps:$4 sm:$0xff]  }
 0x38c   : > { %3938 = vmatpush1.bf16.msra.mxu1 %v5764_v4  ;;  %v5847_v4 = vld [vmem:[%s7818_s9 + $0x74] ss:$8 sps:$4 sm:$0xff]  }
 0x38d   : > { %4102 = vmatpush1.bf16.msra.mxu0 %v5767_v53  ;;  %3939 = vmatprep.subr.bf16.mxu1 %v5772_v34  ;;  %v5845_v53 = vld [vmem:[%s7818_s9 + $0x70] ss:$8 sps:$4 sm:$0xff]   ;;  %v5850_v34 = vld [vmem:[%s7818_s9 + $0x84] ss:$8 sps:$4 sm:$0xff]  }
 0x38e   : > { %4103 = vmatprep.subr.bf16.mxu0 %v5775_v14  ;;  %v5848_v14 = vld [vmem:[%s7818_s9 + $0x80] ss:$8 sps:$4 sm:$0xff]  }
 0x390   : > { %3940 = vmatpush1.bf16.msra.mxu1 %v5770_v6  ;;  %v5853_v6 = vld [vmem:[%s7818_s9 + $0x94] ss:$8 sps:$4 sm:$0xff]  }
 0x391   : > { %4104 = vmatpush1.bf16.msra.mxu0 %v5773_v56  ;;  %3941 = vmatprep.subr.bf16.mxu1 %v5778_v11  ;;  %v5851_v56 = vld [vmem:[%s7818_s9 + $0x90] ss:$8 sps:$4 sm:$0xff]   ;;  %v5856_v11 = vld [vmem:[%s7818_s9 + $0xa4] ss:$8 sps:$4 sm:$0xff]  }
 0x392   : > { %4105 = vmatprep.subr.bf16.mxu0 %v5781_v28  ;;  %v5854_v28 = vld [vmem:[%s7818_s9 + $0xa0] ss:$8 sps:$4 sm:$0xff]  }
 0x394   : > { %3942 = vmatpush1.bf16.msra.mxu1 %v5776_v51  ;;  %v5859_v51 = vld [vmem:[%s7818_s9 + $0xb4] ss:$8 sps:$4 sm:$0xff]  }
 0x395   : > { %4106 = vmatpush1.bf16.msra.mxu0 %v5779_v12  ;;  %3943 = vmatprep.subr.bf16.mxu1 %v5784_v16  ;;  %v5857_v12 = vld [vmem:[%s7818_s9 + $0xb0] ss:$8 sps:$4 sm:$0xff]   ;;  %v5862_v16 = vld [vmem:[%s7818_s9 + $0xc4] ss:$8 sps:$4 sm:$0xff]  }
 0x396   : > { %4107 = vmatprep.subr.bf16.mxu0 %v5787_v17  ;;  %v5860_v17 = vld [vmem:[%s7818_s9 + $0xc0] ss:$8 sps:$4 sm:$0xff]  }
 0x398   : > { %3944 = vmatpush1.bf16.msra.mxu1 %v5782_v61  ;;  %v5865_v61 = vld [vmem:[%s7818_s9 + $0xd4] ss:$8 sps:$4 sm:$0xff]  }
 0x399   : > { %4108 = vmatpush1.bf16.msra.mxu0 %v5785_v37  ;;  %3945 = vmatprep.subr.bf16.mxu1 %v5790_v1  ;;  %v5863_v37 = vld [vmem:[%s7818_s9 + $0xd0] ss:$8 sps:$4 sm:$0xff]   ;;  %v5868_v1 = vld [vmem:[%s7818_s9 + $0xe4] ss:$8 sps:$4 sm:$0xff]  }
 0x39a   : > { %4109 = vmatprep.subr.bf16.mxu0 %v5793_v38  ;;  %v5866_v38 = vld [vmem:[%s7818_s9 + $0xe0] ss:$8 sps:$4 sm:$0xff]  }
 0x39c   : > { %3946 = vmatpush1.bf16.msra.mxu1 %v5788_v21  ;;  %v5871_v21 = vld [vmem:[%s7818_s9 + $0xf4] ss:$8 sps:$4 sm:$0xff]  }
 0x39d   : > { %4110 = vmatpush1.bf16.msra.mxu0 %v5791_v22  ;;  %3947 = vmatprep.subr.bf16.mxu1 %v5796_v10  ;;  %v5874_v22 = vld [vmem:[%s7818_s9 + $0x104] ss:$8 sps:$4 sm:$0xff]  }
 0x39e   : > { %4111 = vmatprep.subr.bf16.mxu0 %v5799_v44  ;;  %v5920_v10 = vld [vmem:[%s7820_s11 + $0x40] sm:$0xff]  }
 0x39f   : > { %v5921_v44 = vld [vmem:[%s7820_s11] sm:$0xff]  }
 0x3a0   : > { %3948 = vmatpush1.bf16.msra.mxu1 %v5794_v18  ;;  %v5922_v18 = vld [vmem:[%s7820_s11 + $0x48] sm:$0xff]  }
 0x3a1   : > { %4112 = vmatpush1.bf16.msra.mxu0 %v5797_v5  ;;  %3949 = vmatprep.subr.bf16.mxu1 %v5802_v23  ;;  %v5924_v5 = vld [vmem:[%s7820_s11 + $0x50] sm:$0xff]  }
 0x3a2   : > { %4113 = vmatprep.subr.bf16.mxu0 %v5805_v8  ;;  %v5925_v23 = vld [vmem:[%s7820_s11 + $0x10] sm:$0xff]   ;;  %v5926_v8 = vld [vmem:[%s7820_s11 + $0x58] sm:$0xff]  }
 0x3a4   : > { %3950 = vmatpush1.bf16.msra.mxu1 %v5800_v48  ;;  %v5927_v48 = vld [vmem:[%s7820_s11 + $0x18] sm:$0xff]  }
 0x3a5   : > { %4114 = vmatpush1.bf16.msra.mxu0 %v5803_v0  ;;  %3951 = vmatprep.subr.bf16.mxu1 %v5808_v25  ;;  %v5929_v0 = vld [vmem:[%s7820_s11 + $0x20] sm:$0xff]   ;;  %v5930_v25 = vld [vmem:[%s7820_s11 + $0x68] sm:$0xff]  }
 0x3a6   : > { %4115 = vmatprep.subr.bf16.mxu0 %v5811_v29  ;;  %v5931_v29 = vld [vmem:[%s7820_s11 + $0x28] sm:$0xff]  }
 0x3a8   : > { %3952 = vmatpush1.bf16.msra.mxu1 %v5806_v30  ;;  %v5932_v30 = vld [vmem:[%s7820_s11 + $0x70] sm:$0xff]  }
 0x3a9   : > { %4116 = vmatpush1.bf16.msra.mxu0 %v5809_v31  ;;  %3953 = vmatprep.subr.bf16.mxu1 %v5814_v32  ;;  %v2505_v31 = vrot.slane %v7672_v45, %v6171_v54  ;;  %v2509_v32 = vrot.slane %v7672_v45, %v6161_v49 }
 0x3aa   : > { %4117 = vmatprep.subr.bf16.mxu0 %v5817_v24  ;;  %v2517_v24 = vrot.slane %v7672_v45, %v1107_v19  ;;  %v5877_v19 = vld [vmem:[%s7818_s9 + $0x114] ss:$8 sps:$4 sm:$0xff]  }
 0x3ac   : > { %3954 = vmatpush1.bf16.msra.mxu1 %v5812_v13 }
 0x3ad   : > { %4118 = vmatpush1.bf16.msra.mxu0 %v5815_v33  ;;  %3955 = vmatprep.subr.bf16.mxu1 %v5820_v35 }
 0x3ae   : > { %4119 = vmatprep.subr.bf16.mxu0 %v5823_v36 }
 0x3b0   : > { %3956 = vmatpush1.bf16.msra.mxu1 %v5818_v62 }
 0x3b1   : > { %4120 = vmatpush1.bf16.msra.mxu0 %v5821_v15  ;;  %4530 = vmatprep.subr.bf16.mxu1 %v5826_v43 }
 0x3b2   : > { %5289 = vmatprep.subr.bf16.mxu0 %v5920_v10  ;;  %v5919_v10 = vld [vmem:[%s7818_s9 + $0x1f4] ss:$8 sps:$4 sm:$0xff]  }
 0x3b3   : > { %3958 = vmatmul.mubr.bf16.vlgmr.msra.gmra.mrb[48].mxu1 %v2242_v59 }
 0x3b4   : > { %4122 = vmatmul.mubr.bf16.vlgmr.msra.gmra.mrb[96].mxu0 %v2242_v59  ;;  %4531 = vmatpush1.bf16.msra.mxu1 %v5824_v41 }
 0x3b5   : > { %4532 = vmatprep.subr.bf16.mxu1 %v5829_v47  ;;  %5290 = vmatpush3.bf16.msra.mxu0 %v5921_v44  ;;  %v5917_v44 = vld [vmem:[%s7818_s9 + $0x1f0] ss:$8 sps:$4 sm:$0xff]  }
 0x3b6   : > { %5291 = vmatprep.subr.bf16.mxu0 %v5922_v18 }
 0x3b8   : > { %4533 = vmatpush1.bf16.msra.mxu1 %v5827_v7  ;;  %v5872_v7 = vld [vmem:[%s7818_s9 + $0x100] ss:$8 sps:$4 sm:$0xff]  }
 0x3b9   : > { %4534 = vmatprep.subr.bf16.mxu1 %v5832_v9  ;;  %5292 = vmatpush3.bf16.msra.mxu0 %v5923_v26 }
 0x3ba   : > { %5293 = vmatprep.subr.bf16.mxu0 %v5924_v5  ;;  %v5934_v5 = vld [vmem:[%s7820_s11 + $0x78] sm:$0xff]  }
 0x3bc   : > { %4535 = vmatpush1.bf16.msra.mxu1 %v5830_v63  ;;  %v5875_v63 = vld [vmem:[%s7818_s9 + $0x110] ss:$8 sps:$4 sm:$0xff]  }
 0x3bd   : > { %4536 = vmatprep.subr.bf16.mxu1 %v5835_v52  ;;  %5294 = vmatpush3.bf16.msra.mxu0 %v5925_v23  ;;  %v5880_v52 = vld [vmem:[%s7818_s9 + $0x124] ss:$8 sps:$4 sm:$0xff]   ;;  %v5935_v23 = vld [vmem:[%s7820_s11 + $0x38] sm:$0xff]  }
 0x3be   : > { %5295 = vmatprep.subr.bf16.mxu0 %v5926_v8  ;;  %v4198_v8 = vld [vmem:[%s7819_s10] sm:$0x3] }
 0x3c0   : > { %4537 = vmatpush1.bf16.msra.mxu1 %v5833_v57  ;;  %v5878_v57 = vld [vmem:[%s7818_s9 + $0x120] ss:$8 sps:$4 sm:$0xff]  }
 0x3c1   : > { %4538 = vmatprep.subr.bf16.mxu1 %v5838_v20  ;;  %5296 = vmatpush3.bf16.msra.mxu0 %v5927_v48  ;;  %v5883_v20 = vld [vmem:[%s7818_s9 + $0x134] ss:$8 sps:$4 sm:$0xff]   ;;  %v4203_v48 = vrot.slane %v4198_v8, %v6171_v54 }
 0x3c2   : > { %5297 = vmatprep.subr.bf16.mxu0 %v5928_v27  ;;  %v4207_v27 = vrot.slane %v4198_v8, %v6161_v49 }
 0x3c4   : > { %4539 = vmatpush1.bf16.msra.mxu1 %v5836_v58  ;;  %v5881_v58 = vld [vmem:[%s7818_s9 + $0x130] ss:$8 sps:$4 sm:$0xff]  }
 0x3c5   : > { %4540 = vmatprep.subr.bf16.mxu1 %v5841_v60  ;;  %5298 = vmatpush3.bf16.msra.mxu0 %v5929_v0  ;;  %v5886_v60 = vld [vmem:[%s7818_s9 + $0x144] ss:$8 sps:$4 sm:$0xff]  }
 0x3c6   : > { %5299 = vmatprep.subr.bf16.mxu0 %v5930_v25 }
 0x3c8   : > { %4541 = vmatpush1.bf16.msra.mxu1 %v5839_v2  ;;  %v5884_v2 = vld [vmem:[%s7818_s9 + $0x140] ss:$8 sps:$4 sm:$0xff]  }
 0x3c9   : > { %4542 = vmatprep.subr.bf16.mxu1 %v5844_v3  ;;  %5300 = vmatpush3.bf16.msra.mxu0 %v5931_v29  ;;  %v5889_v3 = vld [vmem:[%s7818_s9 + $0x154] ss:$8 sps:$4 sm:$0xff]  }
 0x3ca   : > { %5301 = vmatprep.subr.bf16.mxu0 %v5932_v30 }
 0x3cc   : > { %4543 = vmatpush1.bf16.msra.mxu1 %v5842_v50  ;;  %v5887_v50 = vld [vmem:[%s7818_s9 + $0x150] ss:$8 sps:$4 sm:$0xff]  }
 0x3cd   : > { %4544 = vmatprep.subr.bf16.mxu1 %v5847_v4  ;;  %v5892_v4 = vld [vmem:[%s7818_s9 + $0x164] ss:$8 sps:$4 sm:$0xff]  }
 0x3d0   : > { %4545 = vmatpush1.bf16.msra.mxu1 %v5845_v53  ;;  %v5890_v53 = vld [vmem:[%s7818_s9 + $0x160] ss:$8 sps:$4 sm:$0xff]  }
 0x3d1   : > { %4546 = vmatprep.subr.bf16.mxu1 %v5850_v34  ;;  %v5895_v34 = vld [vmem:[%s7818_s9 + $0x174] ss:$8 sps:$4 sm:$0xff]  }
 0x3d4   : > { %4547 = vmatpush1.bf16.msra.mxu1 %v5848_v14  ;;  %v5893_v14 = vld [vmem:[%s7818_s9 + $0x170] ss:$8 sps:$4 sm:$0xff]  }
 0x3d5   : > { %4548 = vmatprep.subr.bf16.mxu1 %v5853_v6  ;;  %v5898_v6 = vld [vmem:[%s7818_s9 + $0x184] ss:$8 sps:$4 sm:$0xff]  }
 0x3d8   : > { %4549 = vmatpush1.bf16.msra.mxu1 %v5851_v56  ;;  %v5896_v56 = vld [vmem:[%s7818_s9 + $0x180] ss:$8 sps:$4 sm:$0xff]  }
 0x3d9   : > { %4550 = vmatprep.subr.bf16.mxu1 %v5856_v11  ;;  %v5901_v11 = vld [vmem:[%s7818_s9 + $0x194] ss:$8 sps:$4 sm:$0xff]  }
 0x3dc   : > { %4551 = vmatpush1.bf16.msra.mxu1 %v5854_v28  ;;  %v5899_v28 = vld [vmem:[%s7818_s9 + $0x190] ss:$8 sps:$4 sm:$0xff]  }
 0x3dd   : > { %4552 = vmatprep.subr.bf16.mxu1 %v5859_v51  ;;  %v5904_v51 = vld [vmem:[%s7818_s9 + $0x1a4] ss:$8 sps:$4 sm:$0xff]  }
 0x3e0   : > { %4553 = vmatpush1.bf16.msra.mxu1 %v5857_v12  ;;  %v5902_v12 = vld [vmem:[%s7818_s9 + $0x1a0] ss:$8 sps:$4 sm:$0xff]  }
 0x3e1   : > { %4554 = vmatprep.subr.bf16.mxu1 %v5862_v16  ;;  %v5907_v16 = vld [vmem:[%s7818_s9 + $0x1b4] ss:$8 sps:$4 sm:$0xff]  }
 0x3e4   : > { %4555 = vmatpush1.bf16.msra.mxu1 %v5860_v17  ;;  %v5905_v17 = vld [vmem:[%s7818_s9 + $0x1b0] ss:$8 sps:$4 sm:$0xff]  }
 0x3e5   : > { %4556 = vmatprep.subr.bf16.mxu1 %v5865_v61  ;;  %v5910_v61 = vld [vmem:[%s7818_s9 + $0x1c4] ss:$8 sps:$4 sm:$0xff]  }
 0x3e8   : > { %4557 = vmatpush1.bf16.msra.mxu1 %v5863_v37  ;;  %v5908_v37 = vld [vmem:[%s7818_s9 + $0x1c0] ss:$8 sps:$4 sm:$0xff]  }
 0x3e9   : > { %4558 = vmatprep.subr.bf16.mxu1 %v5868_v1  ;;  %v5913_v1 = vld [vmem:[%s7818_s9 + $0x1d4] ss:$8 sps:$4 sm:$0xff]  }
 0x3ec   : > { %4559 = vmatpush1.bf16.msra.mxu1 %v5866_v38  ;;  %v5911_v38 = vld [vmem:[%s7818_s9 + $0x1d0] ss:$8 sps:$4 sm:$0xff]  }
 0x3ed   : > { %4560 = vmatprep.subr.bf16.mxu1 %v5871_v21  ;;  %v5916_v21 = vld [vmem:[%s7818_s9 + $0x1e4] ss:$8 sps:$4 sm:$0xff]  }
 0x3f0   : > { %4561 = vmatpush1.bf16.msra.mxu1 %v5869_v46  ;;  %v5914_v46 = vld [vmem:[%s7818_s9 + $0x1e0] ss:$8 sps:$4 sm:$0xff]  }
 0x3f1   : > { %4571 = vmatprep.subr.bf16.mxu1 %v5874_v22  ;;  %v2513_v22 = vrot.slane %v7672_v45, %v6174_v55  ;;  %v5933_v55 = vld [vmem:[%s7820_s11 + $0x30] sm:$0xff]  }
 0x3f2   : > { %5302 = vmatpush3.bf16.msra.mxu0 %v5933_v55 }
 0x3f3   : > { %5303 = vmatprep.subr.bf16.mxu0 %v5934_v5 }
 0x3f6   : > { %5304 = vmatpush3.bf16.msra.mxu0 %v5935_v23 }
 0x486   : > { %v3959_v13 = vpop.f32.mrb[48].mxu1 }
 0x487   : > { %v5351_v39 = vadd.f32 %v3959_v13, %v2505_v31  ;;  %v7681_v33 = vpop.f32.mrb[96].mxu0  ;;  %v3961_v35 = vpop.f32.mrb[49].mxu1 }
 0x488   : > { %v5352_v36 = vadd.f32 %v3961_v35, %v2509_v32  ;;  %v4125_v62 = vpop.f32.mrb[97].mxu0  ;;  %v3963_v15 = vpop.f32.mrb[50].mxu1  ;;  %v5353_v18 = vadd.f32 %v7681_v33, %v2513_v22 }
 0x489   : > { %v5354_v40 = vadd.f32 %v4125_v62, %v2517_v24  ;;  %v4127_v43 = vpop.f32.mrb[98].mxu0  ;;  %v3964_v41 = vpop.f32.mrb[51].mxu1  ;;  %v4130_v42 = vpack.c.bf16 %v5351_v39, %v5351_v39  ;;  %v5257_v39 = vld [vmem:[%s7821_s12] ss:$0 sm:$0xff] }
 0x48a   : > { %v4131_v59 = vpack.c.bf16 %v5352_v36, %v5352_v36  ;;  %v4128_v47 = vpop.f32.mrb[99].mxu0  ;;  %v4132_v26 = vpack.c.bf16 %v5353_v18, %v5353_v18 }
 0x48b   : > { %v4133_v9 = vpack.c.bf16 %v5354_v40, %v5354_v40 }
 0x48c   : > { %4562 = vmatprep.mubr.bf16.mxu1 %v4131_v59 }
 0x48d   : > { %4563 = vmatmul.mubr.bf16.vlgmr.msra.gmra.mrb[52].mxu1 %v4130_v42 }
 0x48e   : > { %4572 = vmatpush1.bf16.msra.mxu1 %v5872_v7  ;;  %4603 = vmatprep.mubr.bf16.mxu1 %v4133_v9 }
 0x48f   : > { %4573 = vmatprep.subr.bf16.mxu1 %v5877_v19 }
 0x492   : > { %4574 = vmatpush1.bf16.msra.mxu1 %v5875_v63 }
 0x493   : > { %4575 = vmatprep.subr.bf16.mxu1 %v5880_v52 }
 0x496   : > { %4576 = vmatpush1.bf16.msra.mxu1 %v5878_v57 }
 0x497   : > { %4577 = vmatprep.subr.bf16.mxu1 %v5883_v20 }
 0x49a   : > { %4578 = vmatpush1.bf16.msra.mxu1 %v5881_v58 }
 0x49b   : > { %4579 = vmatprep.subr.bf16.mxu1 %v5886_v60 }
 0x49e   : > { %4580 = vmatpush1.bf16.msra.mxu1 %v5884_v2 }
 0x49f   : > { %4581 = vmatprep.subr.bf16.mxu1 %v5889_v3 }
 0x4a2   : > { %4582 = vmatpush1.bf16.msra.mxu1 %v5887_v50 }
 0x4a3   : > { %4583 = vmatprep.subr.bf16.mxu1 %v5892_v4 }
 0x4a6   : > { %4584 = vmatpush1.bf16.msra.mxu1 %v5890_v53 }
 0x4a7   : > { %4585 = vmatprep.subr.bf16.mxu1 %v5895_v34 }
 0x4aa   : > { %4586 = vmatpush1.bf16.msra.mxu1 %v5893_v14 }
 0x4ab   : > { %4587 = vmatprep.subr.bf16.mxu1 %v5898_v6 }
 0x4ae   : > { %4588 = vmatpush1.bf16.msra.mxu1 %v5896_v56 }
 0x4af   : > { %4589 = vmatprep.subr.bf16.mxu1 %v5901_v11 }
 0x4b2   : > { %4590 = vmatpush1.bf16.msra.mxu1 %v5899_v28 }
 0x4b3   : > { %4591 = vmatprep.subr.bf16.mxu1 %v5904_v51 }
 0x4b6   : > { %4592 = vmatpush1.bf16.msra.mxu1 %v5902_v12 }
 0x4b7   : > { %4593 = vmatprep.subr.bf16.mxu1 %v5907_v16 }
 0x4ba   : > { %4594 = vmatpush1.bf16.msra.mxu1 %v5905_v17 }
 0x4bb   : > { %4595 = vmatprep.subr.bf16.mxu1 %v5910_v61 }
 0x4be   : > { %4596 = vmatpush1.bf16.msra.mxu1 %v5908_v37 }
 0x4bf   : > { %4597 = vmatprep.subr.bf16.mxu1 %v5913_v1 }
 0x4c2   : > { %4598 = vmatpush1.bf16.msra.mxu1 %v5911_v38 }
 0x4c3   : > { %4599 = vmatprep.subr.bf16.mxu1 %v5916_v21 }
 0x4c6   : > { %4600 = vmatpush1.bf16.msra.mxu1 %v5914_v46 }
 0x4c7   : > { %4601 = vmatprep.subr.bf16.mxu1 %v5919_v10 }
 0x4ca   : > { %4602 = vmatpush1.bf16.msra.mxu1 %v5917_v44 }
 0x4cd   : > { %4604 = vmatmul.mubr.bf16.vlgmr.msra.gmra.mrb[52].mxu1 %v4132_v26 }
 0x5a0   : > { %v4605_v0 = vpop.f32.mrb[52].mxu1 }
 0x5a1   : > { %v5355_v25 = vadd.f32 %v4605_v0, %v4203_v48  ;;  %v4607_v29 = vpop.f32.mrb[53].mxu1 }
 0x5a2   : > { %v5356_v30 = vadd.f32 %v4607_v29, %v4207_v27  ;;  %v4609_v45 = vpop.f32.mrb[54].mxu1 }
 0x5a3   : > { %v4610_v31 = vpop.f32.mrb[55].mxu1  ;;  %v4612_v24 = vpack.c.bf16 %v5355_v25, %v5355_v25 }
 0x5a4   : > { %v4613_v32 = vpack.c.bf16 %v5356_v30, %v5356_v30 }
 0x5a6   : > { %4781 = vmatprep.mubr.bf16.mxu0 %v4613_v32 }
 0x5a7   : > { %4782 = vmatmul.mubr.bf16.vlgmr.msra.gmra.mrb[100].mxu0 %v4612_v24 }
 0x67a   : > { %v5305_v13 = vpop.f32.mrb[100].mxu0 }
 0x67b   : > { %v5306_v33 = vpop.f32.mrb[101].mxu0 }
 0x67c   : > { %v5307_v54 = vadd.f32 %v5306_v33, %v5305_v13  ;;  %v5308_v35 = vpop.f32.mrb[102].mxu0 }
 0x67d   : > { %v5309_v49 = vpop.f32.mrb[103].mxu0 }
 0x67e   : > { %v4784_v36 = vadd.f32 %v5307_v54, %v5257_v39 }
 0x680   : > { %4790 = vst.msk [vmem:[%s464_s21] sm:$0x1] %vm4789_vm1, %v4784_v36 }
 0x681 PF: > { %s23_s27 = sadd.s32 1, %s5958_s27   ;;  %s7823_s25 = smov %s5954_s26 }
 0x682   : > { %p20_p5 = scmp.ge.s32.totalorder %s23_s27, 4   ;;  %s7824_s26 = smov %s7826_s28 }
 0x684   :  { %22 = sbr.rel (!%p20_p5) target bundleno = 2 (0x2), region = 110 }

// kernel: pointnet_cls_forward.3
= control target key start
LH: loop header
LB: loop body
LE: loop exit
PB: predicated region body
PF: predicated region fallthrough
CT: control target
= control target key end

     0   :  { %s7924_s0 = inlined_call_operand.vmem [shape: f32[2,128,3], index: 0, kind: input, shape index: {}]   ;;  %s7925_s1 = inlined_call_operand.vmem [shape: f32[2,3,64], index: 1, kind: input, shape index: {}]   ;;  %s7926_s2 = inlined_call_operand.vmem [shape: f32[1,64], index: 2, kind: input, shape index: {}]   ;;  %s7927_s3 = inlined_call_operand.vmem [shape: bf16[64,128], index: 3, kind: input, shape index: {}]   ;;  %s7928_s4 = inlined_call_operand.vmem [shape: f32[1,128], index: 4, kind: input, shape index: {}]   ;;  %s7929_s5 = inlined_call_operand.vmem [shape: bf16[128,1024], index: 5, kind: input, shape index: {}]   ;;  %s7930_s6 = inlined_call_operand.vmem [shape: f32[1,1024], index: 6, kind: input, shape index: {}]   ;;  %s7931_s7 = inlined_call_operand.vmem [shape: bf16[1024,512], index: 7, kind: input, shape index: {}]   ;;  %s7932_s8 = inlined_call_operand.vmem [shape: f32[1,512], index: 8, kind: input, shape index: {}]   ;;  %s7933_s9 = inlined_call_operand.vmem [shape: bf16[512,256], index: 9, kind: input, shape index: {}]   ;;  %s7934_s10 = inlined_call_operand.vmem [shape: f32[1,256], index: 10, kind: input, shape index: {}]   ;;  %s7935_s11 = inlined_call_operand.vmem [shape: bf16[256,2], index: 11, kind: input, shape index: {}]   ;;  %s7936_s12 = inlined_call_operand.vmem [shape: f32[1,2], index: 12, kind: input, shape index: {}]   ;;  %s7937_s13 = inlined_call_operand.hbm [shape: f32[2,1,2], index: 13, kind: output, shape index: {}]  }
   0x1   :  { %7938 = sst [smem:[#allocation6_spill]] %s7924_s0 }
   0x2   :  { %7939 = sst [smem:[#allocation7_spill]] %s7925_s1 }
   0x3   :  { %7940 = sst [smem:[#allocation8_spill]] %s7926_s2 }
   0x4   :  { %7941 = sst [smem:[#allocation9_spill]] %s7927_s3 }
   0x5   :  { %18 = vsyncpa [#allocation4], 0 }
   0x6   :  { %20 = vsyncpa [#allocation4 + $0x1], 0  ;;  %s6069_s25 = smov 0   ;;  %s6071_s26 = smov 0  }
   0x7   :  { %s6073_s27 = smov 0   ;;  %s6075_s28 = smov 0  }
   0x8   :  { %s6077_s29 = smov 0   ;;  %s6079_s30 = smov 0  }
   0x9 LB: > { %s4794_s14 = sadd.s32 4294967295, %s5993_s30   ;;  %s4795_s15 = sadd.s32 4294967294, %s5993_s30   ;;  %s5993_s30 = sphi %s6079_s30, %s26_s30   ;;  %s5989_s29 = sphi %s6077_s29, %s7952_s29   ;;  %s5985_s28 = sphi %s6075_s28, %s7951_s28   ;;  %s5981_s27 = sphi %s6073_s27, %s7950_s27   ;;  %s5977_s26 = sphi %s6071_s26, %s7949_s26   ;;  %s5973_s25 = sphi %s6069_s25, %s7948_s25  }
   0xa   : > { %s38_s16 = sadd.s32 1, %s5989_s29  ;;  %s330_s17 = sadd.s32 1, %s5981_s27 }
   0xb   : > { %p40_p0 = scmp.ge.s32.totalorder %s38_s16, 2  ;;  %p340_p1 = scmp.ne.s32.totalorder %s5981_s27, %s5977_s26 }
   0xc   : > { %p341_p2 = scmp.eq.s32.totalorder %s4794_s14, 1  ;;  %p346_p3 = scmp.ne.s32.totalorder %s5977_s26, %s5973_s25 }
   0xd   : > { %s7954_s16 = smov (%p40_p0, %s38_s16), 0  ;;  %p347_p5 = scmp.eq.s32.totalorder %s4795_s15, 1 }
   0xe   : > { %p6109_p4 = por %p341_p2, %p340_p1  ;;  %s327_s19 = ssub.s32 %s5989_s29, %s7954_s16 }
   0xf   : > { %p4798_p6 = scmp.ge.s32.totalorder %s5993_s30, 1  ;;  %p328_p7 = scmp.eq.s32.totalorder %s327_s19, 0 }
  0x10   : > { %p6116_p8 = por %p347_p5, %p346_p3  ;;  %p418_p9 = scmp.lt.s32.totalorder %s5993_s30, 3 }
  0x11   : > { %s6122_s21 = scalar_select %p328_p7, %s5981_s27, %s330_s17  }
  0x12   : > { %p419_p10 = pnand %p4798_p6, %p418_p9 }
  0x13   : > { %p470_p11 = scmp.lt.s32.totalorder (!%p419_p10), %s5985_s28, 1  ;;  %v5995_v0 = vmov (!%p419_p10), 1   ;;  %v5996_v1 = vmov (!%p419_p10), 0   ;;  %s7944_s0 = sld [smem:[#allocation6_spill]] (!%p419_p10)  ;;  %v5997_v8 = vmov (!%p419_p10), 2   ;;  %v1045_v30 = vld [vmem:[%s7929_s5] sm:$0xff] (!%p419_p10)  ;;  %v593_v36 = vlaneseq (!%p419_p10) }
  0x14   : > { %422 = sbr.rel (%p419_p10) target bundleno = 2007 (0x7d7), region = 72  ;;  %5389 = vset.pattern.permute.xlu0 (!%p419_p10), %v5995_v0  ;;  %5387 = vset.pattern.permute.xlu1 (!%p419_p10), %v5995_v0  ;;  %s7945_s3 = sld [smem:[#allocation9_spill]] (!%p419_p10)  ;;  %v1049_v31 = vld [vmem:[%s7929_s5 + $0x20] sm:$0xff] (!%p419_p10)  ;;  %vm899_vm0 = vcmask (!%p419_p10), 523264   ;;  %vm4685_vm1 = vcmask (!%p419_p10), 15360   ;;  %vm4698_vm2 = vcmask (!%p419_p10), 8192  }
  0x15   : > { %1543 = vmatprep.mubr.bf16.mxu1 (!%p419_p10), %v5996_v1  ;;  %v1053_v32 = vld [vmem:[%s7929_s5 + $0x40] sm:$0xff] (!%p419_p10)  ;;  %v4817_v34 = vcombine.high (!%p419_p10), %v1045_v30, %v1049_v31  ;;  %v6207_v37 = vcombine.low (!%p419_p10), %v1045_v30, %v1049_v31  ;;  %v6222_v42 = vshrl.u32 (!%p419_p10), %v593_v36, 7  ;;  %s7946_s1 = sld [smem:[#allocation7_spill]] (!%p419_p10)  ;;  %s7947_s2 = sld [smem:[#allocation8_spill]] (!%p419_p10) }
  0x16   : > { %v1057_v35 = vld [vmem:[%s7929_s5 + $0x60] sm:$0xff] (!%p419_p10)  ;;  %s467_s17 = sand.u32 (!%p419_p10), 1, %s5977_s26  }
  0x17   : > { %v6209_v38 = vcombine.high (!%p419_p10), %v1053_v32, %v1057_v35  ;;  %5279 = vmatprep.subr.bf16.mxu1 (!%p419_p10), %v4817_v34  ;;  %v1061_v40 = vld [vmem:[%s7929_s5 + $0x80] sm:$0xff] (!%p419_p10)  ;;  %v6224_v44 = vcombine.low (!%p419_p10), %v1053_v32, %v1057_v35  ;;  %v6242_v49 = vsub.s32 (!%p419_p10), 1, %v6222_v42  ;;  %v6249_v54 = vsub.s32 (!%p419_p10), 0, %v6222_v42  ;;  %s4701_s24 = scalar_lea.sflag (!%p419_p10), [#allocation4], %s467_s17 }
  0x18   : > { %v1065_v41 = vld [vmem:[%s7929_s5 + $0xa0] sm:$0xff] (!%p419_p10)  ;;  %5287 = vmatpush1.bf16.msra.mxu1 (!%p419_p10), %v6207_v37  ;;  %v6252_v55 = vsub.s32 (!%p419_p10), 2, %v6222_v42 }
  0x19   : > { %5280 = vmatprep.subr.bf16.mxu1 (!%p419_p10), %v6209_v38  ;;  %v6226_v45 = vcombine.high (!%p419_p10), %v1061_v40, %v1065_v41  ;;  %v1069_v47 = vld [vmem:[%s7929_s5 + $0xc0] sm:$0xff] (!%p419_p10)  ;;  %v6244_v51 = vcombine.low (!%p419_p10), %v1061_v40, %v1065_v41 }
  0x1a   : > { %v5411_v12 = vld [vmem:[%s7945_s3] sm:$0xff] (!%p419_p10)   ;;  %v5412_v13 = vld [vmem:[%s7945_s3 + $0x8] sm:$0xff] (!%p419_p10)   ;;  %v5413_v14 = vld [vmem:[%s7945_s3 + $0x10] sm:$0xff] (!%p419_p10)  }
  0x1b   : > { %s6128_s22 = scalar_select %p470_p11, %s5985_s28, 1  ;;  %5255 = vmatprep.subr.bf16.mxu0 %v5411_v12  ;;  %v5414_v15 = vld [vmem:[%s7945_s3 + $0x18] sm:$0xff]   ;;  %v1073_v48 = vld [vmem:[%s7929_s5 + $0xe0] sm:$0xff] }
  0x1c   : > { %5256 = vmatpush3.bf16.msra.mxu0 %v5411_v12  ;;  %5288 = vmatpush1.bf16.msra.mxu1 %v6224_v44  ;;  %v6246_v53 = vcombine.high %v1069_v47, %v1073_v48  ;;  %v1077_v57 = vld [vmem:[%s7929_s5 + $0x100] sm:$0xff]  ;;  %v6267_v61 = vcombine.low %v1069_v47, %v1073_v48 }
  0x1d   : > { %s5220_s23 = sshll.u32 %s6128_s22, 7  ;;  %5257 = vmatprep.subr.bf16.mxu0 %v5412_v13  ;;  %s4801_s3 = sshll.u32 %s6128_s22, 2  ;;  %5281 = vmatprep.subr.bf16.mxu1 %v6226_v45  ;;  %v1081_v58 = vld [vmem:[%s7929_s5 + $0x120] sm:$0xff] }
  0x1e   : > { %s6135_s15 = scalar_lea.vmem %s7944_s0, %s5220_s23  ;;  %s482_s19 = scalar_lea.vmem %s7946_s1, %s4801_s3  ;;  %v6269_v62 = vcombine.high %v1077_v57, %v1081_v58 }
  0x1f   : > { %v498_v2 = vld [vmem:[%s6135_s15 + $0x10] sm:$0xff]  ;;  %v496_v3 = vld [vmem:[%s6135_s15] sm:$0xff]  ;;  %v501_v4 = vld [vmem:[%s6135_s15 + $0x28] sm:$0xff]  ;;  %s5217_s1 = sshll.u32 %s5985_s28, 4  ;;  %s5998_s28 = smov [#allocation3]  }
  0x20   : > { %622 = vperm.xlu0 %5389, %v498_v2   ;;  %614 = vperm.xlu1 %5387, %v496_v3   ;;  %v497_v5 = vld [vmem:[%s6135_s15 + $0x8] sm:$0xff]  ;;  %v502_v6 = vld [vmem:[%s6135_s15 + $0x30] sm:$0xff]  ;;  %v499_v7 = vld [vmem:[%s6135_s15 + $0x18] sm:$0xff]  ;;  %s7877_s23 = scalar_lea.hbm %s7937_s13, %s5217_s1  ;;  %s5919_s14 = sshll.u32 %s5998_s28, 4  ;;  %s5920_s14 = int_to_ptr.vmem [resolvable:$false] %s5919_s14 }
  0x21   : > { %v500_v9 = vld [vmem:[%s6135_s15 + $0x20] sm:$0xff]  ;;  %v503_v10 = vld [vmem:[%s6135_s15 + $0x38] sm:$0xff]  ;;  %v505_v11 = vld [vmem:[%s6135_s15 + $0x48] sm:$0xff]  ;;  %5258 = vmatpush3.bf16.msra.mxu0 %v5412_v13  ;;  %5289 = vmatpush1.bf16.msra.mxu1 %v6244_v51 }
  0x22   : > { %5259 = vmatprep.subr.bf16.mxu0 %v5413_v14  ;;  %v506_v16 = vld [vmem:[%s6135_s15 + $0x50] sm:$0xff]  ;;  %v508_v17 = vld [vmem:[%s6135_s15 + $0x60] sm:$0xff]  ;;  %v509_v18 = vld [vmem:[%s6135_s15 + $0x68] sm:$0xff]  ;;  %5282 = vmatprep.subr.bf16.mxu1 %v6246_v53 }
  0x23   : > { %v504_v19 = vld [vmem:[%s6135_s15 + $0x40] sm:$0xff]  ;;  %v510_v20 = vld [vmem:[%s6135_s15 + $0x70] sm:$0xff]  ;;  %v511_v21 = vld [vmem:[%s6135_s15 + $0x78] sm:$0xff] }
  0x24   : > { %634 = vperm.xlu0 %5389, %v501_v4   ;;  %618 = vperm.xlu1 %5387, %v497_v5   ;;  %v507_v22 = vld [vmem:[%s6135_s15 + $0x58] sm:$0xff]  ;;  %v512_v52 = vld [vmem:[%s482_s19] sm:$0x7]  ;;  %s468_s19 = scalar_lea.vmem [#allocation3], %s467_s17 }
  0x25   : > { %5260 = vmatpush3.bf16.msra.mxu0 %v5413_v14  ;;  %v6265_v59 = vrot.slane %v512_v52, %v6242_v49  ;;  %v6272_v63 = vrot.slane %v512_v52, %v6249_v54  ;;  %5290 = vmatpush1.bf16.msra.mxu1 %v6267_v61  ;;  %s4713_s0 = sshll.u32 %s468_s19, 4  ;;  %s7879_s0 = int_to_ptr.vmem [resolvable:$true] %s4713_s0 }
  0x26   : > { %5261 = vmatprep.subr.bf16.mxu0 %v5414_v15  ;;  %5283 = vmatprep.subr.bf16.mxu1 %v6269_v62  ;;  %s5915_s3 = scalar_lea.vmem %s7879_s0, 16  ;;  %p5922_p1 = scmp.lt.s32.totalorder %s7879_s0, %s5920_s14 }
  0x27   : > { %p5916_p12 = scmp.ne.s32.totalorder %s7879_s0, %s5915_s3 }
  0x28   : > { %638 = vperm.xlu0 %5389, %v502_v6   ;;  %5388 = vset.pattern.permute.xlu1 %v5996_v1 }
  0x29   : > { %530 = vperm.xlu1 %5388, %v499_v7   ;;  %5262 = vmatpush3.bf16.msra.mxu0 %v5414_v15  ;;  %p5917_p13 = pnand %p5916_p12, %p6109_p4 }
  0x2a   : > { %1471 = vmatprep.subr.bf16.mxu0 %v4817_v34 }
  0x2b   : > { %p5918_p0 = pneg %p5917_p13 }
  0x2c   : > { %5395 = vset.pattern.permute.xlu0 %v5997_v8 }
  0x2d   : > { %718 = vperm.xlu0 %5395, %v497_v5   ;;  %5390 = vset.pattern.permute.xlu1 %v5995_v0 }
  0x2e   : > { %626 = vperm.xlu1 %5390, %v499_v7  }
  0x31   : > { %730 = vperm.xlu0 %5395, %v500_v9  }
  0x32   : > { %5391 = vset.pattern.permute.xlu1 %v5997_v8 }
  0x33   : > { %714 = vperm.xlu1 %5391, %v496_v3  }
  0x35   : > { %742 = vperm.xlu0 %5395, %v503_v10  }
  0x37   : > { %722 = vperm.xlu1 %5391, %v498_v2  }
  0x39   : > { %750 = vperm.xlu0 %5395, %v505_v11  }
  0x3b   : > { %726 = vperm.xlu1 %5391, %v499_v7   ;;  %v6287_v7 = vcombine.low %v1077_v57, %v1081_v58 }
  0x3d   : > { %5403 = vset.pattern.permute.xlu0 %v5996_v1  ;;  %5291 = vmatpush1.bf16.msra.mxu1 %v6287_v7 }
  0x3e   : > { %515 = vperm.xlu0 %5403, %v496_v3   ;;  %v1089_v3 = vld [vmem:[%s7929_s5 + $0x160] sm:$0xff] }
  0x3f   : > { %5392 = vset.pattern.permute.xlu1 %v5996_v1 }
  0x40   : > { %540 = vperm.xlu1 %5392, %v501_v4  }
  0x42   : > { %520 = vperm.xlu0 %5403, %v497_v5  }
  0x44   : > { %5393 = vset.pattern.permute.xlu1 %v5995_v0 }
  0x45   : > { %630 = vperm.xlu1 %5393, %v500_v9  }
  0x46   : > { %525 = vperm.xlu0 %5403, %v498_v2   ;;  %v1085_v2 = vld [vmem:[%s7929_s5 + $0x140] sm:$0xff] }
  0x49   : > { %5394 = vset.pattern.permute.xlu1 %v5996_v1 }
  0x4a   : > { %535 = vperm.xlu0 %5403, %v500_v9   ;;  %545 = vperm.xlu1 %5394, %v502_v6   ;;  %v6289_v9 = vcombine.high %v1085_v2, %v1089_v3 }
  0x4c   : > { %5284 = vmatprep.subr.bf16.mxu1 %v6289_v9 }
  0x4e   : > { %550 = vperm.xlu1 %5394, %v503_v10   ;;  %560 = vperm.xlu0 %5403, %v505_v11  }
  0x52   : > { %5396 = vset.pattern.permute.xlu1 %v5995_v0  ;;  %565 = vperm.xlu0 %5403, %v506_v16  }
  0x53   : > { %642 = vperm.xlu1 %5396, %v503_v10  }
  0x56   : > { %575 = vperm.xlu0 %5403, %v508_v17  }
  0x57   : > { %5397 = vset.pattern.permute.xlu1 %v5997_v8 }
  0x58   : > { %734 = vperm.xlu1 %5397, %v501_v4  }
  0x5a   : > { %5404 = vset.pattern.permute.xlu0 %v5995_v0 }
  0x5b   : > { %654 = vperm.xlu0 %5404, %v506_v16  }
  0x5c   : > { %738 = vperm.xlu1 %5397, %v502_v6  }
  0x5f   : > { %666 = vperm.xlu0 %5404, %v509_v18  }
  0x60   : > { %5398 = vset.pattern.permute.xlu1 %v5996_v1 }
  0x61   : > { %555 = vperm.xlu1 %5398, %v504_v19  }
  0x63   : > { %670 = vperm.xlu0 %5404, %v510_v20  }
  0x65   : > { %5399 = vset.pattern.permute.xlu1 %v5995_v0 }
  0x66   : > { %646 = vperm.xlu1 %5399, %v504_v19  }
  0x67   : > { %5409 = vset.pattern.permute.xlu0 %v5997_v8 }
  0x68   : > { %762 = vperm.xlu0 %5409, %v508_v17  }
  0x6a   : > { %650 = vperm.xlu1 %5399, %v505_v11  }
  0x6c   : > { %774 = vperm.xlu0 %5409, %v511_v21  }
  0x6e   : > { %5400 = vset.pattern.permute.xlu1 %v5996_v1 }
  0x6f   : > { %570 = vperm.xlu1 %5400, %v507_v22  }
  0x73   : > { %5401 = vset.pattern.permute.xlu1 %v5995_v0 }
  0x74   : > { %658 = vperm.xlu1 %5401, %v507_v22  }
  0x78   : > { %5402 = vset.pattern.permute.xlu1 %v5997_v8 }
  0x79   : > { %746 = vperm.xlu1 %5402, %v504_v19  }
  0x7d   : > { %754 = vperm.xlu1 %5402, %v506_v16  }
  0x81   : > { %758 = vperm.xlu1 %5402, %v507_v22  }
  0x85   : > { %5405 = vset.pattern.permute.xlu1 %v5996_v1 }
  0x86   : > { %580 = vperm.xlu1 %5405, %v509_v18  }
  0x8a   : > { %5406 = vset.pattern.permute.xlu1 %v5995_v0 }
  0x8b   : > { %662 = vperm.xlu1 %5406, %v508_v17  }
  0x8f   : > { %5407 = vset.pattern.permute.xlu1 %v5996_v1 }
  0x90   : > { %585 = vperm.xlu1 %5407, %v510_v20  }
  0x94   : > { %590 = vperm.xlu1 %5407, %v511_v21  }
  0x98   : > { %5408 = vset.pattern.permute.xlu1 %v5995_v0  ;;  %v6275_v0 = vrot.slane %v512_v52, %v6252_v55 }
  0x99   : > { %674 = vperm.xlu1 %5408, %v511_v21  }
  0x9d   : > { %5410 = vset.pattern.permute.xlu1 %v5997_v8 }
  0x9e   : > { %766 = vperm.xlu1 %5410, %v509_v18  }
  0x9f   : > { %v615_v23 = vpop.permute.xlu1 %614  ;;  %v6187_v24 = vpop.permute.xlu0 %622 }
  0xa0   : > { %v681_v5 = vmul.f32 %v6265_v59, %v615_v23  ;;  %v683_v21 = vmul.f32 %v6265_v59, %v6187_v24 }
  0xa2   : > { %770 = vperm.xlu1 %5410, %v510_v20   ;;  %v6301_v20 = vcombine.low %v1085_v2, %v1089_v3 }
  0xa3   : > { %v6189_v25 = vpop.permute.xlu1 %618  ;;  %v6191_v26 = vpop.permute.xlu0 %634 }
  0xa4   : > { %v682_v13 = vmul.f32 %v6265_v59, %v6189_v25  ;;  %5292 = vmatpush1.bf16.msra.mxu1 %v6301_v20 }
  0xa7   : > { %v6193_v27 = vpop.permute.xlu0 %638 }
  0xa8   : > { %v531_v28 = vpop.permute.xlu1 %530 }
  0xa9   : > { %v600_v14 = vmul.f32 %v6272_v63, %v531_v28  ;;  %v6309_v28 = vld [vmem:[%s7947_s2] ss:$0 sm:$0xff]  ;;  %s5921_s2 = scalar_lea.vmem %s5920_s14, 32 }
  0xaa   : > { %p5923_p2 = scmp.lt.s32.totalorder %s5921_s2, %s5915_s3 }
  0xac   : > { %v719_v29 = vpop.permute.xlu0 %718  ;;  %p5924_p3 = por %p5923_p2, %p5922_p1 }
  0xad   : > { %v627_v33 = vpop.permute.xlu1 %626  ;;  %v782_v15 = vmul.f32 %v6275_v0, %v719_v29 }
  0xae   : > { %v684_v10 = vmul.f32 %v6265_v59, %v627_v33  ;;  %p5925_p5 = pnand %p5924_p3, %p5918_p0 }
  0xb0   : > { %v6211_v39 = vpop.permute.xlu0 %730  ;;  %v700_v22 = vadd.f32 %v684_v10, %v600_v14 }
  0xb2   : > { %v715_v43 = vpop.permute.xlu1 %714 }
  0xb3   : > { %v781_v11 = vmul.f32 %v6275_v0, %v715_v43 }
  0xb4   : > { %v6231_v46 = vpop.permute.xlu0 %742 }
  0xb6   : > { %v723_v50 = vpop.permute.xlu1 %722 }
  0xb7   : > { %v783_v34 = vmul.f32 %v6275_v0, %v723_v50 }
  0xb8   : > { %v6254_v56 = vpop.permute.xlu0 %750 }
  0xba   : > { %v727_v60 = vpop.permute.xlu1 %726 }
  0xbb   : > { %v784_v17 = vmul.f32 %v6275_v0, %v727_v60 }
  0xbd   : > { %v516_v4 = vpop.permute.xlu0 %515  ;;  %v800_v30 = vadd.f32 %v784_v17, %v700_v22 }
  0xbe   : > { %v597_v6 = vmul.f32 %v6272_v63, %v516_v4 }
  0xbf   : > { %v541_v8 = vpop.permute.xlu1 %540  ;;  %v823_v40 = vadd.f32 %v6309_v28, %v800_v30 }
  0xc0   : > { %v697_v12 = vadd.f32 %v681_v5, %v597_v6  ;;  %v785_v5 = vmul.f32 %v6275_v0, %v6211_v39  ;;  %v788_v39 = vmul.f32 %v6275_v0, %v6231_v46 }
  0xc1   : > { %v521_v16 = vpop.permute.xlu0 %520  ;;  %v839_v60 = vmax.f32 %v823_v40, 0.0 }
  0xc2   : > { %v797_v18 = vadd.f32 %v781_v11, %v697_v12  ;;  %v598_v19 = vmul.f32 %v6272_v63, %v521_v16  ;;  %v686_v12 = vmul.f32 %v6265_v59, %v6191_v26 }
  0xc4   : > { %v698_v23 = vadd.f32 %v682_v13, %v598_v19  ;;  %v631_v25 = vpop.permute.xlu1 %630  ;;  %v820_v33 = vadd.f32 %v6309_v28, %v797_v18  ;;  %v602_v13 = vmul.f32 %v6272_v63, %v541_v8 }
  0xc5   : > { %v526_v29 = vpop.permute.xlu0 %525  ;;  %v685_v50 = vmul.f32 %v6265_v59, %v631_v25 }
  0xc6   : > { %v798_v31 = vadd.f32 %v782_v15, %v698_v23  ;;  %v599_v32 = vmul.f32 %v6272_v63, %v526_v29  ;;  %v836_v43 = vmax.f32 %v820_v33, 0.0  ;;  %v702_v18 = vadd.f32 %v686_v12, %v602_v13 }
  0xc8   : > { %v699_v24 = vadd.f32 %v683_v21, %v599_v32  ;;  %v821_v35 = vadd.f32 %v6309_v28, %v798_v31 }
  0xc9   : > { %v546_v36 = vpop.permute.xlu1 %545  ;;  %v536_v48 = vpop.permute.xlu0 %535 }
  0xca   : > { %v799_v41 = vadd.f32 %v783_v34, %v699_v24  ;;  %v837_v47 = vmax.f32 %v821_v35, 0.0  ;;  %v601_v3 = vmul.f32 %v6272_v63, %v536_v48  ;;  %v603_v26 = vmul.f32 %v6272_v63, %v546_v36 }
  0xcc   : > { %v822_v52 = vadd.f32 %v6309_v28, %v799_v41  ;;  %v852_v57 = vpack.c.bf16 %v837_v47, %v836_v43  ;;  %v701_v6 = vadd.f32 %v685_v50, %v601_v3 }
  0xcd   : > { %v551_v58 = vpop.permute.xlu1 %550  ;;  %v561_v34 = vpop.permute.xlu0 %560 }
  0xce   : > { %v838_v2 = vmax.f32 %v822_v52, 0.0  ;;  %5263 = vmatprep.mubr.msk.bf16.mxu0 %vm899_vm0, %v852_v57  ;;  %v604_v14 = vmul.f32 %v6272_v63, %v551_v58  ;;  %v801_v15 = vadd.f32 %v785_v5, %v701_v6 }
  0xd0   : > { %v853_v4 = vpack.c.bf16 %v839_v60, %v838_v2 }
  0xd1   : > { %v566_v35 = vpop.permute.xlu0 %565 }
  0xd2   : > { %5264 = vmatmul.mubr.msk.bf16.vlgmr.msra.gmra.mrb[0].mxu0 %vm899_vm0, %v853_v4  ;;  %v643_v10 = vpop.permute.xlu1 %642  ;;  %v607_v60 = vmul.f32 %v6272_v63, %v566_v35 }
  0xd3   : > { %v688_v11 = vmul.f32 %v6265_v59, %v643_v10  ;;  %1472 = vmatpush1.bf16.msra.mxu0 %v6207_v37  ;;  %v687_v37 = vmul.f32 %v6265_v59, %v6193_v27 }
  0xd4   : > { %1473 = vmatprep.subr.bf16.mxu0 %v6209_v38  ;;  %v824_v38 = vadd.f32 %v6309_v28, %v801_v15 }
  0xd5   : > { %v704_v16 = vadd.f32 %v688_v11, %v604_v14  ;;  %v703_v22 = vadd.f32 %v687_v37, %v603_v26  ;;  %v576_v41 = vpop.permute.xlu0 %575 }
  0xd6   : > { %v840_v27 = vmax.f32 %v824_v38, 0.0 }
  0xd7   : > { %v735_v17 = vpop.permute.xlu1 %734  ;;  %1474 = vmatpush1.bf16.msra.mxu0 %v6224_v44  ;;  %v804_v19 = vadd.f32 %v788_v39, %v704_v16 }
  0xd8   : > { %v786_v8 = vmul.f32 %v6275_v0, %v735_v17  ;;  %1475 = vmatprep.subr.bf16.mxu0 %v6226_v45 }
  0xd9   : > { %v827_v25 = vadd.f32 %v6309_v28, %v804_v19 }
  0xda   : > { %v802_v21 = vadd.f32 %v786_v8, %v702_v18  ;;  %v655_v48 = vpop.permute.xlu0 %654 }
  0xdb   : > { %v739_v46 = vpop.permute.xlu1 %738  ;;  %1476 = vmatpush1.bf16.msra.mxu0 %v6244_v51  ;;  %v843_v51 = vmax.f32 %v827_v25, 0.0  ;;  %v691_v2 = vmul.f32 %v6265_v59, %v655_v48 }
  0xdc   : > { %v825_v44 = vadd.f32 %v6309_v28, %v802_v21  ;;  %v787_v23 = vmul.f32 %v6275_v0, %v739_v46  ;;  %1477 = vmatprep.subr.bf16.mxu0 %v6246_v53 }
  0xdd   : > { %v707_v6 = vadd.f32 %v691_v2, %v607_v60 }
  0xde   : > { %v841_v29 = vmax.f32 %v825_v44, 0.0  ;;  %v803_v30 = vadd.f32 %v787_v23, %v703_v22  ;;  %v667_v22 = vpop.permute.xlu0 %666 }
  0xdf   : > { %1478 = vmatpush1.bf16.msra.mxu0 %v6267_v61 }
  0xe0   : > { %v854_v45 = vpack.c.bf16 %v841_v29, %v840_v27  ;;  %v826_v31 = vadd.f32 %v6309_v28, %v803_v30  ;;  %v556_v32 = vpop.permute.xlu1 %555  ;;  %1479 = vmatprep.subr.bf16.mxu0 %v6269_v62  ;;  %v606_v62 = vmul.f32 %v6272_v63, %v561_v34  ;;  %v694_v34 = vmul.f32 %v6265_v59, %v667_v22 }
  0xe1   : > { %v605_v52 = vmul.f32 %v6272_v63, %v556_v32 }
  0xe2   : > { %v842_v33 = vmax.f32 %v826_v31, 0.0  ;;  %5267 = vmatprep.mubr.msk.bf16.mxu0 %vm899_vm0, %v854_v45  ;;  %v671_v23 = vpop.permute.xlu0 %670  ;;  %v609_v45 = vmul.f32 %v6272_v63, %v576_v41 }
  0xe3   : > { %1480 = vmatpush1.bf16.msra.mxu0 %v6287_v7  ;;  %v790_v7 = vmul.f32 %v6275_v0, %v6254_v56  ;;  %v695_v41 = vmul.f32 %v6265_v59, %v671_v23 }
  0xe4   : > { %v855_v53 = vpack.c.bf16 %v843_v51, %v842_v33  ;;  %1481 = vmatprep.subr.bf16.mxu0 %v6289_v9 }
  0xe5   : > { %v647_v24 = vpop.permute.xlu1 %646 }
  0xe6   : > { %5268 = vmatmul.mubr.msk.bf16.gmra.mrb[4].mxu0 %vm899_vm0, %v855_v53  ;;  %v689_v9 = vmul.f32 %v6265_v59, %v647_v24 }
  0xe7   : > { %1482 = vmatpush1.bf16.msra.mxu0 %v6301_v20  ;;  %v763_v30 = vpop.permute.xlu0 %762 }
  0xe8   : > { %v705_v58 = vadd.f32 %v689_v9, %v605_v52  ;;  %v793_v32 = vmul.f32 %v6275_v0, %v763_v30 }
  0xe9   : > { %v651_v61 = vpop.permute.xlu1 %650 }
  0xea   : > { %v690_v40 = vmul.f32 %v6265_v59, %v651_v61 }
  0xeb   : > { %v775_v53 = vpop.permute.xlu0 %774 }
  0xec   : > { %v706_v43 = vadd.f32 %v690_v40, %v606_v62  ;;  %v796_v62 = vmul.f32 %v6275_v0, %v775_v53 }
  0xee   : > { %v571_v36 = vpop.permute.xlu1 %570  ;;  %v806_v57 = vadd.f32 %v790_v7, %v706_v43 }
  0xef   : > { %v608_v13 = vmul.f32 %v6272_v63, %v571_v36 }
  0xf0   : > { %v829_v50 = vadd.f32 %v6309_v28, %v806_v57 }
  0xf2   : > { %v845_v12 = vmax.f32 %v829_v50, 0.0 }
  0xf3   : > { %v659_v47 = vpop.permute.xlu1 %658 }
  0xf4   : > { %v692_v56 = vmul.f32 %v6265_v59, %v659_v47 }
  0xf6   : > { %v708_v16 = vadd.f32 %v692_v56, %v608_v13  ;;  %v1105_v13 = vld [vmem:[%s7929_s5 + $0x1e0] sm:$0xff] }
  0xf8   : > { %v747_v20 = vpop.permute.xlu1 %746 }
  0xf9   : > { %v789_v3 = vmul.f32 %v6275_v0, %v747_v20 }
  0xfb   : > { %v805_v4 = vadd.f32 %v789_v3, %v705_v58 }
  0xfc   : > { %v755_v5 = vpop.permute.xlu1 %754 }
  0xfd   : > { %v828_v10 = vadd.f32 %v6309_v28, %v805_v4  ;;  %v791_v11 = vmul.f32 %v6275_v0, %v755_v5 }
  0xff   : > { %v844_v14 = vmax.f32 %v828_v10, 0.0  ;;  %v807_v39 = vadd.f32 %v791_v11, %v707_v6 }
 0x100   : > { %v759_v15 = vpop.permute.xlu1 %758 }
 0x101   : > { %v856_v17 = vpack.c.bf16 %v845_v12, %v844_v14  ;;  %v792_v37 = vmul.f32 %v6275_v0, %v759_v15  ;;  %v830_v18 = vadd.f32 %v6309_v28, %v807_v39  ;;  %v1101_v12 = vld [vmem:[%s7929_s5 + $0x1c0] sm:$0xff]  ;;  %v1046_v15 = vld [vmem:[%s7929_s5 + $0x8] sm:$0xff] }
 0x102   : > { %v4873_v14 = vcombine.high %v1101_v12, %v1105_v13 }
 0x103   : > { %v808_v26 = vadd.f32 %v792_v37, %v708_v16  ;;  %5271 = vmatprep.mubr.msk.bf16.mxu0 %vm899_vm0, %v856_v17  ;;  %v846_v19 = vmax.f32 %v830_v18, 0.0  ;;  %v1050_v16 = vld [vmem:[%s7929_s5 + $0x28] sm:$0xff]  ;;  %v6411_v18 = vld [vmem:[%s7929_s5 + $0x10] sm:$0xff] }
 0x104   : > { %v4818_v17 = vcombine.low %v1046_v15, %v1050_v16  ;;  %v4819_v37 = vcombine.high %v1046_v15, %v1050_v16  ;;  %v1102_v16 = vld [vmem:[%s7929_s5 + $0x1c8] sm:$0xff] }
 0x105   : > { %v831_v8 = vadd.f32 %v6309_v28, %v808_v26  ;;  %v581_v38 = vpop.permute.xlu1 %580  ;;  %v6416_v26 = vld [vmem:[%s7929_s5 + $0x30] sm:$0xff] }
 0x106   : > { %v610_v24 = vmul.f32 %v6272_v63, %v581_v38  ;;  %v4821_v38 = vcombine.high %v6411_v18, %v6416_v26 }
 0x107   : > { %v847_v21 = vmax.f32 %v831_v8, 0.0  ;;  %v4820_v8 = vcombine.low %v6411_v18, %v6416_v26 }
 0x108   : > { %v710_v43 = vadd.f32 %v694_v34, %v610_v24 }
 0x109   : > { %v857_v46 = vpack.c.bf16 %v847_v21, %v846_v19  ;;  %v6425_v19 = vld [vmem:[%s7928_s4] ss:$0 sm:$0xff] }
 0x10a   : > { %v663_v44 = vpop.permute.xlu1 %662 }
 0x10b   : > { %5272 = vmatmul.mubr.msk.bf16.gmra.mrb[8].mxu0 %vm899_vm0, %v857_v46  ;;  %v693_v29 = vmul.f32 %v6265_v59, %v663_v44 }
 0x10d   : > { %v709_v31 = vadd.f32 %v693_v29, %v609_v45 }
 0x10f   : > { %v586_v27 = vpop.permute.xlu1 %585  ;;  %v809_v35 = vadd.f32 %v793_v32, %v709_v31  ;;  %v1054_v31 = vld [vmem:[%s7929_s5 + $0x48] sm:$0xff] }
 0x110   : > { %v611_v47 = vmul.f32 %v6272_v63, %v586_v27  ;;  %v1058_v32 = vld [vmem:[%s7929_s5 + $0x68] sm:$0xff] }
 0x111   : > { %v832_v9 = vadd.f32 %v6309_v28, %v809_v35  ;;  %v4827_v24 = vcombine.high %v1054_v31, %v1058_v32  ;;  %v1066_v35 = vld [vmem:[%s7929_s5 + $0xa8] sm:$0xff] }
 0x112   : > { %v711_v20 = vadd.f32 %v695_v41, %v611_v47 }
 0x113   : > { %v591_v25 = vpop.permute.xlu1 %590  ;;  %v848_v2 = vmax.f32 %v832_v9, 0.0  ;;  %v1082_v9 = vld [vmem:[%s7929_s5 + $0x128] sm:$0xff] }
 0x114   : > { %v612_v61 = vmul.f32 %v6272_v63, %v591_v25  ;;  %v1097_v63 = vld [vmem:[%s7929_s5 + $0x1a0] sm:$0xff] }
 0x118   : > { %v675_v51 = vpop.permute.xlu1 %674 }
 0x119   : > { %v696_v33 = vmul.f32 %v6265_v59, %v675_v51  ;;  %v1093_v59 = vld [vmem:[%s7929_s5 + $0x180] sm:$0xff] }
 0x11a   : > { %v4865_v5 = vcombine.high %v1093_v59, %v1097_v63  ;;  %v4864_v10 = vcombine.low %v1093_v59, %v1097_v63 }
 0x11b   : > { %v712_v36 = vadd.f32 %v696_v33, %v612_v61  ;;  %v1062_v61 = vld [vmem:[%s7929_s5 + $0x88] sm:$0xff] }
 0x11c   : > { %1483 = vmatprep.subr.bf16.mxu0 %v4865_v5  ;;  %5285 = vmatprep.subr.bf16.mxu1 %v4865_v5  ;;  %v4834_v41 = vcombine.low %v1062_v61, %v1066_v35 }
 0x11d   : > { %v767_v40 = vpop.permute.xlu1 %766  ;;  %v812_v48 = vadd.f32 %v796_v62, %v712_v36  ;;  %1484 = vmatpush1.bf16.msra.mxu0 %v4864_v10  ;;  %5293 = vmatpush1.bf16.msra.mxu1 %v4864_v10  ;;  %v4826_v36 = vcombine.low %v1054_v31, %v1058_v32  ;;  %v4835_v62 = vcombine.high %v1062_v61, %v1066_v35  ;;  %v1080_v35 = vld [vmem:[%s7929_s5 + $0x118] sm:$0xff] }
 0x11e   : > { %v794_v7 = vmul.f32 %v6275_v0, %v767_v40  ;;  %1485 = vmatprep.subr.bf16.mxu0 %v4873_v14  ;;  %5286 = vmatprep.subr.bf16.mxu1 %v4873_v14  ;;  %v1070_v40 = vld [vmem:[%s7929_s5 + $0xc8] sm:$0xff] }
 0x11f   : > { %v835_v3 = vadd.f32 %v6309_v28, %v812_v48 }
 0x120   : > { %v810_v52 = vadd.f32 %v794_v7, %v710_v43  ;;  %v1074_v43 = vld [vmem:[%s7929_s5 + $0xe8] sm:$0xff] }
 0x121   : > { %v771_v57 = vpop.permute.xlu1 %770  ;;  %v4843_v47 = vcombine.high %v1070_v40, %v1074_v43  ;;  %v1078_v7 = vld [vmem:[%s7929_s5 + $0x108] sm:$0xff]  ;;  %v4842_v48 = vcombine.low %v1070_v40, %v1074_v43 }
 0x122   : > { %v833_v58 = vadd.f32 %v6309_v28, %v810_v52  ;;  %v795_v60 = vmul.f32 %v6275_v0, %v771_v57  ;;  %v851_v0 = vmax.f32 %v835_v3, 0.0  ;;  %v4851_v57 = vcombine.high %v1078_v7, %v1082_v9 }
 0x123   : > { %v4850_v63 = vcombine.low %v1078_v7, %v1082_v9 }
 0x124   : > { %v849_v50 = vmax.f32 %v833_v58, 0.0  ;;  %v811_v4 = vadd.f32 %v795_v60, %v711_v20  ;;  %v1086_v60 = vld [vmem:[%s7929_s5 + $0x148] sm:$0xff] }
 0x126   : > { %v858_v6 = vpack.c.bf16 %v849_v50, %v848_v2  ;;  %v834_v56 = vadd.f32 %v6309_v28, %v811_v4  ;;  %v4872_v28 = vcombine.low %v1101_v12, %v1105_v13  ;;  %v1090_v2 = vld [vmem:[%s7929_s5 + $0x168] sm:$0xff] }
 0x128   : > { %v850_v11 = vmax.f32 %v834_v56, 0.0  ;;  %5275 = vmatprep.mubr.msk.bf16.mxu0 %vm899_vm0, %v858_v6  ;;  %1486 = vmatpush1.bf16.msra.mxu0 %v4872_v28  ;;  %v4859_v6 = vcombine.high %v1086_v60, %v1090_v2 }
 0x129   : > { %5294 = vmatpush1.bf16.msra.mxu1 %v4872_v28  ;;  %1584 = vmatprep.subr.bf16.mxu0 %v4819_v37 }
 0x12a   : > { %v859_v39 = vpack.c.bf16 %v851_v0, %v850_v11  ;;  %1697 = vmatprep.subr.bf16.mxu1 %v4821_v38  ;;  %v1094_v0 = vld [vmem:[%s7929_s5 + $0x188] sm:$0xff] }
 0x12b   : > { %v1098_v11 = vld [vmem:[%s7929_s5 + $0x1a8] sm:$0xff] }
 0x12c   : > { %5276 = vmatmul.mubr.msk.bf16.gmra.mrb[12].mxu0 %vm899_vm0, %v859_v39  ;;  %v4858_v39 = vcombine.low %v1086_v60, %v1090_v2  ;;  %v4867_v15 = vcombine.high %v1094_v0, %v1098_v11  ;;  %v4866_v37 = vcombine.low %v1094_v0, %v1098_v11 }
 0x12d   : > { %1503 = vmatprep.mubr.bf16.mxu0 %v5996_v1 }
 0x1a5   : > { %v5265_v21 = vpop.f32.mrb[0].mxu0 }
 0x1a6   : > { %v967_v46 = vadd.f32 %v5265_v21, %v6425_v19  ;;  %v958_v22 = vpop.f32.mrb[1].mxu0  ;;  %v1048_v21 = vld [vmem:[%s7929_s5 + $0x18] sm:$0xff] }
 0x1a7   : > { %v959_v44 = vadd.f32 %v6425_v19, %v958_v22  ;;  %v5266_v23 = vpop.f32.mrb[2].mxu0 }
 0x1a8   : > { %v970_v27 = vadd.f32 %v5266_v23, %v6425_v19  ;;  %v961_v25 = vpop.f32.mrb[3].mxu0  ;;  %v1023_v30 = vmax.f32 %v967_v46, 0.0  ;;  %v1052_v46 = vld [vmem:[%s7929_s5 + $0x38] sm:$0xff] }
 0x1a9   : > { %v962_v29 = vadd.f32 %v6425_v19, %v961_v25  ;;  %v1021_v51 = vmax.f32 %v959_v44, 0.0  ;;  %v4823_v44 = vcombine.high %v1048_v21, %v1052_v46  ;;  %v1056_v23 = vld [vmem:[%s7929_s5 + $0x58] sm:$0xff]  ;;  %v4822_v25 = vcombine.low %v1048_v21, %v1052_v46 }
 0x1aa   : > { %v1024_v45 = vmax.f32 %v970_v27, 0.0  ;;  %v1060_v27 = vld [vmem:[%s7929_s5 + $0x78] sm:$0xff] }
 0x1ab   : > { %v1022_v33 = vmax.f32 %v962_v29, 0.0  ;;  %v4831_v29 = vcombine.high %v1056_v23, %v1060_v27  ;;  %v4830_v31 = vcombine.low %v1056_v23, %v1060_v27  ;;  %v1079_v23 = vld [vmem:[%s7929_s5 + $0x110] sm:$0xff] }
 0x1ac   : > { %v6437_v53 = vpack.c.bf16 %v1024_v45, %v1023_v30  ;;  %v1064_v30 = vld [vmem:[%s7929_s5 + $0x98] sm:$0xff]  ;;  %v1083_v27 = vld [vmem:[%s7929_s5 + $0x130] sm:$0xff] }
 0x1ad   : > { %v6439_v34 = vpack.c.bf16 %v1022_v33, %v1021_v51  ;;  %v1068_v45 = vld [vmem:[%s7929_s5 + $0xb8] sm:$0xff] }
 0x1ae   : > { %v4839_v32 = vcombine.high %v1064_v30, %v1068_v45  ;;  %v1072_v51 = vld [vmem:[%s7929_s5 + $0xd8] sm:$0xff] }
 0x1af   : > { %1504 = vmatmul.mubr.bf16.vlgmr.msra.gmra.mrb[16].mxu0 %v6439_v34  ;;  %v1076_v33 = vld [vmem:[%s7929_s5 + $0xf8] sm:$0xff] }
 0x1b0   : > { %1585 = vmatpush1.bf16.msra.mxu0 %v4818_v17  ;;  %1513 = vmatprep.mubr.bf16.mxu0 %v5996_v1  ;;  %v1106_v17 = vld [vmem:[%s7929_s5 + $0x1e8] sm:$0xff]  ;;  %v4847_v61 = vcombine.high %v1072_v51, %v1076_v33 }
 0x1b1   : > { %1586 = vmatprep.subr.bf16.mxu0 %v4827_v24  ;;  %v4875_v38 = vcombine.high %v1102_v16, %v1106_v17  ;;  %v4874_v22 = vcombine.low %v1102_v16, %v1106_v17  ;;  %v4838_v24 = vcombine.low %v1064_v30, %v1068_v45  ;;  %v1063_v16 = vld [vmem:[%s7929_s5 + $0x90] sm:$0xff] }
 0x1b2   : > { %v1067_v17 = vld [vmem:[%s7929_s5 + $0xb0] sm:$0xff] }
 0x1b3   : > { %v4837_v46 = vcombine.high %v1063_v16, %v1067_v17  ;;  %v4836_v26 = vcombine.low %v1063_v16, %v1067_v17  ;;  %v1087_v30 = vld [vmem:[%s7929_s5 + $0x150] sm:$0xff]  ;;  %v5444_v16 = vld [vmem:[%s7931_s7 + $0x8c] ss:$16 sps:$4 sm:$0xff]  }
 0x1b4   : > { %1587 = vmatpush1.bf16.msra.mxu0 %v4826_v36  ;;  %v1084_v36 = vld [vmem:[%s7929_s5 + $0x138] sm:$0xff]  ;;  %v1091_v45 = vld [vmem:[%s7929_s5 + $0x170] sm:$0xff] }
 0x1b5   : > { %1588 = vmatprep.subr.bf16.mxu0 %v4835_v62  ;;  %v4846_v62 = vcombine.low %v1072_v51, %v1076_v33  ;;  %v4855_v40 = vcombine.high %v1080_v35, %v1084_v36  ;;  %v1095_v51 = vld [vmem:[%s7929_s5 + $0x190] sm:$0xff] }
 0x1b6   : > { %v1099_v33 = vld [vmem:[%s7929_s5 + $0x1b0] sm:$0xff] }
 0x1b7   : > { %1514 = vmatmul.mubr.bf16.gmra.mrb[20].mxu0 %v6437_v53  ;;  %v5439_v17 = vld [vmem:[%s7931_s7 + $0x80] ss:$16 sps:$4 sm:$0xff]  }
 0x1b8   : > { %1589 = vmatpush1.bf16.msra.mxu0 %v4834_v41  ;;  %1523 = vmatprep.mubr.bf16.mxu0 %v5996_v1  ;;  %v1088_v41 = vld [vmem:[%s7929_s5 + $0x158] sm:$0xff] }
 0x1b9   : > { %v5269_v52 = vpop.f32.mrb[4].mxu0  ;;  %1590 = vmatprep.subr.bf16.mxu0 %v4843_v47  ;;  %v1092_v47 = vld [vmem:[%s7929_s5 + $0x178] sm:$0xff] }
 0x1ba   : > { %v983_v20 = vadd.f32 %v5269_v52, %v6425_v19  ;;  %v974_v58 = vpop.f32.mrb[5].mxu0  ;;  %v4863_v60 = vcombine.high %v1088_v41, %v1092_v47 }
 0x1bb   : > { %v975_v3 = vadd.f32 %v6425_v19, %v974_v58  ;;  %v5270_v50 = vpop.f32.mrb[6].mxu0 }
 0x1bc   : > { %v986_v4 = vadd.f32 %v5270_v50, %v6425_v19  ;;  %v977_v59 = vpop.f32.mrb[7].mxu0  ;;  %1591 = vmatpush1.bf16.msra.mxu0 %v4842_v48  ;;  %v1027_v56 = vmax.f32 %v983_v20, 0.0 }
 0x1bd   : > { %v978_v5 = vadd.f32 %v6425_v19, %v977_v59  ;;  %1592 = vmatprep.subr.bf16.mxu0 %v4851_v57  ;;  %v1025_v12 = vmax.f32 %v975_v3, 0.0  ;;  %v4854_v57 = vcombine.low %v1080_v35, %v1084_v36  ;;  %v1055_v3 = vld [vmem:[%s7929_s5 + $0x50] sm:$0xff] }
 0x1be   : > { %v1028_v10 = vmax.f32 %v986_v4, 0.0  ;;  %v1059_v59 = vld [vmem:[%s7929_s5 + $0x70] sm:$0xff] }
 0x1bf   : > { %v1026_v13 = vmax.f32 %v978_v5, 0.0  ;;  %v1100_v5 = vld [vmem:[%s7929_s5 + $0x1b8] sm:$0xff]  ;;  %v1103_v35 = vld [vmem:[%s7929_s5 + $0x1d0] sm:$0xff] }
 0x1c0   : > { %v6479_v14 = vpack.c.bf16 %v1028_v10, %v1027_v56  ;;  %1593 = vmatpush1.bf16.msra.mxu0 %v4850_v63  ;;  %v1096_v63 = vld [vmem:[%s7929_s5 + $0x198] sm:$0xff]  ;;  %v4862_v10 = vcombine.low %v1088_v41, %v1092_v47  ;;  %v1107_v36 = vld [vmem:[%s7929_s5 + $0x1f0] sm:$0xff] }
 0x1c1   : > { %v6481_v28 = vpack.c.bf16 %v1026_v13, %v1025_v12  ;;  %1594 = vmatprep.subr.bf16.mxu0 %v4859_v6  ;;  %v4829_v12 = vcombine.high %v1055_v3, %v1059_v59  ;;  %v4871_v13 = vcombine.high %v1096_v63, %v1100_v5 }
 0x1c3   : > { %1524 = vmatmul.mubr.bf16.gmra.mrb[24].mxu0 %v6481_v28 }
 0x1c4   : > { %1595 = vmatpush1.bf16.msra.mxu0 %v4858_v39  ;;  %1533 = vmatprep.mubr.bf16.mxu0 %v5996_v1  ;;  %v1104_v39 = vld [vmem:[%s7929_s5 + $0x1d8] sm:$0xff] }
 0x1c5   : > { %1596 = vmatprep.subr.bf16.mxu0 %v4867_v15  ;;  %v1108_v15 = vld [vmem:[%s7929_s5 + $0x1f8] sm:$0xff] }
 0x1c6   : > { %v4879_v21 = vcombine.high %v1104_v39, %v1108_v15  ;;  %v4878_v18 = vcombine.low %v1104_v39, %v1108_v15  ;;  %v5436_v39 = vld [vmem:[%s7931_s7 + $0x68] ss:$16 sps:$4 sm:$0xff]   ;;  %v5441_v15 = vld [vmem:[%s7931_s7 + $0x84] ss:$16 sps:$4 sm:$0xff]  }
 0x1c8   : > { %1597 = vmatpush1.bf16.msra.mxu0 %v4866_v37  ;;  %v4870_v37 = vcombine.low %v1096_v63, %v1100_v5  ;;  %v5421_v63 = vld [vmem:[%s7931_s7 + $0x20] ss:$16 sps:$4 sm:$0xff]   ;;  %v5424_v5 = vld [vmem:[%s7931_s7 + $0x28] ss:$16 sps:$4 sm:$0xff]  }
 0x1c9   : > { %1598 = vmatprep.subr.bf16.mxu0 %v4875_v38  ;;  %v4828_v38 = vcombine.low %v1055_v3, %v1059_v59  ;;  %v5426_v59 = vld [vmem:[%s7931_s7 + $0x2c] ss:$16 sps:$4 sm:$0xff]  }
 0x1cb   : > { %1534 = vmatmul.mubr.bf16.gmra.mrb[28].mxu0 %v6479_v14 }
 0x1cc   : > { %1599 = vmatpush1.bf16.msra.mxu0 %v4874_v22  ;;  %1616 = vmatprep.mubr.bf16.mxu0 %v5996_v1  ;;  %v1071_v22 = vld [vmem:[%s7929_s5 + $0xd0] sm:$0xff] }
 0x1cd   : > { %1810 = vmatprep.subr.bf16.mxu0 %v4823_v44  ;;  %v1075_v44 = vld [vmem:[%s7929_s5 + $0xf0] sm:$0xff] }
 0x1d3   : > { %1617 = vmatmul.mubr.bf16.vlgmr.msra.gmra.mrb[32].mxu0 %v6439_v34 }
 0x1d4   : > { %1626 = vmatprep.mubr.bf16.mxu0 %v5996_v1  ;;  %1811 = vmatpush1.bf16.msra.mxu0 %v4822_v25  ;;  %v4844_v25 = vcombine.low %v1071_v22, %v1075_v44 }
 0x1d5   : > { %1812 = vmatprep.subr.bf16.mxu0 %v4831_v29  ;;  %v4853_v29 = vcombine.high %v1079_v23, %v1083_v27 }
 0x1d8   : > { %1813 = vmatpush1.bf16.msra.mxu0 %v4830_v31  ;;  %v4852_v31 = vcombine.low %v1079_v23, %v1083_v27  ;;  %v5459_v23 = vld [vmem:[%s7931_s7 + $0xe4] ss:$16 sps:$4 sm:$0xff]   ;;  %v5460_v27 = vld [vmem:[%s7931_s7 + $0xe8] ss:$16 sps:$4 sm:$0xff]  }
 0x1d9   : > { %1814 = vmatprep.subr.bf16.mxu0 %v4839_v32  ;;  %v4861_v32 = vcombine.high %v1087_v30, %v1091_v45 }
 0x1db   : > { %1627 = vmatmul.mubr.bf16.gmra.mrb[36].mxu0 %v6437_v53 }
 0x1dc   : > { %1636 = vmatprep.mubr.bf16.mxu0 %v5996_v1  ;;  %1815 = vmatpush1.bf16.msra.mxu0 %v4838_v24  ;;  %v4860_v24 = vcombine.low %v1087_v30, %v1091_v45  ;;  %v5468_v30 = vld [vmem:[%s7931_s7 + $0x10c] ss:$16 sps:$4 sm:$0xff]   ;;  %v5463_v45 = vld [vmem:[%s7931_s7 + $0x100] ss:$16 sps:$4 sm:$0xff]  }
 0x1dd   : > { %1816 = vmatprep.subr.bf16.mxu0 %v4847_v61  ;;  %v4869_v61 = vcombine.high %v1095_v51, %v1099_v33 }
 0x1de   : > { %v5273_v43 = vpop.f32.mrb[8].mxu0 }
 0x1df   : > { %v999_v7 = vadd.f32 %v5273_v43, %v6425_v19  ;;  %v990_v9 = vpop.f32.mrb[9].mxu0 }
 0x1e0   : > { %v991_v48 = vadd.f32 %v6425_v19, %v990_v9  ;;  %v5274_v52 = vpop.f32.mrb[10].mxu0  ;;  %1817 = vmatpush1.bf16.msra.mxu0 %v4846_v62  ;;  %v4868_v62 = vcombine.low %v1095_v51, %v1099_v33  ;;  %v5474_v51 = vld [vmem:[%s7931_s7 + $0x12c] ss:$16 sps:$4 sm:$0xff]   ;;  %v5469_v33 = vld [vmem:[%s7931_s7 + $0x120] ss:$16 sps:$4 sm:$0xff]  }
 0x1e1   : > { %v1002_v20 = vadd.f32 %v5274_v52, %v6425_v19  ;;  %v993_v58 = vpop.f32.mrb[11].mxu0  ;;  %1818 = vmatprep.subr.bf16.mxu0 %v4855_v40  ;;  %v1031_v50 = vmax.f32 %v999_v7, 0.0  ;;  %v4877_v40 = vcombine.high %v1103_v35, %v1107_v36 }
 0x1e2   : > { %v994_v2 = vadd.f32 %v6425_v19, %v993_v58  ;;  %v1029_v6 = vmax.f32 %v991_v48, 0.0  ;;  %v4876_v48 = vcombine.low %v1103_v35, %v1107_v36  ;;  %v5480_v35 = vld [vmem:[%s7931_s7 + $0x14c] ss:$16 sps:$4 sm:$0xff]   ;;  %v5475_v36 = vld [vmem:[%s7931_s7 + $0x140] ss:$16 sps:$4 sm:$0xff]  }
 0x1e3   : > { %v1032_v4 = vmax.f32 %v1002_v20, 0.0  ;;  %1637 = vmatmul.mubr.bf16.gmra.mrb[40].mxu0 %v6481_v28 }
 0x1e4   : > { %v1030_v56 = vmax.f32 %v994_v2, 0.0  ;;  %1646 = vmatprep.mubr.bf16.mxu0 %v5996_v1  ;;  %1819 = vmatpush1.bf16.msra.mxu0 %v4854_v57 }
 0x1e5   : > { %v6551_v0 = vpack.c.bf16 %v1032_v4, %v1031_v50  ;;  %1820 = vmatprep.subr.bf16.mxu0 %v4863_v60 }
 0x1e6   : > { %v6553_v11 = vpack.c.bf16 %v1030_v56, %v1029_v6  ;;  %v5429_v6 = vld [vmem:[%s7931_s7 + $0x44] ss:$16 sps:$4 sm:$0xff]   ;;  %v5432_v56 = vld [vmem:[%s7931_s7 + $0x4c] ss:$16 sps:$4 sm:$0xff]  }
 0x1e8   : > { %1544 = vmatmul.mubr.bf16.vlgmr.msra.gmra.mrb[0].mxu1 %v6553_v11  ;;  %1821 = vmatpush1.bf16.msra.mxu0 %v4862_v10  ;;  %v5427_v10 = vld [vmem:[%s7931_s7 + $0x40] ss:$16 sps:$4 sm:$0xff]  }
 0x1e9   : > { %1553 = vmatprep.mubr.bf16.mxu1 %v5996_v1  ;;  %1698 = vmatpush1.bf16.msra.mxu1 %v4820_v8  ;;  %v4845_v8 = vcombine.high %v1071_v22, %v1075_v44  ;;  %v5453_v22 = vld [vmem:[%s7931_s7 + $0xc4] ss:$16 sps:$4 sm:$0xff]   ;;  %v5456_v44 = vld [vmem:[%s7931_s7 + $0xcc] ss:$16 sps:$4 sm:$0xff]  }
 0x1ea   : > { %1699 = vmatprep.subr.bf16.mxu1 %v4829_v12  ;;  %1822 = vmatprep.subr.bf16.mxu0 %v4871_v13  ;;  %v5438_v12 = vld [vmem:[%s7931_s7 + $0x6c] ss:$16 sps:$4 sm:$0xff]   ;;  %v5433_v13 = vld [vmem:[%s7931_s7 + $0x60] ss:$16 sps:$4 sm:$0xff]  }
 0x1eb   : > { %1647 = vmatmul.mubr.bf16.gmra.mrb[44].mxu0 %v6479_v14 }
 0x1ec   : > { %1656 = vmatprep.mubr.bf16.mxu0 %v5996_v1  ;;  %1823 = vmatpush1.bf16.msra.mxu0 %v4870_v37  ;;  %v5442_v37 = vld [vmem:[%s7931_s7 + $0x88] ss:$16 sps:$4 sm:$0xff]  }
 0x1ed   : > { %1700 = vmatpush1.bf16.msra.mxu1 %v4828_v38  ;;  %1824 = vmatprep.subr.bf16.mxu0 %v4879_v21  ;;  %v5447_v38 = vld [vmem:[%s7931_s7 + $0xa4] ss:$16 sps:$4 sm:$0xff]   ;;  %v5450_v21 = vld [vmem:[%s7931_s7 + $0xac] ss:$16 sps:$4 sm:$0xff]  }
 0x1ee   : > { %1701 = vmatprep.subr.bf16.mxu1 %v4837_v46  ;;  %v5445_v46 = vld [vmem:[%s7931_s7 + $0xa0] ss:$16 sps:$4 sm:$0xff]  }
 0x1f0   : > { %1554 = vmatmul.mubr.bf16.gmra.mrb[4].mxu1 %v6551_v0  ;;  %1825 = vmatpush1.bf16.msra.mxu0 %v4878_v18  ;;  %v5451_v18 = vld [vmem:[%s7931_s7 + $0xc0] ss:$16 sps:$4 sm:$0xff]  }
 0x1f1   : > { %1702 = vmatpush1.bf16.msra.mxu1 %v4836_v26  ;;  %1563 = vmatprep.mubr.bf16.mxu1 %v5996_v1  ;;  %v5454_v26 = vld [vmem:[%s7931_s7 + $0xc8] ss:$16 sps:$4 sm:$0xff]  }
 0x1f2   : > { %1703 = vmatprep.subr.bf16.mxu1 %v4845_v8  ;;  %v5457_v8 = vld [vmem:[%s7931_s7 + $0xe0] ss:$16 sps:$4 sm:$0xff]  }
 0x1f3   : > { %1657 = vmatmul.mubr.bf16.gmra.mrb[48].mxu0 %v6553_v11 }
 0x1f4   : > { %1666 = vmatprep.mubr.bf16.mxu0 %v5996_v1 }
 0x1f5   : > { %1704 = vmatpush1.bf16.msra.mxu1 %v4844_v25  ;;  %v5462_v25 = vld [vmem:[%s7931_s7 + $0xec] ss:$16 sps:$4 sm:$0xff]  }
 0x1f6   : > { %1705 = vmatprep.subr.bf16.mxu1 %v4853_v29  ;;  %v5465_v29 = vld [vmem:[%s7931_s7 + $0x104] ss:$16 sps:$4 sm:$0xff]  }
 0x1f9   : > { %1706 = vmatpush1.bf16.msra.mxu1 %v4852_v31  ;;  %v5466_v31 = vld [vmem:[%s7931_s7 + $0x108] ss:$16 sps:$4 sm:$0xff]  }
 0x1fa   : > { %1707 = vmatprep.subr.bf16.mxu1 %v4861_v32  ;;  %v5471_v32 = vld [vmem:[%s7931_s7 + $0x124] ss:$16 sps:$4 sm:$0xff]  }
 0x1fb   : > { %1667 = vmatmul.mubr.bf16.gmra.mrb[52].mxu0 %v6551_v0 }
 0x1fc   : > { %1676 = vmatprep.mubr.bf16.mxu0 %v5996_v1 }
 0x1fd   : > { %1708 = vmatpush1.bf16.msra.mxu1 %v4860_v24  ;;  %v5472_v24 = vld [vmem:[%s7931_s7 + $0x128] ss:$16 sps:$4 sm:$0xff]  }
 0x1fe   : > { %1709 = vmatprep.subr.bf16.mxu1 %v4869_v61  ;;  %v5477_v61 = vld [vmem:[%s7931_s7 + $0x144] ss:$16 sps:$4 sm:$0xff]  }
 0x1ff   : > { %v5277_v43 = vpop.f32.mrb[12].mxu0 }
 0x200   : > { %v1015_v41 = vadd.f32 %v5277_v43, %v6425_v19  ;;  %v1006_v47 = vpop.f32.mrb[13].mxu0  ;;  %v5486_v43 = vld [vmem:[%s7931_s7 + $0x16c] ss:$16 sps:$4 sm:$0xff]  }
 0x201   : > { %v1007_v7 = vadd.f32 %v6425_v19, %v1006_v47  ;;  %v5278_v9 = vpop.f32.mrb[14].mxu0  ;;  %1710 = vmatpush1.bf16.msra.mxu1 %v4868_v62  ;;  %v5478_v62 = vld [vmem:[%s7931_s7 + $0x148] ss:$16 sps:$4 sm:$0xff]  }
 0x202   : > { %v1018_v52 = vadd.f32 %v5278_v9, %v6425_v19  ;;  %v1009_v57 = vpop.f32.mrb[15].mxu0  ;;  %1711 = vmatprep.subr.bf16.mxu1 %v4877_v40  ;;  %v1035_v58 = vmax.f32 %v1015_v41, 0.0  ;;  %v5483_v40 = vld [vmem:[%s7931_s7 + $0x164] ss:$16 sps:$4 sm:$0xff]   ;;  %v5481_v41 = vld [vmem:[%s7931_s7 + $0x160] ss:$16 sps:$4 sm:$0xff]  }
 0x203   : > { %v1010_v20 = vadd.f32 %v6425_v19, %v1009_v57  ;;  %v1033_v2 = vmax.f32 %v1007_v7, 0.0  ;;  %v5417_v19 = vld [vmem:[%s7931_s7 + $0x4] ss:$16 sps:$4 sm:$0xff]   ;;  %v5484_v47 = vld [vmem:[%s7931_s7 + $0x168] ss:$16 sps:$4 sm:$0xff]  }
 0x204   : > { %v1036_v60 = vmax.f32 %v1018_v52, 0.0  ;;  %v5489_v7 = vld [vmem:[%s7931_s7 + $0x184] ss:$16 sps:$4 sm:$0xff]   ;;  %v5492_v9 = vld [vmem:[%s7931_s7 + $0x18c] ss:$16 sps:$4 sm:$0xff]  }
 0x205   : > { %v1034_v3 = vmax.f32 %v1010_v20, 0.0  ;;  %1712 = vmatpush1.bf16.msra.mxu1 %v4876_v48  ;;  %v5487_v48 = vld [vmem:[%s7931_s7 + $0x180] ss:$16 sps:$4 sm:$0xff]   ;;  %v5490_v52 = vld [vmem:[%s7931_s7 + $0x188] ss:$16 sps:$4 sm:$0xff]  }
 0x206   : > { %v6614_v50 = vpack.c.bf16 %v1036_v60, %v1035_v58  ;;  %3692 = vmatprep.subr.bf16.mxu1 %v5417_v19  ;;  %v5495_v57 = vld [vmem:[%s7931_s7 + $0x1a4] ss:$16 sps:$4 sm:$0xff]   ;;  %v5498_v20 = vld [vmem:[%s7931_s7 + $0x1ac] ss:$16 sps:$4 sm:$0xff]   ;;  %v5493_v58 = vld [vmem:[%s7931_s7 + $0x1a0] ss:$16 sps:$4 sm:$0xff]  }
 0x207   : > { %v6616_v4 = vpack.c.bf16 %v1034_v3, %v1033_v2  ;;  %v5496_v60 = vld [vmem:[%s7931_s7 + $0x1a8] ss:$16 sps:$4 sm:$0xff]   ;;  %v5501_v2 = vld [vmem:[%s7931_s7 + $0x1c4] ss:$16 sps:$4 sm:$0xff]   ;;  %v5504_v3 = vld [vmem:[%s7931_s7 + $0x1cc] ss:$16 sps:$4 sm:$0xff]  }
 0x208   : > { %v5507_v19 = vld [vmem:[%s7931_s7 + $0x1e4] ss:$16 sps:$4 sm:$0xff]  }
 0x209   : > { %1564 = vmatmul.mubr.bf16.gmra.mrb[8].mxu1 %v6616_v4  ;;  %1677 = vmatmul.mubr.bf16.gmra.mrb[56].mxu0 %v6616_v4 }
 0x20a   : > { %1573 = vmatprep.mubr.bf16.mxu1 %v5996_v1  ;;  %1686 = vmatprep.mubr.bf16.mxu0 %v5996_v1 }
 0x211   : > { %1574 = vmatmul.mubr.bf16.gmra.mrb[12].mxu1 %v6614_v50  ;;  %1687 = vmatmul.mubr.bf16.gmra.mrb[60].mxu0 %v6614_v50 }
 0x212   : > { %1729 = vmatprep.mubr.bf16.mxu1 %v5996_v1  ;;  %1842 = vmatprep.mubr.bf16.mxu0 %v5996_v1 }
 0x219   : > { %1730 = vmatmul.mubr.bf16.vlgmr.msra.gmra.mrb[16].mxu1 %v6439_v34  ;;  %1843 = vmatmul.mubr.bf16.vlgmr.msra.gmra.mrb[64].mxu0 %v6439_v34  ;;  %v5415_v34 = vld [vmem:[%s7931_s7] ss:$16 sps:$4 sm:$0xff]  }
 0x21a   : > { %1739 = vmatprep.mubr.bf16.mxu1 %v5996_v1  ;;  %1852 = vmatprep.mubr.bf16.mxu0 %v5996_v1 }
 0x21b   : > { %3693 = vmatpush1.bf16.msra.mxu1 %v5415_v34  ;;  %v5505_v34 = vld [vmem:[%s7931_s7 + $0x1e0] ss:$16 sps:$4 sm:$0xff]  }
 0x221   : > { %1740 = vmatmul.mubr.bf16.gmra.mrb[20].mxu1 %v6437_v53  ;;  %1853 = vmatmul.mubr.bf16.gmra.mrb[68].mxu0 %v6437_v53  ;;  %v5420_v53 = vld [vmem:[%s7931_s7 + $0xc] ss:$16 sps:$4 sm:$0xff]  }
 0x222   : > { %1749 = vmatprep.mubr.bf16.mxu1 %v5996_v1  ;;  %1862 = vmatprep.mubr.bf16.mxu0 %v5996_v1 }
 0x223   : > { %3856 = vmatprep.subr.bf16.mxu0 %v5420_v53  ;;  %v5510_v53 = vld [vmem:[%s7931_s7 + $0x1ec] ss:$16 sps:$4 sm:$0xff]  }
 0x229   : > { %1750 = vmatmul.mubr.bf16.gmra.mrb[24].mxu1 %v6481_v28  ;;  %1863 = vmatmul.mubr.bf16.gmra.mrb[72].mxu0 %v6481_v28  ;;  %v5423_v28 = vld [vmem:[%s7931_s7 + $0x24] ss:$16 sps:$4 sm:$0xff]  }
 0x22a   : > { %1759 = vmatprep.mubr.bf16.mxu1 %v5996_v1  ;;  %1872 = vmatprep.mubr.bf16.mxu0 %v5996_v1 }
 0x22b   : > { %3694 = vmatprep.subr.bf16.mxu1 %v5423_v28  ;;  %v5513_v28 = vld [vmem:[%s7931_s7 + $0x204] ss:$16 sps:$4 sm:$0xff]  }
 0x22c   : > { %3695 = vmatpush1.bf16.msra.mxu1 %v5421_v63  ;;  %v6857_v63 = vld [vmem:[%s7930_s6] sm:$0xff] }
 0x22d   : > { %3696 = vmatprep.subr.bf16.mxu1 %v5429_v6 }
 0x230   : > { %3697 = vmatpush1.bf16.msra.mxu1 %v5427_v10 }
 0x231   : > { %1760 = vmatmul.mubr.bf16.gmra.mrb[28].mxu1 %v6479_v14  ;;  %1873 = vmatmul.mubr.bf16.gmra.mrb[76].mxu0 %v6479_v14  ;;  %v5418_v14 = vld [vmem:[%s7931_s7 + $0x8] ss:$16 sps:$4 sm:$0xff]  }
 0x232   : > { %1769 = vmatprep.mubr.bf16.mxu1 %v5996_v1  ;;  %1882 = vmatprep.mubr.bf16.mxu0 %v5996_v1 }
 0x233   : > { %3857 = vmatpush1.bf16.msra.mxu0 %v5418_v14  ;;  %v5508_v14 = vld [vmem:[%s7931_s7 + $0x1e8] ss:$16 sps:$4 sm:$0xff]  }
 0x234   : > { %3858 = vmatprep.subr.bf16.mxu0 %v5426_v59  ;;  %v5516_v59 = vld [vmem:[%s7931_s7 + $0x20c] ss:$16 sps:$4 sm:$0xff]  }
 0x237   : > { %3859 = vmatpush1.bf16.msra.mxu0 %v5424_v5  ;;  %v6861_v5 = vrot.slane %v6857_v63, %v6249_v54 }
 0x238   : > { %3860 = vmatprep.subr.bf16.mxu0 %v5432_v56  ;;  %v6865_v56 = vrot.slane %v6857_v63, %v6242_v49 }
 0x239   : > { %1770 = vmatmul.mubr.bf16.gmra.mrb[32].mxu1 %v6553_v11  ;;  %1883 = vmatmul.mubr.bf16.gmra.mrb[80].mxu0 %v6553_v11  ;;  %v5430_v11 = vld [vmem:[%s7931_s7 + $0x48] ss:$16 sps:$4 sm:$0xff]  }
 0x23a   : > { %1779 = vmatprep.mubr.bf16.mxu1 %v5996_v1  ;;  %1892 = vmatprep.mubr.bf16.mxu0 %v5996_v1 }
 0x23b   : > { %3861 = vmatpush1.bf16.msra.mxu0 %v5430_v11 }
 0x23c   : > { %3862 = vmatprep.subr.bf16.mxu0 %v5438_v12 }
 0x23f   : > { %3863 = vmatpush1.bf16.msra.mxu0 %v5436_v39 }
 0x240   : > { %3864 = vmatprep.subr.bf16.mxu0 %v5444_v16 }
 0x241   : > { %1780 = vmatmul.mubr.bf16.gmra.mrb[36].mxu1 %v6551_v0  ;;  %1893 = vmatmul.mubr.bf16.gmra.mrb[84].mxu0 %v6551_v0  ;;  %v5435_v0 = vld [vmem:[%s7931_s7 + $0x64] ss:$16 sps:$4 sm:$0xff]  }
 0x242   : > { %1789 = vmatprep.mubr.bf16.mxu1 %v5996_v1  ;;  %1902 = vmatprep.mubr.bf16.mxu0 %v5996_v1 }
 0x243   : > { %3698 = vmatprep.subr.bf16.mxu1 %v5435_v0  ;;  %3865 = vmatpush1.bf16.msra.mxu0 %v5442_v37 }
 0x244   : > { %3699 = vmatpush1.bf16.msra.mxu1 %v5433_v13  ;;  %3866 = vmatprep.subr.bf16.mxu0 %v5450_v21 }
 0x245   : > { %3700 = vmatprep.subr.bf16.mxu1 %v5441_v15 }
 0x248   : > { %3701 = vmatpush1.bf16.msra.mxu1 %v5439_v17 }
 0x249   : > { %1790 = vmatmul.mubr.bf16.gmra.mrb[40].mxu1 %v6616_v4  ;;  %1903 = vmatmul.mubr.bf16.gmra.mrb[88].mxu0 %v6616_v4  ;;  %v5502_v4 = vld [vmem:[%s7931_s7 + $0x1c8] ss:$16 sps:$4 sm:$0xff]  }
 0x24a   : > { %1799 = vmatprep.mubr.bf16.mxu1 %v5996_v1  ;;  %1912 = vmatprep.mubr.bf16.mxu0 %v5996_v1  ;;  %v5448_v1 = vld [vmem:[%s7931_s7 + $0xa8] ss:$16 sps:$4 sm:$0xff]  }
 0x24b   : > { %3702 = vmatprep.subr.bf16.mxu1 %v5447_v38  ;;  %3867 = vmatpush1.bf16.msra.mxu0 %v5448_v1 }
 0x24c   : > { %3703 = vmatpush1.bf16.msra.mxu1 %v5445_v46  ;;  %3868 = vmatprep.subr.bf16.mxu0 %v5456_v44 }
 0x24d   : > { %3704 = vmatprep.subr.bf16.mxu1 %v5453_v22 }
 0x24f   : > { %3869 = vmatpush1.bf16.msra.mxu0 %v5454_v26 }
 0x250   : > { %3705 = vmatpush1.bf16.msra.mxu1 %v5451_v18  ;;  %3870 = vmatprep.subr.bf16.mxu0 %v5462_v25 }
 0x251   : > { %1800 = vmatmul.mubr.bf16.gmra.mrb[44].mxu1 %v6614_v50  ;;  %1913 = vmatmul.mubr.bf16.gmra.mrb[92].mxu0 %v6614_v50  ;;  %v5499_v50 = vld [vmem:[%s7931_s7 + $0x1c0] ss:$16 sps:$4 sm:$0xff]  }
 0x252   : > { %3706 = vmatprep.subr.bf16.mxu1 %v5459_v23 }
 0x253   : > { %3871 = vmatpush1.bf16.msra.mxu0 %v5460_v27 }
 0x254   : > { %3707 = vmatpush1.bf16.msra.mxu1 %v5457_v8  ;;  %3872 = vmatprep.subr.bf16.mxu0 %v5468_v30 }
 0x255   : > { %3708 = vmatprep.subr.bf16.mxu1 %v5465_v29 }
 0x257   : > { %3873 = vmatpush1.bf16.msra.mxu0 %v5466_v31 }
 0x258   : > { %3709 = vmatpush1.bf16.msra.mxu1 %v5463_v45  ;;  %3874 = vmatprep.subr.bf16.mxu0 %v5474_v51 }
 0x259   : > { %3710 = vmatprep.subr.bf16.mxu1 %v5471_v32 }
 0x25b   : > { %3875 = vmatpush1.bf16.msra.mxu0 %v5472_v24 }
 0x25c   : > { %3711 = vmatpush1.bf16.msra.mxu1 %v5469_v33  ;;  %3876 = vmatprep.subr.bf16.mxu0 %v5480_v35 }
 0x25d   : > { %3712 = vmatprep.subr.bf16.mxu1 %v5477_v61 }
 0x25f   : > { %3877 = vmatpush1.bf16.msra.mxu0 %v5478_v62 }
 0x260   : > { %3713 = vmatpush1.bf16.msra.mxu1 %v5475_v36  ;;  %3878 = vmatprep.subr.bf16.mxu0 %v5486_v43 }
 0x261   : > { %3714 = vmatprep.subr.bf16.mxu1 %v5483_v40 }
 0x263   : > { %3879 = vmatpush1.bf16.msra.mxu0 %v5484_v47 }
 0x264   : > { %3715 = vmatpush1.bf16.msra.mxu1 %v5481_v41  ;;  %3880 = vmatprep.subr.bf16.mxu0 %v5492_v9 }
 0x265   : > { %3716 = vmatprep.subr.bf16.mxu1 %v5489_v7 }
 0x267   : > { %3881 = vmatpush1.bf16.msra.mxu0 %v5490_v52 }
 0x268   : > { %3717 = vmatpush1.bf16.msra.mxu1 %v5487_v48  ;;  %3882 = vmatprep.subr.bf16.mxu0 %v5498_v20  ;;  %v1125_v20 = vsub.s32 3, %v6222_v42 }
 0x269   : > { %3718 = vmatprep.subr.bf16.mxu1 %v5495_v57 }
 0x26b   : > { %3883 = vmatpush1.bf16.msra.mxu0 %v5496_v60 }
 0x26c   : > { %3719 = vmatpush1.bf16.msra.mxu1 %v5493_v58  ;;  %3884 = vmatprep.subr.bf16.mxu0 %v5504_v3 }
 0x26d   : > { %3720 = vmatprep.subr.bf16.mxu1 %v5501_v2  ;;  %v6886_v2 = vrot.slane %v6857_v63, %v6252_v55 }
 0x26f   : > { %3885 = vmatpush1.bf16.msra.mxu0 %v5502_v4 }
 0x270   : > { %3721 = vmatpush1.bf16.msra.mxu1 %v5499_v50  ;;  %3886 = vmatprep.subr.bf16.mxu0 %v5510_v53  ;;  %v6891_v50 = vrot.slane %v6857_v63, %v1125_v20 }
 0x271   : > { %3722 = vmatprep.subr.bf16.mxu1 %v5507_v19 }
 0x273   : > { %3887 = vmatpush1.bf16.msra.mxu0 %v5508_v14 }
 0x274   : > { %3723 = vmatpush1.bf16.msra.mxu1 %v5505_v34  ;;  %3897 = vmatprep.subr.bf16.mxu0 %v5516_v59 }
 0x275   : > { %3733 = vmatprep.subr.bf16.mxu1 %v5513_v28 }
 0x282   : > { %v1505_v6 = vpop.f32.mrb[16].mxu0 }
 0x283   : > { %v1507_v10 = vpop.f32.mrb[17].mxu0  ;;  %v1506_v0 = vadd.f32 %v1505_v6, %v6861_v5 }
 0x284   : > { %v1509_v11 = vpop.f32.mrb[18].mxu0  ;;  %v1508_v39 = vadd.f32 %v1507_v10, %v6865_v56 }
 0x285   : > { %v1510_v12 = vadd.f32 %v1509_v11, %v6861_v5  ;;  %v1511_v13 = vpop.f32.mrb[19].mxu0 }
 0x286   : > { %v1512_v15 = vadd.f32 %v1511_v13, %v6865_v56 }
 0x287   : > { %v1923_v16 = vmax.f32 %v1506_v0, %v1510_v12 }
 0x288   : > { %v1938_v17 = vmax.f32 %v1508_v39, %v1512_v15 }
 0x28a   : > { %v1515_v37 = vpop.f32.mrb[20].mxu0 }
 0x28b   : > { %v1516_v38 = vadd.f32 %v1515_v37, %v6861_v5  ;;  %v1517_v21 = vpop.f32.mrb[21].mxu0 }
 0x28c   : > { %v1518_v46 = vadd.f32 %v1517_v21, %v6865_v56  ;;  %v1519_v1 = vpop.f32.mrb[22].mxu0 }
 0x28d   : > { %v1924_v22 = vmax.f32 %v1923_v16, %v1516_v38  ;;  %v1520_v44 = vadd.f32 %v1519_v1, %v6861_v5  ;;  %v1521_v18 = vpop.f32.mrb[23].mxu0 }
 0x28e   : > { %v1939_v26 = vmax.f32 %v1938_v17, %v1518_v46  ;;  %v1522_v8 = vadd.f32 %v1521_v18, %v6865_v56 }
 0x28f   : > { %v1925_v23 = vmax.f32 %v1924_v22, %v1520_v44 }
 0x290   : > { %v1940_v27 = vmax.f32 %v1939_v26, %v1522_v8 }
 0x296   : > { %v1525_v25 = vpop.f32.mrb[24].mxu0 }
 0x297   : > { %v1526_v29 = vadd.f32 %v1525_v25, %v6861_v5  ;;  %v1527_v30 = vpop.f32.mrb[25].mxu0 }
 0x298   : > { %v1528_v45 = vadd.f32 %v1527_v30, %v6865_v56  ;;  %v1529_v31 = vpop.f32.mrb[26].mxu0 }
 0x299   : > { %v1926_v32 = vmax.f32 %v1925_v23, %v1526_v29  ;;  %v1530_v51 = vadd.f32 %v1529_v31, %v6861_v5  ;;  %v1531_v33 = vpop.f32.mrb[27].mxu0 }
 0x29a   : > { %v1941_v24 = vmax.f32 %v1940_v27, %v1528_v45  ;;  %v1532_v61 = vadd.f32 %v1531_v33, %v6865_v56 }
 0x29b   : > { %v1927_v35 = vmax.f32 %v1926_v32, %v1530_v51 }
 0x29c   : > { %v1942_v36 = vmax.f32 %v1941_v24, %v1532_v61 }
 0x29e   : > { %v1535_v62 = vpop.f32.mrb[28].mxu0 }
 0x29f   : > { %v1536_v40 = vadd.f32 %v1535_v62, %v6861_v5  ;;  %v1537_v43 = vpop.f32.mrb[29].mxu0 }
 0x2a0   : > { %v1538_v41 = vadd.f32 %v1537_v43, %v6865_v56  ;;  %v1539_v47 = vpop.f32.mrb[30].mxu0 }
 0x2a1   : > { %v1928_v7 = vmax.f32 %v1927_v35, %v1536_v40  ;;  %v1540_v9 = vadd.f32 %v1539_v47, %v6861_v5  ;;  %v1541_v48 = vpop.f32.mrb[31].mxu0 }
 0x2a2   : > { %v1943_v52 = vmax.f32 %v1942_v36, %v1538_v41  ;;  %v1542_v57 = vadd.f32 %v1541_v48, %v6865_v56 }
 0x2a3   : > { %v1929_v58 = vmax.f32 %v1928_v7, %v1540_v9 }
 0x2a4   : > { %v1944_v60 = vmax.f32 %v1943_v52, %v1542_v57 }
 0x2a6   : > { %v1618_v3 = vpop.f32.mrb[32].mxu0 }
 0x2a7   : > { %v1620_v4 = vpop.f32.mrb[33].mxu0  ;;  %v1619_v53 = vadd.f32 %v1618_v3, %v6886_v2 }
 0x2a8   : > { %v1622_v19 = vpop.f32.mrb[34].mxu0  ;;  %v1621_v28 = vadd.f32 %v1620_v4, %v6891_v50 }
 0x2a9   : > { %v1623_v34 = vadd.f32 %v1622_v19, %v6886_v2  ;;  %v1624_v14 = vpop.f32.mrb[35].mxu0 }
 0x2aa   : > { %v1625_v59 = vadd.f32 %v1624_v14, %v6891_v50 }
 0x2ab   : > { %v1953_v6 = vmax.f32 %v1619_v53, %v1623_v34 }
 0x2ac   : > { %v1968_v10 = vmax.f32 %v1621_v28, %v1625_v59 }
 0x2ae   : > { %v1628_v11 = vpop.f32.mrb[36].mxu0 }
 0x2af   : > { %v1629_v0 = vadd.f32 %v1628_v11, %v6886_v2  ;;  %v1630_v12 = vpop.f32.mrb[37].mxu0 }
 0x2b0   : > { %v1631_v13 = vadd.f32 %v1630_v12, %v6891_v50  ;;  %v1632_v39 = vpop.f32.mrb[38].mxu0 }
 0x2b1   : > { %v1954_v15 = vmax.f32 %v1953_v6, %v1629_v0  ;;  %v1633_v16 = vadd.f32 %v1632_v39, %v6886_v2  ;;  %v1634_v17 = vpop.f32.mrb[39].mxu0 }
 0x2b2   : > { %v1969_v37 = vmax.f32 %v1968_v10, %v1631_v13  ;;  %v1635_v38 = vadd.f32 %v1634_v17, %v6891_v50 }
 0x2b3   : > { %v1955_v21 = vmax.f32 %v1954_v15, %v1633_v16 }
 0x2b4   : > { %v1970_v46 = vmax.f32 %v1969_v37, %v1635_v38 }
 0x2b6   : > { %v1638_v1 = vpop.f32.mrb[40].mxu0 }
 0x2b7   : > { %v1639_v22 = vadd.f32 %v1638_v1, %v6886_v2  ;;  %v1640_v44 = vpop.f32.mrb[41].mxu0 }
 0x2b8   : > { %v1641_v18 = vadd.f32 %v1640_v44, %v6891_v50  ;;  %v1642_v26 = vpop.f32.mrb[42].mxu0 }
 0x2b9   : > { %v1956_v8 = vmax.f32 %v1955_v21, %v1639_v22  ;;  %v1643_v23 = vadd.f32 %v1642_v26, %v6886_v2  ;;  %v1644_v27 = vpop.f32.mrb[43].mxu0 }
 0x2ba   : > { %v1971_v25 = vmax.f32 %v1970_v46, %v1641_v18  ;;  %v1645_v29 = vadd.f32 %v1644_v27, %v6891_v50 }
 0x2bb   : > { %v1957_v30 = vmax.f32 %v1956_v8, %v1643_v23  ;;  %v1545_v45 = vpop.f32.mrb[0].mxu1 }
 0x2bc   : > { %v1972_v31 = vmax.f32 %v1971_v25, %v1645_v29  ;;  %v1546_v32 = vadd.f32 %v1545_v45, %v6861_v5  ;;  %v1547_v51 = vpop.f32.mrb[1].mxu1 }
 0x2bd   : > { %v1548_v33 = vadd.f32 %v1547_v51, %v6865_v56  ;;  %v1549_v24 = vpop.f32.mrb[2].mxu1 }
 0x2be   : > { %v1930_v61 = vmax.f32 %v1929_v58, %v1546_v32  ;;  %v1550_v35 = vadd.f32 %v1549_v24, %v6861_v5  ;;  %v1551_v36 = vpop.f32.mrb[3].mxu1  ;;  %v1648_v62 = vpop.f32.mrb[44].mxu0 }
 0x2bf   : > { %v1945_v40 = vmax.f32 %v1944_v60, %v1548_v33  ;;  %v1552_v43 = vadd.f32 %v1551_v36, %v6865_v56  ;;  %v1649_v41 = vadd.f32 %v1648_v62, %v6886_v2  ;;  %v1650_v47 = vpop.f32.mrb[45].mxu0 }
 0x2c0   : > { %v1931_v7 = vmax.f32 %v1930_v61, %v1550_v35  ;;  %v1651_v9 = vadd.f32 %v1650_v47, %v6891_v50  ;;  %v1652_v48 = vpop.f32.mrb[46].mxu0 }
 0x2c1   : > { %v1946_v52 = vmax.f32 %v1945_v40, %v1552_v43  ;;  %v1958_v57 = vmax.f32 %v1957_v30, %v1649_v41  ;;  %v1653_v3 = vadd.f32 %v1652_v48, %v6886_v2  ;;  %v1654_v4 = vpop.f32.mrb[47].mxu0 }
 0x2c2   : > { %v1973_v58 = vmax.f32 %v1972_v31, %v1651_v9  ;;  %v1655_v19 = vadd.f32 %v1654_v4, %v6891_v50 }
 0x2c3   : > { %v1959_v53 = vmax.f32 %v1958_v57, %v1653_v3  ;;  %v1555_v34 = vpop.f32.mrb[4].mxu1 }
 0x2c4   : > { %v1974_v60 = vmax.f32 %v1973_v58, %v1655_v19  ;;  %v1556_v14 = vadd.f32 %v1555_v34, %v6861_v5  ;;  %v1557_v28 = vpop.f32.mrb[5].mxu1 }
 0x2c5   : > { %v1558_v59 = vadd.f32 %v1557_v28, %v6865_v56  ;;  %v1559_v6 = vpop.f32.mrb[6].mxu1 }
 0x2c6   : > { %v1932_v10 = vmax.f32 %v1931_v7, %v1556_v14  ;;  %v1560_v11 = vadd.f32 %v1559_v6, %v6861_v5  ;;  %v1561_v0 = vpop.f32.mrb[7].mxu1  ;;  %v1658_v12 = vpop.f32.mrb[48].mxu0 }
 0x2c7   : > { %v1947_v13 = vmax.f32 %v1946_v52, %v1558_v59  ;;  %v1562_v39 = vadd.f32 %v1561_v0, %v6865_v56  ;;  %v1659_v15 = vadd.f32 %v1658_v12, %v6886_v2  ;;  %v1660_v16 = vpop.f32.mrb[49].mxu0 }
 0x2c8   : > { %v1933_v17 = vmax.f32 %v1932_v10, %v1560_v11  ;;  %v1661_v37 = vadd.f32 %v1660_v16, %v6891_v50  ;;  %v1662_v38 = vpop.f32.mrb[50].mxu0  ;;  %v1129_v16 = vsub.s32 4, %v6222_v42 }
 0x2c9   : > { %v1948_v21 = vmax.f32 %v1947_v13, %v1562_v39  ;;  %v1960_v46 = vmax.f32 %v1959_v53, %v1659_v15  ;;  %v1663_v1 = vadd.f32 %v1662_v38, %v6886_v2  ;;  %v1664_v22 = vpop.f32.mrb[51].mxu0 }
 0x2ca   : > { %v1975_v44 = vmax.f32 %v1974_v60, %v1661_v37  ;;  %v1665_v18 = vadd.f32 %v1664_v22, %v6891_v50  ;;  %v1141_v22 = vsub.s32 7, %v6222_v42 }
 0x2cb   : > { %v1961_v26 = vmax.f32 %v1960_v46, %v1663_v1  ;;  %v1133_v1 = vsub.s32 5, %v6222_v42 }
 0x2cc   : > { %v1976_v8 = vmax.f32 %v1975_v44, %v1665_v18 }
 0x2ce   : > { %v1668_v23 = vpop.f32.mrb[52].mxu0 }
 0x2cf   : > { %v1669_v27 = vadd.f32 %v1668_v23, %v6886_v2  ;;  %v1670_v25 = vpop.f32.mrb[53].mxu0 }
 0x2d0   : > { %v1671_v29 = vadd.f32 %v1670_v25, %v6891_v50  ;;  %v1672_v30 = vpop.f32.mrb[54].mxu0 }
 0x2d1   : > { %v1962_v45 = vmax.f32 %v1961_v26, %v1669_v27  ;;  %v1673_v31 = vadd.f32 %v1672_v30, %v6886_v2  ;;  %v1674_v32 = vpop.f32.mrb[55].mxu0 }
 0x2d2   : > { %v1977_v51 = vmax.f32 %v1976_v8, %v1671_v29  ;;  %v1675_v33 = vadd.f32 %v1674_v32, %v6891_v50 }
 0x2d3   : > { %v1963_v24 = vmax.f32 %v1962_v45, %v1673_v31 }
 0x2d4   : > { %v1978_v61 = vmax.f32 %v1977_v51, %v1675_v33  ;;  %v6948_v51 = vrot.slane %v6857_v63, %v1129_v16 }
 0x2dc   : > { %v1565_v35 = vpop.f32.mrb[8].mxu1  ;;  %v1678_v36 = vpop.f32.mrb[56].mxu0 }
 0x2dd   : > { %v1566_v62 = vadd.f32 %v1565_v35, %v6861_v5  ;;  %v1679_v40 = vadd.f32 %v1678_v36, %v6886_v2  ;;  %v1567_v43 = vpop.f32.mrb[9].mxu1  ;;  %v1680_v41 = vpop.f32.mrb[57].mxu0  ;;  %v6957_v35 = vrot.slane %v6857_v63, %v1141_v22 }
 0x2de   : > { %v1568_v47 = vadd.f32 %v1567_v43, %v6865_v56  ;;  %v1681_v7 = vadd.f32 %v1680_v41, %v6891_v50  ;;  %v1569_v9 = vpop.f32.mrb[10].mxu1  ;;  %v1682_v48 = vpop.f32.mrb[58].mxu0 }
 0x2df   : > { %v1934_v52 = vmax.f32 %v1933_v17, %v1566_v62  ;;  %v1964_v57 = vmax.f32 %v1963_v24, %v1679_v40  ;;  %v1570_v3 = vadd.f32 %v1569_v9, %v6861_v5  ;;  %v1683_v4 = vadd.f32 %v1682_v48, %v6886_v2  ;;  %v1571_v58 = vpop.f32.mrb[11].mxu1  ;;  %v1684_v19 = vpop.f32.mrb[59].mxu0 }
 0x2e0   : > { %v1949_v53 = vmax.f32 %v1948_v21, %v1568_v47  ;;  %v1979_v34 = vmax.f32 %v1978_v61, %v1681_v7  ;;  %v1572_v60 = vadd.f32 %v1571_v58, %v6865_v56  ;;  %v1685_v14 = vadd.f32 %v1684_v19, %v6891_v50 }
 0x2e1   : > { %v1935_v28 = vmax.f32 %v1934_v52, %v1570_v3  ;;  %v1965_v59 = vmax.f32 %v1964_v57, %v1683_v4  ;;  %v1137_v17 = vsub.s32 6, %v6222_v42  ;;  %v5847_v42 = vld [vmem:[%s7933_s9 + $0x100] ss:$8 sps:$4 sm:$0xff]  }
 0x2e2   : > { %v1950_v6 = vmax.f32 %v1949_v53, %v1572_v60  ;;  %v1980_v10 = vmax.f32 %v1979_v34, %v1685_v14 }
 0x2e4   : > { %v1575_v11 = vpop.f32.mrb[12].mxu1  ;;  %v1688_v0 = vpop.f32.mrb[60].mxu0 }
 0x2e5   : > { %v1576_v12 = vadd.f32 %v1575_v11, %v6861_v5  ;;  %v1689_v13 = vadd.f32 %v1688_v0, %v6886_v2  ;;  %v1577_v39 = vpop.f32.mrb[13].mxu1  ;;  %v1690_v15 = vpop.f32.mrb[61].mxu0 }
 0x2e6   : > { %v1578_v37 = vadd.f32 %v1577_v39, %v6865_v56  ;;  %v1691_v38 = vadd.f32 %v1690_v15, %v6891_v50  ;;  %v1579_v21 = vpop.f32.mrb[14].mxu1  ;;  %v1692_v46 = vpop.f32.mrb[62].mxu0 }
 0x2e7   : > { %v1936_v44 = vmax.f32 %v1935_v28, %v1576_v12  ;;  %v1966_v18 = vmax.f32 %v1965_v59, %v1689_v13  ;;  %v1580_v26 = vadd.f32 %v1579_v21, %v6861_v5  ;;  %v1693_v8 = vadd.f32 %v1692_v46, %v6886_v2  ;;  %v1581_v23 = vpop.f32.mrb[15].mxu1  ;;  %v1694_v27 = vpop.f32.mrb[63].mxu0 }
 0x2e8   : > { %v1951_v25 = vmax.f32 %v1950_v6, %v1578_v37  ;;  %v1981_v29 = vmax.f32 %v1980_v10, %v1691_v38  ;;  %v1582_v30 = vadd.f32 %v1581_v23, %v6865_v56  ;;  %v1695_v45 = vadd.f32 %v1694_v27, %v6891_v50 }
 0x2e9   : > { %v1937_v31 = vmax.f32 %v1936_v44, %v1580_v26  ;;  %v6945_v32 = vmax.f32 %v1966_v18, %v1693_v8  ;;  %v6951_v5 = vrot.slane %v6857_v63, %v1137_v17  ;;  %v6954_v2 = vrot.slane %v6857_v63, %v1133_v1 }
 0x2ea   : > { %v1952_v33 = vmax.f32 %v1951_v25, %v1582_v30  ;;  %v1982_v24 = vmax.f32 %v1981_v29, %v1695_v45 }
 0x2eb   : > { %v2078_v61 = vrot.slane %v1937_v31, 4 }
 0x2ec   : > { %v2084_v56 = vrot.slane %v1952_v33, 4  ;;  %v2096_v50 = vrot.slane %v1982_v24, 4  ;;  %v1731_v36 = vpop.f32.mrb[16].mxu1  ;;  %v1844_v62 = vpop.f32.mrb[64].mxu0 }
 0x2ed   : > { %v2079_v40 = vmax.f32 %v1937_v31, %v2078_v61  ;;  %v1732_v43 = vadd.f32 %v1731_v36, %v6948_v51  ;;  %v1733_v41 = vpop.f32.mrb[17].mxu1  ;;  %v1846_v47 = vpop.f32.mrb[65].mxu0  ;;  %v1845_v48 = vadd.f32 %v1844_v62, %v6951_v5 }
 0x2ee   : > { %v2085_v7 = vmax.f32 %v1952_v33, %v2084_v56  ;;  %v2097_v9 = vmax.f32 %v1982_v24, %v2096_v50  ;;  %v1734_v52 = vadd.f32 %v1733_v41, %v6954_v2  ;;  %v1735_v57 = vpop.f32.mrb[18].mxu1  ;;  %v1848_v3 = vpop.f32.mrb[66].mxu0  ;;  %v1847_v63 = vadd.f32 %v1846_v47, %v6957_v35  ;;  %v5514_v41 = vld [vmem:[%s7931_s7 + $0x208] ss:$16 sps:$4 sm:$0xff]  }
 0x2ef   : > { %v2080_v4 = vrot.slane %v2079_v40, 2  ;;  %v1736_v58 = vadd.f32 %v1735_v57, %v6948_v51  ;;  %v1849_v19 = vadd.f32 %v1848_v3, %v6951_v5  ;;  %v1737_v53 = vpop.f32.mrb[19].mxu1  ;;  %v1850_v34 = vpop.f32.mrb[67].mxu0 }
 0x2f0   : > { %v2086_v60 = vrot.slane %v2085_v7, 2  ;;  %v2098_v14 = vrot.slane %v2097_v9, 2  ;;  %v1738_v28 = vadd.f32 %v1737_v53, %v6954_v2  ;;  %v1851_v59 = vadd.f32 %v1850_v34, %v6957_v35 }
 0x2f1   : > { %v2081_v6 = vmax.f32 %v2079_v40, %v2080_v4  ;;  %v1983_v10 = vmax.f32 %v1732_v43, %v1736_v58  ;;  %v2013_v11 = vmax.f32 %v1845_v48, %v1849_v19  ;;  %v5511_v43 = vld [vmem:[%s7931_s7 + $0x200] ss:$16 sps:$4 sm:$0xff]  }
 0x2f2   : > { %v1998_v0 = vmax.f32 %v1734_v52, %v1738_v28  ;;  %v2028_v12 = vmax.f32 %v1847_v63, %v1851_v59  ;;  %v2087_v13 = vmax.f32 %v2085_v7, %v2086_v60  ;;  %v2099_v39 = vmax.f32 %v2097_v9, %v2098_v14  ;;  %v5519_v52 = vld [vmem:[%s7931_s7 + $0x224] ss:$16 sps:$4 sm:$0xff]   ;;  %v5522_v63 = vld [vmem:[%s7931_s7 + $0x22c] ss:$16 sps:$4 sm:$0xff]   ;;  %v5517_v60 = vld [vmem:[%s7931_s7 + $0x220] ss:$16 sps:$4 sm:$0xff]  }
 0x2f3   : > { %v2082_v15 = vrot.slane %v2081_v6, 1  ;;  %v5520_v14 = vld [vmem:[%s7931_s7 + $0x228] ss:$16 sps:$4 sm:$0xff]  }
 0x2f4   : > { %v1741_v16 = vpop.f32.mrb[20].mxu1  ;;  %v1854_v17 = vpop.f32.mrb[68].mxu0  ;;  %v2088_v37 = vrot.slane %v2087_v13, 1  ;;  %v2100_v38 = vrot.slane %v2099_v39, 1 }
 0x2f5   : > { %v1742_v21 = vadd.f32 %v1741_v16, %v6948_v51  ;;  %v1855_v46 = vadd.f32 %v1854_v17, %v6951_v5  ;;  %v1743_v1 = vpop.f32.mrb[21].mxu1  ;;  %v1856_v22 = vpop.f32.mrb[69].mxu0  ;;  %v2083_v44 = vmax.f32 %v2081_v6, %v2082_v15 }
 0x2f6   : > { %v1744_v18 = vadd.f32 %v1743_v1, %v6954_v2  ;;  %v1857_v26 = vadd.f32 %v1856_v22, %v6957_v35  ;;  %v1745_v8 = vpop.f32.mrb[22].mxu1  ;;  %v1858_v23 = vpop.f32.mrb[70].mxu0  ;;  %v2089_v27 = vmax.f32 %v2087_v13, %v2088_v37  ;;  %v2101_v33 = vmax.f32 %v2099_v39, %v2100_v38 }
 0x2f7   : > { %v1984_v25 = vmax.f32 %v1983_v10, %v1742_v21  ;;  %v2014_v29 = vmax.f32 %v2013_v11, %v1855_v46  ;;  %v1746_v30 = vadd.f32 %v1745_v8, %v6948_v51  ;;  %v1747_v45 = vpop.f32.mrb[23].mxu1  ;;  %v1860_v31 = vpop.f32.mrb[71].mxu0  ;;  %v1859_v56 = vadd.f32 %v1858_v23, %v6951_v5  ;;  %v5525_v11 = vld [vmem:[%s7931_s7 + $0x244] ss:$16 sps:$4 sm:$0xff]  }
 0x2f8   : > { %v1999_v24 = vmax.f32 %v1998_v0, %v1744_v18  ;;  %v2029_v61 = vmax.f32 %v2028_v12, %v1857_v26  ;;  %v1748_v50 = vadd.f32 %v1747_v45, %v6954_v2  ;;  %v1861_v62 = vadd.f32 %v1860_v31, %v6957_v35  ;;  %v5528_v0 = vld [vmem:[%s7931_s7 + $0x24c] ss:$16 sps:$4 sm:$0xff]   ;;  %v5526_v18 = vld [vmem:[%s7931_s7 + $0x248] ss:$16 sps:$4 sm:$0xff]   ;;  %v5531_v23 = vld [vmem:[%s7931_s7 + $0x264] ss:$16 sps:$4 sm:$0xff]  }
 0x2f9   : > { %v1985_v36 = vmax.f32 %v1984_v25, %v1746_v30  ;;  %v2127_v40 = vpack.c.bf16 %v2089_v27, %v2089_v27  ;;  %v2126_v47 = vpack.c.bf16 %v2083_v44, %v2083_v44  ;;  %v2015_v7 = vmax.f32 %v2014_v29, %v1859_v56  ;;  %v5523_v44 = vld [vmem:[%s7931_s7 + $0x240] ss:$16 sps:$4 sm:$0xff]   ;;  %v5534_v27 = vld [vmem:[%s7931_s7 + $0x26c] ss:$16 sps:$4 sm:$0xff]  }
 0x2fa   : > { %v2000_v9 = vmax.f32 %v1999_v24, %v1748_v50  ;;  %v2030_v48 = vmax.f32 %v2029_v61, %v1861_v62  ;;  %v2129_v4 = vpack.c.bf16 %v2101_v33, %v2101_v33  ;;  %v5529_v24 = vld [vmem:[%s7931_s7 + $0x260] ss:$16 sps:$4 sm:$0xff]   ;;  %v5532_v61 = vld [vmem:[%s7931_s7 + $0x268] ss:$16 sps:$4 sm:$0xff]  }
 0x2fb   : > { %3724 = vmatprep.mubr.bf16.mxu1 %v2127_v40  ;;  %3888 = vmatprep.mubr.bf16.mxu0 %v2127_v40  ;;  %v5537_v40 = vld [vmem:[%s7931_s7 + $0x284] ss:$16 sps:$4 sm:$0xff]  }
 0x2fc   : > { %3725 = vmatmul.mubr.bf16.vlgmr.msra.gmra.mrb[48].mxu1 %v2126_v47  ;;  %3889 = vmatmul.mubr.bf16.vlgmr.msra.gmra.mrb[96].mxu0 %v2126_v47  ;;  %v1751_v57 = vpop.f32.mrb[24].mxu1  ;;  %v1864_v3 = vpop.f32.mrb[72].mxu0 }
 0x2fd   : > { %3734 = vmatpush1.bf16.msra.mxu1 %v5511_v43  ;;  %3898 = vmatpush1.bf16.msra.mxu0 %v5514_v41  ;;  %v1752_v58 = vadd.f32 %v1751_v57, %v6948_v51  ;;  %v1865_v19 = vadd.f32 %v1864_v3, %v6951_v5  ;;  %v1753_v53 = vpop.f32.mrb[25].mxu1  ;;  %v1866_v34 = vpop.f32.mrb[73].mxu0  ;;  %v5540_v43 = vld [vmem:[%s7931_s7 + $0x28c] ss:$16 sps:$4 sm:$0xff]  }
 0x2fe   : > { %3765 = vmatprep.mubr.bf16.mxu1 %v2129_v4  ;;  %3929 = vmatprep.mubr.bf16.mxu0 %v2129_v4  ;;  %v1754_v28 = vadd.f32 %v1753_v53, %v6954_v2  ;;  %v1867_v59 = vadd.f32 %v1866_v34, %v6957_v35  ;;  %v1755_v6 = vpop.f32.mrb[26].mxu1  ;;  %v1868_v10 = vpop.f32.mrb[74].mxu0  ;;  %v5535_v53 = vld [vmem:[%s7931_s7 + $0x280] ss:$16 sps:$4 sm:$0xff]   ;;  %v5538_v34 = vld [vmem:[%s7931_s7 + $0x288] ss:$16 sps:$4 sm:$0xff]  }
 0x2ff   : > { %v1986_v12 = vmax.f32 %v1985_v36, %v1752_v58  ;;  %v2016_v13 = vmax.f32 %v2015_v7, %v1865_v19  ;;  %v1756_v39 = vadd.f32 %v1755_v6, %v6948_v51  ;;  %v1869_v15 = vadd.f32 %v1868_v10, %v6951_v5  ;;  %3735 = vmatprep.subr.bf16.mxu1 %v5519_v52  ;;  %v1757_v16 = vpop.f32.mrb[27].mxu1  ;;  %v1870_v17 = vpop.f32.mrb[75].mxu0 }
 0x300   : > { %v2001_v37 = vmax.f32 %v2000_v9, %v1754_v28  ;;  %v2031_v38 = vmax.f32 %v2030_v48, %v1867_v59  ;;  %3899 = vmatprep.subr.bf16.mxu0 %v5522_v63  ;;  %v1758_v21 = vadd.f32 %v1757_v16, %v6954_v2  ;;  %v1871_v46 = vadd.f32 %v1870_v17, %v6957_v35  ;;  %v5543_v28 = vld [vmem:[%s7931_s7 + $0x2a4] ss:$16 sps:$4 sm:$0xff]   ;;  %v5546_v59 = vld [vmem:[%s7931_s7 + $0x2ac] ss:$16 sps:$4 sm:$0xff]  }
 0x301   : > { %v1987_v1 = vmax.f32 %v1986_v12, %v1756_v39  ;;  %v2017_v22 = vmax.f32 %v2016_v13, %v1869_v15  ;;  %3736 = vmatpush1.bf16.msra.mxu1 %v5517_v60  ;;  %3900 = vmatpush1.bf16.msra.mxu0 %v5520_v14  ;;  %v5541_v39 = vld [vmem:[%s7931_s7 + $0x2a0] ss:$16 sps:$4 sm:$0xff]   ;;  %v5544_v15 = vld [vmem:[%s7931_s7 + $0x2a8] ss:$16 sps:$4 sm:$0xff]  }
 0x302   : > { %v2002_v26 = vmax.f32 %v2001_v37, %v1758_v21  ;;  %v2032_v8 = vmax.f32 %v2031_v38, %v1871_v46  ;;  %3737 = vmatprep.subr.bf16.mxu1 %v5525_v11  ;;  %3901 = vmatprep.subr.bf16.mxu0 %v5528_v0  ;;  %v5549_v21 = vld [vmem:[%s7931_s7 + $0x2c4] ss:$16 sps:$4 sm:$0xff]   ;;  %v5552_v46 = vld [vmem:[%s7931_s7 + $0x2cc] ss:$16 sps:$4 sm:$0xff]  }
 0x304   : > { %v1761_v25 = vpop.f32.mrb[28].mxu1  ;;  %v1874_v29 = vpop.f32.mrb[76].mxu0 }
 0x305   : > { %3738 = vmatpush1.bf16.msra.mxu1 %v5523_v44  ;;  %3902 = vmatpush1.bf16.msra.mxu0 %v5526_v18  ;;  %v1762_v30 = vadd.f32 %v1761_v25, %v6948_v51  ;;  %v1875_v45 = vadd.f32 %v1874_v29, %v6951_v5  ;;  %v1763_v31 = vpop.f32.mrb[29].mxu1  ;;  %v1876_v33 = vpop.f32.mrb[77].mxu0 }
 0x306   : > { %v1764_v56 = vadd.f32 %v1763_v31, %v6954_v2  ;;  %v1877_v50 = vadd.f32 %v1876_v33, %v6957_v35  ;;  %v1765_v36 = vpop.f32.mrb[30].mxu1  ;;  %v1878_v62 = vpop.f32.mrb[78].mxu0  ;;  %3739 = vmatprep.subr.bf16.mxu1 %v5531_v23  ;;  %3903 = vmatprep.subr.bf16.mxu0 %v5534_v27  ;;  %v5547_v31 = vld [vmem:[%s7931_s7 + $0x2c0] ss:$16 sps:$4 sm:$0xff]   ;;  %v5550_v33 = vld [vmem:[%s7931_s7 + $0x2c8] ss:$16 sps:$4 sm:$0xff]  }
 0x307   : > { %v1988_v41 = vmax.f32 %v1987_v1, %v1762_v30  ;;  %v2018_v47 = vmax.f32 %v2017_v22, %v1875_v45  ;;  %v1766_v7 = vadd.f32 %v1765_v36, %v6948_v51  ;;  %v1879_v9 = vadd.f32 %v1878_v62, %v6951_v5  ;;  %v1767_v48 = vpop.f32.mrb[31].mxu1  ;;  %v1880_v52 = vpop.f32.mrb[79].mxu0 }
 0x308   : > { %v2003_v57 = vmax.f32 %v2002_v26, %v1764_v56  ;;  %v2033_v3 = vmax.f32 %v2032_v8, %v1877_v50  ;;  %v1768_v4 = vadd.f32 %v1767_v48, %v6954_v2  ;;  %v1881_v63 = vadd.f32 %v1880_v52, %v6957_v35  ;;  %v5555_v56 = vld [vmem:[%s7931_s7 + $0x2e4] ss:$16 sps:$4 sm:$0xff]   ;;  %v5558_v50 = vld [vmem:[%s7931_s7 + $0x2ec] ss:$16 sps:$4 sm:$0xff]  }
 0x309   : > { %v1989_v58 = vmax.f32 %v1988_v41, %v1766_v7  ;;  %v2019_v19 = vmax.f32 %v2018_v47, %v1879_v9  ;;  %3740 = vmatpush1.bf16.msra.mxu1 %v5529_v24  ;;  %3904 = vmatpush1.bf16.msra.mxu0 %v5532_v61  ;;  %v5553_v7 = vld [vmem:[%s7931_s7 + $0x2e0] ss:$16 sps:$4 sm:$0xff]   ;;  %v5556_v9 = vld [vmem:[%s7931_s7 + $0x2e8] ss:$16 sps:$4 sm:$0xff]  }
 0x30a   : > { %v2004_v60 = vmax.f32 %v2003_v57, %v1768_v4  ;;  %v2034_v14 = vmax.f32 %v2033_v3, %v1881_v63  ;;  %3741 = vmatprep.subr.bf16.mxu1 %v5537_v40  ;;  %3905 = vmatprep.subr.bf16.mxu0 %v5540_v43  ;;  %v5561_v4 = vld [vmem:[%s7931_s7 + $0x304] ss:$16 sps:$4 sm:$0xff]   ;;  %v5564_v63 = vld [vmem:[%s7931_s7 + $0x30c] ss:$16 sps:$4 sm:$0xff]  }
 0x30c   : > { %v1771_v6 = vpop.f32.mrb[32].mxu1  ;;  %v1884_v10 = vpop.f32.mrb[80].mxu0 }
 0x30d   : > { %3742 = vmatpush1.bf16.msra.mxu1 %v5535_v53  ;;  %3906 = vmatpush1.bf16.msra.mxu0 %v5538_v34  ;;  %v1772_v11 = vadd.f32 %v1771_v6, %v6948_v51  ;;  %v1885_v0 = vadd.f32 %v1884_v10, %v6951_v5  ;;  %v1773_v12 = vpop.f32.mrb[33].mxu1  ;;  %v1886_v13 = vpop.f32.mrb[81].mxu0 }
 0x30e   : > { %v1774_v16 = vadd.f32 %v1773_v12, %v6954_v2  ;;  %v1887_v17 = vadd.f32 %v1886_v13, %v6957_v35  ;;  %v1775_v37 = vpop.f32.mrb[34].mxu1  ;;  %v1888_v38 = vpop.f32.mrb[82].mxu0  ;;  %3743 = vmatprep.subr.bf16.mxu1 %v5543_v28  ;;  %3907 = vmatprep.subr.bf16.mxu0 %v5546_v59  ;;  %v5559_v12 = vld [vmem:[%s7931_s7 + $0x300] ss:$16 sps:$4 sm:$0xff]   ;;  %v5562_v13 = vld [vmem:[%s7931_s7 + $0x308] ss:$16 sps:$4 sm:$0xff]  }
 0x30f   : > { %v1990_v1 = vmax.f32 %v1989_v58, %v1772_v11  ;;  %v2020_v22 = vmax.f32 %v2019_v19, %v1885_v0  ;;  %v1776_v44 = vadd.f32 %v1775_v37, %v6948_v51  ;;  %v1889_v18 = vadd.f32 %v1888_v38, %v6951_v5  ;;  %v1777_v26 = vpop.f32.mrb[35].mxu1  ;;  %v1890_v8 = vpop.f32.mrb[83].mxu0 }
 0x310   : > { %v2005_v23 = vmax.f32 %v2004_v60, %v1774_v16  ;;  %v2035_v27 = vmax.f32 %v2034_v14, %v1887_v17  ;;  %v1778_v25 = vadd.f32 %v1777_v26, %v6954_v2  ;;  %v1891_v29 = vadd.f32 %v1890_v8, %v6957_v35  ;;  %v5567_v16 = vld [vmem:[%s7931_s7 + $0x324] ss:$16 sps:$4 sm:$0xff]   ;;  %v5570_v17 = vld [vmem:[%s7931_s7 + $0x32c] ss:$16 sps:$4 sm:$0xff]  }
 0x311   : > { %v1991_v30 = vmax.f32 %v1990_v1, %v1776_v44  ;;  %v2021_v45 = vmax.f32 %v2020_v22, %v1889_v18  ;;  %3744 = vmatpush1.bf16.msra.mxu1 %v5541_v39  ;;  %3908 = vmatpush1.bf16.msra.mxu0 %v5544_v15  ;;  %v5565_v44 = vld [vmem:[%s7931_s7 + $0x320] ss:$16 sps:$4 sm:$0xff]   ;;  %v5568_v18 = vld [vmem:[%s7931_s7 + $0x328] ss:$16 sps:$4 sm:$0xff]  }
 0x312   : > { %v2006_v24 = vmax.f32 %v2005_v23, %v1778_v25  ;;  %v2036_v61 = vmax.f32 %v2035_v27, %v1891_v29  ;;  %3745 = vmatprep.subr.bf16.mxu1 %v5549_v21  ;;  %3909 = vmatprep.subr.bf16.mxu0 %v5552_v46  ;;  %v5573_v25 = vld [vmem:[%s7931_s7 + $0x344] ss:$16 sps:$4 sm:$0xff]   ;;  %v5576_v29 = vld [vmem:[%s7931_s7 + $0x34c] ss:$16 sps:$4 sm:$0xff]  }
 0x314   : > { %v1781_v36 = vpop.f32.mrb[36].mxu1  ;;  %v1894_v62 = vpop.f32.mrb[84].mxu0 }
 0x315   : > { %3746 = vmatpush1.bf16.msra.mxu1 %v5547_v31  ;;  %3910 = vmatpush1.bf16.msra.mxu0 %v5550_v33  ;;  %v1782_v40 = vadd.f32 %v1781_v36, %v6948_v51  ;;  %v1895_v43 = vadd.f32 %v1894_v62, %v6951_v5  ;;  %v1783_v41 = vpop.f32.mrb[37].mxu1  ;;  %v1896_v47 = vpop.f32.mrb[85].mxu0 }
 0x316   : > { %v1784_v48 = vadd.f32 %v1783_v41, %v6954_v2  ;;  %v1897_v52 = vadd.f32 %v1896_v47, %v6957_v35  ;;  %v1785_v57 = vpop.f32.mrb[38].mxu1  ;;  %v1898_v3 = vpop.f32.mrb[86].mxu0  ;;  %3747 = vmatprep.subr.bf16.mxu1 %v5555_v56  ;;  %3911 = vmatprep.subr.bf16.mxu0 %v5558_v50  ;;  %v5571_v41 = vld [vmem:[%s7931_s7 + $0x340] ss:$16 sps:$4 sm:$0xff]   ;;  %v5574_v47 = vld [vmem:[%s7931_s7 + $0x348] ss:$16 sps:$4 sm:$0xff]  }
 0x317   : > { %v1992_v58 = vmax.f32 %v1991_v30, %v1782_v40  ;;  %v2022_v19 = vmax.f32 %v2021_v45, %v1895_v43  ;;  %v1786_v53 = vadd.f32 %v1785_v57, %v6948_v51  ;;  %v1899_v34 = vadd.f32 %v1898_v3, %v6951_v5  ;;  %v1787_v60 = vpop.f32.mrb[39].mxu1  ;;  %v1900_v14 = vpop.f32.mrb[87].mxu0  ;;  %v5582_v57 = vld [vmem:[%s7931_s7 + $0x36c] ss:$16 sps:$4 sm:$0xff]  }
 0x318   : > { %v2007_v28 = vmax.f32 %v2006_v24, %v1784_v48  ;;  %v2037_v59 = vmax.f32 %v2036_v61, %v1897_v52  ;;  %v1788_v6 = vadd.f32 %v1787_v60, %v6954_v2  ;;  %v1901_v10 = vadd.f32 %v1900_v14, %v6957_v35  ;;  %v5579_v52 = vld [vmem:[%s7931_s7 + $0x364] ss:$16 sps:$4 sm:$0xff]   ;;  %v5580_v60 = vld [vmem:[%s7931_s7 + $0x368] ss:$16 sps:$4 sm:$0xff]  }
 0x319   : > { %v1993_v11 = vmax.f32 %v1992_v58, %v1786_v53  ;;  %v2023_v0 = vmax.f32 %v2022_v19, %v1899_v34  ;;  %3748 = vmatpush1.bf16.msra.mxu1 %v5553_v7  ;;  %3912 = vmatpush1.bf16.msra.mxu0 %v5556_v9  ;;  %v2090_v7 = vrot.slane %v6945_v32, 4  ;;  %v5577_v34 = vld [vmem:[%s7931_s7 + $0x360] ss:$16 sps:$4 sm:$0xff]  }
 0x31a   : > { %v2008_v39 = vmax.f32 %v2007_v28, %v1788_v6  ;;  %v2038_v15 = vmax.f32 %v2037_v59, %v1901_v10  ;;  %3749 = vmatprep.subr.bf16.mxu1 %v5561_v4  ;;  %3913 = vmatprep.subr.bf16.mxu0 %v5564_v63 }
 0x31b   : > { %v2091_v14 = vmax.f32 %v6945_v32, %v2090_v7 }
 0x31c   : > { %v1791_v37 = vpop.f32.mrb[40].mxu1  ;;  %v1904_v38 = vpop.f32.mrb[88].mxu0 }
 0x31d   : > { %3750 = vmatpush1.bf16.msra.mxu1 %v5559_v12  ;;  %3914 = vmatpush1.bf16.msra.mxu0 %v5562_v13  ;;  %v1792_v21 = vadd.f32 %v1791_v37, %v6948_v51  ;;  %v1905_v46 = vadd.f32 %v1904_v38, %v6951_v5  ;;  %v1793_v1 = vpop.f32.mrb[41].mxu1  ;;  %v1906_v22 = vpop.f32.mrb[89].mxu0 }
 0x31e   : > { %v1794_v26 = vadd.f32 %v1793_v1, %v6954_v2  ;;  %v1907_v8 = vadd.f32 %v1906_v22, %v6957_v35  ;;  %v1795_v23 = vpop.f32.mrb[42].mxu1  ;;  %v1908_v27 = vpop.f32.mrb[90].mxu0  ;;  %3751 = vmatprep.subr.bf16.mxu1 %v5567_v16  ;;  %3915 = vmatprep.subr.bf16.mxu0 %v5570_v17  ;;  %v2092_v22 = vrot.slane %v2091_v14, 2 }
 0x31f   : > { %v1994_v30 = vmax.f32 %v1993_v11, %v1792_v21  ;;  %v2024_v45 = vmax.f32 %v2023_v0, %v1905_v46  ;;  %v1796_v31 = vadd.f32 %v1795_v23, %v6948_v51  ;;  %v1909_v33 = vadd.f32 %v1908_v27, %v6951_v5  ;;  %v1797_v24 = vpop.f32.mrb[43].mxu1  ;;  %v1910_v61 = vpop.f32.mrb[91].mxu0  ;;  %v5585_v11 = vld [vmem:[%s7931_s7 + $0x384] ss:$16 sps:$4 sm:$0xff]   ;;  %v5588_v0 = vld [vmem:[%s7931_s7 + $0x38c] ss:$16 sps:$4 sm:$0xff]  }
 0x320   : > { %v2009_v56 = vmax.f32 %v2008_v39, %v1794_v26  ;;  %v2039_v50 = vmax.f32 %v2038_v15, %v1907_v8  ;;  %v1798_v36 = vadd.f32 %v1797_v24, %v6954_v2  ;;  %v1911_v62 = vadd.f32 %v1910_v61, %v6957_v35  ;;  %v5589_v8 = vld [vmem:[%s7931_s7 + $0x3a0] ss:$16 sps:$4 sm:$0xff]   ;;  %v5592_v23 = vld [vmem:[%s7931_s7 + $0x3a8] ss:$16 sps:$4 sm:$0xff]   ;;  %v5603_v61 = vld [vmem:[%s7931_s7 + $0x3e4] ss:$16 sps:$4 sm:$0xff]  }
 0x321   : > { %v1995_v40 = vmax.f32 %v1994_v30, %v1796_v31  ;;  %v2025_v43 = vmax.f32 %v2024_v45, %v1909_v33  ;;  %3752 = vmatpush1.bf16.msra.mxu1 %v5565_v44  ;;  %3916 = vmatpush1.bf16.msra.mxu0 %v5568_v18  ;;  %v2093_v27 = vmax.f32 %v2091_v14, %v2092_v22  ;;  %v5600_v30 = vld [vmem:[%s7931_s7 + $0x3cc] ss:$16 sps:$4 sm:$0xff]   ;;  %v5595_v31 = vld [vmem:[%s7931_s7 + $0x3c0] ss:$16 sps:$4 sm:$0xff]   ;;  %v5598_v33 = vld [vmem:[%s7931_s7 + $0x3c8] ss:$16 sps:$4 sm:$0xff]  }
 0x322   : > { %v2010_v9 = vmax.f32 %v2009_v56, %v1798_v36  ;;  %v2040_v48 = vmax.f32 %v2039_v50, %v1911_v62  ;;  %3753 = vmatprep.subr.bf16.mxu1 %v5573_v25  ;;  %3917 = vmatprep.subr.bf16.mxu0 %v5576_v29  ;;  %v5597_v29 = vld [vmem:[%s7931_s7 + $0x3c4] ss:$16 sps:$4 sm:$0xff]   ;;  %v5606_v56 = vld [vmem:[%s7931_s7 + $0x3ec] ss:$16 sps:$4 sm:$0xff]   ;;  %v5601_v62 = vld [vmem:[%s7931_s7 + $0x3e0] ss:$16 sps:$4 sm:$0xff]  }
 0x323   : > { %v2094_v24 = vrot.slane %v2093_v27, 1  ;;  %v5627_v14 = vld [vmem:[%s7931_s7 + $0x464] ss:$16 sps:$4 sm:$0xff]   ;;  %v5652_v22 = vld [vmem:[%s7931_s7 + $0x4e8] ss:$16 sps:$4 sm:$0xff]  }
 0x324   : > { %v1801_v3 = vpop.f32.mrb[44].mxu1  ;;  %v1914_v4 = vpop.f32.mrb[92].mxu0 }
 0x325   : > { %3754 = vmatpush1.bf16.msra.mxu1 %v5571_v41  ;;  %3918 = vmatpush1.bf16.msra.mxu0 %v5574_v47  ;;  %v1802_v63 = vadd.f32 %v1801_v3, %v6948_v51  ;;  %v1915_v58 = vadd.f32 %v1914_v4, %v6951_v5  ;;  %v1803_v19 = vpop.f32.mrb[45].mxu1  ;;  %v1916_v53 = vpop.f32.mrb[93].mxu0  ;;  %v5609_v41 = vld [vmem:[%s7931_s7 + $0x404] ss:$16 sps:$4 sm:$0xff]   ;;  %v5612_v47 = vld [vmem:[%s7931_s7 + $0x40c] ss:$16 sps:$4 sm:$0xff]  }
 0x326   : > { %v1804_v28 = vadd.f32 %v1803_v19, %v6954_v2  ;;  %v1917_v59 = vadd.f32 %v1916_v53, %v6957_v35  ;;  %v1805_v6 = vpop.f32.mrb[46].mxu1  ;;  %v1918_v10 = vpop.f32.mrb[94].mxu0  ;;  %3755 = vmatprep.subr.bf16.mxu1 %v5579_v52  ;;  %3919 = vmatprep.subr.bf16.mxu0 %v5582_v57  ;;  %v5610_v57 = vld [vmem:[%s7931_s7 + $0x408] ss:$16 sps:$4 sm:$0xff]   ;;  %v5615_v3 = vld [vmem:[%s7931_s7 + $0x424] ss:$16 sps:$4 sm:$0xff]  }
 0x327   : > { %v1996_v12 = vmax.f32 %v1995_v40, %v1802_v63  ;;  %v2026_v13 = vmax.f32 %v2025_v43, %v1915_v58  ;;  %v1806_v32 = vadd.f32 %v1805_v6, %v6948_v51  ;;  %v1919_v39 = vadd.f32 %v1918_v10, %v6951_v5  ;;  %v1807_v15 = vpop.f32.mrb[47].mxu1  ;;  %v1920_v16 = vpop.f32.mrb[95].mxu0  ;;  %v5583_v51 = vld [vmem:[%s7931_s7 + $0x380] ss:$16 sps:$4 sm:$0xff]   ;;  %v5586_v5 = vld [vmem:[%s7931_s7 + $0x388] ss:$16 sps:$4 sm:$0xff]  }
 0x328   : > { %v2011_v17 = vmax.f32 %v2010_v9, %v1804_v28  ;;  %v2041_v37 = vmax.f32 %v2040_v48, %v1917_v59  ;;  %v1808_v38 = vadd.f32 %v1807_v15, %v6954_v2  ;;  %v1921_v21 = vadd.f32 %v1920_v16, %v6957_v35  ;;  %v5591_v2 = vld [vmem:[%s7931_s7 + $0x3a4] ss:$16 sps:$4 sm:$0xff]   ;;  %v5594_v35 = vld [vmem:[%s7931_s7 + $0x3ac] ss:$16 sps:$4 sm:$0xff]   ;;  %v5604_v40 = vld [vmem:[%s7931_s7 + $0x3e8] ss:$16 sps:$4 sm:$0xff]  }
 0x329   : > { %v7169_v46 = vmax.f32 %v1996_v12, %v1806_v32  ;;  %v7171_v1 = vmax.f32 %v2026_v13, %v1919_v39  ;;  %3756 = vmatpush1.bf16.msra.mxu1 %v5577_v34  ;;  %3920 = vmatpush1.bf16.msra.mxu0 %v5580_v60  ;;  %v2095_v43 = vmax.f32 %v2093_v27, %v2094_v24  ;;  %v5607_v9 = vld [vmem:[%s7931_s7 + $0x400] ss:$16 sps:$4 sm:$0xff]   ;;  %v5618_v4 = vld [vmem:[%s7931_s7 + $0x42c] ss:$16 sps:$4 sm:$0xff]   ;;  %v5616_v58 = vld [vmem:[%s7931_s7 + $0x428] ss:$16 sps:$4 sm:$0xff]  }
 0x32a   : > { %v2012_v44 = vmax.f32 %v2011_v17, %v1808_v38  ;;  %v7179_v18 = vmax.f32 %v2041_v37, %v1921_v21  ;;  %3757 = vmatprep.subr.bf16.mxu1 %v5585_v11  ;;  %3921 = vmatprep.subr.bf16.mxu0 %v5588_v0  ;;  %v5613_v63 = vld [vmem:[%s7931_s7 + $0x420] ss:$16 sps:$4 sm:$0xff]   ;;  %v5621_v19 = vld [vmem:[%s7931_s7 + $0x444] ss:$16 sps:$4 sm:$0xff]   ;;  %v5624_v53 = vld [vmem:[%s7931_s7 + $0x44c] ss:$16 sps:$4 sm:$0xff]  }
 0x32b   : > { %v2128_v52 = vpack.c.bf16 %v2095_v43, %v2095_v43  ;;  %v5619_v34 = vld [vmem:[%s7931_s7 + $0x440] ss:$16 sps:$4 sm:$0xff]   ;;  %v5622_v60 = vld [vmem:[%s7931_s7 + $0x448] ss:$16 sps:$4 sm:$0xff]   ;;  %v5630_v28 = vld [vmem:[%s7931_s7 + $0x46c] ss:$16 sps:$4 sm:$0xff]  }
 0x32c   : > { %v2108_v26 = vrot.slane %v2012_v44, 4  ;;  %v5625_v59 = vld [vmem:[%s7931_s7 + $0x460] ss:$16 sps:$4 sm:$0xff]   ;;  %v5628_v6 = vld [vmem:[%s7931_s7 + $0x468] ss:$16 sps:$4 sm:$0xff]  }
 0x32d   : > { %3758 = vmatpush1.bf16.msra.mxu1 %v5583_v51  ;;  %3922 = vmatpush1.bf16.msra.mxu0 %v5586_v5  ;;  %v5633_v10 = vld [vmem:[%s7931_s7 + $0x484] ss:$16 sps:$4 sm:$0xff]   ;;  %v5636_v11 = vld [vmem:[%s7931_s7 + $0x48c] ss:$16 sps:$4 sm:$0xff]   ;;  %v5631_v0 = vld [vmem:[%s7931_s7 + $0x480] ss:$16 sps:$4 sm:$0xff]  }
 0x32e   : > { %v2109_v25 = vmax.f32 %v2012_v44, %v2108_v26  ;;  %3759 = vmatprep.subr.bf16.mxu1 %v5591_v2  ;;  %3923 = vmatprep.subr.bf16.mxu0 %v5594_v35  ;;  %v5634_v12 = vld [vmem:[%s7931_s7 + $0x488] ss:$16 sps:$4 sm:$0xff]   ;;  %v5639_v13 = vld [vmem:[%s7931_s7 + $0x4a4] ss:$16 sps:$4 sm:$0xff]   ;;  %v5642_v32 = vld [vmem:[%s7931_s7 + $0x4ac] ss:$16 sps:$4 sm:$0xff]  }
 0x32f   : > { %v5637_v39 = vld [vmem:[%s7931_s7 + $0x4a0] ss:$16 sps:$4 sm:$0xff]   ;;  %v5640_v15 = vld [vmem:[%s7931_s7 + $0x4a8] ss:$16 sps:$4 sm:$0xff]   ;;  %v5645_v16 = vld [vmem:[%s7931_s7 + $0x4c4] ss:$16 sps:$4 sm:$0xff]  }
 0x330   : > { %v2110_v45 = vrot.slane %v2109_v25, 2  ;;  %v5648_v17 = vld [vmem:[%s7931_s7 + $0x4cc] ss:$16 sps:$4 sm:$0xff]   ;;  %v5643_v37 = vld [vmem:[%s7931_s7 + $0x4c0] ss:$16 sps:$4 sm:$0xff]  }
 0x331   : > { %3760 = vmatpush1.bf16.msra.mxu1 %v5589_v8  ;;  %3924 = vmatpush1.bf16.msra.mxu0 %v5592_v23  ;;  %v5646_v38 = vld [vmem:[%s7931_s7 + $0x4c8] ss:$16 sps:$4 sm:$0xff]   ;;  %v5651_v21 = vld [vmem:[%s7931_s7 + $0x4e4] ss:$16 sps:$4 sm:$0xff]   ;;  %v5654_v51 = vld [vmem:[%s7931_s7 + $0x4ec] ss:$16 sps:$4 sm:$0xff]  }
 0x332   : > { %3761 = vmatprep.subr.bf16.mxu1 %v5597_v29  ;;  %3925 = vmatprep.subr.bf16.mxu0 %v5600_v30  ;;  %v2111_v50 = vmax.f32 %v2109_v25, %v2110_v45  ;;  %v5649_v5 = vld [vmem:[%s7931_s7 + $0x4e0] ss:$16 sps:$4 sm:$0xff]   ;;  %v5657_v44 = vld [vmem:[%s7931_s7 + $0x504] ss:$16 sps:$4 sm:$0xff]   ;;  %v5660_v2 = vld [vmem:[%s7931_s7 + $0x50c] ss:$16 sps:$4 sm:$0xff]  }
 0x333   : > { %v5655_v35 = vld [vmem:[%s7931_s7 + $0x500] ss:$16 sps:$4 sm:$0xff]   ;;  %v5658_v26 = vld [vmem:[%s7931_s7 + $0x508] ss:$16 sps:$4 sm:$0xff]   ;;  %v5663_v8 = vld [vmem:[%s7931_s7 + $0x524] ss:$16 sps:$4 sm:$0xff]  }
 0x334   : > { %v2112_v36 = vrot.slane %v2111_v50, 1  ;;  %v5666_v23 = vld [vmem:[%s7931_s7 + $0x52c] ss:$16 sps:$4 sm:$0xff]   ;;  %v5661_v27 = vld [vmem:[%s7931_s7 + $0x520] ss:$16 sps:$4 sm:$0xff]  }
 0x335   : > { %3762 = vmatpush1.bf16.msra.mxu1 %v5595_v31  ;;  %3926 = vmatpush1.bf16.msra.mxu0 %v5598_v33  ;;  %v5664_v25 = vld [vmem:[%s7931_s7 + $0x528] ss:$16 sps:$4 sm:$0xff]   ;;  %v5669_v29 = vld [vmem:[%s7931_s7 + $0x544] ss:$16 sps:$4 sm:$0xff]   ;;  %v5672_v30 = vld [vmem:[%s7931_s7 + $0x54c] ss:$16 sps:$4 sm:$0xff]  }
 0x336   : > { %3763 = vmatprep.subr.bf16.mxu1 %v5603_v61  ;;  %3927 = vmatprep.subr.bf16.mxu0 %v5606_v56  ;;  %v2113_v7 = vmax.f32 %v2111_v50, %v2112_v36  ;;  %v5667_v45 = vld [vmem:[%s7931_s7 + $0x540] ss:$16 sps:$4 sm:$0xff]   ;;  %v2102_v31 = vrot.slane %v7169_v46, 4  ;;  %v5670_v33 = vld [vmem:[%s7931_s7 + $0x548] ss:$16 sps:$4 sm:$0xff]   ;;  %v2120_v56 = vrot.slane %v7179_v18, 4 }
 0x337   : > { %v5675_v24 = vld [vmem:[%s7931_s7 + $0x564] ss:$16 sps:$4 sm:$0xff]   ;;  %v5678_v61 = vld [vmem:[%s7931_s7 + $0x56c] ss:$16 sps:$4 sm:$0xff]   ;;  %v5673_v50 = vld [vmem:[%s7931_s7 + $0x560] ss:$16 sps:$4 sm:$0xff]  }
 0x338   : > { %v2131_v48 = vpack.c.bf16 %v2113_v7, %v2113_v7  ;;  %v2103_v36 = vmax.f32 %v7169_v46, %v2102_v31  ;;  %v5684_v43 = vld [vmem:[%s7931_s7 + $0x58c] ss:$16 sps:$4 sm:$0xff]   ;;  %v5679_v46 = vld [vmem:[%s7931_s7 + $0x580] ss:$16 sps:$4 sm:$0xff]   ;;  %v5682_v7 = vld [vmem:[%s7931_s7 + $0x588] ss:$16 sps:$4 sm:$0xff]  }
 0x339   : > { %3764 = vmatpush1.bf16.msra.mxu1 %v5601_v62  ;;  %3928 = vmatpush1.bf16.msra.mxu0 %v5604_v40  ;;  %v5676_v62 = vld [vmem:[%s7931_s7 + $0x568] ss:$16 sps:$4 sm:$0xff]   ;;  %v5681_v40 = vld [vmem:[%s7931_s7 + $0x584] ss:$16 sps:$4 sm:$0xff]  }
 0x33a   : > { %3774 = vmatprep.subr.bf16.mxu1 %v5609_v41  ;;  %3938 = vmatprep.subr.bf16.mxu0 %v5612_v47  ;;  %v2121_v41 = vmax.f32 %v7179_v18, %v2120_v56  ;;  %v2104_v47 = vrot.slane %v2103_v36, 2  ;;  %v5690_v18 = vld [vmem:[%s7931_s7 + $0x5ac] ss:$16 sps:$4 sm:$0xff]   ;;  %v5736_v31 = vld [vmem:[%s7931_s7 + $0x6a8] ss:$16 sps:$4 sm:$0xff]  }
 0x33b   : > { %v5742_v56 = vld [vmem:[%s7931_s7 + $0x6c8] ss:$16 sps:$4 sm:$0xff]  }
 0x33c   : > { %3766 = vmatmul.mubr.bf16.vlgmr.msra.gmra.mrb[48].mxu1 %v2128_v52  ;;  %3930 = vmatmul.mubr.bf16.vlgmr.msra.gmra.mrb[96].mxu0 %v2128_v52  ;;  %v5685_v52 = vld [vmem:[%s7931_s7 + $0x5a0] ss:$16 sps:$4 sm:$0xff]  }
 0x33d   : > { %3775 = vmatpush1.bf16.msra.mxu1 %v5607_v9  ;;  %3806 = vmatprep.mubr.bf16.mxu1 %v2131_v48  ;;  %v5687_v9 = vld [vmem:[%s7931_s7 + $0x5a4] ss:$16 sps:$4 sm:$0xff]  }
 0x33e   : > { %3939 = vmatpush1.bf16.msra.mxu0 %v5610_v57  ;;  %3970 = vmatprep.mubr.bf16.mxu0 %v2131_v48  ;;  %v2122_v48 = vrot.slane %v2121_v41, 2  ;;  %v2105_v57 = vmax.f32 %v2103_v36, %v2104_v47  ;;  %v5750_v36 = vld [vmem:[%s7931_s7 + $0x6ec] ss:$16 sps:$4 sm:$0xff]   ;;  %v5754_v47 = vld [vmem:[%s7931_s7 + $0x708] ss:$16 sps:$4 sm:$0xff]  }
 0x33f   : > { %3776 = vmatprep.subr.bf16.mxu1 %v5615_v3  ;;  %3940 = vmatprep.subr.bf16.mxu0 %v5618_v4  ;;  %v5688_v3 = vld [vmem:[%s7931_s7 + $0x5a8] ss:$16 sps:$4 sm:$0xff]   ;;  %v5693_v4 = vld [vmem:[%s7931_s7 + $0x5c4] ss:$16 sps:$4 sm:$0xff]  }
 0x341   : > { %3777 = vmatpush1.bf16.msra.mxu1 %v5613_v63  ;;  %v5696_v63 = vld [vmem:[%s7931_s7 + $0x5cc] ss:$16 sps:$4 sm:$0xff]  }
 0x342   : > { %3941 = vmatpush1.bf16.msra.mxu0 %v5616_v58  ;;  %3778 = vmatprep.subr.bf16.mxu1 %v5621_v19  ;;  %v2123_v58 = vmax.f32 %v2121_v41, %v2122_v48  ;;  %v5691_v19 = vld [vmem:[%s7931_s7 + $0x5c0] ss:$16 sps:$4 sm:$0xff]   ;;  %v5756_v41 = vld [vmem:[%s7931_s7 + $0x70c] ss:$16 sps:$4 sm:$0xff]   ;;  %v5760_v48 = vld [vmem:[%s7931_s7 + $0x728] ss:$16 sps:$4 sm:$0xff]  }
 0x343   : > { %3942 = vmatprep.subr.bf16.mxu0 %v5624_v53  ;;  %v2106_v53 = vrot.slane %v2105_v57, 1 }
 0x345   : > { %3779 = vmatpush1.bf16.msra.mxu1 %v5619_v34  ;;  %v5694_v34 = vld [vmem:[%s7931_s7 + $0x5c8] ss:$16 sps:$4 sm:$0xff]  }
 0x346   : > { %3943 = vmatpush1.bf16.msra.mxu0 %v5622_v60  ;;  %3780 = vmatprep.subr.bf16.mxu1 %v5627_v14  ;;  %v5699_v60 = vld [vmem:[%s7931_s7 + $0x5e4] ss:$16 sps:$4 sm:$0xff]   ;;  %v5702_v14 = vld [vmem:[%s7931_s7 + $0x5ec] ss:$16 sps:$4 sm:$0xff]  }
 0x347   : > { %3944 = vmatprep.subr.bf16.mxu0 %v5630_v28  ;;  %v2124_v28 = vrot.slane %v2123_v58, 1 }
 0x349   : > { %3781 = vmatpush1.bf16.msra.mxu1 %v5625_v59  ;;  %v5697_v59 = vld [vmem:[%s7931_s7 + $0x5e0] ss:$16 sps:$4 sm:$0xff]  }
 0x34a   : > { %3945 = vmatpush1.bf16.msra.mxu0 %v5628_v6  ;;  %3782 = vmatprep.subr.bf16.mxu1 %v5633_v10  ;;  %v5700_v6 = vld [vmem:[%s7931_s7 + $0x5e8] ss:$16 sps:$4 sm:$0xff]   ;;  %v2107_v10 = vmax.f32 %v2105_v57, %v2106_v53  ;;  %v5768_v57 = vld [vmem:[%s7931_s7 + $0x74c] ss:$16 sps:$4 sm:$0xff]   ;;  %v5769_v53 = vld [vmem:[%s7931_s7 + $0x760] ss:$16 sps:$4 sm:$0xff]  }
 0x34b   : > { %3946 = vmatprep.subr.bf16.mxu0 %v5636_v11  ;;  %v5705_v11 = vld [vmem:[%s7931_s7 + $0x604] ss:$16 sps:$4 sm:$0xff]  }
 0x34d   : > { %3783 = vmatpush1.bf16.msra.mxu1 %v5631_v0  ;;  %v5708_v0 = vld [vmem:[%s7931_s7 + $0x60c] ss:$16 sps:$4 sm:$0xff]  }
 0x34e   : > { %3947 = vmatpush1.bf16.msra.mxu0 %v5634_v12  ;;  %3784 = vmatprep.subr.bf16.mxu1 %v5639_v13  ;;  %v2125_v12 = vmax.f32 %v2123_v58, %v2124_v28  ;;  %v5703_v13 = vld [vmem:[%s7931_s7 + $0x600] ss:$16 sps:$4 sm:$0xff]   ;;  %v5771_v58 = vld [vmem:[%s7931_s7 + $0x764] ss:$16 sps:$4 sm:$0xff]   ;;  %v5780_v28 = vld [vmem:[%s7931_s7 + $0x78c] ss:$16 sps:$4 sm:$0xff]  }
 0x34f   : > { %3948 = vmatprep.subr.bf16.mxu0 %v5642_v32  ;;  %v2130_v32 = vpack.c.bf16 %v2107_v10, %v2107_v10  ;;  %v5783_v10 = vld [vmem:[%s7931_s7 + $0x7a4] ss:$16 sps:$4 sm:$0xff]  }
 0x351   : > { %3785 = vmatpush1.bf16.msra.mxu1 %v5637_v39  ;;  %v5706_v39 = vld [vmem:[%s7931_s7 + $0x608] ss:$16 sps:$4 sm:$0xff]  }
 0x352   : > { %3949 = vmatpush1.bf16.msra.mxu0 %v5640_v15  ;;  %3786 = vmatprep.subr.bf16.mxu1 %v5645_v16  ;;  %v5711_v15 = vld [vmem:[%s7931_s7 + $0x624] ss:$16 sps:$4 sm:$0xff]   ;;  %v2133_v16 = vpack.c.bf16 %v2125_v12, %v2125_v12 }
 0x353   : > { %3950 = vmatprep.subr.bf16.mxu0 %v5648_v17  ;;  %v5714_v17 = vld [vmem:[%s7931_s7 + $0x62c] ss:$16 sps:$4 sm:$0xff]  }
 0x355   : > { %3787 = vmatpush1.bf16.msra.mxu1 %v5643_v37  ;;  %v5709_v37 = vld [vmem:[%s7931_s7 + $0x620] ss:$16 sps:$4 sm:$0xff]  }
 0x356   : > { %3951 = vmatpush1.bf16.msra.mxu0 %v5646_v38  ;;  %3788 = vmatprep.subr.bf16.mxu1 %v5651_v21  ;;  %v5712_v38 = vld [vmem:[%s7931_s7 + $0x628] ss:$16 sps:$4 sm:$0xff]   ;;  %v5717_v21 = vld [vmem:[%s7931_s7 + $0x644] ss:$16 sps:$4 sm:$0xff]  }
 0x357   : > { %3952 = vmatprep.subr.bf16.mxu0 %v5654_v51  ;;  %v5720_v51 = vld [vmem:[%s7931_s7 + $0x64c] ss:$16 sps:$4 sm:$0xff]  }
 0x359   : > { %3789 = vmatpush1.bf16.msra.mxu1 %v5649_v5  ;;  %v5715_v5 = vld [vmem:[%s7931_s7 + $0x640] ss:$16 sps:$4 sm:$0xff]  }
 0x35a   : > { %3953 = vmatpush1.bf16.msra.mxu0 %v5652_v22  ;;  %3790 = vmatprep.subr.bf16.mxu1 %v5657_v44  ;;  %v5718_v22 = vld [vmem:[%s7931_s7 + $0x648] ss:$16 sps:$4 sm:$0xff]   ;;  %v5723_v44 = vld [vmem:[%s7931_s7 + $0x664] ss:$16 sps:$4 sm:$0xff]  }
 0x35b   : > { %3954 = vmatprep.subr.bf16.mxu0 %v5660_v2  ;;  %v5726_v2 = vld [vmem:[%s7931_s7 + $0x66c] ss:$16 sps:$4 sm:$0xff]  }
 0x35d   : > { %3791 = vmatpush1.bf16.msra.mxu1 %v5655_v35  ;;  %v5721_v35 = vld [vmem:[%s7931_s7 + $0x660] ss:$16 sps:$4 sm:$0xff]  }
 0x35e   : > { %3955 = vmatpush1.bf16.msra.mxu0 %v5658_v26  ;;  %3792 = vmatprep.subr.bf16.mxu1 %v5663_v8  ;;  %v5724_v26 = vld [vmem:[%s7931_s7 + $0x668] ss:$16 sps:$4 sm:$0xff]   ;;  %v5729_v8 = vld [vmem:[%s7931_s7 + $0x684] ss:$16 sps:$4 sm:$0xff]  }
 0x35f   : > { %3956 = vmatprep.subr.bf16.mxu0 %v5666_v23  ;;  %v5732_v23 = vld [vmem:[%s7931_s7 + $0x68c] ss:$16 sps:$4 sm:$0xff]  }
 0x361   : > { %3793 = vmatpush1.bf16.msra.mxu1 %v5661_v27  ;;  %v5727_v27 = vld [vmem:[%s7931_s7 + $0x680] ss:$16 sps:$4 sm:$0xff]  }
 0x362   : > { %3957 = vmatpush1.bf16.msra.mxu0 %v5664_v25  ;;  %3794 = vmatprep.subr.bf16.mxu1 %v5669_v29  ;;  %v5730_v25 = vld [vmem:[%s7931_s7 + $0x688] ss:$16 sps:$4 sm:$0xff]   ;;  %v5735_v29 = vld [vmem:[%s7931_s7 + $0x6a4] ss:$16 sps:$4 sm:$0xff]  }
 0x363   : > { %3958 = vmatprep.subr.bf16.mxu0 %v5672_v30  ;;  %v5738_v30 = vld [vmem:[%s7931_s7 + $0x6ac] ss:$16 sps:$4 sm:$0xff]  }
 0x365   : > { %3795 = vmatpush1.bf16.msra.mxu1 %v5667_v45  ;;  %v5733_v45 = vld [vmem:[%s7931_s7 + $0x6a0] ss:$16 sps:$4 sm:$0xff]  }
 0x366   : > { %3959 = vmatpush1.bf16.msra.mxu0 %v5670_v33  ;;  %3796 = vmatprep.subr.bf16.mxu1 %v5675_v24  ;;  %v5741_v33 = vld [vmem:[%s7931_s7 + $0x6c4] ss:$16 sps:$4 sm:$0xff]   ;;  %v5744_v24 = vld [vmem:[%s7931_s7 + $0x6cc] ss:$16 sps:$4 sm:$0xff]  }
 0x367   : > { %3960 = vmatprep.subr.bf16.mxu0 %v5678_v61  ;;  %v5739_v61 = vld [vmem:[%s7931_s7 + $0x6c0] ss:$16 sps:$4 sm:$0xff]  }
 0x369   : > { %3797 = vmatpush1.bf16.msra.mxu1 %v5673_v50  ;;  %v5747_v50 = vld [vmem:[%s7931_s7 + $0x6e4] ss:$16 sps:$4 sm:$0xff]  }
 0x36a   : > { %3961 = vmatpush1.bf16.msra.mxu0 %v5676_v62  ;;  %3798 = vmatprep.subr.bf16.mxu1 %v5681_v40  ;;  %v5745_v62 = vld [vmem:[%s7931_s7 + $0x6e0] ss:$16 sps:$4 sm:$0xff]   ;;  %v5748_v40 = vld [vmem:[%s7931_s7 + $0x6e8] ss:$16 sps:$4 sm:$0xff]  }
 0x36b   : > { %3962 = vmatprep.subr.bf16.mxu0 %v5684_v43  ;;  %v5753_v43 = vld [vmem:[%s7931_s7 + $0x704] ss:$16 sps:$4 sm:$0xff]  }
 0x36d   : > { %3799 = vmatpush1.bf16.msra.mxu1 %v5679_v46  ;;  %v5751_v46 = vld [vmem:[%s7931_s7 + $0x700] ss:$16 sps:$4 sm:$0xff]  }
 0x36e   : > { %3963 = vmatpush1.bf16.msra.mxu0 %v5682_v7  ;;  %3800 = vmatprep.subr.bf16.mxu1 %v5687_v9  ;;  %v5759_v7 = vld [vmem:[%s7931_s7 + $0x724] ss:$16 sps:$4 sm:$0xff]   ;;  %v5762_v9 = vld [vmem:[%s7931_s7 + $0x72c] ss:$16 sps:$4 sm:$0xff]  }
 0x36f   : > { %3964 = vmatprep.subr.bf16.mxu0 %v5690_v18  ;;  %v5757_v18 = vld [vmem:[%s7931_s7 + $0x720] ss:$16 sps:$4 sm:$0xff]  }
 0x371   : > { %3801 = vmatpush1.bf16.msra.mxu1 %v5685_v52  ;;  %v5765_v52 = vld [vmem:[%s7931_s7 + $0x744] ss:$16 sps:$4 sm:$0xff]  }
 0x372   : > { %3965 = vmatpush1.bf16.msra.mxu0 %v5688_v3  ;;  %3802 = vmatprep.subr.bf16.mxu1 %v5693_v4  ;;  %v5763_v3 = vld [vmem:[%s7931_s7 + $0x740] ss:$16 sps:$4 sm:$0xff]   ;;  %v2114_v4 = vrot.slane %v7171_v1, 4 }
 0x373   : > { %3966 = vmatprep.subr.bf16.mxu0 %v5696_v63  ;;  %v5766_v63 = vld [vmem:[%s7931_s7 + $0x748] ss:$16 sps:$4 sm:$0xff]  }
 0x375   : > { %3803 = vmatpush1.bf16.msra.mxu1 %v5691_v19  ;;  %v5774_v19 = vld [vmem:[%s7931_s7 + $0x76c] ss:$16 sps:$4 sm:$0xff]  }
 0x376   : > { %3967 = vmatpush1.bf16.msra.mxu0 %v5694_v34  ;;  %3804 = vmatprep.subr.bf16.mxu1 %v5699_v60  ;;  %v2115_v34 = vmax.f32 %v7171_v1, %v2114_v4  ;;  %v5772_v60 = vld [vmem:[%s7931_s7 + $0x768] ss:$16 sps:$4 sm:$0xff]   ;;  %v5775_v1 = vld [vmem:[%s7931_s7 + $0x780] ss:$16 sps:$4 sm:$0xff]  }
 0x377   : > { %3968 = vmatprep.subr.bf16.mxu0 %v5702_v14  ;;  %v5777_v14 = vld [vmem:[%s7931_s7 + $0x784] ss:$16 sps:$4 sm:$0xff]   ;;  %v5844_v4 = vld [vmem:[%s7933_s9 + $0xf0] ss:$8 sps:$4 sm:$0xff]  }
 0x379   : > { %3805 = vmatpush1.bf16.msra.mxu1 %v5697_v59  ;;  %v2116_v59 = vrot.slane %v2115_v34, 2 }
 0x37a   : > { %3969 = vmatpush1.bf16.msra.mxu0 %v5700_v6  ;;  %3815 = vmatprep.subr.bf16.mxu1 %v5705_v11  ;;  %v5778_v6 = vld [vmem:[%s7931_s7 + $0x788] ss:$16 sps:$4 sm:$0xff]   ;;  %v5786_v11 = vld [vmem:[%s7931_s7 + $0x7ac] ss:$16 sps:$4 sm:$0xff]  }
 0x37b   : > { %3979 = vmatprep.subr.bf16.mxu0 %v5708_v0  ;;  %v5781_v0 = vld [vmem:[%s7931_s7 + $0x7a0] ss:$16 sps:$4 sm:$0xff]   ;;  %v2117_v12 = vmax.f32 %v2115_v34, %v2116_v59  ;;  %v5898_v34 = vld [vmem:[%s7935_s11 + $0x8] sm:$0xff]  }
 0x37c   : > { %3807 = vmatmul.mubr.bf16.vlgmr.msra.gmra.mrb[48].mxu1 %v2130_v32  ;;  %v5903_v59 = vld [vmem:[%s7935_s11 + $0x60] sm:$0xff]  }
 0x37d   : > { %3971 = vmatmul.mubr.bf16.vlgmr.msra.gmra.mrb[96].mxu0 %v2130_v32  ;;  %3816 = vmatpush1.bf16.msra.mxu1 %v5703_v13  ;;  %v5784_v13 = vld [vmem:[%s7931_s7 + $0x7a8] ss:$16 sps:$4 sm:$0xff]   ;;  %v5789_v32 = vld [vmem:[%s7931_s7 + $0x7c4] ss:$16 sps:$4 sm:$0xff]  }
 0x37e   : > { %3847 = vmatprep.mubr.bf16.mxu1 %v2133_v16  ;;  %3980 = vmatpush1.bf16.msra.mxu0 %v5706_v39  ;;  %v5792_v39 = vld [vmem:[%s7931_s7 + $0x7cc] ss:$16 sps:$4 sm:$0xff]  }
 0x37f   : > { %4011 = vmatprep.mubr.bf16.mxu0 %v2133_v16  ;;  %3817 = vmatprep.subr.bf16.mxu1 %v5711_v15  ;;  %v5787_v15 = vld [vmem:[%s7931_s7 + $0x7c0] ss:$16 sps:$4 sm:$0xff]   ;;  %v2118_v16 = vrot.slane %v2117_v12, 1 }
 0x380   : > { %3981 = vmatprep.subr.bf16.mxu0 %v5714_v17  ;;  %v5790_v17 = vld [vmem:[%s7931_s7 + $0x7c8] ss:$16 sps:$4 sm:$0xff]  }
 0x381   : > { %3818 = vmatpush1.bf16.msra.mxu1 %v5709_v37  ;;  %v5795_v37 = vld [vmem:[%s7931_s7 + $0x7e4] ss:$16 sps:$4 sm:$0xff]  }
 0x382   : > { %3982 = vmatpush1.bf16.msra.mxu0 %v5712_v38  ;;  %3819 = vmatprep.subr.bf16.mxu1 %v5717_v21  ;;  %v5798_v38 = vld [vmem:[%s7931_s7 + $0x7ec] ss:$16 sps:$4 sm:$0xff]   ;;  %v5793_v21 = vld [vmem:[%s7931_s7 + $0x7e0] ss:$16 sps:$4 sm:$0xff]  }
 0x383   : > { %3983 = vmatprep.subr.bf16.mxu0 %v5720_v51  ;;  %v5796_v51 = vld [vmem:[%s7931_s7 + $0x7e8] ss:$16 sps:$4 sm:$0xff]  }
 0x385   : > { %3820 = vmatpush1.bf16.msra.mxu1 %v5715_v5  ;;  %v2119_v5 = vmax.f32 %v2117_v12, %v2118_v16 }
 0x386   : > { %3984 = vmatpush1.bf16.msra.mxu0 %v5718_v22  ;;  %3821 = vmatprep.subr.bf16.mxu1 %v5723_v44  ;;  %v5801_v22 = vld [vmem:[%s7933_s9 + $0x4] ss:$8 sps:$4 sm:$0xff]   ;;  %v5799_v44 = vld [vmem:[%s7933_s9] ss:$8 sps:$4 sm:$0xff]  }
 0x387   : > { %3985 = vmatprep.subr.bf16.mxu0 %v5726_v2  ;;  %v2132_v2 = vpack.c.bf16 %v2119_v5, %v2119_v5 }
 0x389   : > { %3822 = vmatpush1.bf16.msra.mxu1 %v5721_v35  ;;  %v5804_v35 = vld [vmem:[%s7933_s9 + $0x14] ss:$8 sps:$4 sm:$0xff]  }
 0x38a   : > { %3986 = vmatpush1.bf16.msra.mxu0 %v5724_v26  ;;  %3823 = vmatprep.subr.bf16.mxu1 %v5729_v8  ;;  %v5802_v26 = vld [vmem:[%s7933_s9 + $0x10] ss:$8 sps:$4 sm:$0xff]   ;;  %v5807_v8 = vld [vmem:[%s7933_s9 + $0x24] ss:$8 sps:$4 sm:$0xff]  }
 0x38b   : > { %3987 = vmatprep.subr.bf16.mxu0 %v5732_v23  ;;  %v5805_v23 = vld [vmem:[%s7933_s9 + $0x20] ss:$8 sps:$4 sm:$0xff]  }
 0x38d   : > { %3824 = vmatpush1.bf16.msra.mxu1 %v5727_v27  ;;  %v5810_v27 = vld [vmem:[%s7933_s9 + $0x34] ss:$8 sps:$4 sm:$0xff]  }
 0x38e   : > { %3988 = vmatpush1.bf16.msra.mxu0 %v5730_v25  ;;  %3825 = vmatprep.subr.bf16.mxu1 %v5735_v29  ;;  %v5808_v25 = vld [vmem:[%s7933_s9 + $0x30] ss:$8 sps:$4 sm:$0xff]   ;;  %v5813_v29 = vld [vmem:[%s7933_s9 + $0x44] ss:$8 sps:$4 sm:$0xff]  }
 0x38f   : > { %3989 = vmatprep.subr.bf16.mxu0 %v5738_v30  ;;  %v5811_v30 = vld [vmem:[%s7933_s9 + $0x40] ss:$8 sps:$4 sm:$0xff]  }
 0x391   : > { %3826 = vmatpush1.bf16.msra.mxu1 %v5733_v45  ;;  %v5816_v45 = vld [vmem:[%s7933_s9 + $0x54] ss:$8 sps:$4 sm:$0xff]  }
 0x392   : > { %3990 = vmatpush1.bf16.msra.mxu0 %v5736_v31  ;;  %3827 = vmatprep.subr.bf16.mxu1 %v5741_v33  ;;  %v5814_v31 = vld [vmem:[%s7933_s9 + $0x50] ss:$8 sps:$4 sm:$0xff]   ;;  %v5819_v33 = vld [vmem:[%s7933_s9 + $0x64] ss:$8 sps:$4 sm:$0xff]  }
 0x393   : > { %3991 = vmatprep.subr.bf16.mxu0 %v5744_v24  ;;  %v5817_v24 = vld [vmem:[%s7933_s9 + $0x60] ss:$8 sps:$4 sm:$0xff]  }
 0x395   : > { %3828 = vmatpush1.bf16.msra.mxu1 %v5739_v61  ;;  %v5822_v61 = vld [vmem:[%s7933_s9 + $0x74] ss:$8 sps:$4 sm:$0xff]  }
 0x396   : > { %3992 = vmatpush1.bf16.msra.mxu0 %v5742_v56  ;;  %3829 = vmatprep.subr.bf16.mxu1 %v5747_v50  ;;  %v5820_v56 = vld [vmem:[%s7933_s9 + $0x70] ss:$8 sps:$4 sm:$0xff]   ;;  %v5825_v50 = vld [vmem:[%s7933_s9 + $0x84] ss:$8 sps:$4 sm:$0xff]  }
 0x397   : > { %3993 = vmatprep.subr.bf16.mxu0 %v5750_v36  ;;  %v5823_v36 = vld [vmem:[%s7933_s9 + $0x80] ss:$8 sps:$4 sm:$0xff]  }
 0x399   : > { %3830 = vmatpush1.bf16.msra.mxu1 %v5745_v62  ;;  %v5828_v62 = vld [vmem:[%s7933_s9 + $0x94] ss:$8 sps:$4 sm:$0xff]  }
 0x39a   : > { %3994 = vmatpush1.bf16.msra.mxu0 %v5748_v40  ;;  %3831 = vmatprep.subr.bf16.mxu1 %v5753_v43  ;;  %v5826_v40 = vld [vmem:[%s7933_s9 + $0x90] ss:$8 sps:$4 sm:$0xff]   ;;  %v5831_v43 = vld [vmem:[%s7933_s9 + $0xa4] ss:$8 sps:$4 sm:$0xff]  }
 0x39b   : > { %3995 = vmatprep.subr.bf16.mxu0 %v5756_v41  ;;  %v5829_v41 = vld [vmem:[%s7933_s9 + $0xa0] ss:$8 sps:$4 sm:$0xff]  }
 0x39d   : > { %3832 = vmatpush1.bf16.msra.mxu1 %v5751_v46  ;;  %v5834_v46 = vld [vmem:[%s7933_s9 + $0xb4] ss:$8 sps:$4 sm:$0xff]  }
 0x39e   : > { %3996 = vmatpush1.bf16.msra.mxu0 %v5754_v47  ;;  %3833 = vmatprep.subr.bf16.mxu1 %v5759_v7  ;;  %v5832_v47 = vld [vmem:[%s7933_s9 + $0xb0] ss:$8 sps:$4 sm:$0xff]   ;;  %v5837_v7 = vld [vmem:[%s7933_s9 + $0xc4] ss:$8 sps:$4 sm:$0xff]  }
 0x39f   : > { %3997 = vmatprep.subr.bf16.mxu0 %v5762_v9  ;;  %v5835_v9 = vld [vmem:[%s7933_s9 + $0xc0] ss:$8 sps:$4 sm:$0xff]  }
 0x3a1   : > { %3834 = vmatpush1.bf16.msra.mxu1 %v5757_v18  ;;  %v5840_v18 = vld [vmem:[%s7933_s9 + $0xd4] ss:$8 sps:$4 sm:$0xff]  }
 0x3a2   : > { %3998 = vmatpush1.bf16.msra.mxu0 %v5760_v48  ;;  %3835 = vmatprep.subr.bf16.mxu1 %v5765_v52  ;;  %v5838_v48 = vld [vmem:[%s7933_s9 + $0xd0] ss:$8 sps:$4 sm:$0xff]   ;;  %v5843_v52 = vld [vmem:[%s7933_s9 + $0xe4] ss:$8 sps:$4 sm:$0xff]  }
 0x3a3   : > { %3999 = vmatprep.subr.bf16.mxu0 %v5768_v57  ;;  %v5841_v57 = vld [vmem:[%s7933_s9 + $0xe0] ss:$8 sps:$4 sm:$0xff]  }
 0x3a5   : > { %3836 = vmatpush1.bf16.msra.mxu1 %v5763_v3  ;;  %v5846_v3 = vld [vmem:[%s7933_s9 + $0xf4] ss:$8 sps:$4 sm:$0xff]  }
 0x3a6   : > { %4000 = vmatpush1.bf16.msra.mxu0 %v5766_v63  ;;  %3837 = vmatprep.subr.bf16.mxu1 %v5771_v58  ;;  %v5849_v63 = vld [vmem:[%s7933_s9 + $0x104] ss:$8 sps:$4 sm:$0xff]  }
 0x3a7   : > { %4001 = vmatprep.subr.bf16.mxu0 %v5774_v19  ;;  %v5895_v58 = vld [vmem:[%s7935_s11 + $0x40] sm:$0xff]  }
 0x3a8   : > { %v5896_v19 = vld [vmem:[%s7935_s11] sm:$0xff]  }
 0x3a9   : > { %3838 = vmatpush1.bf16.msra.mxu1 %v5769_v53  ;;  %v5897_v53 = vld [vmem:[%s7935_s11 + $0x48] sm:$0xff]  }
 0x3aa   : > { %4002 = vmatpush1.bf16.msra.mxu0 %v5772_v60  ;;  %3839 = vmatprep.subr.bf16.mxu1 %v5777_v14  ;;  %v5899_v60 = vld [vmem:[%s7935_s11 + $0x50] sm:$0xff]  }
 0x3ab   : > { %4003 = vmatprep.subr.bf16.mxu0 %v5780_v28  ;;  %v5900_v14 = vld [vmem:[%s7935_s11 + $0x10] sm:$0xff]   ;;  %v5901_v28 = vld [vmem:[%s7935_s11 + $0x58] sm:$0xff]  }
 0x3ad   : > { %3840 = vmatpush1.bf16.msra.mxu1 %v5775_v1  ;;  %v5902_v1 = vld [vmem:[%s7935_s11 + $0x18] sm:$0xff]  }
 0x3ae   : > { %4004 = vmatpush1.bf16.msra.mxu0 %v5778_v6  ;;  %3841 = vmatprep.subr.bf16.mxu1 %v5783_v10  ;;  %v5904_v6 = vld [vmem:[%s7935_s11 + $0x20] sm:$0xff]   ;;  %v5905_v10 = vld [vmem:[%s7935_s11 + $0x68] sm:$0xff]  }
 0x3af   : > { %4005 = vmatprep.subr.bf16.mxu0 %v5786_v11  ;;  %v5906_v11 = vld [vmem:[%s7935_s11 + $0x28] sm:$0xff]  }
 0x3b1   : > { %3842 = vmatpush1.bf16.msra.mxu1 %v5781_v0  ;;  %v7745_v0 = vld [vmem:[%s7932_s8] sm:$0xf] }
 0x3b2   : > { %4006 = vmatpush1.bf16.msra.mxu0 %v5784_v13  ;;  %3843 = vmatprep.subr.bf16.mxu1 %v5789_v32  ;;  %v2395_v12 = vrot.slane %v7745_v0, %v6249_v54  ;;  %v2399_v13 = vrot.slane %v7745_v0, %v6242_v49  ;;  %v2407_v32 = vrot.slane %v7745_v0, %v1125_v20 }
 0x3b3   : > { %4007 = vmatprep.subr.bf16.mxu0 %v5792_v39 }
 0x3b5   : > { %3844 = vmatpush1.bf16.msra.mxu1 %v5787_v15 }
 0x3b6   : > { %4008 = vmatpush1.bf16.msra.mxu0 %v5790_v17  ;;  %3845 = vmatprep.subr.bf16.mxu1 %v5795_v37 }
 0x3b7   : > { %4009 = vmatprep.subr.bf16.mxu0 %v5798_v38 }
 0x3b9   : > { %3846 = vmatpush1.bf16.msra.mxu1 %v5793_v21 }
 0x3ba   : > { %4010 = vmatpush1.bf16.msra.mxu0 %v5796_v51  ;;  %4424 = vmatprep.subr.bf16.mxu1 %v5801_v22 }
 0x3bb   : > { %5233 = vmatprep.subr.bf16.mxu0 %v5895_v58  ;;  %v5891_v58 = vld [vmem:[%s7933_s9 + $0x1e4] ss:$8 sps:$4 sm:$0xff]  }
 0x3bc   : > { %3848 = vmatmul.mubr.bf16.vlgmr.msra.gmra.mrb[48].mxu1 %v2132_v2 }
 0x3bd   : > { %4012 = vmatmul.mubr.bf16.vlgmr.msra.gmra.mrb[96].mxu0 %v2132_v2  ;;  %4425 = vmatpush1.bf16.msra.mxu1 %v5799_v44 }
 0x3be   : > { %4426 = vmatprep.subr.bf16.mxu1 %v5804_v35  ;;  %5234 = vmatpush3.bf16.msra.mxu0 %v5896_v19  ;;  %v5889_v19 = vld [vmem:[%s7933_s9 + $0x1e0] ss:$8 sps:$4 sm:$0xff]  }
 0x3bf   : > { %5235 = vmatprep.subr.bf16.mxu0 %v5897_v53 }
 0x3c1   : > { %4427 = vmatpush1.bf16.msra.mxu1 %v5802_v26 }
 0x3c2   : > { %4428 = vmatprep.subr.bf16.mxu1 %v5807_v8  ;;  %5236 = vmatpush3.bf16.msra.mxu0 %v5898_v34  ;;  %v5894_v34 = vld [vmem:[%s7933_s9 + $0x1f4] ss:$8 sps:$4 sm:$0xff]  }
 0x3c3   : > { %5237 = vmatprep.subr.bf16.mxu0 %v5899_v60 }
 0x3c5   : > { %4429 = vmatpush1.bf16.msra.mxu1 %v5805_v23  ;;  %v5852_v23 = vld [vmem:[%s7933_s9 + $0x114] ss:$8 sps:$4 sm:$0xff]  }
 0x3c6   : > { %4430 = vmatprep.subr.bf16.mxu1 %v5810_v27  ;;  %5238 = vmatpush3.bf16.msra.mxu0 %v5900_v14 }
 0x3c7   : > { %5239 = vmatprep.subr.bf16.mxu0 %v5901_v28  ;;  %v5907_v28 = vld [vmem:[%s7935_s11 + $0x70] sm:$0xff]  }
 0x3c9   : > { %4431 = vmatpush1.bf16.msra.mxu1 %v5808_v25  ;;  %v5850_v25 = vld [vmem:[%s7933_s9 + $0x110] ss:$8 sps:$4 sm:$0xff]  }
 0x3ca   : > { %4432 = vmatprep.subr.bf16.mxu1 %v5813_v29  ;;  %5240 = vmatpush3.bf16.msra.mxu0 %v5902_v1  ;;  %v5855_v29 = vld [vmem:[%s7933_s9 + $0x124] ss:$8 sps:$4 sm:$0xff]   ;;  %v5908_v1 = vld [vmem:[%s7935_s11 + $0x30] sm:$0xff]  }
 0x3cb   : > { %5241 = vmatprep.subr.bf16.mxu0 %v5903_v59  ;;  %v5909_v59 = vld [vmem:[%s7935_s11 + $0x78] sm:$0xff]  }
 0x3cd   : > { %4433 = vmatpush1.bf16.msra.mxu1 %v5811_v30  ;;  %v5853_v30 = vld [vmem:[%s7933_s9 + $0x120] ss:$8 sps:$4 sm:$0xff]  }
 0x3ce   : > { %4434 = vmatprep.subr.bf16.mxu1 %v5816_v45  ;;  %5242 = vmatpush3.bf16.msra.mxu0 %v5904_v6  ;;  %v5858_v45 = vld [vmem:[%s7933_s9 + $0x134] ss:$8 sps:$4 sm:$0xff]  }
 0x3cf   : > { %5243 = vmatprep.subr.bf16.mxu0 %v5905_v10  ;;  %v5910_v6 = vld [vmem:[%s7935_s11 + $0x38] sm:$0xff]   ;;  %v4092_v10 = vld [vmem:[%s7934_s10] sm:$0x3] }
 0x3d1   : > { %4435 = vmatpush1.bf16.msra.mxu1 %v5814_v31  ;;  %v5856_v31 = vld [vmem:[%s7933_s9 + $0x130] ss:$8 sps:$4 sm:$0xff]  }
 0x3d2   : > { %4436 = vmatprep.subr.bf16.mxu1 %v5819_v33  ;;  %5244 = vmatpush3.bf16.msra.mxu0 %v5906_v11  ;;  %v5861_v33 = vld [vmem:[%s7933_s9 + $0x144] ss:$8 sps:$4 sm:$0xff]   ;;  %v4097_v11 = vrot.slane %v4092_v10, %v6249_v54  ;;  %v5200_v54 = vld [vmem:[%s7936_s12] ss:$0 sm:$0xff] }
 0x3d3   : > { %5245 = vmatprep.subr.bf16.mxu0 %v5907_v28 }
 0x3d5   : > { %4437 = vmatpush1.bf16.msra.mxu1 %v5817_v24  ;;  %v5859_v24 = vld [vmem:[%s7933_s9 + $0x140] ss:$8 sps:$4 sm:$0xff]  }
 0x3d6   : > { %4438 = vmatprep.subr.bf16.mxu1 %v5822_v61  ;;  %v5864_v61 = vld [vmem:[%s7933_s9 + $0x154] ss:$8 sps:$4 sm:$0xff]   ;;  %5246 = vmatpush3.bf16.msra.mxu0 %v5908_v1 }
 0x3d7   : > { %5247 = vmatprep.subr.bf16.mxu0 %v5909_v59 }
 0x3d9   : > { %4439 = vmatpush1.bf16.msra.mxu1 %v5820_v56  ;;  %v5862_v56 = vld [vmem:[%s7933_s9 + $0x150] ss:$8 sps:$4 sm:$0xff]  }
 0x3da   : > { %4440 = vmatprep.subr.bf16.mxu1 %v5825_v50  ;;  %v5867_v50 = vld [vmem:[%s7933_s9 + $0x164] ss:$8 sps:$4 sm:$0xff]   ;;  %5248 = vmatpush3.bf16.msra.mxu0 %v5910_v6 }
 0x3dd   : > { %4441 = vmatpush1.bf16.msra.mxu1 %v5823_v36  ;;  %v5865_v36 = vld [vmem:[%s7933_s9 + $0x160] ss:$8 sps:$4 sm:$0xff]  }
 0x3de   : > { %4442 = vmatprep.subr.bf16.mxu1 %v5828_v62  ;;  %v5870_v62 = vld [vmem:[%s7933_s9 + $0x174] ss:$8 sps:$4 sm:$0xff]  }
 0x3e1   : > { %4443 = vmatpush1.bf16.msra.mxu1 %v5826_v40  ;;  %v5868_v40 = vld [vmem:[%s7933_s9 + $0x170] ss:$8 sps:$4 sm:$0xff]  }
 0x3e2   : > { %4444 = vmatprep.subr.bf16.mxu1 %v5831_v43  ;;  %v5873_v43 = vld [vmem:[%s7933_s9 + $0x184] ss:$8 sps:$4 sm:$0xff]  }
 0x3e5   : > { %4445 = vmatpush1.bf16.msra.mxu1 %v5829_v41  ;;  %v5871_v41 = vld [vmem:[%s7933_s9 + $0x180] ss:$8 sps:$4 sm:$0xff]  }
 0x3e6   : > { %4446 = vmatprep.subr.bf16.mxu1 %v5834_v46  ;;  %v5876_v46 = vld [vmem:[%s7933_s9 + $0x194] ss:$8 sps:$4 sm:$0xff]  }
 0x3e9   : > { %4447 = vmatpush1.bf16.msra.mxu1 %v5832_v47  ;;  %v5874_v47 = vld [vmem:[%s7933_s9 + $0x190] ss:$8 sps:$4 sm:$0xff]  }
 0x3ea   : > { %4448 = vmatprep.subr.bf16.mxu1 %v5837_v7  ;;  %v5879_v7 = vld [vmem:[%s7933_s9 + $0x1a4] ss:$8 sps:$4 sm:$0xff]  }
 0x3ed   : > { %4449 = vmatpush1.bf16.msra.mxu1 %v5835_v9  ;;  %v5877_v9 = vld [vmem:[%s7933_s9 + $0x1a0] ss:$8 sps:$4 sm:$0xff]  }
 0x3ee   : > { %4450 = vmatprep.subr.bf16.mxu1 %v5840_v18  ;;  %v5882_v18 = vld [vmem:[%s7933_s9 + $0x1b4] ss:$8 sps:$4 sm:$0xff]  }
 0x3f1   : > { %4451 = vmatpush1.bf16.msra.mxu1 %v5838_v48  ;;  %v5880_v48 = vld [vmem:[%s7933_s9 + $0x1b0] ss:$8 sps:$4 sm:$0xff]  }
 0x3f2   : > { %4452 = vmatprep.subr.bf16.mxu1 %v5843_v52  ;;  %v5885_v52 = vld [vmem:[%s7933_s9 + $0x1c4] ss:$8 sps:$4 sm:$0xff]  }
 0x3f5   : > { %4453 = vmatpush1.bf16.msra.mxu1 %v5841_v57  ;;  %v5883_v57 = vld [vmem:[%s7933_s9 + $0x1c0] ss:$8 sps:$4 sm:$0xff]  }
 0x3f6   : > { %4454 = vmatprep.subr.bf16.mxu1 %v5846_v3  ;;  %v5888_v3 = vld [vmem:[%s7933_s9 + $0x1d4] ss:$8 sps:$4 sm:$0xff]  }
 0x3f9   : > { %4455 = vmatpush1.bf16.msra.mxu1 %v5844_v4  ;;  %v5886_v4 = vld [vmem:[%s7933_s9 + $0x1d0] ss:$8 sps:$4 sm:$0xff]  }
 0x3fa   : > { %4465 = vmatprep.subr.bf16.mxu1 %v5849_v63  ;;  %v2403_v63 = vrot.slane %v7745_v0, %v6252_v55  ;;  %v5892_v55 = vld [vmem:[%s7933_s9 + $0x1f0] ss:$8 sps:$4 sm:$0xff]   ;;  %v4101_v0 = vrot.slane %v4092_v10, %v6242_v49 }
 0x48f   : > { %v3849_v39 = vpop.f32.mrb[48].mxu1 }
 0x490   : > { %v5295_v15 = vadd.f32 %v3849_v39, %v2395_v12  ;;  %v7754_v16 = vpop.f32.mrb[96].mxu0  ;;  %v3851_v17 = vpop.f32.mrb[49].mxu1 }
 0x491   : > { %v5296_v37 = vadd.f32 %v3851_v17, %v2399_v13  ;;  %v4015_v38 = vpop.f32.mrb[97].mxu0  ;;  %v3853_v21 = vpop.f32.mrb[50].mxu1  ;;  %v5297_v53 = vadd.f32 %v7754_v16, %v2403_v63 }
 0x492   : > { %v4020_v51 = vmax.f32 %v5295_v15, 0.0  ;;  %v5298_v5 = vadd.f32 %v4015_v38, %v2407_v32  ;;  %v4017_v22 = vpop.f32.mrb[98].mxu0  ;;  %v3854_v44 = vpop.f32.mrb[51].mxu1 }
 0x493   : > { %v4021_v2 = vmax.f32 %v5296_v37, 0.0  ;;  %v4018_v35 = vpop.f32.mrb[99].mxu0  ;;  %v4022_v60 = vmax.f32 %v5297_v53, 0.0 }
 0x494   : > { %v4023_v26 = vmax.f32 %v5298_v5, 0.0  ;;  %v4024_v20 = vpack.c.bf16 %v4020_v51, %v4020_v51 }
 0x495   : > { %v4025_v8 = vpack.c.bf16 %v4021_v2, %v4021_v2  ;;  %v4026_v14 = vpack.c.bf16 %v4022_v60, %v4022_v60 }
 0x496   : > { %v4027_v27 = vpack.c.bf16 %v4023_v26, %v4023_v26 }
 0x497   : > { %4456 = vmatprep.mubr.bf16.mxu1 %v4025_v8 }
 0x498   : > { %4457 = vmatmul.mubr.bf16.vlgmr.msra.gmra.mrb[52].mxu1 %v4024_v20 }
 0x499   : > { %4466 = vmatpush1.bf16.msra.mxu1 %v5847_v42  ;;  %4497 = vmatprep.mubr.bf16.mxu1 %v4027_v27 }
 0x49a   : > { %4467 = vmatprep.subr.bf16.mxu1 %v5852_v23 }
 0x49d   : > { %4468 = vmatpush1.bf16.msra.mxu1 %v5850_v25 }
 0x49e   : > { %4469 = vmatprep.subr.bf16.mxu1 %v5855_v29 }
 0x4a1   : > { %4470 = vmatpush1.bf16.msra.mxu1 %v5853_v30 }
 0x4a2   : > { %4471 = vmatprep.subr.bf16.mxu1 %v5858_v45 }
 0x4a5   : > { %4472 = vmatpush1.bf16.msra.mxu1 %v5856_v31 }
 0x4a6   : > { %4473 = vmatprep.subr.bf16.mxu1 %v5861_v33 }
 0x4a9   : > { %4474 = vmatpush1.bf16.msra.mxu1 %v5859_v24 }
 0x4aa   : > { %4475 = vmatprep.subr.bf16.mxu1 %v5864_v61 }
 0x4ad   : > { %4476 = vmatpush1.bf16.msra.mxu1 %v5862_v56 }
 0x4ae   : > { %4477 = vmatprep.subr.bf16.mxu1 %v5867_v50 }
 0x4b1   : > { %4478 = vmatpush1.bf16.msra.mxu1 %v5865_v36 }
 0x4b2   : > { %4479 = vmatprep.subr.bf16.mxu1 %v5870_v62 }
 0x4b5   : > { %4480 = vmatpush1.bf16.msra.mxu1 %v5868_v40 }
 0x4b6   : > { %4481 = vmatprep.subr.bf16.mxu1 %v5873_v43 }
 0x4b9   : > { %4482 = vmatpush1.bf16.msra.mxu1 %v5871_v41 }
 0x4ba   : > { %4483 = vmatprep.subr.bf16.mxu1 %v5876_v46 }
 0x4bd   : > { %4484 = vmatpush1.bf16.msra.mxu1 %v5874_v47 }
 0x4be   : > { %4485 = vmatprep.subr.bf16.mxu1 %v5879_v7 }
 0x4c1   : > { %4486 = vmatpush1.bf16.msra.mxu1 %v5877_v9 }
 0x4c2   : > { %4487 = vmatprep.subr.bf16.mxu1 %v5882_v18 }
 0x4c5   : > { %4488 = vmatpush1.bf16.msra.mxu1 %v5880_v48 }
 0x4c6   : > { %4489 = vmatprep.subr.bf16.mxu1 %v5885_v52 }
 0x4c9   : > { %4490 = vmatpush1.bf16.msra.mxu1 %v5883_v57 }
 0x4ca   : > { %4491 = vmatprep.subr.bf16.mxu1 %v5888_v3 }
 0x4cd   : > { %4492 = vmatpush1.bf16.msra.mxu1 %v5886_v4 }
 0x4ce   : > { %4493 = vmatprep.subr.bf16.mxu1 %v5891_v58 }
 0x4d1   : > { %4494 = vmatpush1.bf16.msra.mxu1 %v5889_v19 }
 0x4d2   : > { %4495 = vmatprep.subr.bf16.mxu1 %v5894_v34 }
 0x4d5   : > { %4496 = vmatpush1.bf16.msra.mxu1 %v5892_v55 }
 0x4d8   : > { %4498 = vmatmul.mubr.bf16.vlgmr.msra.gmra.mrb[52].mxu1 %v4026_v14 }
 0x5ab   : > { %v4499_v12 = vpop.f32.mrb[52].mxu1 }
 0x5ac   : > { %v5299_v13 = vadd.f32 %v4499_v12, %v4097_v11  ;;  %v4501_v32 = vpop.f32.mrb[53].mxu1 }
 0x5ad   : > { %v5300_v39 = vadd.f32 %v4501_v32, %v4101_v0  ;;  %v4503_v15 = vpop.f32.mrb[54].mxu1 }
 0x5ae   : > { %v4506_v16 = vmax.f32 %v5299_v13, 0.0  ;;  %v4504_v17 = vpop.f32.mrb[55].mxu1 }
 0x5af   : > { %v4507_v37 = vmax.f32 %v5300_v39, 0.0 }
 0x5b0   : > { %v4508_v21 = vpack.c.bf16 %v4506_v16, %v4506_v16 }
 0x5b1   : > { %v4509_v38 = vpack.c.bf16 %v4507_v37, %v4507_v37 }
 0x5b3   : > { %4677 = vmatprep.mubr.bf16.mxu0 %v4509_v38 }
 0x5b4   : > { %4678 = vmatmul.mubr.bf16.vlgmr.msra.gmra.mrb[100].mxu0 %v4508_v21 }
 0x687   : > { %v5249_v51 = vpop.f32.mrb[100].mxu0 }
 0x688   : > { %v5250_v5 = vpop.f32.mrb[101].mxu0 }
 0x689   : > { %v5251_v22 = vadd.f32 %v5250_v5, %v5249_v51  ;;  %v5252_v49 = vpop.f32.mrb[102].mxu0 }
 0x68a   : > { %v5253_v44 = vpop.f32.mrb[103].mxu0 }
 0x68b   : > { %v4680_v2 = vadd.f32 %v5251_v22, %v5200_v54 }
 0x68d   : > { %v4686_v35 = vsel %vm4685_vm1, %v4680_v2, -inf }
 0x68e   : > { %4687 = vmax.xlane.f32.xlu1 %v4686_v35 }
 0x71b   : > { %v4688_v26 = vpop.xlane.xlu1 %4687 }
 0x71c   : > { %v4689_v8 = vsub.f32 %v4680_v2, %v4688_v26 }
 0x71e   : > { %v4690_v42 = vmul.f32 1.442695, %v4689_v8 }
 0x720   : > { %5911 = vpow2.f32 %v4690_v42 }
 0x72a   : > { %v5912_v20 = vpop.eup %5911 }
 0x72b   : > { %v4692_v23 = vsel %vm4685_vm1, %v5912_v20, 0.0 }
 0x72c   : > { %4693 = vadd.xlane.f32.xlu0 %v4692_v23 }
 0x7b9   : > { %v4694_v27 = vpop.xlane.xlu0 %4693 }
 0x7ba   : > { %5913 = vlog2.f32 %v4694_v27 }
 0x7c4   : > { %v5914_v25 = vpop.eup %5913 }
 0x7c5   : > { %v4696_v29 = vmul.f32 0.6931472, %v5914_v25 }
 0x7c7   : > { %v4697_v30 = vsub.f32 %v4689_v8, %v4696_v29 }
 0x7c9   : > { %4699 = vst.msk [vmem:[%s468_s19] sm:$0x1] %vm4698_vm2, %v4697_v30 }
 0x7ca   : > { %5928 = shalt.err (!%p5925_p5)
}
 0x7cb   : > { %s5929_s17 = scalar_lea.hbm %s7877_s23, 16  ;;  %s5933_s15 = scalar_lea.hbm %s7937_s13, 32 }
 0x7cc   : > { %p5930_p6 = scmp.ne.s32.totalorder %s7877_s23, %s5929_s17  ;;  %p5934_p10 = scmp.lt.u32.totalorder %s7877_s23, %s7937_s13 }
 0x7cd   : > { %p5935_p11 = scmp.lt.u32.totalorder %s5933_s15, %s5929_s17  ;;  %p5937_p13 = scmp.lt.u32.totalorder %s5929_s17, %s7877_s23 }
 0x7ce   : > { %p5931_p7 = pnand %p5930_p6, %p6109_p4 }
 0x7cf   : > { %p5936_p12 = por %p5935_p11, %p5934_p10 }
 0x7d0   : > { %p5932_p9 = pneg %p5931_p7 }
 0x7d1   : > { %p5938_p0 = por %p5937_p13, %p5936_p12 }
 0x7d3   : > { %p5939_p1 = pnand %p5938_p0, %p5932_p9 }
 0x7d5   : > { %5942 = shalt.err (!%p5939_p1)
}
 0x7d6   : > { %5329 = dma.vmem_to_hbm [thread:$0]  (%p6109_p4), %s7879_s0, 16, %s7877_s23, %s4701_s24  }
 0x7d7 PF: > { %p5335_p2 = scmp.ge.s32.totalorder %s5993_s30, 2  ;;  %s4725_s3 = sand.u32 1, %s5973_s25  }
 0x7d8   : > { %s4726_s14 = scalar_lea.sflag [#allocation4], %s4725_s3 }
 0x7d9   : > { %p5332_p3 = pnand %p5335_p2, %p6116_p8 }
 0x7db   : > { %5968 = dma.done.wait (!%p5332_p3), %s4726_s14, 16  }
 0x7dc   : > { %5970 = vsyncadd (!%p5332_p3), %s4726_s14, 4294967280  ;;  %s26_s30 = sadd.s32 1, %s5993_s30   ;;  %s7948_s25 = smov %s5977_s26 }
 0x7dd   : > { %p23_p5 = scmp.ge.s32.totalorder %s26_s30, 4   ;;  %s7949_s26 = smov %s5981_s27 }
 0x7de   : > { %s7950_s27 = smov %s6122_s21  ;;  %s7951_s28 = smov %s5989_s29 }
 0x7df   : > { %s7952_s29 = smov %s7954_s16  ;;  %25 = sbr.rel (!%p23_p5) target bundleno = 9 (0x9), region = 118 }
 0x7e6   :  { %4730 = vsyncpa [#allocation4], 1 }
 0x7e7   :  { %4732 = vsyncpa [#allocation4 + $0x1], 1 }

</bundles_post_ra>
